<compile_context>
chip_gen: v5e
topology: v5e:2x2
jax: 0.10.0
libtpu: 0.0.40
codegen_flags: <defaults>
</compile_context>

<pallas_src>
import functools

import jax
import jax.numpy as jnp
from jax import lax
from jax.experimental import pallas as pl
from jax.experimental.pallas import tpu as pltpu


# ---------------------------------------------------------------------------
# Kernel A: per-batch mask compute (Gram accumulated over m-chunks).
# ---------------------------------------------------------------------------
def _mask_kernel(xp_ref, mask_ref, g_acc, *, head, n, ts, p):
    # xp_ref   : (ch, head*n, tmc) float -- one m-chunk of the partitioned input
    # mask_ref : (head, n, n)      int32 -- per-batch mask (written on last chunk)
    # g_acc    : (head, n, n)      f32   -- VMEM Gram accumulator across chunks
    mc = pl.program_id(1)

    @pl.when(mc == 0)
    def _init():
        g_acc[...] = jnp.zeros_like(g_acc)

    xw = jnp.mean(xp_ref[...].astype(jnp.float32), axis=0)      # (head*n, tmc)
    xw = xw.reshape(head, n, -1)                                 # (head, n, tmc)
    g_acc[...] += lax.dot_general(                               # batched MXU matmul
        xw, xw, (((2,), (2,)), ((0,), (0,))),
        precision=lax.Precision.HIGHEST,
        preferred_element_type=jnp.float32)                      # (head, n, n)

    @pl.when(mc == pl.num_programs(1) - 1)
    def _finish():
        g = g_acc[...]                                           # (head, n, n)
        if p == 2.0:
            # ||a-b||^2 = ||a||^2 + ||b||^2 - 2ab; stay in the squared domain.
            r = jnp.sum(g * g, axis=-1)                          # (head, n)
            gg = lax.dot_general(
                g, g, (((2,), (2,)), ((0,), (0,))),
                precision=lax.Precision.HIGHEST,
                preferred_element_type=jnp.float32)              # (head, n, n)
            dp = jnp.maximum(r[:, :, None] + r[:, None, :] - 2.0 * gg, 0.0)
        else:
            # Row-chunked sum|gi - gj|^p -- no (head, n, n, n) rank-4 temporary.
            rc = 8 if n % 8 == 0 else 1

            def body(i, d):
                gi = lax.dynamic_slice_in_dim(g, i * rc, rc, axis=1)   # (head, rc, n)
                diff = jnp.abs(gi[:, :, None, :] - g[:, None, :, :])   # (head, rc, n, n)
                if p == 1.0:
                    drow = jnp.sum(diff, axis=-1)
                else:
                    drow = jnp.sum(jnp.power(diff, p), axis=-1)        # (head, rc, n)
                return lax.dynamic_update_slice_in_dim(d, drow, i * rc, axis=1)

            dp = lax.fori_loop(0, n // rc, body,
                               jnp.zeros((head, n, n), jnp.float32),
                               unroll=True)
        # d < ts*rowmax(d)  <=>  d^p < ts^p * rowmax(d^p)   (monotone, ts >= 0)
        thr = (ts ** p) * jnp.max(dp, axis=-1, keepdims=True)
        mask_ref[...] = (dp < thr).astype(jnp.int32)


# ---------------------------------------------------------------------------
# Kernel B: m-fold lane-dense writeback (both grid axes parallel).
# ---------------------------------------------------------------------------
def _writeback_kernel(mask_ref, o_ref):
    # mask_ref : (head, n*n)     int32 -- per-batch mask, lane-dense
    # o_ref    : (tm, head, n*n) int32 -- tm identical copies
    o_ref[...] = jnp.broadcast_to(mask_ref[...][None], o_ref.shape)


# ---------------------------------------------------------------------------
# Tiling helpers.
# ---------------------------------------------------------------------------
def _pick_m_chunk(m, ch, head, n, cap_bytes=8 << 20):
    """Return (padded_m, chunk) for the compute kernel's m axis."""
    per_col = ch * head * n * 4
    if m * per_col <= cap_bytes:
        return m, m                       # whole batch fits comfortably: 1 chunk
    m_pad = ((m + 127) // 128) * 128      # minor dim must be 128-divisible to chunk
    tmc = max(128, ((cap_bytes // per_col) // 128) * 128)
    tmc = min(tmc, m_pad)
    while m_pad % tmc:
        tmc -= 128
    return m_pad, tmc


def _pick_tile_m(m, head, n, cap_bytes=4 << 20):
    """Largest divisor of m giving ~<=4 MiB lane-dense output blocks."""
    per_window = head * n * n * 4
    tm = max(1, min(m, cap_bytes // per_window))
    while m % tm:
        tm -= 1
    return tm


def _vmem_limit(nbytes):
    return int(min(max(nbytes, 16 << 20), 100 << 20))


# ---------------------------------------------------------------------------
# Public entry point.
# ---------------------------------------------------------------------------
def callj_forward(x, *, window_size=8, head=6, ts=0.5, p=2.0):
    """x: (B, H, W, C) -> int32 mask (B*m, head, n, n), n=ws*ws, m=(H/ws)*(W/ws)."""
    B, H, W, C = x.shape
    ws = window_size
    assert H % ws == 0 and W % ws == 0, "H, W must be divisible by window_size"
    assert C % head == 0, "C must be divisible by head"
    hh, ww = H // ws, W // ws
    m, n, ch = hh * ww, ws * ws, C // head
    nn = n * n

    # ljwindow_partition (pure layout -> XLA): channel mean reduces the leading
    # axis and windows (m) sit on the minor axis:
    #   xp[b, c, hd*n + (j*ws+i), h*ww+w] = x[b, j*hh+h, i*ww+w, hd*ch+c]
    xr = x.reshape(B, ws, hh, ws, ww, head, ch)            # b, j, h, i, w, hd, c
    xp = jnp.transpose(xr, (0, 6, 5, 1, 3, 2, 4))          # b, c, hd, j, i, h, w
    xp = xp.reshape(B, ch, head * n, m)

    # ---- pass 1: per-batch mask (compute-only; tiny output) ----------------
    m_pad, tmc = _pick_m_chunk(m, ch, head, n)
    if m_pad != m:
        # Zero columns contribute nothing to the Gram accumulation (exact).
        xp = jnp.pad(xp, ((0, 0), (0, 0), (0, 0), (0, m_pad - m)))

    in_block_a = ch * head * n * tmc * 4
    mask_block = head * nn * 4
    vmem_a = _vmem_limit(2 * in_block_a + 3 * mask_block + (4 << 20))

    mask = pl.pallas_call(
        functools.partial(_mask_kernel, head=head, n=n, ts=float(ts), p=float(p)),
        out_shape=jax.ShapeDtypeStruct((B, head, n, n), jnp.int32),
        grid_spec=pltpu.PrefetchScalarGridSpec(
            num_scalar_prefetch=0,
            grid=(B, m_pad // tmc),
            in_specs=[pl.BlockSpec((None, ch, head * n, tmc),
                                   lambda b, mc: (b, 0, 0, mc))],
            out_specs=pl.BlockSpec((None, head, n, n),
                                   lambda b, mc: (b, 0, 0, 0)),
            scratch_shapes=[pltpu.VMEM((head, n, n), jnp.float32)],
        ),
        compiler_params=pltpu.CompilerParams(
            # Gram scratch is carried across the m-chunk axis -> "arbitrary".
            dimension_semantics=("parallel", "arbitrary"),
            vmem_limit_bytes=vmem_a,
        ),
    )(xp)

    # ---- pass 2: m-fold writeback (lane-dense, both axes parallel) ---------
    mask_flat = mask.reshape(B, head, nn)                  # contiguous, free
    tm = _pick_tile_m(m, head, n)
    out_block_b = tm * head * nn * 4
    vmem_b = _vmem_limit(2 * out_block_b + 2 * mask_block + (2 << 20))

    out = pl.pallas_call(
        _writeback_kernel,
        out_shape=jax.ShapeDtypeStruct((B, m, head, nn), jnp.int32),
        grid_spec=pltpu.PrefetchScalarGridSpec(
            num_scalar_prefetch=0,
            grid=(B, m // tm),
            in_specs=[pl.BlockSpec((None, head, nn), lambda b, mt: (b, 0, 0))],
            out_specs=pl.BlockSpec((None, tm, head, nn),
                                   lambda b, mt: (b, mt, 0, 0)),
        ),
        compiler_params=pltpu.CompilerParams(
            # No scratch carry: every output tile is independent -> both parallel
            # (lets v7x's two TensorCores share the HBM writeback even for B=1).
            dimension_semantics=("parallel", "parallel"),
            vmem_limit_bytes=vmem_b,
        ),
    )(mask_flat)

    # (B, m, head, n*n) -> (B*m, head, n, n): contiguous reshape, free.
    return out.reshape(B * m, head, n, n)


# ---------------------------------------------------------------------------
# Pure-JAX reference (mirrors the PyTorch module) + smoke test.
# ---------------------------------------------------------------------------
def _reference(x, ws, head, ts, p):
    B, H, W, C = x.shape
    hh, ww = H // ws, W // ws
    m, n, ch = hh * ww, ws * ws, C // head
    # rearrange 'b (j h) (i w) c -> b (h w) (j i) c'
    xr = x.reshape(B, ws, hh, ws, ww, C)
    xr = jnp.transpose(xr, (0, 2, 4, 1, 3, 5)).reshape(B, m, n, C)
    # rearrange 'b m n (h c) -> b c h n m'
    x5 = jnp.transpose(xr.reshape(B, m, n, head, ch), (0, 4, 3, 2, 1))
    xw = jnp.mean(x5, axis=1)                                       # (B, head, n, m)
    g = jnp.einsum('bhnm,bhkm->bhnk', xw, xw, precision='highest')  # (B, head, n, n)
    if p == 2.0:
        r = jnp.sum(g * g, axis=-1)
        gg = jnp.einsum('bhik,bhjk->bhij', g, g, precision='highest')
        d = jnp.sqrt(jnp.maximum(r[..., :, None] + r[..., None, :] - 2.0 * gg, 0.0))
    elif p == 1.0:
        d = jnp.sum(jnp.abs(g[..., :, None, :] - g[..., None, :, :]), axis=-1)
    else:
        d = jnp.power(
            jnp.sum(jnp.abs(g[..., :, None, :] - g[..., None, :, :]) ** p, axis=-1),
            1.0 / p)
    thr = ts * jnp.max(d, axis=-1, keepdims=True)
    mask = (d < thr).astype(jnp.int32)                              # (B, head, n, n)
    lj = jnp.broadcast_to(mask[:, None], (B, m, head, n, n)).reshape(B * m, head, n, n)
    return lj, d, thr


if __name__ == "__main__":
    # Small shapes consistent with the module: window_size=8, head=6, ts=0.5, p=2.
    B, H, W = 2, 16, 16
    head, ws = 6, 8
    C = 12                      # channels, divisible by head (c_head = 2)
    ts, p = 0.5, 2.0

    key = jax.random.PRNGKey(0)
    x = jax.random.normal(key, (B, H, W, C), dtype=jnp.float32)

    out = jax.block_until_ready(callj_forward(x, window_size=ws, head=head, ts=ts, p=p))

    m = (H // ws) * (W // ws)
    n = ws * ws
    assert out.shape == (B * m, head, n, n) and out.dtype == jnp.int32

    lj_ref, d_ref, thr_ref = _reference(x, ws, head, ts, p)
    # Exact match except (possibly) entries numerically on the threshold
    # boundary, where reduction-order / monotone-domain differences may flip
    # the < comparison.
    near = jnp.abs(d_ref - thr_ref) <= 1e-4 * jnp.maximum(jnp.abs(thr_ref), 1e-6)
    near = jnp.broadcast_to(near[:, None], (B, m, head, n, n)).reshape(B * m, head, n, n)
    ok = (out == lj_ref) | near
    assert bool(jnp.all(ok))
    assert float(jnp.mean(out != lj_ref)) < 1e-2

    print("KERNEL_OK")
</pallas_src>

<mosaic_0001>
module attributes {stable_mosaic.version = 11 : i64} {
  func.func @_mask_kernel(%arg0: i32, %arg1: i32, %arg2: memref<1x2x384x4xf32, #tpu.memory_space<vmem>>, %arg3: memref<1x6x64x64xi32, #tpu.memory_space<vmem>>, %arg4: memref<6x64x64xf32, #tpu.memory_space<vmem>>) attributes {dimension_semantics = [#tpu.dimension_semantics<parallel>, #tpu.dimension_semantics<arbitrary>], iteration_bounds = array<i64: 2, 1>, scalar_prefetch = 0 : i64, scratch_operands = 1 : i64, tpu.core_type = #tpu.core_type<tc>, window_params = [{transform_indices = @transform_0, window_bounds = array<i64: 1, 2, 384, 4>}, {transform_indices = @transform_1, window_bounds = array<i64: 1, 6, 64, 64>}]} {
    %c0_i32 = arith.constant 0 : i32
    %0 = arith.cmpi eq, %arg1, %c0_i32 : i32
    %1 = arith.extui %0 : i1 to i32
    %c0_i32_0 = arith.constant 0 : i32
    %2 = arith.cmpi ne, %1, %c0_i32_0 : i32
    scf.if %2 {
      %cst_14 = arith.constant 0.000000e+00 : f32
      %16 = vector.broadcast %cst_14 : f32 to vector<6x64x64xf32>
      %c0_15 = arith.constant 0 : index
      %c0_16 = arith.constant 0 : index
      %c0_17 = arith.constant 0 : index
      %17 = vector.load %arg4[%c0_15, %c0_16, %c0_17] : memref<6x64x64xf32, #tpu.memory_space<vmem>>, vector<6x64x64xf32>
      tpu.vector_store %arg4[%c0_15, %c0_16, %c0_17], %16 {strides = array<i32>} : memref<6x64x64xf32, #tpu.memory_space<vmem>>, vector<6x64x64xf32>,
    } else {
    }
    %c0 = arith.constant 0 : index
    %c0_1 = arith.constant 0 : index
    %c0_2 = arith.constant 0 : index
    %c0_3 = arith.constant 0 : index
    %3 = vector.load %arg2[%c0, %c0_1, %c0_2, %c0_3] : memref<1x2x384x4xf32, #tpu.memory_space<vmem>>, vector<1x2x384x4xf32>
    %4 = vector.shape_cast %3 : vector<1x2x384x4xf32> to vector<2x384x4xf32>
    %cst = arith.constant dense<0.000000e+00> : vector<384x4xf32>
    %5 = vector.multi_reduction <add>, %4, %cst [0] : vector<2x384x4xf32> to vector<384x4xf32>
    %cst_4 = arith.constant 2.000000e+00 : f32
    %6 = vector.broadcast %cst_4 : f32 to vector<384x4xf32>
    %7 = arith.divf %5, %6 : vector<384x4xf32>
    %8 = vector.shape_cast %7 : vector<384x4xf32> to vector<6x64x4xf32>
    %c0_5 = arith.constant 0 : index
    %c0_6 = arith.constant 0 : index
    %c0_7 = arith.constant 0 : index
    %9 = vector.load %arg4[%c0_5, %c0_6, %c0_7] : memref<6x64x64xf32, #tpu.memory_space<vmem>>, vector<6x64x64xf32>
    %cst_8 = arith.constant dense<0.000000e+00> : vector<6x64x64xf32>
    %10 = tpu.matmul %8, %8, %cst_8 {dimension_numbers = #tpu.dot_dimension_numbers<[2], [2], [1], [1], [0, 0, 0, 1, 1, 1], [0], [0]>, precision = #tpu.contract_precision<fp32>} : vector<6x64x4xf32>, vector<6x64x4xf32>, vector<6x64x64xf32> -> vector<6x64x64xf32>
    %11 = arith.addf %9, %10 : vector<6x64x64xf32>
    %c0_9 = arith.constant 0 : index
    %c0_10 = arith.constant 0 : index
    %c0_11 = arith.constant 0 : index
    %12 = vector.load %arg4[%c0_9, %c0_10, %c0_11] : memref<6x64x64xf32, #tpu.memory_space<vmem>>, vector<6x64x64xf32>
    tpu.vector_store %arg4[%c0_9, %c0_10, %c0_11], %11 {strides = array<i32>} : memref<6x64x64xf32, #tpu.memory_space<vmem>>, vector<6x64x64xf32>,
    %c0_i32_12 = arith.constant 0 : i32
    %13 = arith.cmpi eq, %arg1, %c0_i32_12 : i32
    %14 = arith.extui %13 : i1 to i32
    %c0_i32_13 = arith.constant 0 : i32
    %15 = arith.cmpi ne, %14, %c0_i32_13 : i32
    scf.if %15 {
      %c0_14 = arith.constant 0 : index
      %c0_15 = arith.constant 0 : index
      %c0_16 = arith.constant 0 : index
      %16 = vector.load %arg4[%c0_14, %c0_15, %c0_16] : memref<6x64x64xf32, #tpu.memory_space<vmem>>, vector<6x64x64xf32>
      %17 = arith.mulf %16, %16 : vector<6x64x64xf32>
      %cst_17 = arith.constant dense<0.000000e+00> : vector<6x64xf32>
      %18 = vector.multi_reduction <add>, %17, %cst_17 [2] : vector<6x64x64xf32> to vector<6x64xf32>
      %cst_18 = arith.constant dense<0.000000e+00> : vector<6x64x64xf32>
      %19 = tpu.matmul %16, %16, %cst_18 {dimension_numbers = #tpu.dot_dimension_numbers<[2], [2], [1], [1], [0, 0, 0, 1, 1, 1], [0], [0]>, precision = #tpu.contract_precision<fp32>} : vector<6x64x64xf32>, vector<6x64x64xf32>, vector<6x64x64xf32> -> vector<6x64x64xf32>
      %20 = vector.shape_cast %18 : vector<6x64xf32> to vector<6x64x1xf32>
      %21 = vector.shape_cast %18 : vector<6x64xf32> to vector<6x1x64xf32>
      %22 = vector.broadcast %20 : vector<6x64x1xf32> to vector<6x64x64xf32>
      %23 = vector.broadcast %21 : vector<6x1x64xf32> to vector<6x64x64xf32>
      %24 = arith.addf %22, %23 : vector<6x64x64xf32>
      %cst_19 = arith.constant 2.000000e+00 : f32
      %25 = vector.broadcast %cst_19 : f32 to vector<6x64x64xf32>
      %26 = arith.mulf %25, %19 : vector<6x64x64xf32>
      %27 = arith.subf %24, %26 : vector<6x64x64xf32>
      %cst_20 = arith.constant 0.000000e+00 : f32
      %28 = vector.broadcast %cst_20 : f32 to vector<6x64x64xf32>
      %29 = arith.maximumf %27, %28 : vector<6x64x64xf32>
      %cst_21 = arith.constant dense<0xFF800000> : vector<6x64xf32>
      %30 = vector.multi_reduction <maximumf>, %29, %cst_21 [2] : vector<6x64x64xf32> to vector<6x64xf32>
      %31 = vector.shape_cast %30 : vector<6x64xf32> to vector<6x64x1xf32>
      %cst_22 = arith.constant 2.500000e-01 : f32
      %32 = vector.broadcast %cst_22 : f32 to vector<6x64x1xf32>
      %33 = arith.mulf %32, %31 : vector<6x64x1xf32>
      %34 = vector.broadcast %33 : vector<6x64x1xf32> to vector<6x64x64xf32>
      %35 = arith.cmpf olt, %29, %34 : vector<6x64x64xf32>
      %36 = arith.extui %35 : vector<6x64x64xi1> to vector<6x64x64xi32>
      %c0_23 = arith.constant 0 : index
      %c0_24 = arith.constant 0 : index
      %c0_25 = arith.constant 0 : index
      %c0_26 = arith.constant 0 : index
      %37 = vector.load %arg3[%c0_23, %c0_24, %c0_25, %c0_26] : memref<1x6x64x64xi32, #tpu.memory_space<vmem>>, vector<1x6x64x64xi32>
      %38 = vector.shape_cast %37 : vector<1x6x64x64xi32> to vector<6x64x64xi32>
      %39 = vector.shape_cast %36 : vector<6x64x64xi32> to vector<1x6x64x64xi32>
      tpu.vector_store %arg3[%c0_23, %c0_24, %c0_25, %c0_26], %39 {strides = array<i32>} : memref<1x6x64x64xi32, #tpu.memory_space<vmem>>, vector<1x6x64x64xi32>,
    } else {
    }
    return
  }
  func.func @transform_0(%arg0: i32, %arg1: i32) -> (i32, i32, i32, i32) {
    %c0_i32 = arith.constant 0 : i32
    %c0_i32_0 = arith.constant 0 : i32
    %c0_i32_1 = arith.constant 0 : i32
    return %arg0, %c0_i32, %c0_i32_0, %arg1 : i32, i32, i32, i32
  }
  func.func @transform_1(%arg0: i32, %arg1: i32) -> (i32, i32, i32, i32) {
    %c0_i32 = arith.constant 0 : i32
    %c0_i32_0 = arith.constant 0 : i32
    %c0_i32_1 = arith.constant 0 : i32
    %c0_i32_2 = arith.constant 0 : i32
    return %arg0, %c0_i32, %c0_i32_0, %c0_i32_1 : i32, i32, i32, i32
  }
}

</mosaic_0001>

<bundles_post_ra>
// kernel: tpu_custom_call.1
= control target key start
LH: loop header
LB: loop body
LE: loop exit
PB: predicated region body
PF: predicated region fallthrough
CT: control target
= control target key end

     0   :  { %6 = vsyncpa [#allocation4], 0  ;;  %s12234_s0 = inlined_call_operand.vmem [shape: f32[2,2,384,4], index: 0, kind: input, shape index: {}]   ;;  %s12235_s1 = inlined_call_operand.hbm [shape: s32[2,6,64,64], index: 1, kind: output, shape index: {}]  }
   0x1   :  { %8 = vsyncpa [#allocation4 + $0x1], 0  ;;  %s7650_s6 = smov 0   ;;  %s7652_s7 = smov 0  }
   0x2   :  { %s7654_s8 = smov 0   ;;  %s7656_s9 = smov 0  }
   0x3   :  { %s7658_s10 = smov 0   ;;  %s7660_s11 = smov 0  }
   0x4 LB: > { %s7433_s12 = sadd.s32 4294967295, %s7633_s11   ;;  %s7434_s13 = sadd.s32 4294967294, %s7633_s11   ;;  %s7633_s11 = sphi %s7660_s11, %s14_s11   ;;  %s7629_s10 = sphi %s7658_s10, %s13235_s10   ;;  %s7625_s9 = sphi %s7656_s9, %s13234_s9   ;;  %s7621_s8 = sphi %s7654_s8, %s13233_s8   ;;  %s7617_s7 = sphi %s7652_s7, %s13232_s7   ;;  %s7613_s6 = sphi %s7650_s6, %s13231_s6  }
   0x5   : > { %s26_s14 = sadd.s32 1, %s7629_s10  ;;  %s61_s15 = sadd.s32 1, %s7621_s8 }
   0x6   : > { %p28_p0 = scmp.ge.s32.totalorder %s26_s14, 2  ;;  %p71_p1 = scmp.ne.s32.totalorder %s7621_s8, %s7617_s7 }
   0x7   : > { %p72_p2 = scmp.eq.s32.totalorder %s7433_s12, 1  ;;  %p77_p3 = scmp.ne.s32.totalorder %s7617_s7, %s7613_s6 }
   0x8   : > { %s13237_s14 = smov (%p28_p0, %s26_s14), 0  ;;  %p78_p5 = scmp.eq.s32.totalorder %s7434_s13, 1 }
   0x9   : > { %p7690_p4 = por %p72_p2, %p71_p1  ;;  %s58_s17 = ssub.s32 %s7629_s10, %s13237_s14 }
   0xa   : > { %p7437_p6 = scmp.ge.s32.totalorder %s7633_s11, 1  ;;  %p59_p7 = scmp.eq.s32.totalorder %s58_s17, 0 }
   0xb   : > { %p7697_p8 = por %p78_p5, %p77_p3  ;;  %p107_p9 = scmp.lt.s32.totalorder %s7633_s11, 3 }
   0xc   : > { %s7703_s19 = scalar_select %p59_p7, %s7621_s8, %s61_s15  }
   0xd   : > { %p108_p10 = pnand %p7437_p6, %p107_p9 }
   0xf   : > { %111 = sbr.rel (%p108_p10) target bundleno = 1491 (0x5d3), region = 24 }
  0x14   : > { %p130_p11 = scmp.lt.s32.totalorder %s7625_s9, 1  ;;  %v7635_v0 = vmov 2.0   ;;  %vm287_vm0 = vcmask 31744   ;;  %vm142_vm2 = vcmask 523264   ;;  %vm6664_vm3 = vcmask 130112   ;;  %s127_s25 = sand.u32 1, %s7617_s7  }
  0x15   : > { %7505 = vrcp.f32 %v7635_v0  ;;  %vm6668_vm4 = vcmask 195712   ;;  %vm6672_vm5 = vcmask 261312   ;;  %vm6676_vm6 = vcmask 326912   ;;  %s11283_s26 = smul.u32 384, %s127_s25  ;;  %s7342_s5 = scalar_lea.sflag [#allocation4], %s127_s25 }
  0x16   : > { %s131_s20 = scalar_select %p130_p11, %s7625_s9, 1  ;;  %vm6680_vm7 = vcmask 392512   ;;  %vm6684_vm8 = vcmask 458112   ;;  %vm6688_vm9 = vcmask 523712  }
  0x17   : > { %s11329_s27 = scalar_lea.vmem [#allocation3], %s11283_s26  ;;  %s7444_s28 = smul.u32 384, %s7625_s9 }
  0x18   : > { %s7443_s21 = smul.u32 768, %s131_s20  ;;  %s7354_s3 = sshll.u32 %s11329_s27, 4  ;;  %s7355_s3 = int_to_ptr.vmem [resolvable:$true] %s7354_s3 }
  0x19   : > { %s7353_s2 = scalar_lea.hbm %s12235_s1, %s7444_s28  ;;  %s7575_s17 = scalar_lea.hbm %s12235_s1, 768 }
  0x1a   : > { %s7710_s24 = scalar_lea.vmem %s12234_s0, %s7443_s21  ;;  %s7356_s4 = sshll.u32 %s7353_s2, 4  ;;  %s7357_s4 = int_to_ptr.hbm [resolvable:$true] %s7356_s4 }
  0x1b   : > { %v7506_v1 = vpop.eup %7505  ;;  %v198_v2 = vld [vmem:[%s7710_s24 + $0x38] sm:$0xff]  ;;  %v197_v4 = vld [vmem:[%s7710_s24 + $0x30] sm:$0xff]  ;;  %v196_v9 = vld [vmem:[%s7710_s24 + $0x28] sm:$0xff]  ;;  %s7569_s9 = sshra.s32 %s7357_s4, 4  ;;  %s7570_s9 = int_to_ptr.hbm [resolvable:$true] %s7569_s9 }
  0x1c   : > { %v246_v3 = vld [vmem:[%s7710_s24 + $0x1b8] sm:$0xff]  ;;  %v309_v5 = vsel %vm287_vm0, %v198_v2, 0.0  ;;  %v433_v7 = vmul.f32 2.0, %v7506_v1  ;;  %v245_v8 = vld [vmem:[%s7710_s24 + $0x1b0] sm:$0xff]  ;;  %v244_v10 = vld [vmem:[%s7710_s24 + $0x1a8] sm:$0xff]  ;;  %v306_v11 = vsel %vm287_vm0, %v197_v4, 0.0  ;;  %vm437_vm1 = vweird.f32 %v7506_v1  ;;  %p7576_p1 = scmp.lt.s32.totalorder %s7570_s9, %s12235_s1 }
  0x1d   : > { %v310_v6 = vsel %vm287_vm0, %v246_v3, 0.0  ;;  %v307_v12 = vsel %vm287_vm0, %v245_v8, 0.0  ;;  %v303_v13 = vsel %vm287_vm0, %v196_v9, 0.0  ;;  %v195_v14 = vld [vmem:[%s7710_s24 + $0x20] sm:$0xff]  ;;  %v194_v16 = vld [vmem:[%s7710_s24 + $0x18] sm:$0xff]  ;;  %v304_v18 = vsel %vm287_vm0, %v244_v10, 0.0 }
  0x1e   : > { %v243_v15 = vld [vmem:[%s7710_s24 + $0x1a0] sm:$0xff]  ;;  %v434_v17 = vsub.f32 1.0, %v433_v7  ;;  %v300_v19 = vsel %vm287_vm0, %v195_v14, 0.0  ;;  %v242_v20 = vld [vmem:[%s7710_s24 + $0x198] sm:$0xff]  ;;  %v193_v21 = vld [vmem:[%s7710_s24 + $0x10] sm:$0xff]  ;;  %v297_v24 = vsel %vm287_vm0, %v194_v16, 0.0  ;;  %v311_v26 = vadd.f32 %v310_v6, %v309_v5 }
  0x1f   : > { %v241_v22 = vld [vmem:[%s7710_s24 + $0x190] sm:$0xff]  ;;  %v301_v23 = vsel %vm287_vm0, %v243_v15, 0.0  ;;  %v298_v25 = vsel %vm287_vm0, %v242_v20, 0.0  ;;  %v308_v28 = vadd.f32 %v307_v12, %v306_v11  ;;  %v305_v29 = vadd.f32 %v304_v18, %v303_v13  ;;  %v192_v33 = vld [vmem:[%s7710_s24 + $0x8] sm:$0xff]  ;;  %v191_v37 = vld [vmem:[%s7710_s24] sm:$0xff]  ;;  %s7571_s12 = scalar_lea.hbm %s7570_s9, 384 }
  0x20   : > { %v435_v27 = vmul.f32 %v7506_v1, %v434_v17  ;;  %v302_v30 = vadd.f32 %v301_v23, %v300_v19  ;;  %v294_v31 = vsel %vm287_vm0, %v193_v21, 0.0  ;;  %v295_v32 = vsel %vm287_vm0, %v241_v22, 0.0  ;;  %v240_v34 = vld [vmem:[%s7710_s24 + $0x188] sm:$0xff]  ;;  %v239_v38 = vld [vmem:[%s7710_s24 + $0x180] sm:$0xff]  ;;  %v206_v11 = vld [vmem:[%s7710_s24 + $0x78] sm:$0xff]  ;;  %p7572_p12 = scmp.ne.s32.totalorder %s7570_s9, %s7571_s12  ;;  %p7577_p2 = scmp.lt.s32.totalorder %s7575_s17, %s7571_s12 }
  0x21   : > { %v299_v36 = vadd.f32 %v298_v25, %v297_v24  ;;  %v296_v40 = vadd.f32 %v295_v32, %v294_v31  ;;  %v291_v41 = vsel %vm287_vm0, %v192_v33, 0.0  ;;  %v292_v42 = vsel %vm287_vm0, %v240_v34, 0.0  ;;  %v254_v12 = vld [vmem:[%s7710_s24 + $0x1f8] sm:$0xff]  ;;  %v205_v24 = vld [vmem:[%s7710_s24 + $0x70] sm:$0xff] }
  0x22   : > { %v436_v35 = vadd.f32 %v7506_v1, %v435_v27  ;;  %v288_v48 = vsel %vm287_vm0, %v191_v37, 0.0  ;;  %v289_v49 = vsel %vm287_vm0, %v239_v38, 0.0  ;;  %v293_v57 = vadd.f32 %v292_v42, %v291_v41  ;;  %v253_v25 = vld [vmem:[%s7710_s24 + $0x1f0] sm:$0xff]  ;;  %p7573_p13 = pnand %p7572_p12, %p7690_p4  ;;  %p7578_p3 = por %p7577_p2, %p7576_p1 }
  0x23   : > { %v290_v60 = vadd.f32 %v289_v49, %v288_v48  ;;  %v333_v21 = vsel %vm287_vm0, %v206_v11, 0.0  ;;  %v334_v22 = vsel %vm287_vm0, %v254_v12, 0.0  ;;  %v330_v27 = vsel %vm287_vm0, %v205_v24, 0.0  ;;  %v204_v48 = vld [vmem:[%s7710_s24 + $0x68] sm:$0xff] }
  0x24   : > { %v7740_v39 = vsel %vm437_vm1, %v7506_v1, %v436_v35  ;;  %v335_v23 = vadd.f32 %v334_v22, %v333_v21  ;;  %v252_v49 = vld [vmem:[%s7710_s24 + $0x1e8] sm:$0xff]  ;;  %v203_v21 = vld [vmem:[%s7710_s24 + $0x60] sm:$0xff]  ;;  %p7574_p0 = pneg %p7573_p13 }
  0x25   : > { %v446_v43 = vmul.f32 %v7740_v39, %v311_v26  ;;  %v445_v44 = vmul.f32 %v7740_v39, %v308_v28  ;;  %v444_v45 = vmul.f32 %v7740_v39, %v305_v29  ;;  %v443_v46 = vmul.f32 %v7740_v39, %v302_v30  ;;  %v251_v22 = vld [vmem:[%s7710_s24 + $0x1e0] sm:$0xff] }
  0x26   : > { %v442_v47 = vmul.f32 %v7740_v39, %v299_v36  ;;  %v441_v59 = vmul.f32 %v7740_v39, %v296_v40  ;;  %v440_v3 = vmul.f32 %v7740_v39, %v293_v57  ;;  %v439_v6 = vmul.f32 %v7740_v39, %v290_v60  ;;  %p7579_p5 = pnand %p7578_p3, %p7574_p0 }
  0x27   : > { %v557_v50 = vsel %vm287_vm0, %v446_v43, 0  ;;  %v554_v51 = vsel %vm287_vm0, %v445_v44, 0  ;;  %v551_v52 = vsel %vm287_vm0, %v444_v45, 0  ;;  %v548_v53 = vsel %vm287_vm0, %v443_v46, 0 }
  0x28   : > { %v7755_v54 = vand.u32 4294901760, %v557_v50  ;;  %v7757_v55 = vand.u32 4294901760, %v554_v51  ;;  %v7759_v56 = vand.u32 4294901760, %v551_v52  ;;  %v7761_v58 = vand.u32 4294901760, %v548_v53 }
  0x29   : > { %v545_v0 = vsel %vm287_vm0, %v442_v47, 0  ;;  %v542_v10 = vsel %vm287_vm0, %v441_v59, 0  ;;  %v539_v14 = vsel %vm287_vm0, %v440_v3, 0  ;;  %v536_v18 = vsel %vm287_vm0, %v439_v6, 0 }
  0x2a   : > { %568 = vmatpush.xpose.msra.mxu0 %v7755_v54  ;;  %819 = vmatpush.xpose.msra.mxu3 %v7755_v54  ;;  %v7767_v61 = vsub.f32 %v557_v50, %v7755_v54  ;;  %v7770_v62 = vsub.f32 %v554_v51, %v7757_v55  ;;  %v7773_v63 = vsub.f32 %v551_v52, %v7759_v56  ;;  %v7787_v5 = vand.u32 4294901760, %v545_v0 }
  0x2b   : > { %v7785_v4 = vsub.f32 %v548_v53, %v7761_v58  ;;  %v7809_v16 = vand.u32 4294901760, %v542_v10  ;;  %v7827_v26 = vand.u32 4294901760, %v539_v14  ;;  %v331_v28 = vsel %vm287_vm0, %v253_v25, 0.0 }
  0x2c   : > { %747 = vmatpush.xpose.msra.mxu2 %v7767_v61  ;;  %v7778_v1 = vand.u32 4294901760, %v7767_v61  ;;  %v7781_v2 = vand.u32 4294901760, %v7770_v62  ;;  %v7797_v9 = vand.u32 4294901760, %v7773_v63  ;;  %v7807_v15 = vsub.f32 %v545_v0, %v7787_v5 }
  0x2d   : > { %v7812_v17 = vand.u32 4294901760, %v7785_v4  ;;  %v7832_v29 = vsub.f32 %v542_v10, %v7809_v16  ;;  %v7834_v30 = vand.u32 4294901760, %v536_v18  ;;  %v454_v31 = vmul.f32 %v7740_v39, %v335_v23 }
  0x2e   : > { %570 = vmatpush.xpose.msra.mxu0 %v7757_v55  ;;  %821 = vmatpush.xpose.msra.mxu3 %v7757_v55  ;;  %v642_v7 = vsub.f32 %v7767_v61, %v7778_v1  ;;  %v634_v8 = vsub.f32 %v7770_v62, %v7781_v2  ;;  %v626_v20 = vsub.f32 %v7773_v63, %v7797_v9  ;;  %v7844_v35 = vand.u32 4294901760, %v7807_v15 }
  0x2f   : > { %v332_v32 = vadd.f32 %v331_v28, %v330_v27  ;;  %v618_v34 = vsub.f32 %v7785_v4, %v7812_v17  ;;  %v1035_v36 = vsel %vm287_vm0, %v454_v31, 0  ;;  %v7853_v40 = vsub.f32 %v539_v14, %v7827_v26 }
  0x30   : > { %750 = vmatpush.xpose.msra.mxu2 %v7770_v62  ;;  %v7803_v13 = vand.u32 4294901760, %v642_v7  ;;  %v7817_v19 = vand.u32 4294901760, %v634_v8  ;;  %v7839_v33 = vand.u32 4294901760, %v626_v20  ;;  %v7850_v38 = vand.u32 4294901760, %v1035_v36 }
  0x31   : > { %v453_v37 = vmul.f32 %v7740_v39, %v332_v32  ;;  %v7856_v41 = vand.u32 4294901760, %v7832_v29  ;;  %v7859_v42 = vsub.f32 %v536_v18, %v7834_v30  ;;  %v7864_v44 = vand.u32 4294901760, %v618_v34 }
  0x32   : > { %572 = vmatpush.xpose.msra.mxu0 %v7759_v56  ;;  %661 = vmatpush.xpose.msra.mxu1 %v7803_v13  ;;  %v610_v45 = vsub.f32 %v7807_v15, %v7844_v35  ;;  %v7869_v46 = vsub.f32 %v1035_v36, %v7850_v38  ;;  %v327_v52 = vsel %vm287_vm0, %v204_v48, 0.0  ;;  %v328_v53 = vsel %vm287_vm0, %v252_v49, 0.0  ;;  %v202_v49 = vld [vmem:[%s7710_s24 + $0x58] sm:$0xff] }
  0x33   : > { %823 = vmatpush.xpose.msra.mxu3 %v7759_v56  ;;  %v1032_v43 = vsel %vm287_vm0, %v453_v37, 0  ;;  %v7886_v57 = vand.u32 4294901760, %v7859_v42  ;;  %v329_v59 = vadd.f32 %v328_v53, %v327_v52  ;;  %v602_v0 = vsub.f32 %v7832_v29, %v7856_v41  ;;  %v250_v52 = vld [vmem:[%s7710_s24 + $0x1d8] sm:$0xff] }
  0x34   : > { %753 = vmatpush.xpose.msra.mxu2 %v7773_v63  ;;  %v7871_v47 = vand.u32 4294901760, %v1032_v43  ;;  %v7878_v50 = vand.u32 4294901760, %v7869_v46  ;;  %v7890_v60 = vand.u32 4294901760, %v610_v45  ;;  %v7895_v3 = vand.u32 4294901760, %v7853_v40 }
  0x35   : > { %v452_v7 = vmul.f32 %v7740_v39, %v329_v59  ;;  %v586_v10 = vsub.f32 %v7859_v42, %v7886_v57  ;;  %v7910_v12 = vand.u32 4294901760, %v602_v0  ;;  %v324_v25 = vsel %vm287_vm0, %v203_v21, 0.0 }
  0x36   : > { %574 = vmatpush.xpose.msra.mxu0 %v7761_v58  ;;  %667 = vmatpush.xpose.msra.mxu1 %v7817_v19  ;;  %v7881_v51 = vsub.f32 %v1032_v43, %v7871_v47  ;;  %v1120_v6 = vsub.f32 %v7869_v46, %v7878_v50  ;;  %v594_v14 = vsub.f32 %v7853_v40, %v7895_v3  ;;  %v325_v27 = vsel %vm287_vm0, %v251_v22, 0.0 }
  0x37   : > { %825 = vmatpush.xpose.msra.mxu3 %v7761_v58  ;;  %v1029_v11 = vsel %vm287_vm0, %v452_v7, 0  ;;  %v587_v28 = vand.u32 4294901760, %v586_v10  ;;  %v326_v31 = vadd.f32 %v325_v27, %v324_v25  ;;  %v321_v53 = vsel %vm287_vm0, %v202_v49, 0.0 }
  0x38   : > { %756 = vmatpush.xpose.msra.mxu2 %v7785_v4  ;;  %v7903_v8 = vand.u32 4294901760, %v7881_v51  ;;  %v7914_v18 = vand.u32 4294901760, %v1029_v11  ;;  %v7917_v20 = vand.u32 4294901760, %v1120_v6  ;;  %v595_v32 = vand.u32 4294901760, %v594_v14  ;;  %v249_v14 = vld [vmem:[%s7710_s24 + $0x1d0] sm:$0xff] }
  0x39   : > { %v451_v36 = vmul.f32 %v7740_v39, %v326_v31  ;;  %v322_v59 = vsel %vm287_vm0, %v250_v52, 0.0  ;;  %v319_v22 = vsel %vm287_vm0, %v249_v14, 0.0  ;;  %v247_v14 = vld [vmem:[%s7710_s24 + $0x1c0] sm:$0xff] }
  0x3a   : > { %576 = vmatpush.xpose.msra.mxu0 %v7787_v5  ;;  %673 = vmatpush.xpose.msra.mxu1 %v7839_v33  ;;  %v1112_v23 = vsub.f32 %v7881_v51, %v7903_v8  ;;  %v7925_v24 = vsub.f32 %v1029_v11, %v7914_v18  ;;  %v323_v7 = vadd.f32 %v322_v59, %v321_v53  ;;  %v201_v11 = vld [vmem:[%s7710_s24 + $0x50] sm:$0xff] }
  0x3b   : > { %827 = vmatpush.xpose.msra.mxu3 %v7787_v5  ;;  %v1026_v45 = vsel %vm287_vm0, %v451_v36, 0  ;;  %v318_v21 = vsel %vm287_vm0, %v201_v11, 0.0  ;;  %v199_v11 = vld [vmem:[%s7710_s24 + $0x40] sm:$0xff] }
  0x3c   : > { %759 = vmatpush.xpose.msra.mxu2 %v7807_v15  ;;  %v7932_v34 = vand.u32 4294901760, %v7925_v24  ;;  %v7939_v37 = vand.u32 4294901760, %v1112_v23  ;;  %v7946_v48 = vand.u32 4294901760, %v1026_v45  ;;  %v320_v27 = vadd.f32 %v319_v22, %v318_v21 }
  0x3e   : > { %578 = vmatpush.xpose.msra.mxu0 %v7809_v16  ;;  %679 = vmatpush.xpose.msra.mxu1 %v7864_v44  ;;  %v1104_v43 = vsub.f32 %v7925_v24, %v7932_v34  ;;  %v7958_v6 = vsub.f32 %v1026_v45, %v7946_v48  ;;  %v449_v36 = vmul.f32 %v7740_v39, %v320_v27  ;;  %v248_v45 = vld [vmem:[%s7710_s24 + $0x1c8] sm:$0xff] }
  0x3f   : > { %829 = vmatpush.xpose.msra.mxu3 %v7809_v16  ;;  %v316_v52 = vsel %vm287_vm0, %v248_v45, 0.0 }
  0x40   : > { %762 = vmatpush.xpose.msra.mxu2 %v7832_v29  ;;  %v7955_v0 = vand.u32 4294901760, %v1104_v43  ;;  %v7962_v10 = vand.u32 4294901760, %v7958_v6  ;;  %v200_v43 = vld [vmem:[%s7710_s24 + $0x48] sm:$0xff]  ;;  %v1020_v53 = vsel %vm287_vm0, %v449_v36, 0 }
  0x41   : > { %v315_v49 = vsel %vm287_vm0, %v200_v43, 0.0 }
  0x42   : > { %580 = vmatpush.xpose.msra.mxu0 %v7827_v26  ;;  %685 = vmatpush.xpose.msra.mxu1 %v7890_v60  ;;  %v1096_v23 = vsub.f32 %v7958_v6, %v7962_v10  ;;  %v317_v59 = vadd.f32 %v316_v52, %v315_v49 }
  0x43   : > { %831 = vmatpush.xpose.msra.mxu3 %v7827_v26 }
  0x44   : > { %765 = vmatpush.xpose.msra.mxu2 %v7853_v40  ;;  %v7980_v31 = vand.u32 4294901760, %v1096_v23  ;;  %v312_v23 = vsel %vm287_vm0, %v199_v11, 0.0 }
  0x46   : > { %582 = vmatpush.xpose.msra.mxu0 %v7834_v30  ;;  %691 = vmatpush.xpose.msra.mxu1 %v7910_v12 }
  0x47   : > { %833 = vmatpush.xpose.msra.mxu3 %v7834_v30 }
  0x48   : > { %768 = vmatpush.xpose.msra.mxu2 %v7859_v42 }
  0x49   : > { %588 = vmatmul.f32.vlgmr.msra.gmra.mxu0 %v587_v28 }
  0x4a   : > { %894 = vmatpush.xpose.msrb.mxu0 %v7778_v1  ;;  %837 = vmatmul.f32.vlgmr.msra.gmra.mxu3 %v7886_v57 }
  0x4b   : > { %1139 = vmatpush.xpose.msrb.mxu3 %v7917_v20  ;;  %697 = vmatpush.xpose.msra.mxu1 %v595_v32 }
  0x4c   : > { %1046 = vmatpush.xpose.msrb.mxu2 %v7850_v38 }
  0x4d   : > { %771 = vmatmul.f32.vlgmr.msra.gmra.mxu2 %v7859_v42  ;;  %v450_v42 = vmul.f32 %v7740_v39, %v323_v7 }
  0x4e   : > { %898 = vmatpush.xpose.msrb.mxu0 %v7781_v2 }
  0x4f   : > { %1145 = vmatpush.xpose.msrb.mxu3 %v7939_v37  ;;  %703 = vmatpush.xpose.msra.mxu1 %v587_v28  ;;  %v1023_v25 = vsel %vm287_vm0, %v450_v42, 0  ;;  %v448_v42 = vmul.f32 %v7740_v39, %v317_v59 }
  0x50   : > { %1048 = vmatpush.xpose.msrb.mxu2 %v7871_v47  ;;  %v7976_v28 = vand.u32 4294901760, %v1023_v25 }
  0x51   : > { %596 = vmatmul.f32.gmra.mxu0 %v595_v32  ;;  %v1017_v27 = vsel %vm287_vm0, %v448_v42, 0 }
  0x52   : > { %902 = vmatpush.xpose.msrb.mxu0 %v7797_v9  ;;  %705 = vmatmul.f32.vlgmr.msra.gmra.mxu1 %v7834_v30  ;;  %v7988_v32 = vsub.f32 %v1023_v25, %v7976_v28  ;;  %v313_v25 = vsel %vm287_vm0, %v247_v14, 0.0  ;;  %v8021_v49 = vand.u32 4294901760, %v1017_v27 }
  0x53   : > { %965 = vmatpush.xpose.msrb.mxu1 %v7755_v54  ;;  %1151 = vmatpush.xpose.msrb.mxu3 %v7955_v0  ;;  %v314_v36 = vadd.f32 %v313_v25, %v312_v23 }
  0x54   : > { %843 = vmatmul.f32.gmra.mxu3 %v7895_v3  ;;  %1050 = vmatpush.xpose.msrb.mxu2 %v7914_v18  ;;  %v7996_v7 = vand.u32 4294901760, %v7988_v32 }
  0x55   : > { %776 = vmatmul.f32.gmra.mxu2 %v7853_v40  ;;  %v7998_v40 = vand.u32 4294901760, %v1020_v53  ;;  %v447_v52 = vmul.f32 %v7740_v39, %v314_v36 }
  0x56   : > { %906 = vmatpush.xpose.msrb.mxu0 %v7812_v17  ;;  %v1088_v21 = vsub.f32 %v7988_v32, %v7996_v7 }
  0x57   : > { %967 = vmatpush.xpose.msrb.mxu1 %v7757_v55  ;;  %1157 = vmatpush.xpose.msrb.mxu3 %v7980_v31  ;;  %v8008_v22 = vsub.f32 %v1020_v53, %v7998_v40  ;;  %v8031_v53 = vsub.f32 %v1017_v27, %v8021_v49  ;;  %v1014_v59 = vsel %vm287_vm0, %v447_v52, 0 }
  0x58   : > { %1052 = vmatpush.xpose.msrb.mxu2 %v7946_v48  ;;  %v8016_v43 = vand.u32 4294901760, %v1088_v21 }
  0x59   : > { %604 = vmatmul.f32.gmra.mxu0 %v7910_v12  ;;  %v8019_v45 = vand.u32 4294901760, %v8008_v22  ;;  %v8039_v11 = vand.u32 4294901760, %v8031_v53 }
  0x5a   : > { %910 = vmatpush.xpose.msrb.mxu0 %v7844_v35  ;;  %709 = vmatmul.f32.gmra.mxu1 %v7827_v26 }
  0x5b   : > { %969 = vmatpush.xpose.msrb.mxu1 %v7759_v56  ;;  %v1080_v12 = vsub.f32 %v8008_v22, %v8019_v45  ;;  %1163 = vmatpush.xpose.msrb.mxu3 %v8016_v43  ;;  %v1072_v14 = vsub.f32 %v8031_v53, %v8039_v11 }
  0x5c   : > { %849 = vmatmul.f32.gmra.mxu3 %v7856_v41  ;;  %1054 = vmatpush.xpose.msrb.mxu2 %v7976_v28 }
  0x5d   : > { %781 = vmatmul.f32.gmra.mxu2 %v7832_v29  ;;  %v8036_v42 = vand.u32 4294901760, %v1080_v12  ;;  %v8041_v29 = vand.u32 4294901760, %v1014_v59 }
  0x5e   : > { %914 = vmatpush.xpose.msrb.mxu0 %v7856_v41  ;;  %v8054_v41 = vand.u32 4294901760, %v1072_v14  ;;  %v211_v14 = vld [vmem:[%s7710_s24 + $0xa0] sm:$0xff] }
  0x5f   : > { %971 = vmatpush.xpose.msrb.mxu1 %v7761_v58  ;;  %v8048_v21 = vsub.f32 %v1014_v59, %v8041_v29  ;;  %1169 = vmatpush.xpose.msrb.mxu3 %v8036_v42 }
  0x60   : > { %1056 = vmatpush.xpose.msrb.mxu2 %v7998_v40 }
  0x61   : > { %612 = vmatmul.f32.gmra.mxu0 %v7890_v60  ;;  %v8057_v23 = vand.u32 4294901760, %v8048_v21 }
  0x62   : > { %918 = vmatpush.xpose.msrb.mxu0 %v7895_v3  ;;  %713 = vmatmul.f32.gmra.mxu1 %v7809_v16 }
  0x63   : > { %973 = vmatpush.xpose.msrb.mxu1 %v7787_v5  ;;  %v1064_v3 = vsub.f32 %v8048_v21, %v8057_v23  ;;  %1175 = vmatpush.xpose.msrb.mxu3 %v8054_v41 }
  0x64   : > { %855 = vmatmul.f32.gmra.mxu3 %v7844_v35  ;;  %1058 = vmatpush.xpose.msrb.mxu2 %v8021_v49 }
  0x65   : > { %786 = vmatmul.f32.gmra.mxu2 %v7807_v15  ;;  %v1065_v60 = vand.u32 4294901760, %v1064_v3  ;;  %v261_v15 = vld [vmem:[%s7710_s24 + $0x230] sm:$0xff] }
  0x66   : > { %922 = vmatpush.xpose.msrb.mxu0 %v7886_v57 }
  0x67   : > { %975 = vmatpush.xpose.msrb.mxu1 %v7809_v16  ;;  %1181 = vmatpush.xpose.msrb.mxu3 %v1065_v60 }
  0x68   : > { %1060 = vmatpush.xpose.msrb.mxu2 %v8041_v29 }
  0x69   : > { %620 = vmatmul.f32.gmra.mxu0 %v7864_v44 }
  0x6a   : > { %1225 = vmatpush.xpose.msra.mxu0 %v7869_v46  ;;  %717 = vmatmul.f32.gmra.mxu1 %v7787_v5 }
  0x6b   : > { %977 = vmatpush.xpose.msrb.mxu1 %v7827_v26  ;;  %1443 = vmatpush.xpose.msra.mxu3 %v7850_v38 }
  0x6c   : > { %1372 = vmatpush.xpose.msra.mxu2 %v7878_v50  ;;  %861 = vmatmul.f32.gmra.mxu3 %v7812_v17  ;;  %v355_v17 = vsel %vm287_vm0, %v261_v15, 0.0  ;;  %v258_v15 = vld [vmem:[%s7710_s24 + $0x218] sm:$0xff] }
  0x6d   : > { %791 = vmatmul.f32.gmra.mxu2 %v7785_v4 }
  0x6e   : > { %1228 = vmatpush.xpose.msra.mxu0 %v7881_v51 }
  0x6f   : > { %979 = vmatpush.xpose.msrb.mxu1 %v7834_v30  ;;  %1445 = vmatpush.xpose.msra.mxu3 %v7871_v47 }
  0x70   : > { %1376 = vmatpush.xpose.msra.mxu2 %v7903_v8 }
  0x71   : > { %628 = vmatmul.f32.gmra.mxu0 %v7839_v33 }
  0x72   : > { %1231 = vmatpush.xpose.msra.mxu0 %v7925_v24  ;;  %721 = vmatmul.f32.gmra.mxu1 %v7761_v58 }
  0x73   : > { %1297 = vmatpush.xpose.msra.mxu1 %v7850_v38  ;;  %1447 = vmatpush.xpose.msra.mxu3 %v7914_v18 }
  0x74   : > { %867 = vmatmul.f32.gmra.mxu3 %v7797_v9  ;;  %1380 = vmatpush.xpose.msra.mxu2 %v7932_v34 }
  0x75   : > { %796 = vmatmul.f32.gmra.mxu2 %v7773_v63 }
  0x76   : > { %1234 = vmatpush.xpose.msra.mxu0 %v7958_v6 }
  0x77   : > { %1299 = vmatpush.xpose.msra.mxu1 %v7871_v47  ;;  %1449 = vmatpush.xpose.msra.mxu3 %v7946_v48 }
  0x78   : > { %1384 = vmatpush.xpose.msra.mxu2 %v7962_v10 }
  0x79   : > { %636 = vmatmul.f32.gmra.mxu0 %v7817_v19 }
  0x7a   : > { %1237 = vmatpush.xpose.msra.mxu0 %v7988_v32  ;;  %725 = vmatmul.f32.gmra.mxu1 %v7759_v56 }
  0x7b   : > { %1301 = vmatpush.xpose.msra.mxu1 %v7914_v18  ;;  %1451 = vmatpush.xpose.msra.mxu3 %v7976_v28 }
  0x7c   : > { %873 = vmatmul.f32.gmra.mxu3 %v7781_v2  ;;  %1388 = vmatpush.xpose.msra.mxu2 %v7996_v7 }
  0x7d   : > { %801 = vmatmul.f32.gmra.mxu2 %v7770_v62  ;;  %v262_v62 = vld [vmem:[%s7710_s24 + $0x238] sm:$0xff] }
  0x7e   : > { %1240 = vmatpush.xpose.msra.mxu0 %v8008_v22 }
  0x7f   : > { %1303 = vmatpush.xpose.msra.mxu1 %v7946_v48  ;;  %1453 = vmatpush.xpose.msra.mxu3 %v7998_v40 }
  0x80   : > { %1392 = vmatpush.xpose.msra.mxu2 %v8019_v45 }
  0x81   : > { %644 = vmatmul.f32.gmra.mxu0 %v7803_v13  ;;  %v213_v13 = vld [vmem:[%s7710_s24 + $0xb0] sm:$0xff] }
  0x82   : > { %1243 = vmatpush.xpose.msra.mxu0 %v8031_v53  ;;  %729 = vmatmul.f32.gmra.mxu1 %v7757_v55 }
  0x83   : > { %1305 = vmatpush.xpose.msra.mxu1 %v7976_v28  ;;  %1455 = vmatpush.xpose.msra.mxu3 %v8021_v49 }
  0x84   : > { %879 = vmatmul.f32.gmra.mxu3 %v7778_v1  ;;  %1396 = vmatpush.xpose.msra.mxu2 %v8039_v11  ;;  %v358_v1 = vsel %vm287_vm0, %v262_v62, 0.0 }
  0x85   : > { %806 = vmatmul.f32.gmra.mxu2 %v7767_v61  ;;  %v214_v61 = vld [vmem:[%s7710_s24 + $0xb8] sm:$0xff] }
  0x86   : > { %1246 = vmatpush.xpose.msra.mxu0 %v8048_v21  ;;  %v357_v63 = vsel %vm287_vm0, %v214_v61, 0.0 }
  0x87   : > { %1307 = vmatpush.xpose.msra.mxu1 %v7998_v40  ;;  %1457 = vmatpush.xpose.msra.mxu3 %v8041_v29  ;;  %v359_v2 = vadd.f32 %v358_v1, %v357_v63 }
  0x88   : > { %1400 = vmatpush.xpose.msra.mxu2 %v8057_v23 }
  0x89   : > { %924 = vmatmul.f32.vlgmr.msrb.gmra.mxu0 %v7834_v30  ;;  %v462_v4 = vmul.f32 %v7740_v39, %v359_v2 }
  0x8a   : > { %733 = vmatmul.f32.gmra.mxu1 %v7755_v54 }
  0x8b   : > { %1309 = vmatpush.xpose.msra.mxu1 %v8021_v49 }
  0x8c   : > { %1183 = vmatmul.f32.vlgmr.msrb.gmra.mxu3 %v8041_v29 }
  0x8d   : > { %1066 = vmatmul.f32.vlgmr.msrb.gmra.mxu2 %v1065_v60  ;;  %v348_v60 = vsel %vm287_vm0, %v211_v14, 0.0 }
  0x8f   : > { %1311 = vmatpush.xpose.msra.mxu1 %v8041_v29 }
  0x91   : > { %928 = vmatmul.f32.gmra.mxu0 %v7827_v26 }
  0x92   : > { %981 = vmatmul.f32.vlgmr.msrb.gmra.mxu1 %v7834_v30 }
  0x94   : > { %1187 = vmatmul.f32.gmra.mxu3 %v8021_v49 }
  0x95   : > { %1074 = vmatmul.f32.gmra.mxu2 %v8054_v41  ;;  %v259_v41 = vld [vmem:[%s7710_s24 + $0x220] sm:$0xff] }
  0x99   : > { %932 = vmatmul.f32.gmra.mxu0 %v7809_v16 }
  0x9a   : > { %985 = vmatmul.f32.gmra.mxu1 %v7827_v26 }
  0x9c   : > { %1191 = vmatmul.f32.gmra.mxu3 %v7998_v40 }
  0x9d   : > { %1082 = vmatmul.f32.gmra.mxu2 %v8036_v42 }
  0xa1   : > { %936 = vmatmul.f32.gmra.mxu0 %v7787_v5 }
  0xa2   : > { %989 = vmatmul.f32.gmra.mxu1 %v7809_v16 }
  0xa4   : > { %1195 = vmatmul.f32.gmra.mxu3 %v7976_v28 }
  0xa5   : > { %1090 = vmatmul.f32.gmra.mxu2 %v8016_v43 }
  0xa9   : > { %940 = vmatmul.f32.gmra.mxu0 %v7761_v58 }
  0xaa   : > { %993 = vmatmul.f32.gmra.mxu1 %v7787_v5  ;;  %v1513_v5 = vsel %vm287_vm0, %v462_v4, 0 }
  0xab   : > { %v8147_v9 = vand.u32 4294901760, %v1513_v5 }
  0xac   : > { %1199 = vmatmul.f32.gmra.mxu3 %v7946_v48 }
  0xad   : > { %1098 = vmatmul.f32.gmra.mxu2 %v7980_v31  ;;  %12545 = vst [vmem:[#allocation6_spill] sm:$0xff] %v8147_v9  ;;  %v8152_v16 = vsub.f32 %v1513_v5, %v8147_v9  ;;  %1524 = vmatpush.xpose.msrb.mxu0 %v8147_v9  ;;  %v260_v31 = vld [vmem:[%s7710_s24 + $0x228] sm:$0xff] }
  0xae   : > { %1775 = vmatpush.xpose.msrb.mxu3 %v8147_v9 }
  0xaf   : > { %12546 = vst [vmem:[#allocation7_spill] sm:$0xff] %v8152_v16  ;;  %1703 = vmatpush.xpose.msrb.mxu2 %v8152_v16  ;;  %v8160_v26 = vand.u32 4294901760, %v8152_v16 }
  0xb1   : > { %944 = vmatmul.f32.gmra.mxu0 %v7759_v56  ;;  %12547 = vst [vmem:[#allocation8_spill] sm:$0xff] %v8160_v26  ;;  %v1598_v33 = vsub.f32 %v8152_v16, %v8160_v26  ;;  %v7636_v16 = vmov 0.0  }
  0xb2   : > { %997 = vmatmul.f32.gmra.mxu1 %v7761_v58  ;;  %v354_v58 = vsel %vm287_vm0, %v213_v13, 0.0  ;;  %143 = vst.msk [vmem:[#allocation2] sm:$0xff] %vm142_vm2, %v7636_v16 }
  0xb3   : > { %v356_v19 = vadd.f32 %v355_v17, %v354_v58  ;;  %v8170_v44 = vand.u32 4294901760, %v1598_v33  ;;  %144 = vst.msk [vmem:[#allocation2 + $0x8] sm:$0xff] %vm142_vm2, %v7636_v16 }
  0xb4   : > { %1203 = vmatmul.f32.gmra.mxu3 %v7914_v18  ;;  %145 = vst.msk [vmem:[#allocation2 + $0x10] sm:$0xff] %vm142_vm2, %v7636_v16 }
  0xb5   : > { %1106 = vmatmul.f32.gmra.mxu2 %v7955_v0  ;;  %v461_v30 = vmul.f32 %v7740_v39, %v356_v19  ;;  %12548 = vst [vmem:[#allocation9_spill] sm:$0xff] %v8170_v44  ;;  %v212_v0 = vld [vmem:[%s7710_s24 + $0xa8] sm:$0xff]  ;;  %1617 = vmatpush.xpose.msrb.mxu1 %v8170_v44  ;;  %v346_v19 = vsel %vm287_vm0, %v258_v15, 0.0 }
  0xb6   : > { %v351_v25 = vsel %vm287_vm0, %v212_v0, 0.0  ;;  %v208_v15 = vld [vmem:[%s7710_s24 + $0x88] sm:$0xff]  ;;  %146 = vst.msk [vmem:[#allocation2 + $0x18] sm:$0xff] %vm142_vm2, %v7636_v16 }
  0xb7   : > { %v1510_v35 = vsel %vm287_vm0, %v461_v30, 0  ;;  %147 = vst.msk [vmem:[#allocation2 + $0x20] sm:$0xff] %vm142_vm2, %v7636_v16 }
  0xb8   : > { %v8172_v57 = vand.u32 4294901760, %v1510_v35  ;;  %148 = vst.msk [vmem:[#allocation2 + $0x28] sm:$0xff] %vm142_vm2, %v7636_v16 }
  0xb9   : > { %948 = vmatmul.f32.gmra.mxu0 %v7757_v55  ;;  %149 = vst.msk [vmem:[#allocation2 + $0x30] sm:$0xff] %vm142_vm2, %v7636_v16 }
  0xba   : > { %1001 = vmatmul.f32.gmra.mxu1 %v7759_v56  ;;  %12549 = vst [vmem:[#allocation10_spill] sm:$0xff] %v8172_v57  ;;  %v8178_v56 = vsub.f32 %v1510_v35, %v8172_v57  ;;  %1526 = vmatpush.xpose.msrb.mxu0 %v8172_v57 }
  0xbb   : > { %1777 = vmatpush.xpose.msrb.mxu3 %v8172_v57  ;;  %150 = vst.msk [vmem:[#allocation2 + $0x38] sm:$0xff] %vm142_vm2, %v7636_v16 }
  0xbc   : > { %1207 = vmatmul.f32.gmra.mxu3 %v7871_v47  ;;  %12550 = vst [vmem:[#allocation11_spill] sm:$0xff] %v8178_v56  ;;  %1706 = vmatpush.xpose.msrb.mxu2 %v8178_v56  ;;  %v8186_v36 = vand.u32 4294901760, %v8178_v56 }
  0xbd   : > { %1114 = vmatmul.f32.gmra.mxu2 %v7939_v37  ;;  %v352_v37 = vsel %vm287_vm0, %v260_v31, 0.0  ;;  %151 = vst.msk [vmem:[#allocation2 + $0x40] sm:$0xff] %vm142_vm2, %v7636_v16 }
  0xbe   : > { %v353_v27 = vadd.f32 %v352_v37, %v351_v25  ;;  %12551 = vst [vmem:[#allocation12_spill] sm:$0xff] %v8186_v36  ;;  %v1590_v52 = vsub.f32 %v8178_v56, %v8186_v36 }
  0xbf   : > { %152 = vst.msk [vmem:[#allocation2 + $0x48] sm:$0xff] %vm142_vm2, %v7636_v16 }
  0xc0   : > { %v460_v43 = vmul.f32 %v7740_v39, %v353_v27  ;;  %v8196_v59 = vand.u32 4294901760, %v1590_v52  ;;  %v257_v52 = vld [vmem:[%s7710_s24 + $0x210] sm:$0xff]  ;;  %153 = vst.msk [vmem:[#allocation2 + $0x50] sm:$0xff] %vm142_vm2, %v7636_v16 }
  0xc1   : > { %952 = vmatmul.f32.gmra.mxu0 %v7755_v54  ;;  %154 = vst.msk [vmem:[#allocation2 + $0x58] sm:$0xff] %vm142_vm2, %v7636_v16 }
  0xc2   : > { %1005 = vmatmul.f32.gmra.mxu1 %v7757_v55  ;;  %v1507_v12 = vsel %vm287_vm0, %v460_v43, 0  ;;  %12552 = vst [vmem:[#allocation13_spill] sm:$0xff] %v8196_v59 }
  0xc3   : > { %v8198_v42 = vand.u32 4294901760, %v1507_v12  ;;  %1623 = vmatpush.xpose.msrb.mxu1 %v8196_v59  ;;  %155 = vst.msk [vmem:[#allocation2 + $0x60] sm:$0xff] %vm142_vm2, %v7636_v16 }
  0xc4   : > { %1211 = vmatmul.f32.gmra.mxu3 %v7850_v38  ;;  %156 = vst.msk [vmem:[#allocation2 + $0x68] sm:$0xff] %vm142_vm2, %v7636_v16 }
  0xc5   : > { %1122 = vmatmul.f32.gmra.mxu2 %v7917_v20  ;;  %12553 = vst [vmem:[#allocation14_spill] sm:$0xff] %v8198_v42  ;;  %v8206_v55 = vsub.f32 %v1507_v12, %v8198_v42  ;;  %1528 = vmatpush.xpose.msrb.mxu0 %v8198_v42  ;;  %v349_v20 = vsel %vm287_vm0, %v259_v41, 0.0  ;;  %v343_v41 = vsel %vm287_vm0, %v257_v52, 0.0 }
  0xc6   : > { %v8202_v3 = vpop.f32.mrf.mxu0  ;;  %1779 = vmatpush.xpose.msrb.mxu3 %v8198_v42  ;;  %v350_v61 = vadd.f32 %v349_v20, %v348_v60  ;;  %157 = vst.msk [vmem:[#allocation2 + $0x70] sm:$0xff] %vm142_vm2, %v7636_v16 }
  0xc7   : > { %12554 = vst [vmem:[#allocation15_spill] sm:$0xff] %v8206_v55  ;;  %1709 = vmatpush.xpose.msrb.mxu2 %v8206_v55  ;;  %v8214_v62 = vand.u32 4294901760, %v8206_v55 }
  0xc8   : > { %v459_v63 = vmul.f32 %v7740_v39, %v350_v61  ;;  %158 = vst.msk [vmem:[#allocation2 + $0x78] sm:$0xff] %vm142_vm2, %v7636_v16 }
  0xc9   : > { %12555 = vst [vmem:[#allocation16_spill] sm:$0xff] %v8214_v62  ;;  %1249 = vmatmul.f32.vlgmr.msra.gmra.mxu0 %v8048_v21  ;;  %v1582_v1 = vsub.f32 %v8206_v55, %v8214_v62 }
  0xca   : > { %1009 = vmatmul.f32.gmra.mxu1 %v7755_v54  ;;  %v1504_v2 = vsel %vm287_vm0, %v459_v63, 0  ;;  %v210_v54 = vld [vmem:[%s7710_s24 + $0x98] sm:$0xff]  ;;  %159 = vst.msk [vmem:[#allocation2 + $0x80] sm:$0xff] %vm142_vm2, %v7636_v16 }
  0xcb   : > { %v8224_v4 = vand.u32 4294901760, %v1582_v1  ;;  %v8226_v5 = vand.u32 4294901760, %v1504_v2  ;;  %v207_v1 = vld [vmem:[%s7710_s24 + $0x80] sm:$0xff]  ;;  %160 = vst.msk [vmem:[#allocation2 + $0x88] sm:$0xff] %vm142_vm2, %v7636_v16 }
  0xcc   : > { %1459 = vmatmul.f32.vlgmr.msra.gmra.mxu3 %v8041_v29  ;;  %161 = vst.msk [vmem:[#allocation2 + $0x90] sm:$0xff] %vm142_vm2, %v7636_v16 }
  0xcd   : > { %1402 = vmatmul.f32.vlgmr.msra.gmra.mxu2 %v8041_v29  ;;  %v8228_v13 = vpop.f32.mrf.mxu3  ;;  %1629 = vmatpush.xpose.msrb.mxu1 %v8224_v4  ;;  %v8238_v17 = vsub.f32 %v1504_v2, %v8226_v5  ;;  %v345_v29 = vsel %vm287_vm0, %v210_v54, 0.0  ;;  %v255_v2 = vld [vmem:[%s7710_s24 + $0x200] sm:$0xff]  ;;  %162 = vst.msk [vmem:[#allocation2 + $0x98] sm:$0xff] %vm142_vm2, %v7636_v16 }
  0xce   : > { %v8232_v21 = vpop.f32.mrf.mxu0  ;;  %1530 = vmatpush.xpose.msrb.mxu0 %v8226_v5  ;;  %1781 = vmatpush.xpose.msrb.mxu3 %v8226_v5  ;;  %v347_v33 = vadd.f32 %v346_v19, %v345_v29  ;;  %v256_v29 = vld [vmem:[%s7710_s24 + $0x208] sm:$0xff]  ;;  %v336_v19 = vsel %vm287_vm0, %v207_v1, 0.0  ;;  %163 = vst.msk [vmem:[#allocation2 + $0xa0] sm:$0xff] %vm142_vm2, %v7636_v16 }
  0xcf   : > { %v8234_v58 = vpop.f32.mrf.mxu1  ;;  %1712 = vmatpush.xpose.msrb.mxu2 %v8238_v17  ;;  %v8248_v35 = vand.u32 4294901760, %v8238_v17  ;;  %164 = vst.msk [vmem:[#allocation2 + $0xa8] sm:$0xff] %vm142_vm2, %v7636_v16 }
  0xd0   : > { %v8243_v30 = vpop.f32.mrf.mxu2  ;;  %v458_v0 = vmul.f32 %v7740_v39, %v347_v33  ;;  %v337_v33 = vsel %vm287_vm0, %v255_v2, 0.0  ;;  %165 = vst.msk [vmem:[#allocation2 + $0xb0] sm:$0xff] %vm142_vm2, %v7636_v16 }
  0xd1   : > { %1254 = vmatmul.f32.gmra.mxu0 %v8031_v53  ;;  %v1574_v31 = vsub.f32 %v8238_v17, %v8248_v35  ;;  %v209_v53 = vld [vmem:[%s7710_s24 + $0x90] sm:$0xff]  ;;  %166 = vst.msk [vmem:[#allocation2 + $0xb8] sm:$0xff] %vm142_vm2, %v7636_v16 }
  0xd2   : > { %1315 = vmatmul.f32.vlgmr.msra.gmra.mxu1 %v8057_v23  ;;  %v1501_v25 = vsel %vm287_vm0, %v458_v0, 0  ;;  %v342_v14 = vsel %vm287_vm0, %v209_v53, 0.0  ;;  %v340_v0 = vsel %vm287_vm0, %v256_v29, 0.0  ;;  %167 = vst.msk [vmem:[#allocation2 + $0xc0] sm:$0xff] %vm142_vm2, %v7636_v16 }
  0xd3   : > { %v8258_v37 = vand.u32 4294901760, %v1574_v31  ;;  %v8260_v27 = vand.u32 4294901760, %v1501_v25  ;;  %v344_v20 = vadd.f32 %v343_v41, %v342_v14  ;;  %v338_v31 = vadd.f32 %v337_v33, %v336_v19  ;;  %168 = vst.msk [vmem:[#allocation2 + $0xc8] sm:$0xff] %vm142_vm2, %v7636_v16 }
  0xd4   : > { %1463 = vmatmul.f32.gmra.mxu3 %v8021_v49  ;;  %169 = vst.msk [vmem:[#allocation2 + $0xd0] sm:$0xff] %vm142_vm2, %v7636_v16 }
  0xd5   : > { %1406 = vmatmul.f32.gmra.mxu2 %v8021_v49  ;;  %1635 = vmatpush.xpose.msrb.mxu1 %v8258_v37  ;;  %v8272_v49 = vsub.f32 %v1501_v25, %v8260_v27  ;;  %v457_v63 = vmul.f32 %v7740_v39, %v344_v20  ;;  %v455_v41 = vmul.f32 %v7740_v39, %v338_v31 }
  0xd6   : > { %v8266_v23 = vpop.f32.mrf.mxu0  ;;  %1532 = vmatpush.xpose.msrb.mxu0 %v8260_v27  ;;  %1783 = vmatpush.xpose.msrb.mxu3 %v8260_v27  ;;  %170 = vst.msk [vmem:[#allocation2 + $0xd8] sm:$0xff] %vm142_vm2, %v7636_v16 }
  0xd7   : > { %v8262_v43 = vpop.f32.mrf.mxu3  ;;  %v8268_v12 = vpop.f32.mrf.mxu1  ;;  %1715 = vmatpush.xpose.msrb.mxu2 %v8272_v49  ;;  %v8282_v61 = vand.u32 4294901760, %v8272_v49  ;;  %171 = vst.msk [vmem:[#allocation2 + $0xe0] sm:$0xff] %vm142_vm2, %v7636_v16 }
  0xd8   : > { %v8277_v60 = vpop.f32.mrf.mxu2  ;;  %172 = vst.msk [vmem:[#allocation2 + $0xe8] sm:$0xff] %vm142_vm2, %v7636_v16 }
  0xd9   : > { %1259 = vmatmul.f32.gmra.mxu0 %v8008_v22  ;;  %v1566_v54 = vsub.f32 %v8272_v49, %v8282_v61  ;;  %v1498_v22 = vsel %vm287_vm0, %v457_v63, 0  ;;  %173 = vst.msk [vmem:[#allocation2 + $0xf0] sm:$0xff] %vm142_vm2, %v7636_v16 }
  0xda   : > { %1321 = vmatmul.f32.gmra.mxu1 %v8039_v11  ;;  %v339_v11 = vsel %vm287_vm0, %v208_v15, 0.0  ;;  %v8302_v53 = vand.u32 4294901760, %v1498_v22  ;;  %174 = vst.msk [vmem:[#allocation2 + $0xf8] sm:$0xff] %vm142_vm2, %v7636_v16 }
  0xdb   : > { %v8300_v25 = vand.u32 4294901760, %v1566_v54  ;;  %v341_v52 = vadd.f32 %v340_v0, %v339_v11  ;;  %v1492_v54 = vsel %vm287_vm0, %v455_v41, 0  ;;  %175 = vst.msk [vmem:[#allocation2 + $0x100] sm:$0xff] %vm142_vm2, %v7636_v16 }
  0xdc   : > { %1467 = vmatmul.f32.gmra.mxu3 %v7998_v40  ;;  %1534 = vmatpush.xpose.msrb.mxu0 %v8302_v53  ;;  %v8326_v19 = vand.u32 4294901760, %v1492_v54  ;;  %176 = vst.msk [vmem:[#allocation2 + $0x108] sm:$0xff] %vm142_vm2, %v7636_v16 }
  0xdd   : > { %1410 = vmatmul.f32.gmra.mxu2 %v7998_v40  ;;  %1641 = vmatpush.xpose.msrb.mxu1 %v8300_v25  ;;  %v8313_v40 = vsub.f32 %v1498_v22, %v8302_v53  ;;  %v456_v63 = vmul.f32 %v7740_v39, %v341_v52  ;;  %177 = vst.msk [vmem:[#allocation2 + $0x110] sm:$0xff] %vm142_vm2, %v7636_v16 }
  0xde   : > { %v8307_v20 = vpop.f32.mrf.mxu0  ;;  %1785 = vmatpush.xpose.msrb.mxu3 %v8302_v53  ;;  %v8336_v11 = vsub.f32 %v1492_v54, %v8326_v19  ;;  %178 = vst.msk [vmem:[#allocation2 + $0x118] sm:$0xff] %vm142_vm2, %v7636_v16 }
  0xdf   : > { %v8304_v14 = vpop.f32.mrf.mxu3  ;;  %v8309_v1 = vpop.f32.mrf.mxu1  ;;  %1718 = vmatpush.xpose.msrb.mxu2 %v8313_v40  ;;  %v8323_v15 = vand.u32 4294901760, %v8313_v40  ;;  %v1495_v29 = vsel %vm287_vm0, %v456_v63, 0  ;;  %179 = vst.msk [vmem:[#allocation2 + $0x120] sm:$0xff] %vm142_vm2, %v7636_v16 }
  0xe0   : > { %v8317_v2 = vpop.f32.mrf.mxu2  ;;  %v8330_v33 = vand.u32 4294901760, %v1495_v29  ;;  %v8353_v52 = vand.u32 4294901760, %v8336_v11  ;;  %180 = vst.msk [vmem:[#allocation2 + $0x128] sm:$0xff] %vm142_vm2, %v7636_v16 }
  0xe1   : > { %1264 = vmatmul.f32.gmra.mxu0 %v7988_v32  ;;  %v1558_v22 = vsub.f32 %v8313_v40, %v8323_v15  ;;  %181 = vst.msk [vmem:[#allocation2 + $0x130] sm:$0xff] %vm142_vm2, %v7636_v16 }
  0xe2   : > { %1327 = vmatmul.f32.gmra.mxu1 %v8019_v45  ;;  %v8340_v0 = vsub.f32 %v1495_v29, %v8330_v33  ;;  %1536 = vmatpush.xpose.msrb.mxu0 %v8330_v33  ;;  %182 = vst.msk [vmem:[#allocation2 + $0x138] sm:$0xff] %vm142_vm2, %v7636_v16 }
  0xe3   : > { %v8343_v32 = vand.u32 4294901760, %v1558_v22  ;;  %1787 = vmatpush.xpose.msrb.mxu3 %v8330_v33  ;;  %v1542_v22 = vsub.f32 %v8336_v11, %v8353_v52  ;;  %183 = vst.msk [vmem:[#allocation2 + $0x140] sm:$0xff] %vm142_vm2, %v7636_v16 }
  0xe4   : > { %1471 = vmatmul.f32.gmra.mxu3 %v7976_v28  ;;  %1721 = vmatpush.xpose.msrb.mxu2 %v8340_v0  ;;  %v8350_v31 = vand.u32 4294901760, %v8340_v0  ;;  %184 = vst.msk [vmem:[#allocation2 + $0x148] sm:$0xff] %vm142_vm2, %v7636_v16 }
  0xe5   : > { %1414 = vmatmul.f32.gmra.mxu2 %v7976_v28  ;;  %1647 = vmatpush.xpose.msrb.mxu1 %v8343_v32  ;;  %185 = vst.msk [vmem:[#allocation2 + $0x150] sm:$0xff] %vm142_vm2, %v7636_v16 }
  0xe6   : > { %v8355_v28 = vpop.f32.mrf.mxu0  ;;  %v1550_v54 = vsub.f32 %v8340_v0, %v8350_v31  ;;  %1538 = vmatpush.xpose.msrb.mxu0 %v8326_v19  ;;  %186 = vst.msk [vmem:[#allocation2 + $0x158] sm:$0xff] %vm142_vm2, %v7636_v16 }
  0xe7   : > { %v8346_v45 = vpop.f32.mrf.mxu3  ;;  %v8357_v41 = vpop.f32.mrf.mxu1  ;;  %1789 = vmatpush.xpose.msrb.mxu3 %v8326_v19  ;;  %187 = vst.msk [vmem:[#allocation2 + $0x160] sm:$0xff] %vm142_vm2, %v7636_v16 }
  0xe8   : > { %v8360_v63 = vpop.f32.mrf.mxu2  ;;  %v8369_v29 = vand.u32 4294901760, %v1550_v54  ;;  %1724 = vmatpush.xpose.msrb.mxu2 %v8336_v11  ;;  %v222_v54 = vld [vmem:[%s7710_s24 + $0xf8] sm:$0xff]  ;;  %188 = vst.msk [vmem:[#allocation2 + $0x168] sm:$0xff] %vm142_vm2, %v7636_v16 }
  0xe9   : > { %1269 = vmatmul.f32.gmra.mxu0 %v7958_v6  ;;  %v381_v56 = vsel %vm287_vm0, %v222_v54, 0.0  ;;  %189 = vst.msk [vmem:[#allocation2 + $0x170] sm:$0xff] %vm142_vm2, %v7636_v16 }
  0xea   : > { %1850 = vmatpush.xpose.msra.mxu0 %v8160_v26  ;;  %1333 = vmatmul.f32.gmra.mxu1 %v7996_v7  ;;  %v8386_v7 = vand.u32 4294901760, %v1542_v22  ;;  %v270_v26 = vld [vmem:[%s7710_s24 + $0x278] sm:$0xff]  ;;  %190 = vst.msk [vmem:[#allocation2 + $0x178] sm:$0xff] %vm142_vm2, %v7636_v16 }
  0xeb   : > { %1653 = vmatpush.xpose.msrb.mxu1 %v8369_v29  ;;  %v382_v59 = vsel %vm287_vm0, %v270_v26, 0.0 }
  0xec   : > { %1475 = vmatmul.f32.gmra.mxu3 %v7946_v48  ;;  %v383_v22 = vadd.f32 %v382_v59, %v381_v56 }
  0xed   : > { %1418 = vmatmul.f32.gmra.mxu2 %v7946_v48 }
  0xee   : > { %1854 = vmatpush.xpose.msra.mxu0 %v8186_v36  ;;  %v8392_v48 = vpop.f32.mrf.mxu0  ;;  %v470_v26 = vmul.f32 %v7740_v39, %v383_v22 }
  0xef   : > { %v8384_v6 = vpop.f32.mrf.mxu3  ;;  %v8394_v44 = vpop.f32.mrf.mxu1  ;;  %1659 = vmatpush.xpose.msrb.mxu1 %v8386_v7 }
  0xf0   : > { %v8400_v36 = vpop.f32.mrf.mxu2  ;;  %v1991_v56 = vsel %vm287_vm0, %v470_v26, 0  ;;  %v221_v26 = vld [vmem:[%s7710_s24 + $0xf0] sm:$0xff] }
  0xf1   : > { %1274 = vmatmul.f32.gmra.mxu0 %v7925_v24  ;;  %v8421_v24 = vand.u32 4294901760, %v1991_v56 }
  0xf2   : > { %1858 = vmatpush.xpose.msra.mxu0 %v8214_v62  ;;  %1339 = vmatmul.f32.gmra.mxu1 %v7962_v10 }
  0xf3   : > { %1921 = vmatpush.xpose.msra.mxu1 %v8147_v9  ;;  %2002 = vmatpush.xpose.msra.mxu2 %v8421_v24  ;;  %v8454_v22 = vsub.f32 %v1991_v56, %v8421_v24  ;;  %v269_v9 = vld [vmem:[%s7710_s24 + $0x270] sm:$0xff] }
  0xf4   : > { %1479 = vmatmul.f32.gmra.mxu3 %v7914_v18 }
  0xf5   : > { %1422 = vmatmul.f32.gmra.mxu2 %v7914_v18  ;;  %12558 = vst [vmem:[#allocation19_spill] sm:$0xff] %v8454_v22 }
  0xf6   : > { %1862 = vmatpush.xpose.msra.mxu0 %v8248_v35  ;;  %v8431_v18 = vpop.f32.mrf.mxu0 }
  0xf7   : > { %1923 = vmatpush.xpose.msra.mxu1 %v8172_v57  ;;  %v8427_v10 = vpop.f32.mrf.mxu3  ;;  %12557 = vst [vmem:[#allocation18_spill] sm:$0xff] %v8431_v18  ;;  %v8433_v59 = vpop.f32.mrf.mxu1  ;;  %v8466_v57 = vand.u32 4294901760, %v8454_v22 }
  0xf8   : > { %12556 = vst [vmem:[#allocation17_spill] sm:$0xff] %v8427_v10  ;;  %v8438_v54 = vpop.f32.mrf.mxu2 }
  0xf9   : > { %1279 = vmatmul.f32.gmra.mxu0 %v7881_v51  ;;  %v378_v51 = vsel %vm287_vm0, %v221_v26, 0.0  ;;  %12559 = vst [vmem:[#allocation20_spill] sm:$0xff] %v8466_v57  ;;  %v268_v26 = vld [vmem:[%s7710_s24 + $0x268] sm:$0xff] }
  0xfa   : > { %1866 = vmatpush.xpose.msra.mxu0 %v8282_v61  ;;  %1345 = vmatmul.f32.gmra.mxu1 %v7932_v34  ;;  %v379_v34 = vsel %vm287_vm0, %v269_v9, 0.0 }
  0xfb   : > { %1925 = vmatpush.xpose.msra.mxu1 %v8198_v42  ;;  %v380_v42 = vadd.f32 %v379_v34, %v378_v51  ;;  %v2076_v51 = vsub.f32 %v8454_v22, %v8466_v57 }
  0xfc   : > { %1483 = vmatmul.f32.gmra.mxu3 %v7871_v47 }
  0xfd   : > { %1426 = vmatmul.f32.gmra.mxu2 %v7871_v47  ;;  %v220_v47 = vld [vmem:[%s7710_s24 + $0xe8] sm:$0xff]  ;;  %v469_v34 = vmul.f32 %v7740_v39, %v380_v42 }
  0xfe   : > { %1870 = vmatpush.xpose.msra.mxu0 %v8323_v15  ;;  %v8476_v55 = vpop.f32.mrf.mxu0  ;;  %v375_v10 = vsel %vm287_vm0, %v220_v47, 0.0 }
  0xff   : > { %1927 = vmatpush.xpose.msra.mxu1 %v8226_v5  ;;  %v8470_v56 = vpop.f32.mrf.mxu3  ;;  %12561 = vst [vmem:[#allocation22_spill] sm:$0xff] %v8476_v55  ;;  %v8478_v9 = vpop.f32.mrf.mxu1  ;;  %v1988_v62 = vsel %vm287_vm0, %v469_v34, 0 }
 0x100   : > { %12560 = vst [vmem:[#allocation21_spill] sm:$0xff] %v8470_v56  ;;  %v376_v56 = vsel %vm287_vm0, %v268_v26, 0.0  ;;  %v8487_v18 = vpop.f32.mrf.mxu2  ;;  %v8502_v42 = vand.u32 4294901760, %v1988_v62 }
 0x101   : > { %12562 = vst [vmem:[#allocation23_spill] sm:$0xff] %v8478_v9  ;;  %v377_v55 = vadd.f32 %v376_v56, %v375_v10  ;;  %v8493_v9 = vand.u32 4294901760, %v2076_v51  ;;  %1284 = vmatmul.f32.gmra.mxu0 %v7869_v46  ;;  %v707_v56 = vadd.f32 %v8234_v58, %v8202_v3  ;;  %v267_v58 = vld [vmem:[%s7710_s24 + $0x260] sm:$0xff] }
 0x102   : > { %12563 = vst [vmem:[#allocation24_spill] sm:$0xff] %v8487_v18  ;;  %1874 = vmatpush.xpose.msra.mxu0 %v8350_v31  ;;  %1351 = vmatmul.f32.gmra.mxu1 %v7903_v8  ;;  %v8515_v46 = vsub.f32 %v1988_v62, %v8502_v42  ;;  %v219_v62 = vld [vmem:[%s7710_s24 + $0xe0] sm:$0xff] }
 0x103   : > { %12564 = vst [vmem:[#allocation25_spill] sm:$0xff] %v8493_v9  ;;  %1929 = vmatpush.xpose.msra.mxu1 %v8260_v27  ;;  %v468_v10 = vmul.f32 %v7740_v39, %v377_v55  ;;  %2095 = vmatpush.xpose.msra.mxu3 %v8493_v9  ;;  %v372_v34 = vsel %vm287_vm0, %v219_v62, 0.0  ;;  %v773_v9 = vadd.f32 %v8243_v30, %v707_v56 }
 0x104   : > { %1487 = vmatmul.f32.gmra.mxu3 %v7850_v38  ;;  %12565 = vst [vmem:[#allocation26_spill] sm:$0xff] %v8515_v46  ;;  %2004 = vmatpush.xpose.msra.mxu2 %v8502_v42  ;;  %v8529_v3 = vand.u32 4294901760, %v8515_v46  ;;  %v711_v62 = vadd.f32 %v8268_v12, %v8232_v21 }
 0x105   : > { %1430 = vmatmul.f32.gmra.mxu2 %v7850_v38  ;;  %v1985_v8 = vsel %vm287_vm0, %v468_v10, 0  ;;  %v373_v10 = vsel %vm287_vm0, %v267_v58, 0.0  ;;  %v218_v58 = vld [vmem:[%s7710_s24 + $0xd8] sm:$0xff] }
 0x106   : > { %v8521_v55 = vand.u32 4294901760, %v1985_v8  ;;  %1878 = vmatpush.xpose.msra.mxu0 %v8353_v52  ;;  %v925_v26 = vpop.f32.mrf.mxu0  ;;  %v374_v18 = vadd.f32 %v373_v10, %v372_v34  ;;  %v369_v12 = vsel %vm287_vm0, %v218_v58, 0.0  ;;  %v778_v10 = vadd.f32 %v8277_v60, %v711_v62  ;;  %v487_v58 = vld [vmem:[#allocation2] sm:$0xff] }
 0x107   : > { %1931 = vmatpush.xpose.msra.mxu1 %v8302_v53  ;;  %v8524_v38 = vpop.f32.mrf.mxu3  ;;  %v8534_v47 = vpop.f32.mrf.mxu1 }
 0x108   : > { %12566 = vst [vmem:[#allocation27_spill] sm:$0xff] %v8524_v38  ;;  %v8539_v51 = vsub.f32 %v1985_v8, %v8521_v55  ;;  %v8544_v38 = vpop.f32.mrf.mxu2  ;;  %2006 = vmatpush.xpose.msra.mxu2 %v8521_v55  ;;  %v467_v56 = vmul.f32 %v7740_v39, %v374_v18 }
 0x109   : > { %12567 = vst [vmem:[#allocation28_spill] sm:$0xff] %v8534_v47  ;;  %v2068_v47 = vsub.f32 %v8515_v46, %v8529_v3  ;;  %1544 = vmatmul.f32.vlgmr.msrb.gmra.mxu0 %v8386_v7  ;;  %v266_v7 = vld [vmem:[%s7710_s24 + $0x258] sm:$0xff] }
 0x10a   : > { %12568 = vst [vmem:[#allocation29_spill] sm:$0xff] %v8539_v51  ;;  %v8554_v8 = vand.u32 4294901760, %v8539_v51  ;;  %1357 = vmatmul.f32.gmra.mxu1 %v7878_v50  ;;  %2181 = vmatpush.xpose.msrb.mxu0 %v8454_v22  ;;  %v1982_v21 = vsel %vm287_vm0, %v467_v56, 0 }
 0x10b   : > { %1933 = vmatpush.xpose.msra.mxu1 %v8330_v33  ;;  %v8561_v30 = vand.u32 4294901760, %v2068_v47  ;;  %v839_v47 = vadd.f32 %v8228_v13, %v773_v9  ;;  %v8586_v13 = vand.u32 4294901760, %v1982_v21 }
 0x10c   : > { %1793 = vmatmul.f32.vlgmr.msrb.gmra.mxu3 %v8353_v52  ;;  %v2060_v50 = vsub.f32 %v8539_v51, %v8554_v8  ;;  %v370_v52 = vsel %vm287_vm0, %v266_v7, 0.0 }
 0x10d   : > { %12569 = vst [vmem:[#allocation30_spill] sm:$0xff] %v8561_v30  ;;  %1727 = vmatmul.f32.vlgmr.msrb.gmra.mxu2 %v8336_v11  ;;  %2101 = vmatpush.xpose.msra.mxu3 %v8561_v30  ;;  %v371_v11 = vadd.f32 %v370_v52, %v369_v12  ;;  %v926_v9 = vadd.f32 %v925_v26, %v839_v47  ;;  %v217_v47 = vld [vmem:[%s7710_s24 + $0xd0] sm:$0xff] }
 0x10e   : > { %v8584_v18 = vand.u32 4294901760, %v2060_v50  ;;  %v929_v56 = vpop.f32.mrf.mxu0  ;;  %2008 = vmatpush.xpose.msra.mxu2 %v8586_v13  ;;  %v8598_v50 = vsub.f32 %v1982_v21, %v8586_v13  ;;  %v265_v12 = vld [vmem:[%s7710_s24 + $0x250] sm:$0xff]  ;;  %2184 = vmatpush.xpose.msrb.mxu0 %v8515_v46  ;;  %v366_v62 = vsel %vm287_vm0, %v217_v47, 0.0 }
 0x10f   : > { %1935 = vmatpush.xpose.msra.mxu1 %v8326_v19  ;;  %v8589_v34 = vpop.f32.mrf.mxu3  ;;  %v982_v7 = vpop.f32.mrf.mxu1  ;;  %v466_v26 = vmul.f32 %v7740_v39, %v371_v11  ;;  %v367_v21 = vsel %vm287_vm0, %v265_v12, 0.0  ;;  %v845_v12 = vadd.f32 %v8262_v43, %v778_v10 }
 0x110   : > { %v983_v52 = vadd.f32 %v982_v7, %v926_v9  ;;  %v8606_v60 = vpop.f32.mrf.mxu2  ;;  %v8614_v11 = vand.u32 4294901760, %v8598_v50  ;;  %v368_v7 = vadd.f32 %v367_v21, %v366_v62  ;;  %v264_v62 = vld [vmem:[%s7710_s24 + $0x248] sm:$0xff] }
 0x111   : > { %2107 = vmatpush.xpose.msra.mxu3 %v8584_v18  ;;  %v1979_v9 = vsel %vm287_vm0, %v466_v26, 0  ;;  %1552 = vmatmul.f32.gmra.mxu0 %v8369_v29  ;;  %v715_v29 = vadd.f32 %v8309_v1, %v8266_v23  ;;  %v364_v10 = vsel %vm287_vm0, %v264_v62, 0.0 }
 0x112   : > { %v3403_v22 = vadd.f32 %v983_v52, %v487_v58  ;;  %1661 = vmatmul.f32.vlgmr.msrb.gmra.mxu1 %v8326_v19  ;;  %v8621_v47 = vand.u32 4294901760, %v1979_v9  ;;  %v2052_v26 = vsub.f32 %v8598_v50, %v8614_v11  ;;  %v465_v58 = vmul.f32 %v7740_v39, %v368_v7  ;;  %v216_v52 = vld [vmem:[%s7710_s24 + $0xc8] sm:$0xff]  ;;  %2187 = vmatpush.xpose.msrb.mxu0 %v8539_v51 }
 0x113   : > { %2253 = vmatpush.xpose.msrb.mxu1 %v8421_v24 }
 0x114   : > { %1799 = vmatmul.f32.gmra.mxu3 %v8350_v31  ;;  %3452 = vst.msk [vmem:[#allocation2] sm:$0xff] %vm142_vm2, %v3403_v22  ;;  %v8638_v43 = vsub.f32 %v1979_v9, %v8621_v47  ;;  %v363_v31 = vsel %vm287_vm0, %v216_v52, 0.0  ;;  %v8645_v21 = vand.u32 4294901760, %v2052_v26  ;;  %2010 = vmatpush.xpose.msra.mxu2 %v8621_v47  ;;  %v1976_v23 = vsel %vm287_vm0, %v465_v58, 0  ;;  %v488_v52 = vld [vmem:[#allocation2 + $0x8] sm:$0xff]  ;;  %v263_v58 = vld [vmem:[%s7710_s24 + $0x240] sm:$0xff] }
 0x115   : > { %1732 = vmatmul.f32.gmra.mxu2 %v8340_v0  ;;  %v365_v1 = vadd.f32 %v364_v10, %v363_v31  ;;  %v930_v0 = vadd.f32 %v929_v56, %v845_v12  ;;  %v8656_v7 = vand.u32 4294901760, %v1976_v23  ;;  %v215_v12 = vld [vmem:[%s7710_s24 + $0xc0] sm:$0xff]  ;;  %v783_v31 = vadd.f32 %v8317_v2, %v715_v29 }
 0x116   : > { %v8654_v9 = vand.u32 4294901760, %v8638_v43  ;;  %v933_v26 = vpop.f32.mrf.mxu0  ;;  %2113 = vmatpush.xpose.msra.mxu3 %v8645_v21  ;;  %v360_v2 = vsel %vm287_vm0, %v215_v12, 0.0  ;;  %v361_v29 = vsel %vm287_vm0, %v263_v58, 0.0  ;;  %2190 = vmatpush.xpose.msrb.mxu0 %v8598_v50  ;;  %v719_v12 = vadd.f32 %v8357_v41, %v8307_v20 }
 0x117   : > { %v8651_v22 = vpop.f32.mrf.mxu3  ;;  %v986_v62 = vpop.f32.mrf.mxu1  ;;  %v464_v56 = vmul.f32 %v7740_v39, %v365_v1  ;;  %2255 = vmatpush.xpose.msrb.mxu1 %v8502_v42  ;;  %v8673_v30 = vsub.f32 %v1976_v23, %v8656_v7  ;;  %v362_v58 = vadd.f32 %v361_v29, %v360_v2  ;;  %v489_v29 = vld [vmem:[#allocation2 + $0x10] sm:$0xff] }
 0x118   : > { %v987_v10 = vadd.f32 %v986_v62, %v930_v0  ;;  %v8668_v46 = vpop.f32.mrf.mxu2  ;;  %v2044_v51 = vsub.f32 %v8638_v43, %v8654_v9  ;;  %2012 = vmatpush.xpose.msra.mxu2 %v8656_v7 }
 0x119   : > { %v1973_v1 = vsel %vm287_vm0, %v464_v56, 0  ;;  %1560 = vmatmul.f32.gmra.mxu0 %v8343_v32  ;;  %v8689_v62 = vand.u32 4294901760, %v8673_v30  ;;  %v851_v32 = vadd.f32 %v8304_v14, %v783_v31 }
 0x11a   : > { %v3404_v0 = vadd.f32 %v987_v10, %v488_v52  ;;  %1665 = vmatmul.f32.gmra.mxu1 %v8330_v33  ;;  %v8686_v23 = vand.u32 4294901760, %v2044_v51  ;;  %v8691_v56 = vand.u32 4294901760, %v1973_v1  ;;  %2193 = vmatpush.xpose.msrb.mxu0 %v8638_v43  ;;  %v788_v10 = vadd.f32 %v8360_v63, %v719_v12 }
 0x11b   : > { %v3503_v52 = vld [vmem:[#allocation2] sm:$0xff]  ;;  %2257 = vmatpush.xpose.msrb.mxu1 %v8521_v55  ;;  %v2036_v20 = vsub.f32 %v8673_v30, %v8689_v62  ;;  %v934_v14 = vadd.f32 %v933_v26, %v851_v32 }
 0x11c   : > { %1805 = vmatmul.f32.gmra.mxu3 %v8323_v15  ;;  %3453 = vst.msk [vmem:[#allocation2 + $0x8] sm:$0xff] %vm142_vm2, %v3404_v0  ;;  %v3551_v51 = vmul.f32 %v3503_v52, %v3503_v52  ;;  %2014 = vmatpush.xpose.msra.mxu2 %v8691_v56  ;;  %v8707_v16 = vsub.f32 %v1973_v1, %v8691_v56 }
 0x11d   : > { %1737 = vmatmul.f32.gmra.mxu2 %v8313_v40  ;;  %2119 = vmatpush.xpose.msra.mxu3 %v8686_v23  ;;  %v463_v15 = vmul.f32 %v7740_v39, %v362_v58  ;;  %v8714_v31 = vand.u32 4294901760, %v2036_v20  ;;  %v857_v20 = vadd.f32 %v8346_v45, %v788_v10 }
 0x11e   : > { %v3599_v40 = vsel %vm142_vm2, %v3551_v51, 0.0  ;;  %v937_v2 = vpop.f32.mrf.mxu0  ;;  %v8718_v1 = vand.u32 4294901760, %v8707_v16  ;;  %2196 = vmatpush.xpose.msrb.mxu0 %v8673_v30 }
 0x11f   : > { %v8711_v41 = vpop.f32.mrf.mxu3  ;;  %v990_v0 = vpop.f32.mrf.mxu1  ;;  %3600 = vadd.xlane.f32.xlu0 %v3599_v40  ;;  %v1970_v52 = vsel %vm287_vm0, %v463_v15, 0  ;;  %2259 = vmatpush.xpose.msrb.mxu1 %v8586_v13  ;;  %v723_v40 = vadd.f32 %v8394_v44, %v8355_v28  ;;  %v490_v28 = vld [vmem:[#allocation2 + $0x18] sm:$0xff] }
 0x120   : > { %v991_v26 = vadd.f32 %v990_v0, %v934_v14  ;;  %v8722_v58 = vpop.f32.mrf.mxu2  ;;  %v8725_v32 = vand.u32 4294901760, %v1970_v52  ;;  %v2028_v63 = vsub.f32 %v8707_v16, %v8718_v1 }
 0x121   : > { %2125 = vmatpush.xpose.msra.mxu3 %v8714_v31  ;;  %1568 = vmatmul.f32.gmra.mxu0 %v8300_v25 }
 0x122   : > { %v3405_v12 = vadd.f32 %v991_v26, %v489_v29  ;;  %1669 = vmatmul.f32.gmra.mxu1 %v8302_v53  ;;  %v8733_v51 = vsub.f32 %v1970_v52, %v8725_v32  ;;  %v8737_v14 = vand.u32 4294901760, %v2028_v63  ;;  %2016 = vmatpush.xpose.msra.mxu2 %v8725_v32  ;;  %v793_v52 = vadd.f32 %v8400_v36, %v723_v40 }
 0x123   : > { %v3504_v15 = vld [vmem:[#allocation2 + $0x8] sm:$0xff]  ;;  %2261 = vmatpush.xpose.msrb.mxu1 %v8621_v47  ;;  %2199 = vmatpush.xpose.msrb.mxu0 %v8707_v16  ;;  %v727_v36 = vadd.f32 %v8433_v59, %v8392_v48 }
 0x124   : > { %1811 = vmatmul.f32.gmra.mxu3 %v8282_v61  ;;  %3454 = vst.msk [vmem:[#allocation2 + $0x10] sm:$0xff] %vm142_vm2, %v3405_v12  ;;  %v3552_v25 = vmul.f32 %v3504_v15, %v3504_v15  ;;  %v8745_v29 = vand.u32 4294901760, %v8733_v51  ;;  %v938_v61 = vadd.f32 %v937_v2, %v857_v20  ;;  %v863_v15 = vadd.f32 %v8384_v6, %v793_v52  ;;  %v491_v6 = vld [vmem:[#allocation2 + $0x20] sm:$0xff]  ;;  %v12572_v52 = vld [vmem:[#allocation23_spill] sm:$0xff] }
 0x125   : > { %1742 = vmatmul.f32.gmra.mxu2 %v8272_v49  ;;  %2131 = vmatpush.xpose.msra.mxu3 %v8737_v14 }
 0x126   : > { %2328 = vmatpush.xpose.msrb.mxu2 %v8466_v57  ;;  %v3602_v10 = vsel %vm142_vm2, %v3552_v25, 0.0  ;;  %v2020_v44 = vsub.f32 %v8733_v51, %v8745_v29  ;;  %v941_v49 = vpop.f32.mrf.mxu0 }
 0x127   : > { %v8750_v45 = vpop.f32.mrf.mxu3  ;;  %v994_v0 = vpop.f32.mrf.mxu1  ;;  %3603 = vadd.xlane.f32.xlu0 %v3602_v10  ;;  %2263 = vmatpush.xpose.msrb.mxu1 %v8656_v7 }
 0x128   : > { %v995_v26 = vadd.f32 %v994_v0, %v938_v61  ;;  %v8757_v63 = vpop.f32.mrf.mxu2  ;;  %v8759_v12 = vand.u32 4294901760, %v2020_v44  ;;  %2202 = vmatpush.xpose.msrb.mxu0 %v8733_v51  ;;  %v12571_v0 = vld [vmem:[#allocation18_spill] sm:$0xff] }
 0x129   : > { %1576 = vmatmul.f32.gmra.mxu0 %v8258_v37 }
 0x12a   : > { %2332 = vmatpush.xpose.msrb.mxu2 %v8529_v3  ;;  %v3406_v2 = vadd.f32 %v995_v26, %v490_v28  ;;  %1673 = vmatmul.f32.gmra.mxu1 %v8260_v27  ;;  %v12573_v26 = vld [vmem:[#allocation17_spill] sm:$0xff] }
 0x12b   : > { %v3505_v20 = vld [vmem:[#allocation2 + $0x10] sm:$0xff]  ;;  %2137 = vmatpush.xpose.msra.mxu3 %v8759_v12  ;;  %2265 = vmatpush.xpose.msrb.mxu1 %v8691_v56 }
 0x12c   : > { %1817 = vmatmul.f32.gmra.mxu3 %v8248_v35  ;;  %3455 = vst.msk [vmem:[#allocation2 + $0x18] sm:$0xff] %vm142_vm2, %v3406_v2  ;;  %v3553_v40 = vmul.f32 %v3505_v20, %v3505_v20  ;;  %v942_v35 = vadd.f32 %v941_v49, %v863_v15  ;;  %v12570_v49 = vld [vmem:[#allocation16_spill] sm:$0xff]  ;;  %v12574_v20 = vld [vmem:[#allocation15_spill] sm:$0xff] }
 0x12d   : > { %1747 = vmatmul.f32.gmra.mxu2 %v8238_v17  ;;  %v798_v17 = vadd.f32 %v8438_v54, %v727_v36  ;;  %v731_v54 = vadd.f32 %v12572_v52, %v12571_v0  ;;  %v12578_v0 = vld [vmem:[#allocation12_spill] sm:$0xff] }
 0x12e   : > { %2336 = vmatpush.xpose.msrb.mxu2 %v8554_v8  ;;  %v3605_v25 = vsel %vm142_vm2, %v3553_v40, 0.0  ;;  %v945_v48 = vpop.f32.mrf.mxu0 }
 0x12f   : > { %2399 = vmatpush.xpose.msrb.mxu3 %v8421_v24  ;;  %v8775_v37 = vpop.f32.mrf.mxu3  ;;  %v998_v59 = vpop.f32.mrf.mxu1  ;;  %3606 = vadd.xlane.f32.xlu1 %v3605_v25  ;;  %v869_v2 = vadd.f32 %v12573_v26, %v798_v17  ;;  %v492_v25 = vld [vmem:[#allocation2 + $0x28] sm:$0xff]  ;;  %v12579_v26 = vld [vmem:[#allocation22_spill] sm:$0xff] }
 0x130   : > { %v999_v61 = vadd.f32 %v998_v59, %v942_v35  ;;  %v8780_v10 = vpop.f32.mrf.mxu2  ;;  %2267 = vmatpush.xpose.msrb.mxu1 %v8725_v32  ;;  %v12575_v59 = vld [vmem:[#allocation24_spill] sm:$0xff] }
 0x131   : > { %1584 = vmatmul.f32.gmra.mxu0 %v8224_v4  ;;  %v946_v4 = vadd.f32 %v945_v48, %v869_v2  ;;  %v803_v17 = vadd.f32 %v12575_v59, %v731_v54  ;;  %v12577_v48 = vld [vmem:[#allocation14_spill] sm:$0xff]  ;;  %v12580_v2 = vld [vmem:[#allocation28_spill] sm:$0xff] }
 0x132   : > { %2340 = vmatpush.xpose.msrb.mxu2 %v8614_v11  ;;  %v3407_v44 = vadd.f32 %v999_v61, %v491_v6  ;;  %1677 = vmatmul.f32.gmra.mxu1 %v8226_v5 }
 0x133   : > { %2401 = vmatpush.xpose.msrb.mxu3 %v8502_v42  ;;  %v3506_v28 = vld [vmem:[#allocation2 + $0x18] sm:$0xff] }
 0x134   : > { %1823 = vmatmul.f32.gmra.mxu3 %v12570_v49  ;;  %3456 = vst.msk [vmem:[#allocation2 + $0x20] sm:$0xff] %vm142_vm2, %v3407_v44  ;;  %v3554_v36 = vmul.f32 %v3506_v28, %v3506_v28  ;;  %v12576_v28 = vld [vmem:[#allocation13_spill] sm:$0xff] }
 0x135   : > { %1752 = vmatmul.f32.gmra.mxu2 %v12574_v20  ;;  %v735_v20 = vadd.f32 %v12580_v2, %v12579_v26  ;;  %v12583_v2 = vld [vmem:[#allocation9_spill] sm:$0xff] }
 0x136   : > { %2344 = vmatpush.xpose.msrb.mxu2 %v8654_v9  ;;  %v3608_v40 = vsel %vm142_vm2, %v3554_v36, 0.0  ;;  %v949_v35 = vpop.f32.mrf.mxu0  ;;  %v12581_v36 = vld [vmem:[#allocation21_spill] sm:$0xff] }
 0x137   : > { %2403 = vmatpush.xpose.msrb.mxu3 %v8521_v55  ;;  %v8795_v15 = vpop.f32.mrf.mxu3  ;;  %v1002_v6 = vpop.f32.mrf.mxu1  ;;  %3609 = vadd.xlane.f32.xlu1 %v3608_v40  ;;  %v875_v54 = vadd.f32 %v12581_v36, %v803_v17  ;;  %v808_v17 = vadd.f32 %v8544_v38, %v735_v20  ;;  %v12585_v36 = vld [vmem:[#allocation8_spill] sm:$0xff]  ;;  %v12587_v38 = vld [vmem:[#allocation7_spill] sm:$0xff] }
 0x138   : > { %v1003_v61 = vadd.f32 %v1002_v6, %v946_v4  ;;  %v8799_v44 = vpop.f32.mrf.mxu2  ;;  %v12582_v4 = vld [vmem:[#allocation11_spill] sm:$0xff] }
 0x139   : > { %1592 = vmatmul.f32.gmra.mxu0 %v12576_v28  ;;  %v493_v28 = vld [vmem:[#allocation2 + $0x30] sm:$0xff] }
 0x13a   : > { %2348 = vmatpush.xpose.msrb.mxu2 %v8689_v62  ;;  %v3408_v49 = vadd.f32 %v1003_v61, %v492_v25  ;;  %1681 = vmatmul.f32.gmra.mxu1 %v12577_v48  ;;  %v950_v25 = vadd.f32 %v949_v35, %v875_v54  ;;  %v12584_v35 = vld [vmem:[#allocation10_spill] sm:$0xff] }
 0x13b   : > { %2405 = vmatpush.xpose.msrb.mxu3 %v8586_v13  ;;  %v3507_v52 = vld [vmem:[#allocation2 + $0x20] sm:$0xff] }
 0x13c   : > { %1829 = vmatmul.f32.gmra.mxu3 %v12578_v0  ;;  %3457 = vst.msk [vmem:[#allocation2 + $0x28] sm:$0xff] %vm142_vm2, %v3408_v49  ;;  %v3555_v40 = vmul.f32 %v3507_v52, %v3507_v52 }
 0x13d   : > { %1757 = vmatmul.f32.gmra.mxu2 %v12582_v4  ;;  %v12586_v4 = vld [vmem:[#allocation27_spill] sm:$0xff] }
 0x13e   : > { %2352 = vmatpush.xpose.msrb.mxu2 %v8718_v1  ;;  %v3611_v59 = vsel %vm142_vm2, %v3555_v40, 0.0  ;;  %v953_v61 = vpop.f32.mrf.mxu0  ;;  %v881_v40 = vadd.f32 %v12586_v4, %v808_v17 }
 0x13f   : > { %2407 = vmatpush.xpose.msrb.mxu3 %v8621_v47  ;;  %v8813_v6 = vpop.f32.mrf.mxu3  ;;  %v1006_v0 = vpop.f32.mrf.mxu1  ;;  %3612 = vadd.xlane.f32.xlu2 %v3611_v59 }
 0x140   : > { %v1007_v26 = vadd.f32 %v1006_v0, %v950_v25  ;;  %v8817_v49 = vpop.f32.mrf.mxu2  ;;  %v954_v25 = vadd.f32 %v953_v61, %v881_v40  ;;  %v494_v0 = vld [vmem:[#allocation2 + $0x38] sm:$0xff] }
 0x141   : > { %1600 = vmatmul.f32.gmra.mxu0 %v12583_v2 }
 0x142   : > { %2356 = vmatpush.xpose.msrb.mxu2 %v8745_v29  ;;  %v3409_v52 = vadd.f32 %v1007_v26, %v493_v28  ;;  %1685 = vmatmul.f32.gmra.mxu1 %v12584_v35 }
 0x143   : > { %2409 = vmatpush.xpose.msrb.mxu3 %v8656_v7  ;;  %v3508_v54 = vld [vmem:[#allocation2 + $0x28] sm:$0xff] }
 0x144   : > { %1835 = vmatmul.f32.gmra.mxu3 %v12585_v36  ;;  %3458 = vst.msk [vmem:[#allocation2 + $0x30] sm:$0xff] %vm142_vm2, %v3409_v52  ;;  %v3556_v20 = vmul.f32 %v3508_v54, %v3508_v54  ;;  %v12588_v52 = vld [vmem:[#allocation6_spill] sm:$0xff]  ;;  %v1185_v54 = vadd.f32 %v8589_v34, %v8606_v60 }
 0x145   : > { %1762 = vmatmul.f32.gmra.mxu2 %v12587_v38  ;;  %v495_v34 = vld [vmem:[#allocation2 + $0x40] sm:$0xff] }
 0x146   : > { %v3614_v28 = vsel %vm142_vm2, %v3556_v20, 0.0  ;;  %v1250_v2 = vpop.f32.mrf.mxu0 }
 0x147   : > { %2411 = vmatpush.xpose.msrb.mxu3 %v8691_v56  ;;  %v8828_v59 = vpop.f32.mrf.mxu3  ;;  %v1010_v26 = vpop.f32.mrf.mxu1  ;;  %3615 = vadd.xlane.f32.xlu2 %v3614_v28  ;;  %v1251_v40 = vadd.f32 %v1250_v2, %v1185_v54 }
 0x148   : > { %v1011_v36 = vadd.f32 %v1010_v26, %v954_v25  ;;  %v8831_v57 = vpop.f32.mrf.mxu2 }
 0x149   : > { %1880 = vmatmul.f32.vlgmr.msra.gmra.mxu0 %v8326_v19 }
 0x14a   : > { %v3410_v17 = vadd.f32 %v1011_v36, %v494_v0  ;;  %1689 = vmatmul.f32.gmra.mxu1 %v12588_v52 }
 0x14b   : > { %2413 = vmatpush.xpose.msrb.mxu3 %v8725_v32  ;;  %v3509_v61 = vld [vmem:[#allocation2 + $0x30] sm:$0xff] }
 0x14c   : > { %2139 = vmatmul.f32.vlgmr.msra.gmra.mxu3 %v8725_v32  ;;  %3459 = vst.msk [vmem:[#allocation2 + $0x38] sm:$0xff] %vm142_vm2, %v3410_v17  ;;  %v3557_v4 = vmul.f32 %v3509_v61, %v3509_v61 }
 0x14d   : > { %2022 = vmatmul.f32.vlgmr.msra.gmra.mxu2 %v8759_v12  ;;  %v1189_v12 = vadd.f32 %v8651_v22, %v8668_v46  ;;  %v496_v46 = vld [vmem:[#allocation2 + $0x48] sm:$0xff]  ;;  %v1193_v22 = vadd.f32 %v8711_v41, %v8722_v58  ;;  %v497_v58 = vld [vmem:[#allocation2 + $0x50] sm:$0xff] }
 0x14e   : > { %v3617_v20 = vsel %vm142_vm2, %v3557_v4, 0.0  ;;  %v1255_v25 = vpop.f32.mrf.mxu0 }
 0x14f   : > { %v1460_v38 = vpop.f32.mrf.mxu3  ;;  %v1316_v28 = vpop.f32.mrf.mxu1  ;;  %3618 = vadd.xlane.f32.xlu0 %v3617_v20  ;;  %v1256_v61 = vadd.f32 %v1255_v25, %v1189_v12 }
 0x150   : > { %v1317_v0 = vadd.f32 %v1316_v28, %v1251_v40  ;;  %v1403_v26 = vpop.f32.mrf.mxu2 }
 0x151   : > { %1884 = vmatmul.f32.gmra.mxu0 %v8330_v33 }
 0x152   : > { %v1404_v36 = vadd.f32 %v1403_v26, %v1317_v0  ;;  %1937 = vmatmul.f32.vlgmr.msra.gmra.mxu1 %v8326_v19 }
 0x153   : > { %v3510_v60 = vld [vmem:[#allocation2 + $0x38] sm:$0xff] }
 0x154   : > { %2143 = vmatmul.f32.gmra.mxu3 %v8691_v56  ;;  %v1461_v2 = vadd.f32 %v1460_v38, %v1404_v36  ;;  %v3558_v17 = vmul.f32 %v3510_v60, %v3510_v60 }
 0x155   : > { %2030 = vmatmul.f32.gmra.mxu2 %v8737_v14 }
 0x156   : > { %v3411_v54 = vadd.f32 %v1461_v2, %v495_v34  ;;  %v3620_v40 = vsel %vm142_vm2, %v3558_v17, 0.0  ;;  %v1260_v20 = vpop.f32.mrf.mxu0 }
 0x157   : > { %v1464_v4 = vpop.f32.mrf.mxu3  ;;  %v1322_v28 = vpop.f32.mrf.mxu1  ;;  %3621 = vadd.xlane.f32.xlu1 %v3620_v40  ;;  %v1261_v38 = vadd.f32 %v1260_v20, %v1193_v22 }
 0x158   : > { %3460 = vst.msk [vmem:[#allocation2 + $0x40] sm:$0xff] %vm142_vm2, %v3411_v54  ;;  %v1323_v19 = vadd.f32 %v1322_v28, %v1256_v61  ;;  %v1407_v0 = vpop.f32.mrf.mxu2 }
 0x159   : > { %1888 = vmatmul.f32.gmra.mxu0 %v8302_v53 }
 0x15a   : > { %v1408_v26 = vadd.f32 %v1407_v0, %v1323_v19  ;;  %1941 = vmatmul.f32.gmra.mxu1 %v8330_v33 }
 0x15c   : > { %2147 = vmatmul.f32.gmra.mxu3 %v8656_v7  ;;  %v1465_v14 = vadd.f32 %v1464_v4, %v1408_v26 }
 0x15d   : > { %2038 = vmatmul.f32.gmra.mxu2 %v8714_v31  ;;  %v1197_v31 = vadd.f32 %v8750_v45, %v8757_v63  ;;  %v498_v63 = vld [vmem:[#allocation2 + $0x58] sm:$0xff] }
 0x15e   : > { %v3412_v25 = vadd.f32 %v1465_v14, %v496_v46  ;;  %v1265_v34 = vpop.f32.mrf.mxu0 }
 0x15f   : > { %v1468_v36 = vpop.f32.mrf.mxu3  ;;  %v1328_v60 = vpop.f32.mrf.mxu1  ;;  %v3511_v12 = vld [vmem:[#allocation2 + $0x40] sm:$0xff]  ;;  %v1266_v4 = vadd.f32 %v1265_v34, %v1197_v31 }
 0x160   : > { %3461 = vst.msk [vmem:[#allocation2 + $0x48] sm:$0xff] %vm142_vm2, %v3412_v25  ;;  %v1329_v2 = vadd.f32 %v1328_v60, %v1261_v38  ;;  %v1411_v17 = vpop.f32.mrf.mxu2  ;;  %v3559_v33 = vmul.f32 %v3511_v12, %v3511_v12  ;;  %v499_v31 = vld [vmem:[#allocation2 + $0x60] sm:$0xff] }
 0x161   : > { %1892 = vmatmul.f32.gmra.mxu0 %v8260_v27 }
 0x162   : > { %v1412_v61 = vadd.f32 %v1411_v17, %v1329_v2  ;;  %1945 = vmatmul.f32.gmra.mxu1 %v8302_v53  ;;  %v3623_v41 = vsel %vm142_vm2, %v3559_v33, 0.0  ;;  %v230_v33 = vld [vmem:[%s7710_s24 + $0x138] sm:$0xff] }
 0x163   : > { %3624 = vadd.xlane.f32.xlu2 %v3623_v41  ;;  %v405_v41 = vsel %vm287_vm0, %v230_v33, 0.0 }
 0x164   : > { %2151 = vmatmul.f32.gmra.mxu3 %v8621_v47  ;;  %v1469_v54 = vadd.f32 %v1468_v36, %v1412_v61  ;;  %v278_v61 = vld [vmem:[%s7710_s24 + $0x2b8] sm:$0xff] }
 0x165   : > { %2046 = vmatmul.f32.gmra.mxu2 %v8686_v23  ;;  %v1201_v23 = vadd.f32 %v8775_v37, %v8780_v10  ;;  %v406_v37 = vsel %vm287_vm0, %v278_v61, 0.0 }
 0x166   : > { %v3413_v40 = vadd.f32 %v1469_v54, %v497_v58  ;;  %v1270_v28 = vpop.f32.mrf.mxu0  ;;  %v407_v58 = vadd.f32 %v406_v37, %v405_v41  ;;  %v1205_v54 = vadd.f32 %v8795_v15, %v8799_v44 }
 0x167   : > { %v1472_v20 = vpop.f32.mrf.mxu3  ;;  %v1334_v19 = vpop.f32.mrf.mxu1  ;;  %v3512_v0 = vld [vmem:[#allocation2 + $0x48] sm:$0xff]  ;;  %v1271_v38 = vadd.f32 %v1270_v28, %v1201_v23 }
 0x168   : > { %3462 = vst.msk [vmem:[#allocation2 + $0x50] sm:$0xff] %vm142_vm2, %v3413_v40  ;;  %v1335_v53 = vadd.f32 %v1334_v19, %v1266_v4  ;;  %v1415_v26 = vpop.f32.mrf.mxu2  ;;  %v3560_v46 = vmul.f32 %v3512_v0, %v3512_v0  ;;  %v478_v40 = vmul.f32 %v7740_v39, %v407_v58  ;;  %v229_v0 = vld [vmem:[%s7710_s24 + $0x130] sm:$0xff]  ;;  %v276_v58 = vld [vmem:[%s7710_s24 + $0x2a8] sm:$0xff] }
 0x169   : > { %1896 = vmatmul.f32.gmra.mxu0 %v8226_v5 }
 0x16a   : > { %v1416_v22 = vadd.f32 %v1415_v26, %v1335_v53  ;;  %1949 = vmatmul.f32.gmra.mxu1 %v8260_v27  ;;  %v3626_v45 = vsel %vm142_vm2, %v3560_v46, 0.0  ;;  %v277_v53 = vld [vmem:[%s7710_s24 + $0x2b0] sm:$0xff] }
 0x16b   : > { %3627 = vadd.xlane.f32.xlu0 %v3626_v45  ;;  %v403_v15 = vsel %vm287_vm0, %v277_v53, 0.0 }
 0x16c   : > { %2155 = vmatmul.f32.gmra.mxu3 %v8586_v13  ;;  %v1473_v14 = vadd.f32 %v1472_v20, %v1416_v22 }
 0x16d   : > { %2054 = vmatmul.f32.gmra.mxu2 %v8645_v21 }
 0x16e   : > { %v3414_v25 = vadd.f32 %v1473_v14, %v498_v63  ;;  %v1275_v34 = vpop.f32.mrf.mxu0  ;;  %v402_v63 = vsel %vm287_vm0, %v229_v0, 0.0 }
 0x16f   : > { %v1476_v36 = vpop.f32.mrf.mxu3  ;;  %v1340_v60 = vpop.f32.mrf.mxu1  ;;  %v3513_v27 = vld [vmem:[#allocation2 + $0x50] sm:$0xff]  ;;  %v1276_v20 = vadd.f32 %v1275_v34, %v1205_v54  ;;  %v500_v34 = vld [vmem:[#allocation2 + $0x68] sm:$0xff] }
 0x170   : > { %3463 = vst.msk [vmem:[#allocation2 + $0x58] sm:$0xff] %vm142_vm2, %v3414_v25  ;;  %v1341_v12 = vadd.f32 %v1340_v60, %v1271_v38  ;;  %v1419_v2 = vpop.f32.mrf.mxu2  ;;  %v3561_v17 = vmul.f32 %v3513_v27, %v3513_v27  ;;  %v404_v38 = vadd.f32 %v403_v15, %v402_v63  ;;  %v1213_v15 = vadd.f32 %v8828_v59, %v8831_v57 }
 0x171   : > { %1900 = vmatmul.f32.gmra.mxu0 %v12577_v48 }
 0x172   : > { %v1420_v10 = vadd.f32 %v1419_v2, %v1341_v12  ;;  %1953 = vmatmul.f32.gmra.mxu1 %v8226_v5  ;;  %v3629_v21 = vsel %vm142_vm2, %v3561_v17, 0.0  ;;  %v2469_v5 = vsel %vm287_vm0, %v478_v40, 0  ;;  %v477_v27 = vmul.f32 %v7740_v39, %v404_v38  ;;  %v12592_v17 = vld [vmem:[#allocation30_spill] sm:$0xff] }
 0x173   : > { %3630 = vadd.xlane.f32.xlu1 %v3629_v21  ;;  %v8888_v45 = vand.u32 4294901760, %v2469_v5  ;;  %v1209_v12 = vadd.f32 %v8813_v6, %v8817_v49  ;;  %v228_v21 = vld [vmem:[%s7710_s24 + $0x128] sm:$0xff]  ;;  %v400_v40 = vsel %vm287_vm0, %v276_v58, 0.0 }
 0x174   : > { %2159 = vmatmul.f32.gmra.mxu3 %v8521_v55  ;;  %v1477_v4 = vadd.f32 %v1476_v36, %v1420_v10  ;;  %v2466_v33 = vsel %vm287_vm0, %v477_v27, 0  ;;  %v227_v27 = vld [vmem:[%s7710_s24 + $0x120] sm:$0xff] }
 0x175   : > { %2062 = vmatmul.f32.gmra.mxu2 %v8584_v18  ;;  %12589 = vst [vmem:[#allocation16_spill] sm:$0xff] %v8888_v45  ;;  %v8894_v14 = vsub.f32 %v2469_v5, %v8888_v45  ;;  %2480 = vmatpush.xpose.msra.mxu0 %v8888_v45  ;;  %v8913_v10 = vand.u32 4294901760, %v2466_v33 }
 0x176   : > { %v3415_v28 = vadd.f32 %v1477_v4, %v499_v31  ;;  %v1280_v26 = vpop.f32.mrf.mxu0  ;;  %2731 = vmatpush.xpose.msra.mxu3 %v8888_v45  ;;  %v399_v4 = vsel %vm287_vm0, %v228_v21, 0.0 }
 0x177   : > { %v1480_v19 = vpop.f32.mrf.mxu3  ;;  %v1346_v46 = vpop.f32.mrf.mxu1  ;;  %v3514_v22 = vld [vmem:[#allocation2 + $0x58] sm:$0xff]  ;;  %12590 = vst [vmem:[#allocation18_spill] sm:$0xff] %v8894_v14  ;;  %v8903_v60 = vand.u32 4294901760, %v8894_v14  ;;  %2659 = vmatpush.xpose.msra.mxu2 %v8894_v14  ;;  %v1281_v61 = vadd.f32 %v1280_v26, %v1209_v12  ;;  %v8925_v5 = vsub.f32 %v2466_v33, %v8913_v10  ;;  %v401_v0 = vadd.f32 %v400_v40, %v399_v4  ;;  %v275_v12 = vld [vmem:[%s7710_s24 + $0x2a0] sm:$0xff] }
 0x178   : > { %3464 = vst.msk [vmem:[#allocation2 + $0x60] sm:$0xff] %vm142_vm2, %v3415_v28  ;;  %v1347_v18 = vadd.f32 %v1346_v46, %v1276_v20  ;;  %v1423_v44 = vpop.f32.mrf.mxu2  ;;  %v3562_v23 = vmul.f32 %v3514_v22, %v3514_v22  ;;  %v501_v46 = vld [vmem:[#allocation2 + $0x70] sm:$0xff]  ;;  %v397_v33 = vsel %vm287_vm0, %v275_v12, 0.0  ;;  %v502_v4 = vld [vmem:[#allocation2 + $0x78] sm:$0xff] }
 0x179   : > { %1904 = vmatmul.f32.gmra.mxu0 %v12584_v35  ;;  %12591 = vst [vmem:[#allocation23_spill] sm:$0xff] %v8903_v60  ;;  %v8933_v22 = vand.u32 4294901760, %v8925_v5  ;;  %v476_v63 = vmul.f32 %v7740_v39, %v401_v0 }
 0x17a   : > { %v1424_v25 = vadd.f32 %v1423_v44, %v1347_v18  ;;  %1957 = vmatmul.f32.gmra.mxu1 %v12577_v48  ;;  %v3632_v36 = vsel %vm142_vm2, %v3562_v23, 0.0  ;;  %v2554_v48 = vsub.f32 %v8894_v14, %v8903_v60  ;;  %12593 = vst [vmem:[#allocation17_spill] sm:$0xff] %v8913_v10  ;;  %2482 = vmatpush.xpose.msra.mxu0 %v8913_v10  ;;  %v12597_v44 = vld [vmem:[#allocation25_spill] sm:$0xff]  ;;  %v284_v14 = vld [vmem:[%s7710_s24 + $0x2e8] sm:$0xff] }
 0x17b   : > { %3633 = vadd.xlane.f32.xlu2 %v3632_v36  ;;  %12595 = vst [vmem:[#allocation24_spill] sm:$0xff] %v8925_v5  ;;  %2733 = vmatpush.xpose.msra.mxu3 %v8913_v10  ;;  %v2463_v23 = vsel %vm287_vm0, %v476_v63, 0 }
 0x17c   : > { %2163 = vmatmul.f32.gmra.mxu3 %v8502_v42  ;;  %v1481_v2 = vadd.f32 %v1480_v19, %v1424_v25  ;;  %v8917_v49 = vand.u32 4294901760, %v2554_v48  ;;  %12596 = vst [vmem:[#allocation13_spill] sm:$0xff] %v8933_v22  ;;  %2662 = vmatpush.xpose.msra.mxu2 %v8925_v5  ;;  %v396_v48 = vsel %vm287_vm0, %v227_v27, 0.0 }
 0x17d   : > { %2070 = vmatmul.f32.gmra.mxu2 %v12592_v17  ;;  %v398_v58 = vadd.f32 %v397_v33, %v396_v48  ;;  %v225_v33 = vld [vmem:[%s7710_s24 + $0x110] sm:$0xff] }
 0x17e   : > { %v3416_v41 = vadd.f32 %v1481_v2, %v500_v34  ;;  %v1285_v31 = vpop.f32.mrf.mxu0  ;;  %12594 = vst [vmem:[#allocation15_spill] sm:$0xff] %v8917_v49  ;;  %2573 = vmatpush.xpose.msra.mxu1 %v8917_v49  ;;  %v8943_v34 = vand.u32 4294901760, %v2463_v23 }
 0x17f   : > { %v1484_v37 = vpop.f32.mrf.mxu3  ;;  %v1352_v54 = vpop.f32.mrf.mxu1  ;;  %v3515_v6 = vld [vmem:[#allocation2 + $0x60] sm:$0xff]  ;;  %v1286_v38 = vadd.f32 %v1285_v31, %v1213_v15  ;;  %v475_v40 = vmul.f32 %v7740_v39, %v398_v58  ;;  %v390_v58 = vsel %vm287_vm0, %v225_v33, 0.0 }
 0x180   : > { %3465 = vst.msk [vmem:[#allocation2 + $0x68] sm:$0xff] %vm142_vm2, %v3416_v41  ;;  %v1353_v20 = vadd.f32 %v1352_v54, %v1281_v61  ;;  %v1427_v28 = vpop.f32.mrf.mxu2  ;;  %v3563_v19 = vmul.f32 %v3515_v6, %v3515_v6  ;;  %v8955_v21 = vsub.f32 %v2463_v23, %v8943_v34  ;;  %2484 = vmatpush.xpose.msra.mxu0 %v8943_v34 }
 0x181   : > { %1908 = vmatmul.f32.gmra.mxu0 %v12588_v52  ;;  %12598 = vst [vmem:[#allocation14_spill] sm:$0xff] %v8943_v34  ;;  %2735 = vmatpush.xpose.msra.mxu3 %v8943_v34 }
 0x182   : > { %v1428_v53 = vadd.f32 %v1427_v28, %v1353_v20  ;;  %1961 = vmatmul.f32.gmra.mxu1 %v12584_v35  ;;  %v3635_v26 = vsel %vm142_vm2, %v3563_v19, 0.0  ;;  %v2546_v35 = vsub.f32 %v8925_v5, %v8933_v22  ;;  %12600 = vst [vmem:[#allocation22_spill] sm:$0xff] %v8955_v21  ;;  %v8964_v6 = vand.u32 4294901760, %v8955_v21  ;;  %2665 = vmatpush.xpose.msra.mxu2 %v8955_v21 }
 0x183   : > { %3636 = vadd.xlane.f32.xlu0 %v3635_v26  ;;  %v226_v26 = vld [vmem:[%s7710_s24 + $0x118] sm:$0xff] }
 0x184   : > { %2167 = vmatmul.f32.gmra.mxu3 %v8421_v24  ;;  %v1485_v18 = vadd.f32 %v1484_v37, %v1428_v53  ;;  %v8949_v59 = vand.u32 4294901760, %v2546_v35  ;;  %12601 = vst [vmem:[#allocation28_spill] sm:$0xff] %v8964_v6 }
 0x185   : > { %2078 = vmatmul.f32.gmra.mxu2 %v12597_v44 }
 0x186   : > { %v3417_v25 = vadd.f32 %v1485_v18, %v501_v46  ;;  %v8947_v17 = vpop.f32.mrf.mxu0  ;;  %12599 = vst [vmem:[#allocation12_spill] sm:$0xff] %v8949_v59  ;;  %2579 = vmatpush.xpose.msra.mxu1 %v8949_v59  ;;  %v274_v46 = vld [vmem:[%s7710_s24 + $0x298] sm:$0xff]  ;;  %v393_v18 = vsel %vm287_vm0, %v226_v26, 0.0  ;;  %v271_v26 = vld [vmem:[%s7710_s24 + $0x280] sm:$0xff] }
 0x187   : > { %v1488_v36 = vpop.f32.mrf.mxu3  ;;  %v1358_v2 = vpop.f32.mrf.mxu1  ;;  %v3516_v57 = vld [vmem:[#allocation2 + $0x68] sm:$0xff]  ;;  %v394_v44 = vsel %vm287_vm0, %v274_v46, 0.0  ;;  %v235_v59 = vld [vmem:[%s7710_s24 + $0x160] sm:$0xff] }
 0x188   : > { %3466 = vst.msk [vmem:[#allocation2 + $0x70] sm:$0xff] %vm142_vm2, %v3417_v25  ;;  %v1359_v61 = vadd.f32 %v1358_v2, %v1286_v38  ;;  %v1431_v41 = vpop.f32.mrf.mxu2  ;;  %v3564_v37 = vmul.f32 %v3516_v57, %v3516_v57  ;;  %v395_v25 = vadd.f32 %v394_v44, %v393_v18  ;;  %v272_v18 = vld [vmem:[%s7710_s24 + $0x288] sm:$0xff] }
 0x189   : > { %2205 = vmatmul.f32.vlgmr.msrb.gmra.mxu0 %v8733_v51  ;;  %v2460_v51 = vsel %vm287_vm0, %v475_v40, 0  ;;  %v388_v44 = vsel %vm287_vm0, %v272_v18, 0.0 }
 0x18a   : > { %v1432_v31 = vadd.f32 %v1431_v41, %v1359_v61  ;;  %1965 = vmatmul.f32.gmra.mxu1 %v12588_v52  ;;  %v3638_v54 = vsel %vm142_vm2, %v3564_v37, 0.0  ;;  %v2538_v52 = vsub.f32 %v8955_v21, %v8964_v6  ;;  %v8977_v53 = vand.u32 4294901760, %v2460_v51  ;;  %v273_v61 = vld [vmem:[%s7710_s24 + $0x290] sm:$0xff] }
 0x18b   : > { %3639 = vadd.xlane.f32.xlu1 %v3638_v54  ;;  %v474_v12 = vmul.f32 %v7740_v39, %v395_v25 }
 0x18c   : > { %2415 = vmatmul.f32.vlgmr.msrb.gmra.mxu3 %v8725_v32  ;;  %v1489_v20 = vadd.f32 %v1488_v36, %v1432_v31  ;;  %v8975_v0 = vand.u32 4294901760, %v2538_v52  ;;  %12603 = vst [vmem:[#allocation11_spill] sm:$0xff] %v8977_v53  ;;  %v8992_v38 = vsub.f32 %v2460_v51, %v8977_v53  ;;  %2486 = vmatpush.xpose.msra.mxu0 %v8977_v53  ;;  %v391_v31 = vsel %vm287_vm0, %v273_v61, 0.0 }
 0x18d   : > { %2358 = vmatmul.f32.vlgmr.msrb.gmra.mxu2 %v8725_v32  ;;  %2737 = vmatpush.xpose.msra.mxu3 %v8977_v53 }
 0x18e   : > { %v3418_v28 = vadd.f32 %v1489_v20, %v502_v4  ;;  %12602 = vst [vmem:[#allocation21_spill] sm:$0xff] %v8975_v0  ;;  %v8981_v63 = vpop.f32.mrf.mxu0  ;;  %2585 = vmatpush.xpose.msra.mxu1 %v8975_v0  ;;  %v9000_v27 = vand.u32 4294901760, %v8992_v38  ;;  %2668 = vmatpush.xpose.msra.mxu2 %v8992_v38  ;;  %v392_v20 = vadd.f32 %v391_v31, %v390_v58 }
 0x18f   : > { %v8973_v19 = vpop.f32.mrf.mxu3  ;;  %v8983_v15 = vpop.f32.mrf.mxu1  ;;  %v3517_v32 = vld [vmem:[#allocation2 + $0x70] sm:$0xff]  ;;  %12604 = vst [vmem:[#allocation9_spill] sm:$0xff] %v8992_v38 }
 0x190   : > { %3467 = vst.msk [vmem:[#allocation2 + $0x78] sm:$0xff] %vm142_vm2, %v3418_v28  ;;  %v8988_v35 = vpop.f32.mrf.mxu2  ;;  %v3565_v23 = vmul.f32 %v3517_v32, %v3517_v32  ;;  %v2530_v2 = vsub.f32 %v8992_v38, %v9000_v27  ;;  %v223_v28 = vld [vmem:[%s7710_s24 + $0x100] sm:$0xff]  ;;  %v473_v46 = vmul.f32 %v7740_v39, %v392_v20  ;;  %v224_v32 = vld [vmem:[%s7710_s24 + $0x108] sm:$0xff] }
 0x191   : > { %2210 = vmatmul.f32.gmra.mxu0 %v8707_v16  ;;  %12605 = vst [vmem:[#allocation10_spill] sm:$0xff] %v9000_v27  ;;  %v2457_v16 = vsel %vm287_vm0, %v474_v12, 0  ;;  %v385_v12 = vsel %vm287_vm0, %v271_v26, 0.0 }
 0x192   : > { %2271 = vmatmul.f32.vlgmr.msrb.gmra.mxu1 %v8745_v29  ;;  %v3641_v36 = vsel %vm142_vm2, %v3565_v23, 0.0  ;;  %v9011_v57 = vand.u32 4294901760, %v2530_v2  ;;  %v9013_v48 = vand.u32 4294901760, %v2457_v16  ;;  %v384_v23 = vsel %vm287_vm0, %v223_v28, 0.0  ;;  %v286_v28 = vld [vmem:[%s7710_s24 + $0x2f8] sm:$0xff] }
 0x193   : > { %3642 = vadd.xlane.f32.xlu2 %v3641_v36  ;;  %v2454_v25 = vsel %vm287_vm0, %v473_v46, 0  ;;  %v386_v33 = vadd.f32 %v385_v12, %v384_v23  ;;  %v285_v12 = vld [vmem:[%s7710_s24 + $0x2f0] sm:$0xff] }
 0x194   : > { %2419 = vmatmul.f32.gmra.mxu3 %v8691_v56  ;;  %12606 = vst [vmem:[#allocation8_spill] sm:$0xff] %v9011_v57  ;;  %2591 = vmatpush.xpose.msra.mxu1 %v9011_v57  ;;  %v9027_v40 = vsub.f32 %v2457_v16, %v9013_v48  ;;  %v9056_v16 = vand.u32 4294901760, %v2454_v25  ;;  %v234_v57 = vld [vmem:[%s7710_s24 + $0x158] sm:$0xff] }
 0x195   : > { %2362 = vmatmul.f32.gmra.mxu2 %v8691_v56  ;;  %2488 = vmatpush.xpose.msra.mxu0 %v9013_v48  ;;  %v471_v20 = vmul.f32 %v7740_v39, %v386_v33 }
 0x196   : > { %v9017_v41 = vpop.f32.mrf.mxu0  ;;  %12607 = vst [vmem:[#allocation27_spill] sm:$0xff] %v9027_v40  ;;  %2739 = vmatpush.xpose.msra.mxu3 %v9013_v48  ;;  %v9035_v51 = vand.u32 4294901760, %v9027_v40  ;;  %2671 = vmatpush.xpose.msra.mxu2 %v9027_v40 }
 0x197   : > { %v9009_v29 = vpop.f32.mrf.mxu3  ;;  %v9019_v37 = vpop.f32.mrf.mxu1  ;;  %v3518_v56 = vld [vmem:[#allocation2 + $0x78] sm:$0xff] }
 0x198   : > { %v9023_v54 = vpop.f32.mrf.mxu2  ;;  %v3566_v4 = vmul.f32 %v3518_v56, %v3518_v56 }
 0x199   : > { %2215 = vmatmul.f32.gmra.mxu0 %v8673_v30  ;;  %v2522_v30 = vsub.f32 %v9027_v40, %v9035_v51 }
 0x19a   : > { %2277 = vmatmul.f32.gmra.mxu1 %v8718_v1  ;;  %v3644_v52 = vsel %vm142_vm2, %v3566_v4, 0.0  ;;  %v387_v1 = vsel %vm287_vm0, %v224_v32, 0.0  ;;  %v9067_v4 = vsub.f32 %v2454_v25, %v9056_v16  ;;  %2490 = vmatpush.xpose.msra.mxu0 %v9056_v16  ;;  %v430_v32 = vsel %vm287_vm0, %v286_v28, 0.0 }
 0x19b   : > { %3645 = vadd.xlane.f32.xlu0 %v3644_v52  ;;  %v389_v36 = vadd.f32 %v388_v44, %v387_v1  ;;  %v238_v52 = vld [vmem:[%s7710_s24 + $0x178] sm:$0xff]  ;;  %2741 = vmatpush.xpose.msra.mxu3 %v9056_v16  ;;  %v2448_v1 = vsel %vm287_vm0, %v471_v20, 0 }
 0x19c   : > { %2423 = vmatmul.f32.gmra.mxu3 %v8656_v7  ;;  %v429_v46 = vsel %vm287_vm0, %v238_v52, 0.0  ;;  %v9080_v18 = vand.u32 4294901760, %v9067_v4  ;;  %2674 = vmatpush.xpose.msra.mxu2 %v9067_v4 }
 0x19d   : > { %2366 = vmatmul.f32.gmra.mxu2 %v8656_v7  ;;  %v9054_v7 = vand.u32 4294901760, %v2522_v30  ;;  %v472_v58 = vmul.f32 %v7740_v39, %v389_v36  ;;  %v431_v44 = vadd.f32 %v430_v32, %v429_v46  ;;  %v237_v36 = vld [vmem:[%s7710_s24 + $0x170] sm:$0xff]  ;;  %v427_v32 = vsel %vm287_vm0, %v285_v12, 0.0  ;;  %v236_v12 = vld [vmem:[%s7710_s24 + $0x168] sm:$0xff] }
 0x19e   : > { %v9058_v61 = vpop.f32.mrf.mxu0  ;;  %v426_v52 = vsel %vm287_vm0, %v237_v36, 0.0 }
 0x19f   : > { %v9052_v2 = vpop.f32.mrf.mxu3  ;;  %v9060_v56 = vpop.f32.mrf.mxu1  ;;  %2597 = vmatpush.xpose.msra.mxu1 %v9054_v7  ;;  %v2451_v26 = vsel %vm287_vm0, %v472_v58, 0  ;;  %v486_v25 = vmul.f32 %v7740_v39, %v431_v44 }
 0x1a0   : > { %v9063_v31 = vpop.f32.mrf.mxu2  ;;  %v9082_v30 = vand.u32 4294901760, %v2451_v26 }
 0x1a1   : > { %2220 = vmatmul.f32.gmra.mxu0 %v8638_v43  ;;  %v2514_v43 = vsub.f32 %v9067_v4, %v9080_v18  ;;  %v2947_v46 = vsel %vm287_vm0, %v486_v25, 0  ;;  %v428_v25 = vadd.f32 %v427_v32, %v426_v52 }
 0x1a2   : > { %2283 = vmatmul.f32.gmra.mxu1 %v8689_v62  ;;  %v9091_v23 = vsub.f32 %v2451_v26, %v9082_v30  ;;  %2492 = vmatpush.xpose.msra.mxu0 %v9082_v30  ;;  %v9094_v62 = vand.u32 4294901760, %v2448_v1  ;;  %v9127_v36 = vand.u32 4294901760, %v2947_v46 }
 0x1a3   : > { %2743 = vmatpush.xpose.msra.mxu3 %v9082_v30  ;;  %v9102_v58 = vand.u32 4294901760, %v2514_v43  ;;  %v485_v52 = vmul.f32 %v7740_v39, %v428_v25  ;;  %v283_v25 = vld [vmem:[%s7710_s24 + $0x2e0] sm:$0xff] }
 0x1a4   : > { %2427 = vmatmul.f32.gmra.mxu3 %v8621_v47  ;;  %v9108_v20 = vsub.f32 %v2448_v1, %v9094_v62  ;;  %2677 = vmatpush.xpose.msra.mxu2 %v9091_v23 }
 0x1a5   : > { %2370 = vmatmul.f32.gmra.mxu2 %v8621_v47  ;;  %v9105_v47 = vand.u32 4294901760, %v9091_v23  ;;  %2603 = vmatpush.xpose.msra.mxu1 %v9102_v58 }
 0x1a6   : > { %v9111_v28 = vpop.f32.mrf.mxu0  ;;  %v9124_v43 = vand.u32 4294901760, %v9108_v20  ;;  %2494 = vmatpush.xpose.msra.mxu0 %v9094_v62 }
 0x1a7   : > { %v9100_v33 = vpop.f32.mrf.mxu3  ;;  %v9113_v26 = vpop.f32.mrf.mxu1  ;;  %v2506_v1 = vsub.f32 %v9091_v23, %v9105_v47  ;;  %2745 = vmatpush.xpose.msra.mxu3 %v9094_v62 }
 0x1a8   : > { %12608 = vst [vmem:[#allocation7_spill] sm:$0xff] %v9100_v33  ;;  %v9118_v44 = vpop.f32.mrf.mxu2  ;;  %v2498_v5 = vsub.f32 %v9108_v20, %v9124_v43  ;;  %2680 = vmatpush.xpose.msra.mxu2 %v9108_v20 }
 0x1a9   : > { %2225 = vmatmul.f32.gmra.mxu0 %v8598_v50  ;;  %v9135_v49 = vand.u32 4294901760, %v2506_v1  ;;  %v423_v50 = vsel %vm287_vm0, %v236_v12, 0.0  ;;  %v421_v12 = vsel %vm287_vm0, %v283_v25, 0.0 }
 0x1aa   : > { %2806 = vmatpush.xpose.msrb.mxu0 %v8903_v60  ;;  %2289 = vmatmul.f32.gmra.mxu1 %v8654_v9  ;;  %v9142_v60 = vsub.f32 %v2947_v46, %v9127_v36  ;;  %v424_v9 = vsel %vm287_vm0, %v284_v14, 0.0  ;;  %v2944_v46 = vsel %vm287_vm0, %v485_v52, 0  ;;  %v420_v14 = vsel %vm287_vm0, %v235_v59, 0.0 }
 0x1ab   : > { %2609 = vmatpush.xpose.msra.mxu1 %v9135_v49  ;;  %v425_v1 = vadd.f32 %v424_v9, %v423_v50  ;;  %v9161_v0 = vand.u32 4294901760, %v2944_v46  ;;  %v422_v9 = vadd.f32 %v421_v12, %v420_v14  ;;  %v12617_v14 = vld [vmem:[#allocation29_spill] sm:$0xff] }
 0x1ac   : > { %2431 = vmatmul.f32.gmra.mxu3 %v8586_v13  ;;  %12609 = vst [vmem:[#allocation6_spill] sm:$0xff] %v9142_v60  ;;  %2958 = vmatpush.xpose.msrb.mxu2 %v9127_v36  ;;  %v9151_v32 = vand.u32 4294901760, %v9142_v60 }
 0x1ad   : > { %2374 = vmatmul.f32.gmra.mxu2 %v8586_v13  ;;  %v9159_v13 = vand.u32 4294901760, %v2498_v5  ;;  %v484_v50 = vmul.f32 %v7740_v39, %v425_v1  ;;  %v282_v1 = vld [vmem:[%s7710_s24 + $0x2d8] sm:$0xff] }
 0x1ae   : > { %12610 = vst [vmem:[#allocation30_spill] sm:$0xff] %v9151_v32  ;;  %2810 = vmatpush.xpose.msrb.mxu0 %v8933_v22  ;;  %v9165_v38 = vpop.f32.mrf.mxu0  ;;  %v3032_v52 = vsub.f32 %v9142_v60, %v9151_v32 }
 0x1af   : > { %v9157_v21 = vpop.f32.mrf.mxu3  ;;  %12612 = vst [vmem:[#allocation31_spill] sm:$0xff] %v9165_v38  ;;  %v9167_v22 = vpop.f32.mrf.mxu1  ;;  %2615 = vmatpush.xpose.msra.mxu1 %v9159_v13  ;;  %v2941_v25 = vsel %vm287_vm0, %v484_v50, 0  ;;  %v483_v38 = vmul.f32 %v7740_v39, %v422_v9  ;;  %v418_v9 = vsel %vm287_vm0, %v282_v1, 0.0 }
 0x1b0   : > { %12611 = vst [vmem:[#allocation25_spill] sm:$0xff] %v9157_v21  ;;  %v9172_v5 = vpop.f32.mrf.mxu2  ;;  %v9176_v21 = vsub.f32 %v2944_v46, %v9161_v0  ;;  %v9178_v59 = vand.u32 4294901760, %v3032_v52  ;;  %2960 = vmatpush.xpose.msrb.mxu2 %v9161_v0  ;;  %v9191_v12 = vand.u32 4294901760, %v2941_v25  ;;  %v417_v52 = vsel %vm287_vm0, %v234_v57, 0.0 }
 0x1b1   : > { %12613 = vst [vmem:[#allocation32_spill] sm:$0xff] %v9167_v22  ;;  %2230 = vmatmul.f32.gmra.mxu0 %v12617_v14  ;;  %v2938_v50 = vsel %vm287_vm0, %v483_v38, 0  ;;  %v419_v57 = vadd.f32 %v418_v9, %v417_v52  ;;  %v233_v38 = vld [vmem:[%s7710_s24 + $0x150] sm:$0xff] }
 0x1b2   : > { %12614 = vst [vmem:[#allocation33_spill] sm:$0xff] %v9172_v5  ;;  %2295 = vmatmul.f32.gmra.mxu1 %v8614_v11  ;;  %v9189_v46 = vand.u32 4294901760, %v9176_v21  ;;  %2814 = vmatpush.xpose.msrb.mxu0 %v8964_v6  ;;  %v9203_v14 = vsub.f32 %v2941_v25, %v9191_v12  ;;  %v281_v6 = vld [vmem:[%s7710_s24 + $0x2d0] sm:$0xff] }
 0x1b3   : > { %12615 = vst [vmem:[#allocation34_spill] sm:$0xff] %v9176_v21  ;;  %2877 = vmatpush.xpose.msrb.mxu1 %v8888_v45  ;;  %3051 = vmatpush.xpose.msrb.mxu3 %v9178_v59  ;;  %v9205_v45 = vand.u32 4294901760, %v2938_v50  ;;  %v482_v25 = vmul.f32 %v7740_v39, %v419_v57 }
 0x1b4   : > { %12616 = vst [vmem:[#allocation35_spill] sm:$0xff] %v9178_v59  ;;  %2435 = vmatmul.f32.gmra.mxu3 %v8521_v55  ;;  %v3024_v11 = vsub.f32 %v9176_v21, %v9189_v46  ;;  %2962 = vmatpush.xpose.msrb.mxu2 %v9191_v12  ;;  %v9216_v59 = vand.u32 4294901760, %v9203_v14 }
 0x1b5   : > { %12618 = vst [vmem:[#allocation29_spill] sm:$0xff] %v9189_v46  ;;  %2378 = vmatmul.f32.gmra.mxu2 %v8521_v55  ;;  %v9219_v5 = vsub.f32 %v2938_v50, %v9205_v45 }
 0x1b6   : > { %12619 = vst [vmem:[#allocation36_spill] sm:$0xff] %v9203_v14  ;;  %v9213_v55 = vand.u32 4294901760, %v3024_v11  ;;  %v9222_v52 = vpop.f32.mrf.mxu0  ;;  %2818 = vmatpush.xpose.msrb.mxu0 %v9000_v27  ;;  %v415_v11 = vsel %vm287_vm0, %v281_v6, 0.0  ;;  %v3016_v50 = vsub.f32 %v9203_v14, %v9216_v59  ;;  %v232_v6 = vld [vmem:[%s7710_s24 + $0x148] sm:$0xff] }
 0x1b7   : > { %2879 = vmatpush.xpose.msrb.mxu1 %v8913_v10  ;;  %v9211_v1 = vpop.f32.mrf.mxu3  ;;  %12622 = vst [vmem:[#allocation39_spill] sm:$0xff] %v9216_v59  ;;  %v9224_v9 = vpop.f32.mrf.mxu1  ;;  %v414_v10 = vsel %vm287_vm0, %v233_v38, 0.0  ;;  %v9235_v57 = vand.u32 4294901760, %v9219_v5  ;;  %v280_v27 = vld [vmem:[%s7710_s24 + $0x2c8] sm:$0xff] }
 0x1b8   : > { %12620 = vst [vmem:[#allocation37_spill] sm:$0xff] %v9211_v1  ;;  %v9229_v1 = vpop.f32.mrf.mxu2  ;;  %3057 = vmatpush.xpose.msrb.mxu3 %v9213_v55  ;;  %2964 = vmatpush.xpose.msrb.mxu2 %v9205_v45  ;;  %v416_v38 = vadd.f32 %v415_v11, %v414_v10 }
 0x1b9   : > { %12621 = vst [vmem:[#allocation38_spill] sm:$0xff] %v9213_v55  ;;  %v9246_v55 = vand.u32 4294901760, %v3016_v50  ;;  %v3008_v40 = vsub.f32 %v9219_v5, %v9235_v57 }
 0x1ba   : > { %12623 = vst [vmem:[#allocation40_spill] sm:$0xff] %v9219_v5  ;;  %2301 = vmatmul.f32.gmra.mxu1 %v8554_v8  ;;  %2822 = vmatpush.xpose.msrb.mxu0 %v9035_v51  ;;  %v412_v8 = vsel %vm287_vm0, %v280_v27, 0.0 }
 0x1bb   : > { %12624 = vst [vmem:[#allocation41_spill] sm:$0xff] %v9222_v52  ;;  %v2935_v52 = vsel %vm287_vm0, %v482_v25, 0  ;;  %2881 = vmatpush.xpose.msrb.mxu1 %v8943_v34  ;;  %v411_v25 = vsel %vm287_vm0, %v232_v6, 0.0  ;;  %v9260_v11 = vand.u32 4294901760, %v3008_v40  ;;  %v231_v34 = vld [vmem:[%s7710_s24 + $0x140] sm:$0xff] }
 0x1bc   : > { %12625 = vst [vmem:[#allocation42_spill] sm:$0xff] %v9224_v9  ;;  %v9240_v9 = vand.u32 4294901760, %v2935_v52  ;;  %2439 = vmatmul.f32.gmra.mxu3 %v8502_v42  ;;  %v413_v50 = vadd.f32 %v412_v8, %v411_v25  ;;  %v408_v40 = vsel %vm287_vm0, %v231_v34, 0.0 }
 0x1bd   : > { %12626 = vst [vmem:[#allocation43_spill] sm:$0xff] %v9229_v1  ;;  %v12628_v1 = vld [vmem:[#allocation26_spill] sm:$0xff]  ;;  %2382 = vmatmul.f32.gmra.mxu2 %v8502_v42  ;;  %3063 = vmatpush.xpose.msrb.mxu3 %v9246_v55 }
 0x1be   : > { %12627 = vst [vmem:[#allocation44_spill] sm:$0xff] %v9235_v57  ;;  %2235 = vmatmul.f32.gmra.mxu0 %v12628_v1  ;;  %v9254_v10 = vsub.f32 %v2935_v52, %v9240_v9  ;;  %v481_v1 = vmul.f32 %v7740_v39, %v416_v38  ;;  %2966 = vmatpush.xpose.msrb.mxu2 %v9240_v9  ;;  %v279_v38 = vld [vmem:[%s7710_s24 + $0x2c0] sm:$0xff]  ;;  %v9277_v8 = vpop.f32.mrf.mxu0 }
 0x1bf   : > { %12629 = vst [vmem:[#allocation26_spill] sm:$0xff] %v9246_v55  ;;  %2883 = vmatpush.xpose.msrb.mxu1 %v8977_v53  ;;  %v9270_v33 = vpop.f32.mrf.mxu3  ;;  %v480_v42 = vmul.f32 %v7740_v39, %v413_v50  ;;  %v409_v25 = vsel %vm287_vm0, %v279_v38, 0.0  ;;  %v9279_v55 = vpop.f32.mrf.mxu1  ;;  %2826 = vmatpush.xpose.msrb.mxu0 %v9080_v18 }
 0x1c0   : > { %12630 = vst [vmem:[#allocation45_spill] sm:$0xff] %v9260_v11  ;;  %v9263_v6 = vand.u32 4294901760, %v9254_v10  ;;  %v2932_v52 = vsel %vm287_vm0, %v481_v1, 0  ;;  %v410_v1 = vadd.f32 %v409_v25, %v408_v40  ;;  %v9284_v22 = vpop.f32.mrf.mxu2  ;;  %v12635_v40 = vld [vmem:[#allocation19_spill] sm:$0xff] }
 0x1c1   : > { %12632 = vst [vmem:[#allocation47_spill] sm:$0xff] %v9270_v33  ;;  %v9272_v27 = vand.u32 4294901760, %v2932_v52  ;;  %3069 = vmatpush.xpose.msrb.mxu3 %v9260_v11  ;;  %v2929_v34 = vsel %vm287_vm0, %v480_v42, 0  ;;  %v1663_v42 = vadd.f32 %v8983_v15, %v8947_v17 }
 0x1c2   : > { %12631 = vst [vmem:[#allocation46_spill] sm:$0xff] %v9263_v6  ;;  %v3000_v53 = vsub.f32 %v9254_v10, %v9263_v6  ;;  %v9295_v33 = vand.u32 4294901760, %v2929_v34  ;;  %2307 = vmatmul.f32.gmra.mxu1 %v8529_v3 }
 0x1c3   : > { %12633 = vst [vmem:[#allocation48_spill] sm:$0xff] %v9277_v8  ;;  %v9288_v50 = vsub.f32 %v2932_v52, %v9272_v27  ;;  %2968 = vmatpush.xpose.msrb.mxu2 %v9272_v27  ;;  %2885 = vmatpush.xpose.msrb.mxu1 %v9013_v48  ;;  %v479_v8 = vmul.f32 %v7740_v39, %v410_v1 }
 0x1c4   : > { %v9291_v38 = vand.u32 4294901760, %v3000_v53  ;;  %2443 = vmatmul.f32.gmra.mxu3 %v8421_v24  ;;  %2830 = vmatpush.xpose.msrb.mxu0 %v9105_v47  ;;  %v9306_v53 = vsub.f32 %v2929_v34, %v9295_v33  ;;  %v1729_v11 = vadd.f32 %v8988_v35, %v1663_v42  ;;  %v1667_v42 = vadd.f32 %v9019_v37, %v8981_v63 }
 0x1c5   : > { %v9301_v25 = vand.u32 4294901760, %v9288_v50  ;;  %v2926_v52 = vsel %vm287_vm0, %v479_v8, 0  ;;  %2386 = vmatmul.f32.gmra.mxu2 %v8421_v24 }
 0x1c6   : > { %12634 = vst [vmem:[#allocation49_spill] sm:$0xff] %v9291_v38  ;;  %2240 = vmatmul.f32.gmra.mxu0 %v12635_v40  ;;  %3075 = vmatpush.xpose.msrb.mxu3 %v9291_v38  ;;  %v9315_v3 = vand.u32 4294901760, %v2926_v52  ;;  %v9318_v1 = vand.u32 4294901760, %v9306_v53  ;;  %v1881_v15 = vpop.f32.mrf.mxu0 }
 0x1c7   : > { %v2992_v39 = vsub.f32 %v9288_v50, %v9301_v25  ;;  %2970 = vmatpush.xpose.msrb.mxu2 %v9295_v33  ;;  %2887 = vmatpush.xpose.msrb.mxu1 %v9056_v16  ;;  %v9322_v8 = vpop.f32.mrf.mxu3  ;;  %v9329_v17 = vpop.f32.mrf.mxu1 }
 0x1c8   : > { %12636 = vst [vmem:[#allocation19_spill] sm:$0xff] %v9322_v8  ;;  %v9327_v24 = vsub.f32 %v2926_v52, %v9315_v3  ;;  %v2984_v40 = vsub.f32 %v9306_v53, %v9318_v1  ;;  %2834 = vmatpush.xpose.msrb.mxu0 %v9124_v43  ;;  %v9335_v38 = vpop.f32.mrf.mxu2  ;;  %v12639_v52 = vld [vmem:[#allocation20_spill] sm:$0xff] }
 0x1c9   : > { %v9324_v34 = vand.u32 4294901760, %v2992_v39  ;;  %12638 = vst [vmem:[#allocation51_spill] sm:$0xff] %v9335_v38 }
 0x1ca   : > { %v9339_v39 = vand.u32 4294901760, %v9327_v24  ;;  %v9341_v8 = vand.u32 4294901760, %v2984_v40  ;;  %2313 = vmatmul.f32.gmra.mxu1 %v12639_v52  ;;  %v1795_v40 = vadd.f32 %v8973_v19, %v1729_v11  ;;  %v1734_v19 = vadd.f32 %v9023_v54, %v1667_v42 }
 0x1cb   : > { %12637 = vst [vmem:[#allocation50_spill] sm:$0xff] %v9324_v34  ;;  %3081 = vmatpush.xpose.msrb.mxu3 %v9324_v34  ;;  %2972 = vmatpush.xpose.msrb.mxu2 %v9315_v3  ;;  %v1671_v54 = vadd.f32 %v9060_v56, %v9017_v41 }
 0x1cc   : > { %2889 = vmatpush.xpose.msrb.mxu1 %v9082_v30  ;;  %v2976_v35 = vsub.f32 %v9327_v24, %v9339_v39  ;;  %2749 = vmatmul.f32.vlgmr.msra.gmra.mxu3 %v9124_v43  ;;  %v1801_v11 = vadd.f32 %v9009_v29, %v1734_v19 }
 0x1cd   : > { %2683 = vmatmul.f32.vlgmr.msra.gmra.mxu2 %v9108_v20  ;;  %v1739_v29 = vadd.f32 %v9063_v31, %v1671_v54  ;;  %v1675_v31 = vadd.f32 %v9113_v26, %v9058_v61  ;;  %v505_v61 = vld [vmem:[#allocation2 + $0x90] sm:$0xff] }
 0x1ce   : > { %2500 = vmatmul.f32.vlgmr.msra.gmra.mxu0 %v9159_v13  ;;  %v9356_v34 = vand.u32 4294901760, %v2976_v35  ;;  %v1882_v13 = vadd.f32 %v1881_v15, %v1795_v40  ;;  %v1885_v43 = vpop.f32.mrf.mxu0 }
 0x1cf   : > { %3137 = vmatpush.xpose.msra.mxu0 %v9142_v60  ;;  %3087 = vmatpush.xpose.msrb.mxu3 %v9341_v8  ;;  %v9360_v52 = vpop.f32.mrf.mxu3  ;;  %v503_v60 = vld [vmem:[#allocation2 + $0x80] sm:$0xff]  ;;  %v1938_v38 = vpop.f32.mrf.mxu1  ;;  %v1807_v42 = vadd.f32 %v9052_v2, %v1739_v29  ;;  %v1744_v2 = vadd.f32 %v9118_v44, %v1675_v31  ;;  %v12640_v44 = vld [vmem:[#allocation32_spill] sm:$0xff] }
 0x1d0   : > { %3284 = vmatpush.xpose.msra.mxu2 %v9151_v32  ;;  %2891 = vmatpush.xpose.msrb.mxu1 %v9094_v62  ;;  %v1939_v63 = vadd.f32 %v1938_v38, %v1882_v13  ;;  %v9364_v37 = vpop.f32.mrf.mxu2  ;;  %v504_v38 = vld [vmem:[#allocation2 + $0x88] sm:$0xff]  ;;  %v1679_v54 = vadd.f32 %v12640_v44, %v9111_v28  ;;  %v506_v28 = vld [vmem:[#allocation2 + $0x98] sm:$0xff] }
 0x1d1   : > { %v510_v32 = vld [vmem:[#allocation2 + $0xb8] sm:$0xff] }
 0x1d2   : > { %v3419_v20 = vadd.f32 %v1939_v63, %v503_v60  ;;  %2617 = vmatmul.f32.vlgmr.msra.gmra.mxu1 %v9094_v62  ;;  %v1886_v60 = vadd.f32 %v1885_v43, %v1801_v11  ;;  %v12641_v11 = vld [vmem:[#allocation7_spill] sm:$0xff] }
 0x1d3   : > { %3140 = vmatpush.xpose.msra.mxu0 %v9176_v21  ;;  %3093 = vmatpush.xpose.msrb.mxu3 %v9356_v34 }
 0x1d4   : > { %3288 = vmatpush.xpose.msra.mxu2 %v9189_v46  ;;  %2755 = vmatmul.f32.gmra.mxu3 %v9105_v47  ;;  %3468 = vst.msk [vmem:[#allocation2 + $0x80] sm:$0xff] %vm142_vm2, %v3419_v20 }
 0x1d5   : > { %2688 = vmatmul.f32.gmra.mxu2 %v9091_v23  ;;  %3209 = vmatpush.xpose.msra.mxu1 %v9127_v36 }
 0x1d6   : > { %2508 = vmatmul.f32.gmra.mxu0 %v9135_v49  ;;  %v1889_v47 = vpop.f32.mrf.mxu0 }
 0x1d7   : > { %3355 = vmatpush.xpose.msra.mxu3 %v9127_v36  ;;  %3143 = vmatpush.xpose.msra.mxu0 %v9203_v14  ;;  %v9381_v49 = vpop.f32.mrf.mxu3  ;;  %v1942_v15 = vpop.f32.mrf.mxu1 }
 0x1d8   : > { %3292 = vmatpush.xpose.msra.mxu2 %v9216_v59  ;;  %v1943_v41 = vadd.f32 %v1942_v15, %v1886_v60  ;;  %v9385_v56 = vpop.f32.mrf.mxu2  ;;  %v1813_v60 = vadd.f32 %v12641_v11, %v1744_v2 }
 0x1d9   : > { %3211 = vmatpush.xpose.msra.mxu1 %v9161_v0 }
 0x1da   : > { %v3420_v23 = vadd.f32 %v1943_v41, %v504_v38  ;;  %2621 = vmatmul.f32.gmra.mxu1 %v9082_v30 }
 0x1db   : > { %3357 = vmatpush.xpose.msra.mxu3 %v9161_v0  ;;  %3146 = vmatpush.xpose.msra.mxu0 %v9219_v5  ;;  %v3519_v35 = vld [vmem:[#allocation2 + $0x80] sm:$0xff] }
 0x1dc   : > { %3296 = vmatpush.xpose.msra.mxu2 %v9235_v57  ;;  %2761 = vmatmul.f32.gmra.mxu3 %v9080_v18  ;;  %3469 = vst.msk [vmem:[#allocation2 + $0x88] sm:$0xff] %vm142_vm2, %v3420_v23  ;;  %v3567_v40 = vmul.f32 %v3519_v35, %v3519_v35  ;;  %v1890_v18 = vadd.f32 %v1889_v47, %v1807_v42  ;;  %v12642_v47 = vld [vmem:[#allocation27_spill] sm:$0xff]  ;;  %v12643_v23 = vld [vmem:[#allocation33_spill] sm:$0xff] }
 0x1dd   : > { %2693 = vmatmul.f32.gmra.mxu2 %v9067_v4  ;;  %3213 = vmatpush.xpose.msra.mxu1 %v9191_v12  ;;  %v1749_v35 = vadd.f32 %v12643_v23, %v1679_v54 }
 0x1de   : > { %2516 = vmatmul.f32.gmra.mxu0 %v9102_v58  ;;  %v3647_v13 = vsel %vm142_vm2, %v3567_v40, 0.0  ;;  %v1893_v43 = vpop.f32.mrf.mxu0 }
 0x1df   : > { %3359 = vmatpush.xpose.msra.mxu3 %v9191_v12  ;;  %3149 = vmatpush.xpose.msra.mxu0 %v9254_v10  ;;  %v9402_v58 = vpop.f32.mrf.mxu3  ;;  %v1946_v26 = vpop.f32.mrf.mxu1 }
 0x1e0   : > { %3300 = vmatpush.xpose.msra.mxu2 %v9263_v6  ;;  %3648 = vadd.xlane.f32.xlu1 %v3647_v13  ;;  %v1947_v4 = vadd.f32 %v1946_v26, %v1890_v18  ;;  %v9407_v19 = vpop.f32.mrf.mxu2  ;;  %v12644_v18 = vld [vmem:[#allocation8_spill] sm:$0xff]  ;;  %v12645_v13 = vld [vmem:[#allocation10_spill] sm:$0xff]  ;;  %v7513_v6 = vld [vmem:[#allocation2 + $0x8] sm:$0xff] }
 0x1e1   : > { %3215 = vmatpush.xpose.msra.mxu1 %v9205_v45  ;;  %v12647_v26 = vld [vmem:[#allocation42_spill] sm:$0xff]  ;;  %v3747_v5 = vsel %vm142_vm2, %v7513_v6, 0 }
 0x1e2   : > { %v3421_v63 = vadd.f32 %v1947_v4, %v505_v61  ;;  %2625 = vmatmul.f32.gmra.mxu1 %v9056_v16  ;;  %v12646_v61 = vld [vmem:[#allocation31_spill] sm:$0xff]  ;;  %v12648_v4 = vld [vmem:[#allocation25_spill] sm:$0xff] }
 0x1e3   : > { %3361 = vmatpush.xpose.msra.mxu3 %v9205_v45  ;;  %3152 = vmatpush.xpose.msra.mxu0 %v9288_v50  ;;  %v3520_v20 = vld [vmem:[#allocation2 + $0x88] sm:$0xff]  ;;  %v1683_v2 = vadd.f32 %v12647_v26, %v12646_v61  ;;  %v12655_v61 = vld [vmem:[#allocation37_spill] sm:$0xff] }
 0x1e4   : > { %3304 = vmatpush.xpose.msra.mxu2 %v9301_v25  ;;  %2767 = vmatmul.f32.gmra.mxu3 %v9035_v51  ;;  %3470 = vst.msk [vmem:[#allocation2 + $0x90] sm:$0xff] %vm142_vm2, %v3421_v63  ;;  %v3568_v38 = vmul.f32 %v3520_v20, %v3520_v20  ;;  %v1894_v51 = vadd.f32 %v1893_v43, %v1813_v60  ;;  %v12649_v20 = vld [vmem:[#allocation9_spill] sm:$0xff] }
 0x1e5   : > { %2698 = vmatmul.f32.gmra.mxu2 %v12642_v47  ;;  %3217 = vmatpush.xpose.msra.mxu1 %v9240_v9  ;;  %v1819_v63 = vadd.f32 %v12648_v4, %v1749_v35 }
 0x1e6   : > { %2524 = vmatmul.f32.gmra.mxu0 %v9054_v7  ;;  %v3650_v15 = vsel %vm142_vm2, %v3568_v38, 0.0  ;;  %v1897_v29 = vpop.f32.mrf.mxu0  ;;  %v507_v38 = vld [vmem:[#allocation2 + $0xa0] sm:$0xff] }
 0x1e7   : > { %3363 = vmatpush.xpose.msra.mxu3 %v9240_v9  ;;  %3155 = vmatpush.xpose.msra.mxu0 %v9306_v53  ;;  %v9424_v7 = vpop.f32.mrf.mxu3  ;;  %v1950_v41 = vpop.f32.mrf.mxu1  ;;  %v1898_v54 = vadd.f32 %v1897_v29, %v1819_v63  ;;  %v12653_v29 = vld [vmem:[#allocation28_spill] sm:$0xff] }
 0x1e8   : > { %3308 = vmatpush.xpose.msra.mxu2 %v9318_v1  ;;  %3651 = vadd.xlane.f32.xlu2 %v3650_v15  ;;  %v1951_v31 = vadd.f32 %v1950_v41, %v1894_v51  ;;  %v9429_v42 = vpop.f32.mrf.mxu2  ;;  %v12650_v15 = vld [vmem:[#allocation43_spill] sm:$0xff] }
 0x1e9   : > { %3219 = vmatpush.xpose.msra.mxu1 %v9272_v27 }
 0x1ea   : > { %v3422_v40 = vadd.f32 %v1951_v31, %v506_v28  ;;  %2629 = vmatmul.f32.gmra.mxu1 %v9013_v48  ;;  %v1754_v28 = vadd.f32 %v12650_v15, %v1683_v2  ;;  %v12651_v31 = vld [vmem:[#allocation21_spill] sm:$0xff]  ;;  %v12656_v2 = vld [vmem:[#allocation22_spill] sm:$0xff] }
 0x1eb   : > { %3365 = vmatpush.xpose.msra.mxu3 %v9272_v27  ;;  %3158 = vmatpush.xpose.msra.mxu0 %v9327_v24  ;;  %v3521_v43 = vld [vmem:[#allocation2 + $0x90] sm:$0xff] }
 0x1ec   : > { %3312 = vmatpush.xpose.msra.mxu2 %v9339_v39  ;;  %2773 = vmatmul.f32.gmra.mxu3 %v12645_v13  ;;  %3471 = vst.msk [vmem:[#allocation2 + $0x98] sm:$0xff] %vm142_vm2, %v3422_v40  ;;  %v3569_v44 = vmul.f32 %v3521_v43, %v3521_v43  ;;  %v12652_v40 = vld [vmem:[#allocation11_spill] sm:$0xff]  ;;  %v12654_v13 = vld [vmem:[#allocation41_spill] sm:$0xff]  ;;  %v1825_v26 = vadd.f32 %v12655_v61, %v1754_v28 }
 0x1ed   : > { %2703 = vmatmul.f32.gmra.mxu2 %v12649_v20  ;;  %3221 = vmatpush.xpose.msra.mxu1 %v9295_v33  ;;  %v1687_v43 = vadd.f32 %v9279_v55, %v12654_v13  ;;  %v12661_v13 = vld [vmem:[#allocation47_spill] sm:$0xff] }
 0x1ee   : > { %2532 = vmatmul.f32.gmra.mxu0 %v12644_v18  ;;  %v3653_v60 = vsel %vm142_vm2, %v3569_v44, 0.0  ;;  %v1901_v47 = vpop.f32.mrf.mxu0 }
 0x1ef   : > { %3367 = vmatpush.xpose.msra.mxu3 %v9295_v33  ;;  %v9444_v11 = vpop.f32.mrf.mxu3  ;;  %v1954_v51 = vpop.f32.mrf.mxu1  ;;  %3654 = vadd.xlane.f32.xlu0 %v3653_v60  ;;  %v1902_v63 = vadd.f32 %v1901_v47, %v1825_v26  ;;  %v508_v60 = vld [vmem:[#allocation2 + $0xa8] sm:$0xff]  ;;  %v12662_v26 = vld [vmem:[#allocation24_spill] sm:$0xff] }
 0x1f0   : > { %v1955_v41 = vadd.f32 %v1954_v51, %v1898_v54  ;;  %v9448_v23 = vpop.f32.mrf.mxu2  ;;  %v1759_v51 = vadd.f32 %v9284_v22, %v1687_v43 }
 0x1f1   : > { %3223 = vmatpush.xpose.msra.mxu1 %v9315_v3 }
 0x1f2   : > { %v3423_v35 = vadd.f32 %v1955_v41, %v507_v38  ;;  %2633 = vmatmul.f32.gmra.mxu1 %v12652_v40  ;;  %v12657_v41 = vld [vmem:[#allocation12_spill] sm:$0xff]  ;;  %v1831_v61 = vadd.f32 %v12661_v13, %v1759_v51 }
 0x1f3   : > { %3369 = vmatpush.xpose.msra.mxu3 %v9315_v3  ;;  %v3522_v18 = vld [vmem:[#allocation2 + $0x98] sm:$0xff]  ;;  %v7508_v13 = vld [vmem:[#allocation2 + $0x30] sm:$0xff] }
 0x1f4   : > { %2779 = vmatmul.f32.gmra.mxu3 %v12653_v29  ;;  %3472 = vst.msk [vmem:[#allocation2 + $0xa0] sm:$0xff] %vm142_vm2, %v3423_v35  ;;  %v3570_v4 = vmul.f32 %v3522_v18, %v3522_v18  ;;  %v12658_v35 = vld [vmem:[#allocation14_spill] sm:$0xff]  ;;  %v12660_v29 = vld [vmem:[#allocation48_spill] sm:$0xff] }
 0x1f5   : > { %2708 = vmatmul.f32.gmra.mxu2 %v12656_v2  ;;  %v1691_v18 = vadd.f32 %v9329_v17, %v12660_v29  ;;  %v12663_v17 = vld [vmem:[#allocation51_spill] sm:$0xff]  ;;  %v12666_v29 = vld [vmem:[#allocation17_spill] sm:$0xff] }
 0x1f6   : > { %2540 = vmatmul.f32.gmra.mxu0 %v12651_v31  ;;  %v3656_v44 = vsel %vm142_vm2, %v3570_v4, 0.0  ;;  %v1905_v54 = vpop.f32.mrf.mxu0  ;;  %v12659_v31 = vld [vmem:[#allocation13_spill] sm:$0xff] }
 0x1f7   : > { %v9459_v20 = vpop.f32.mrf.mxu3  ;;  %v1958_v38 = vpop.f32.mrf.mxu1  ;;  %3657 = vadd.xlane.f32.xlu1 %v3656_v44  ;;  %v1906_v43 = vadd.f32 %v1905_v54, %v1831_v61  ;;  %v12665_v54 = vld [vmem:[#allocation15_spill] sm:$0xff]  ;;  %v3762_v61 = vsel %vm142_vm2, %v7508_v13, 0 }
 0x1f8   : > { %v1959_v15 = vadd.f32 %v1958_v38, %v1902_v63  ;;  %v9463_v55 = vpop.f32.mrf.mxu2  ;;  %v7507_v63 = vld [vmem:[#allocation2 + $0x38] sm:$0xff]  ;;  %v509_v38 = vld [vmem:[#allocation2 + $0xb0] sm:$0xff] }
 0x1f9   : > { %v3765_v44 = vsel %vm142_vm2, %v7507_v63, 0  ;;  %v12668_v63 = vld [vmem:[#allocation19_spill] sm:$0xff] }
 0x1fa   : > { %v3424_v28 = vadd.f32 %v1959_v15, %v508_v60  ;;  %2637 = vmatmul.f32.gmra.mxu1 %v12658_v35 }
 0x1fb   : > { %v3523_v47 = vld [vmem:[#allocation2 + $0xa0] sm:$0xff] }
 0x1fc   : > { %2785 = vmatmul.f32.gmra.mxu3 %v12659_v31  ;;  %3473 = vst.msk [vmem:[#allocation2 + $0xa8] sm:$0xff] %vm142_vm2, %v3424_v28  ;;  %v3571_v22 = vmul.f32 %v3523_v47, %v3523_v47  ;;  %v9480_v28 = vand.u32 4294901760, %v3765_v44 }
 0x1fd   : > { %2713 = vmatmul.f32.gmra.mxu2 %v12662_v26  ;;  %v12667_v26 = vld [vmem:[#allocation23_spill] sm:$0xff] }
 0x1fe   : > { %2548 = vmatmul.f32.gmra.mxu0 %v12657_v41  ;;  %v3659_v4 = vsel %vm142_vm2, %v3571_v22, 0.0  ;;  %v1909_v60 = vpop.f32.mrf.mxu0  ;;  %v1764_v41 = vadd.f32 %v12663_v17, %v1691_v18  ;;  %12664 = vst [vmem:[#allocation20_spill] sm:$0xff] %v9480_v28  ;;  %v12669_v18 = vld [vmem:[#allocation18_spill] sm:$0xff]  ;;  %v9490_v17 = vand.u32 4294901760, %v3762_v61 }
 0x1ff   : > { %v9473_v2 = vpop.f32.mrf.mxu3  ;;  %v1962_v15 = vpop.f32.mrf.mxu1  ;;  %3660 = vadd.xlane.f32.xlu2 %v3659_v4 }
 0x200   : > { %v1963_v51 = vadd.f32 %v1962_v15, %v1906_v43  ;;  %v9478_v31 = vpop.f32.mrf.mxu2  ;;  %v1837_v4 = vadd.f32 %v12668_v63, %v1764_v41  ;;  %v7509_v15 = vld [vmem:[#allocation2 + $0x28] sm:$0xff]  ;;  %12670 = vst [vmem:[#allocation32_spill] sm:$0xff] %v9490_v17 }
 0x202   : > { %v3425_v47 = vadd.f32 %v1963_v51, %v509_v38  ;;  %2641 = vmatmul.f32.gmra.mxu1 %v12666_v29  ;;  %v3759_v38 = vsel %vm142_vm2, %v7509_v15, 0  ;;  %v9493_v51 = vsub.f32 %v3765_v44, %v9480_v28  ;;  %v7510_v15 = vld [vmem:[#allocation2 + $0x20] sm:$0xff]  ;;  %v9504_v44 = vsub.f32 %v3762_v61, %v9490_v17  ;;  %v7511_v61 = vld [vmem:[#allocation2 + $0x18] sm:$0xff] }
 0x203   : > { %v3524_v22 = vld [vmem:[#allocation2 + $0xa8] sm:$0xff]  ;;  %v3756_v46 = vsel %vm142_vm2, %v7510_v15, 0 }
 0x204   : > { %2791 = vmatmul.f32.gmra.mxu3 %v12667_v26  ;;  %3474 = vst.msk [vmem:[#allocation2 + $0xb0] sm:$0xff] %vm142_vm2, %v3425_v47  ;;  %v3572_v43 = vmul.f32 %v3524_v22, %v3524_v22  ;;  %v9500_v22 = vand.u32 4294901760, %v3759_v38 }
 0x205   : > { %2718 = vmatmul.f32.gmra.mxu2 %v12669_v18  ;;  %12671 = vst [vmem:[#allocation7_spill] sm:$0xff] %v9493_v51 }
 0x206   : > { %2556 = vmatmul.f32.gmra.mxu0 %v12665_v54  ;;  %v1910_v54 = vadd.f32 %v1909_v60, %v1837_v4  ;;  %v3662_v26 = vsel %vm142_vm2, %v3572_v43, 0.0  ;;  %v2206_v63 = vpop.f32.mrf.mxu0  ;;  %12672 = vst [vmem:[#allocation27_spill] sm:$0xff] %v9500_v22  ;;  %v12674_v4 = vld [vmem:[#allocation16_spill] sm:$0xff]  ;;  %v9509_v43 = vand.u32 4294901760, %v9493_v51  ;;  %v9522_v15 = vsub.f32 %v3759_v38, %v9500_v22 }
 0x207   : > { %v9495_v13 = vpop.f32.mrf.mxu3  ;;  %v1966_v41 = vpop.f32.mrf.mxu1  ;;  %3663 = vadd.xlane.f32.xlu0 %v3662_v26  ;;  %12673 = vst [vmem:[#allocation33_spill] sm:$0xff] %v9504_v44  ;;  %v2141_v26 = vadd.f32 %v9360_v52, %v9364_v37 }
 0x208   : > { %v1967_v47 = vadd.f32 %v1966_v41, %v1910_v54  ;;  %v9498_v18 = vpop.f32.mrf.mxu2  ;;  %12675 = vst [vmem:[#allocation8_spill] sm:$0xff] %v9509_v43  ;;  %v3753_v41 = vsel %vm142_vm2, %v7511_v61, 0  ;;  %v3850_v37 = vsub.f32 %v9493_v51, %v9509_v43 }
 0x209   : > { %12677 = vst [vmem:[#allocation31_spill] sm:$0xff] %v9522_v15  ;;  %v2207_v59 = vadd.f32 %v2206_v63, %v2141_v26  ;;  %v9533_v57 = vand.u32 4294901760, %v3753_v41  ;;  %v9540_v26 = vand.u32 4294901760, %v9522_v15 }
 0x20a   : > { %v3426_v60 = vadd.f32 %v1967_v47, %v510_v32  ;;  %2645 = vmatmul.f32.gmra.mxu1 %v12674_v4  ;;  %v9519_v47 = vand.u32 4294901760, %v3756_v46 }
 0x20b   : > { %v3525_v54 = vld [vmem:[#allocation2 + $0xb0] sm:$0xff]  ;;  %12679 = vst [vmem:[#allocation25_spill] sm:$0xff] %v9533_v57 }
 0x20c   : > { %3095 = vmatmul.f32.vlgmr.msrb.gmra.mxu3 %v9315_v3  ;;  %3475 = vst.msk [vmem:[#allocation2 + $0xb8] sm:$0xff] %vm142_vm2, %v3426_v60  ;;  %v3573_v32 = vmul.f32 %v3525_v54, %v3525_v54  ;;  %v9536_v63 = vsub.f32 %v3756_v46, %v9519_v47  ;;  %v511_v46 = vld [vmem:[#allocation2 + $0xc0] sm:$0xff] }
 0x20d   : > { %4027 = vmatpush.xpose.msrb.mxu3 %v9480_v28  ;;  %2978 = vmatmul.f32.vlgmr.msrb.gmra.mxu2 %v9356_v34  ;;  %12676 = vst [vmem:[#allocation10_spill] sm:$0xff] %v9519_v47  ;;  %v9529_v34 = vand.u32 4294901760, %v9504_v44 }
 0x20e   : > { %2836 = vmatmul.f32.vlgmr.msrb.gmra.mxu0 %v9094_v62  ;;  %3955 = vmatpush.xpose.msrb.mxu2 %v9493_v51  ;;  %v3665_v52 = vsel %vm142_vm2, %v3573_v32, 0.0  ;;  %v2211_v60 = vpop.f32.mrf.mxu0  ;;  %12680 = vst [vmem:[#allocation9_spill] sm:$0xff] %v9536_v63  ;;  %v7512_v32 = vld [vmem:[#allocation2 + $0x10] sm:$0xff]  ;;  %v9565_v6 = vand.u32 4294901760, %v9536_v63 }
 0x20f   : > { %3776 = vmatpush.xpose.msrb.mxu0 %v9480_v28  ;;  %v2416_v21 = vpop.f32.mrf.mxu3  ;;  %12678 = vst [vmem:[#allocation42_spill] sm:$0xff] %v9529_v34  ;;  %v2272_v54 = vpop.f32.mrf.mxu1  ;;  %3666 = vadd.xlane.f32.xlu1 %v3665_v52  ;;  %v3750_v51 = vsel %vm142_vm2, %v7512_v32, 0  ;;  %v3842_v52 = vsub.f32 %v9504_v44, %v9529_v34  ;;  %v9559_v32 = vsub.f32 %v3753_v41, %v9533_v57 }
 0x210   : > { %v2273_v38 = vadd.f32 %v2272_v54, %v2207_v59  ;;  %v2359_v61 = vpop.f32.mrf.mxu2  ;;  %12681 = vst [vmem:[#allocation43_spill] sm:$0xff] %v9540_v26  ;;  %v9545_v59 = vand.u32 4294901760, %v3850_v37  ;;  %v9556_v37 = vand.u32 4294901760, %v3750_v51 }
 0x211   : > { %4029 = vmatpush.xpose.msrb.mxu3 %v9490_v17  ;;  %12683 = vst [vmem:[#allocation11_spill] sm:$0xff] %v9559_v32 }
 0x212   : > { %3958 = vmatpush.xpose.msrb.mxu2 %v9504_v44  ;;  %v2360_v14 = vadd.f32 %v2359_v61, %v2273_v38  ;;  %2893 = vmatmul.f32.vlgmr.msrb.gmra.mxu1 %v9094_v62  ;;  %12682 = vst [vmem:[#allocation21_spill] sm:$0xff] %v9545_v59  ;;  %v2145_v38 = vadd.f32 %v9381_v49, %v9385_v56  ;;  %v9568_v56 = vand.u32 4294901760, %v3842_v52  ;;  %v9576_v52 = vand.u32 4294901760, %v3747_v5 }
 0x213   : > { %3778 = vmatpush.xpose.msrb.mxu0 %v9490_v17  ;;  %v3526_v54 = vld [vmem:[#allocation2 + $0xb8] sm:$0xff]  ;;  %3869 = vmatpush.xpose.msrb.mxu1 %v9545_v59  ;;  %v3834_v44 = vsub.f32 %v9522_v15, %v9540_v26  ;;  %12684 = vst [vmem:[#allocation28_spill] sm:$0xff] %v9565_v6 }
 0x214   : > { %3099 = vmatmul.f32.gmra.mxu3 %v9295_v33  ;;  %v2417_v61 = vadd.f32 %v2416_v21, %v2360_v14  ;;  %v3574_v62 = vmul.f32 %v3526_v54, %v3526_v54  ;;  %v2212_v49 = vadd.f32 %v2211_v60, %v2145_v38  ;;  %12685 = vst [vmem:[#allocation41_spill] sm:$0xff] %v9568_v56 }
 0x215   : > { %4031 = vmatpush.xpose.msrb.mxu3 %v9500_v22  ;;  %2986 = vmatmul.f32.gmra.mxu2 %v9341_v8 }
 0x216   : > { %2840 = vmatmul.f32.gmra.mxu0 %v9082_v30  ;;  %v3427_v21 = vadd.f32 %v2417_v61, %v511_v46  ;;  %3961 = vmatpush.xpose.msrb.mxu2 %v9522_v15  ;;  %v3668_v54 = vsel %vm142_vm2, %v3574_v62, 0.0  ;;  %v2216_v41 = vpop.f32.mrf.mxu0  ;;  %v7514_v46 = vld [vmem:[#allocation2] sm:$0xff]  ;;  %v9579_v61 = vsub.f32 %v3750_v51, %v9556_v37  ;;  %v2149_v51 = vadd.f32 %v9402_v58, %v9407_v19 }
 0x217   : > { %3780 = vmatpush.xpose.msrb.mxu0 %v9500_v22  ;;  %v2420_v14 = vpop.f32.mrf.mxu3  ;;  %v2278_v59 = vpop.f32.mrf.mxu1  ;;  %3669 = vadd.xlane.f32.xlu2 %v3668_v54  ;;  %v3744_v38 = vsel %vm142_vm2, %v7514_v46, 0  ;;  %v3826_v54 = vsub.f32 %v9536_v63, %v9565_v6  ;;  %v12689_v46 = vld [vmem:[#allocation50_spill] sm:$0xff] }
 0x218   : > { %3476 = vst.msk [vmem:[#allocation2 + $0xc0] sm:$0xff] %vm142_vm2, %v3427_v21  ;;  %3875 = vmatpush.xpose.msrb.mxu1 %v9568_v56  ;;  %v2279_v8 = vadd.f32 %v2278_v59, %v2212_v49  ;;  %v2363_v60 = vpop.f32.mrf.mxu2  ;;  %v9583_v21 = vand.u32 4294901760, %v3834_v44  ;;  %v9588_v59 = vand.u32 4294901760, %v9559_v32  ;;  %v512_v49 = vld [vmem:[#allocation2 + $0xc8] sm:$0xff]  ;;  %v9596_v44 = vand.u32 4294901760, %v3744_v38 }
 0x219   : > { %4033 = vmatpush.xpose.msrb.mxu3 %v9519_v47  ;;  %12686 = vst [vmem:[#allocation37_spill] sm:$0xff] %v9579_v61  ;;  %v2217_v56 = vadd.f32 %v2216_v41, %v2149_v51  ;;  %v9607_v19 = vand.u32 4294901760, %v3826_v54 }
 0x21a   : > { %v2364_v62 = vadd.f32 %v2363_v60, %v2279_v8  ;;  %3964 = vmatpush.xpose.msrb.mxu2 %v9536_v63  ;;  %12687 = vst [vmem:[#allocation22_spill] sm:$0xff] %v9583_v21  ;;  %2897 = vmatmul.f32.gmra.mxu1 %v9082_v30  ;;  %v9599_v60 = vsub.f32 %v3747_v5, %v9576_v52  ;;  %v9604_v30 = vand.u32 4294901760, %v9579_v61 }
 0x21b   : > { %3782 = vmatpush.xpose.msrb.mxu0 %v9519_v47  ;;  %12690 = vst [vmem:[#allocation14_spill] sm:$0xff] %v9607_v19  ;;  %v9615_v51 = vsub.f32 %v3744_v38, %v9596_v44  ;;  %v2153_v38 = vadd.f32 %v9424_v7, %v9429_v42 }
 0x21c   : > { %3103 = vmatmul.f32.gmra.mxu3 %v9272_v27  ;;  %v2421_v8 = vadd.f32 %v2420_v14, %v2364_v62  ;;  %3881 = vmatpush.xpose.msrb.mxu1 %v9583_v21  ;;  %12688 = vst [vmem:[#allocation12_spill] sm:$0xff] %v9599_v60  ;;  %v3818_v14 = vsub.f32 %v9559_v32, %v9588_v59  ;;  %v9619_v54 = vand.u32 4294901760, %v9599_v60 }
 0x21d   : > { %4035 = vmatpush.xpose.msrb.mxu3 %v9533_v57  ;;  %2994 = vmatmul.f32.gmra.mxu2 %v12689_v46 }
 0x21e   : > { %2844 = vmatmul.f32.gmra.mxu0 %v9056_v16  ;;  %v3428_v15 = vadd.f32 %v2421_v8, %v512_v49  ;;  %3967 = vmatpush.xpose.msrb.mxu2 %v9559_v32  ;;  %v2221_v62 = vpop.f32.mrf.mxu0  ;;  %v3802_v7 = vsub.f32 %v9599_v60, %v9619_v54 }
 0x21f   : > { %3784 = vmatpush.xpose.msrb.mxu0 %v9533_v57  ;;  %v2424_v58 = vpop.f32.mrf.mxu3  ;;  %v2284_v5 = vpop.f32.mrf.mxu1  ;;  %v3527_v21 = vld [vmem:[#allocation2 + $0xc0] sm:$0xff] }
 0x220   : > { %3477 = vst.msk [vmem:[#allocation2 + $0xc8] sm:$0xff] %vm142_vm2, %v3428_v15  ;;  %3887 = vmatpush.xpose.msrb.mxu1 %v9607_v19  ;;  %v2285_v46 = vadd.f32 %v2284_v5, %v2217_v56  ;;  %v2367_v41 = vpop.f32.mrf.mxu2  ;;  %v3575_v49 = vmul.f32 %v3527_v21, %v3527_v21  ;;  %v9623_v15 = vand.u32 4294901760, %v3818_v14  ;;  %v3810_v56 = vsub.f32 %v9579_v61, %v9604_v30  ;;  %v513_v21 = vld [vmem:[#allocation2 + $0xd0] sm:$0xff] }
 0x221   : > { %4037 = vmatpush.xpose.msrb.mxu3 %v9556_v37  ;;  %v9636_v14 = vand.u32 4294901760, %v9615_v51 }
 0x222   : > { %v2368_v8 = vadd.f32 %v2367_v41, %v2285_v46  ;;  %3970 = vmatpush.xpose.msrb.mxu2 %v9579_v61  ;;  %12691 = vst [vmem:[#allocation13_spill] sm:$0xff] %v9623_v15  ;;  %v3671_v63 = vsel %vm142_vm2, %v3575_v49, 0.0  ;;  %2901 = vmatmul.f32.gmra.mxu1 %v9056_v16  ;;  %v2222_v46 = vadd.f32 %v2221_v62, %v2153_v38  ;;  %v12692_v49 = vld [vmem:[#allocation49_spill] sm:$0xff]  ;;  %v9639_v19 = vand.u32 4294901760, %v3810_v56 }
 0x223   : > { %3786 = vmatpush.xpose.msrb.mxu0 %v9556_v37  ;;  %3672 = vadd.xlane.f32.xlu0 %v3671_v63  ;;  %v9649_v38 = vand.u32 4294901760, %v3802_v7  ;;  %v9660_v7 = vpop.xlane.xlu0 %3600 }
 0x224   : > { %3107 = vmatmul.f32.gmra.mxu3 %v9240_v9  ;;  %v2425_v5 = vadd.f32 %v2424_v58, %v2368_v8  ;;  %3893 = vmatpush.xpose.msrb.mxu1 %v9623_v15  ;;  %12693 = vst [vmem:[#allocation48_spill] sm:$0xff] %v9639_v19 }
 0x225   : > { %4039 = vmatpush.xpose.msrb.mxu3 %v9576_v52  ;;  %3002 = vmatmul.f32.gmra.mxu2 %v12692_v49  ;;  %v3794_v49 = vsub.f32 %v9615_v51, %v9636_v14  ;;  %12694 = vst [vmem:[#allocation47_spill] sm:$0xff] %v9660_v7 }
 0x226   : > { %2848 = vmatmul.f32.gmra.mxu0 %v9013_v48  ;;  %v3429_v41 = vadd.f32 %v2425_v5, %v513_v21  ;;  %3973 = vmatpush.xpose.msrb.mxu2 %v9599_v60  ;;  %v2226_v42 = vpop.f32.mrf.mxu0 }
 0x227   : > { %3788 = vmatpush.xpose.msrb.mxu0 %v9576_v52  ;;  %v2428_v16 = vpop.f32.mrf.mxu3  ;;  %v2290_v58 = vpop.f32.mrf.mxu1  ;;  %v3528_v8 = vld [vmem:[#allocation2 + $0xc8] sm:$0xff]  ;;  %v9665_v15 = vand.u32 4294901760, %v3794_v49  ;;  %v2161_v49 = vadd.f32 %v9459_v20, %v9463_v55 }
 0x228   : > { %3478 = vst.msk [vmem:[#allocation2 + $0xd0] sm:$0xff] %vm142_vm2, %v3429_v41  ;;  %3899 = vmatpush.xpose.msrb.mxu1 %v9639_v19  ;;  %v2291_v63 = vadd.f32 %v2290_v58, %v2222_v46  ;;  %v2371_v62 = vpop.f32.mrf.mxu2  ;;  %v3576_v21 = vmul.f32 %v3528_v8, %v3528_v8  ;;  %v514_v41 = vld [vmem:[#allocation2 + $0xd8] sm:$0xff]  ;;  %v2157_v46 = vadd.f32 %v9444_v11, %v9448_v23  ;;  %v9662_v8 = vpop.xlane.xlu1 %3606 }
 0x229   : > { %4041 = vmatpush.xpose.msrb.mxu3 %v9596_v44  ;;  %12695 = vst [vmem:[#allocation24_spill] sm:$0xff] %v9662_v8  ;;  %v9667_v23 = vpop.xlane.xlu2 %3612 }
 0x22a   : > { %v2372_v56 = vadd.f32 %v2371_v62, %v2291_v63  ;;  %v3674_v5 = vsel %vm142_vm2, %v3576_v21, 0.0  ;;  %3976 = vmatpush.xpose.msrb.mxu2 %v9615_v51  ;;  %2905 = vmatmul.f32.gmra.mxu1 %v9013_v48  ;;  %v2227_v63 = vadd.f32 %v2226_v42, %v2157_v46  ;;  %v12696_v21 = vld [vmem:[#allocation45_spill] sm:$0xff]  ;;  %12697 = vst [vmem:[#allocation51_spill] sm:$0xff] %v9667_v23 }
 0x22b   : > { %3790 = vmatpush.xpose.msrb.mxu0 %v9596_v44  ;;  %3675 = vadd.xlane.f32.xlu1 %v3674_v5 }
 0x22c   : > { %v2429_v58 = vadd.f32 %v2428_v16, %v2372_v56  ;;  %3111 = vmatmul.f32.gmra.mxu3 %v9205_v45  ;;  %3905 = vmatpush.xpose.msrb.mxu1 %v9649_v38 }
 0x22d   : > { %3010 = vmatmul.f32.gmra.mxu2 %v12696_v21 }
 0x22e   : > { %2852 = vmatmul.f32.gmra.mxu0 %v12652_v40  ;;  %v3430_v62 = vadd.f32 %v2429_v58, %v514_v41  ;;  %v2231_v48 = vpop.f32.mrf.mxu0  ;;  %v515_v41 = vld [vmem:[#allocation2 + $0xe0] sm:$0xff] }
 0x22f   : > { %v2432_v32 = vpop.f32.mrf.mxu3  ;;  %v2296_v61 = vpop.f32.mrf.mxu1  ;;  %v3529_v11 = vld [vmem:[#allocation2 + $0xd0] sm:$0xff]  ;;  %v2232_v58 = vadd.f32 %v2231_v48, %v2161_v49  ;;  %v516_v49 = vld [vmem:[#allocation2 + $0xe8] sm:$0xff] }
 0x230   : > { %3479 = vst.msk [vmem:[#allocation2 + $0xd8] sm:$0xff] %vm142_vm2, %v3430_v62  ;;  %3911 = vmatpush.xpose.msrb.mxu1 %v9665_v15  ;;  %v2297_v16 = vadd.f32 %v2296_v61, %v2227_v63  ;;  %v2375_v56 = vpop.f32.mrf.mxu2  ;;  %v3577_v5 = vmul.f32 %v3529_v11, %v3529_v11  ;;  %v12698_v61 = vld [vmem:[#allocation26_spill] sm:$0xff]  ;;  %v9679_v23 = vpop.xlane.xlu1 %3609 }
 0x231   : > { %12699 = vst [vmem:[#allocation15_spill] sm:$0xff] %v9679_v23 }
 0x232   : > { %v2376_v7 = vadd.f32 %v2375_v56, %v2297_v16  ;;  %v3677_v42 = vsel %vm142_vm2, %v3577_v5, 0.0  ;;  %2909 = vmatmul.f32.gmra.mxu1 %v12652_v40  ;;  %v7515_v56 = vld [vmem:[#allocation2 + $0x78] sm:$0xff] }
 0x233   : > { %3678 = vadd.xlane.f32.xlu2 %v3677_v42  ;;  %v4243_v5 = vsel %vm142_vm2, %v7515_v56, 0  ;;  %v12702_v56 = vld [vmem:[#allocation38_spill] sm:$0xff] }
 0x234   : > { %v2433_v46 = vadd.f32 %v2432_v32, %v2376_v7  ;;  %3115 = vmatmul.f32.gmra.mxu3 %v9191_v12  ;;  %v9682_v32 = vpop.xlane.xlu0 %3603  ;;  %v9684_v7 = vpop.xlane.xlu2 %3615 }
 0x235   : > { %3018 = vmatmul.f32.gmra.mxu2 %v12698_v61  ;;  %12700 = vst [vmem:[#allocation17_spill] sm:$0xff] %v9682_v32 }
 0x236   : > { %2856 = vmatmul.f32.gmra.mxu0 %v12658_v35  ;;  %v3431_v62 = vadd.f32 %v2433_v46, %v515_v41  ;;  %12701 = vst [vmem:[#allocation23_spill] sm:$0xff] %v9684_v7  ;;  %v9688_v41 = vand.u32 4294901760, %v4243_v5  ;;  %v7516_v46 = vld [vmem:[#allocation2 + $0x70] sm:$0xff] }
 0x237   : > { %v2436_v63 = vpop.f32.mrf.mxu3  ;;  %v2302_v11 = vpop.f32.mrf.mxu1  ;;  %v3530_v16 = vld [vmem:[#allocation2 + $0xd8] sm:$0xff] }
 0x238   : > { %3480 = vst.msk [vmem:[#allocation2 + $0xe0] sm:$0xff] %vm142_vm2, %v3431_v62  ;;  %v2303_v40 = vadd.f32 %v2302_v11, %v2232_v58  ;;  %v2379_v20 = vpop.f32.mrf.mxu2  ;;  %v3578_v55 = vmul.f32 %v3530_v16, %v3530_v16  ;;  %v4240_v58 = vsel %vm142_vm2, %v7516_v46, 0  ;;  %v2165_v62 = vadd.f32 %v9473_v2, %v9478_v31  ;;  %v7517_v46 = vld [vmem:[#allocation2 + $0x68] sm:$0xff]  ;;  %v9702_v2 = vpop.xlane.xlu1 %3621 }
 0x239   : > { %v4237_v23 = vsel %vm142_vm2, %v7517_v46, 0  ;;  %12704 = vst [vmem:[#allocation18_spill] sm:$0xff] %v9702_v2  ;;  %v517_v46 = vld [vmem:[#allocation2 + $0xf0] sm:$0xff]  ;;  %v12709_v2 = vld [vmem:[#allocation35_spill] sm:$0xff] }
 0x23a   : > { %v2380_v48 = vadd.f32 %v2379_v20, %v2303_v40  ;;  %v3680_v42 = vsel %vm142_vm2, %v3578_v55, 0.0  ;;  %2913 = vmatmul.f32.gmra.mxu1 %v12658_v35  ;;  %v9696_v20 = vand.u32 4294901760, %v4240_v58  ;;  %v9699_v55 = vsub.f32 %v4243_v5, %v9688_v41 }
 0x23b   : > { %v2236_v21 = vpop.f32.mrf.mxu0  ;;  %3681 = vadd.xlane.f32.xlu0 %v3680_v42 }
 0x23c   : > { %v2437_v61 = vadd.f32 %v2436_v63, %v2380_v48  ;;  %3119 = vmatmul.f32.gmra.mxu3 %v9161_v0  ;;  %v2237_v11 = vadd.f32 %v2236_v21, %v2165_v62  ;;  %12703 = vst [vmem:[#allocation19_spill] sm:$0xff] %v9699_v55  ;;  %v9705_v48 = vpop.xlane.xlu0 %3618 }
 0x23d   : > { %3026 = vmatmul.f32.gmra.mxu2 %v12702_v56  ;;  %12705 = vst [vmem:[#allocation16_spill] sm:$0xff] %v9705_v48  ;;  %v9714_v56 = vsub.f32 %v4240_v58, %v9696_v20 }
 0x23e   : > { %2860 = vmatmul.f32.gmra.mxu0 %v12666_v29  ;;  %v3432_v16 = vadd.f32 %v2437_v61, %v516_v49  ;;  %v9707_v49 = vpop.xlane.xlu2 %3624  ;;  %v9711_v61 = vand.u32 4294901760, %v4237_v23 }
 0x23f   : > { %v2440_v40 = vpop.f32.mrf.mxu3  ;;  %v2308_v42 = vpop.f32.mrf.mxu1  ;;  %v3531_v7 = vld [vmem:[#allocation2 + $0xe0] sm:$0xff]  ;;  %12706 = vst [vmem:[#allocation50_spill] sm:$0xff] %v9707_v49 }
 0x240   : > { %3481 = vst.msk [vmem:[#allocation2 + $0xe8] sm:$0xff] %vm142_vm2, %v3432_v16  ;;  %v2309_v31 = vadd.f32 %v2308_v42, %v2237_v11  ;;  %v2383_v63 = vpop.f32.mrf.mxu2  ;;  %v3579_v21 = vmul.f32 %v3531_v7, %v3531_v7  ;;  %v9718_v7 = vand.u32 4294901760, %v9699_v55  ;;  %v7518_v11 = vld [vmem:[#allocation2 + $0x60] sm:$0xff]  ;;  %v2169_v42 = vadd.f32 %v9495_v13, %v9498_v18 }
 0x241   : > { %12707 = vst [vmem:[#allocation49_spill] sm:$0xff] %v9714_v56  ;;  %v4234_v16 = vsel %vm142_vm2, %v7518_v11, 0  ;;  %v9729_v48 = vsub.f32 %v4237_v23, %v9711_v61 }
 0x242   : > { %v2384_v62 = vadd.f32 %v2383_v63, %v2309_v31  ;;  %v3683_v5 = vsel %vm142_vm2, %v3579_v21, 0.0  ;;  %2917 = vmatmul.f32.gmra.mxu1 %v12666_v29  ;;  %12708 = vst [vmem:[#allocation45_spill] sm:$0xff] %v9718_v7  ;;  %v7519_v63 = vld [vmem:[#allocation2 + $0x58] sm:$0xff]  ;;  %v4328_v13 = vsub.f32 %v9699_v55, %v9718_v7 }
 0x243   : > { %v2241_v35 = vpop.f32.mrf.mxu0  ;;  %3684 = vadd.xlane.f32.xlu1 %v3683_v5  ;;  %v4231_v58 = vsel %vm142_vm2, %v7519_v63, 0  ;;  %v9726_v5 = vand.u32 4294901760, %v4234_v16  ;;  %12710 = vst [vmem:[#allocation26_spill] sm:$0xff] %v9729_v48 }
 0x244   : > { %v2441_v31 = vadd.f32 %v2440_v40, %v2384_v62  ;;  %3123 = vmatmul.f32.gmra.mxu3 %v9127_v36  ;;  %v2242_v21 = vadd.f32 %v2241_v35, %v2169_v42  ;;  %v9736_v40 = vand.u32 4294901760, %v9714_v56  ;;  %v9738_v35 = vpop.xlane.xlu1 %3630  ;;  %v7520_v42 = vld [vmem:[#allocation2 + $0x50] sm:$0xff]  ;;  %v9744_v63 = vpop.xlane.xlu0 %3627 }
 0x245   : > { %3034 = vmatmul.f32.gmra.mxu2 %v12709_v2  ;;  %12712 = vst [vmem:[#allocation35_spill] sm:$0xff] %v9738_v35  ;;  %v4228_v23 = vsel %vm142_vm2, %v7520_v42, 0  ;;  %v9751_v35 = vsub.f32 %v4234_v16, %v9726_v5 }
 0x246   : > { %2864 = vmatmul.f32.gmra.mxu0 %v12674_v4  ;;  %v3433_v49 = vadd.f32 %v2441_v31, %v517_v46  ;;  %12711 = vst [vmem:[#allocation38_spill] sm:$0xff] %v9736_v40  ;;  %v9742_v31 = vand.u32 4294901760, %v4231_v58  ;;  %v9746_v32 = vpop.xlane.xlu2 %3633 }
 0x247   : > { %v2444_v29 = vpop.f32.mrf.mxu3  ;;  %v2314_v11 = vpop.f32.mrf.mxu1  ;;  %v3532_v18 = vld [vmem:[#allocation2 + $0xe8] sm:$0xff]  ;;  %12713 = vst [vmem:[#allocation52_spill] sm:$0xff] %v9744_v63 }
 0x248   : > { %3482 = vst.msk [vmem:[#allocation2 + $0xf0] sm:$0xff] %vm142_vm2, %v3433_v49  ;;  %v2315_v2 = vadd.f32 %v2314_v11, %v2242_v21  ;;  %v2387_v62 = vpop.f32.mrf.mxu2  ;;  %v3580_v46 = vmul.f32 %v3532_v18, %v3532_v18  ;;  %v518_v49 = vld [vmem:[#allocation2 + $0xf8] sm:$0xff]  ;;  %v9755_v21 = vand.u32 4294901760, %v4328_v13  ;;  %v4320_v11 = vsub.f32 %v9714_v56, %v9736_v40 }
 0x249   : > { %12714 = vst [vmem:[#allocation53_spill] sm:$0xff] %v9746_v32  ;;  %v9760_v18 = vand.u32 4294901760, %v9729_v48 }
 0x24a   : > { %v2388_v19 = vadd.f32 %v2387_v62, %v2315_v2  ;;  %v3686_v60 = vsel %vm142_vm2, %v3580_v46, 0.0  ;;  %12715 = vst [vmem:[#allocation54_spill] sm:$0xff] %v9751_v35  ;;  %2921 = vmatmul.f32.gmra.mxu1 %v12674_v4  ;;  %v9765_v4 = vand.u32 4294901760, %v4228_v23  ;;  %v9771_v46 = vsub.f32 %v4231_v58, %v9742_v31 }
 0x24b   : > { %v9731_v8 = vpop.f32.mrf.mxu0  ;;  %12716 = vst [vmem:[#allocation55_spill] sm:$0xff] %v9755_v21  ;;  %3687 = vadd.xlane.f32.xlu2 %v3686_v60  ;;  %v9775_v60 = vand.u32 4294901760, %v4320_v11  ;;  %v4312_v42 = vsub.f32 %v9729_v48, %v9760_v18  ;;  %v7522_v11 = vld [vmem:[#allocation2 + $0x40] sm:$0xff] }
 0x24c   : > { %12717 = vst [vmem:[#allocation56_spill] sm:$0xff] %v9760_v18  ;;  %v2445_v2 = vadd.f32 %v2444_v29, %v2388_v19  ;;  %3371 = vmatmul.f32.vlgmr.msra.gmra.mxu3 %v9315_v3  ;;  %v4222_v32 = vsel %vm142_vm2, %v7522_v11, 0 }
 0x24d   : > { %4347 = vmatpush.xpose.msra.mxu3 %v9755_v21  ;;  %3314 = vmatmul.f32.vlgmr.msra.gmra.mxu2 %v9315_v3  ;;  %12718 = vst [vmem:[#allocation57_spill] sm:$0xff] %v9771_v46  ;;  %v9784_v3 = vand.u32 4294901760, %v9751_v35  ;;  %v9796_v21 = vsub.f32 %v4228_v23, %v9765_v4  ;;  %v9811_v23 = vand.u32 4294901760, %v9771_v46 }
 0x24e   : > { %3161 = vmatmul.f32.vlgmr.msra.gmra.mxu0 %v9327_v24  ;;  %v7521_v24 = vld [vmem:[#allocation2 + $0x48] sm:$0xff]  ;;  %v3434_v62 = vadd.f32 %v2445_v2, %v518_v49  ;;  %4254 = vmatpush.xpose.msra.mxu2 %v9688_v41  ;;  %12719 = vst [vmem:[#allocation58_spill] sm:$0xff] %v9775_v60  ;;  %v9786_v2 = vpop.xlane.xlu1 %3639  ;;  %v9800_v18 = vpop.xlane.xlu2 %3642 }
 0x24f   : > { %4102 = vmatpush.xpose.msra.mxu0 %v9509_v43  ;;  %v4225_v16 = vsel %vm142_vm2, %v7521_v24, 0  ;;  %v9768_v13 = vpop.f32.mrf.mxu3  ;;  %v9779_v29 = vpop.f32.mrf.mxu1  ;;  %v3533_v49 = vld [vmem:[#allocation2 + $0xf0] sm:$0xff]  ;;  %12720 = vst [vmem:[#allocation59_spill] sm:$0xff] %v9784_v3  ;;  %v6659_v43 = vlaneseq  ;;  %v4304_v11 = vsub.f32 %v9751_v35, %v9784_v3 }
 0x250   : > { %12721 = vst [vmem:[#allocation60_spill] sm:$0xff] %v9786_v2  ;;  %v9789_v58 = vpop.f32.mrf.mxu2  ;;  %v3581_v24 = vmul.f32 %v3533_v49, %v3533_v49  ;;  %v9793_v63 = vand.u32 4294901760, %v4225_v16 }
 0x251   : > { %3483 = vst.msk [vmem:[#allocation2 + $0xf8] sm:$0xff] %vm142_vm2, %v3434_v62  ;;  %4353 = vmatpush.xpose.msra.mxu3 %v9775_v60  ;;  %v9805_v62 = vand.u32 4294901760, %v4312_v42  ;;  %v9831_v2 = vand.u32 4294901760, %v4304_v11 }
 0x252   : > { %12722 = vst [vmem:[#allocation61_spill] sm:$0xff] %v9793_v63  ;;  %4256 = vmatpush.xpose.msra.mxu2 %v9696_v20  ;;  %3227 = vmatmul.f32.vlgmr.msra.gmra.mxu1 %v9339_v39  ;;  %v3689_v49 = vsel %vm142_vm2, %v3581_v24, 0.0  ;;  %v9820_v39 = vsub.f32 %v4225_v16, %v9793_v63  ;;  %v9826_v24 = vand.u32 4294901760, %v9796_v21  ;;  %v4296_v16 = vsub.f32 %v9771_v46, %v9811_v23 }
 0x253   : > { %4106 = vmatpush.xpose.msra.mxu0 %v9529_v34  ;;  %v9777_v19 = vpop.f32.mrf.mxu0  ;;  %12723 = vst [vmem:[#allocation62_spill] sm:$0xff] %v9796_v21  ;;  %v9798_v34 = vpop.xlane.xlu0 %3636  ;;  %4173 = vmatpush.xpose.msra.mxu1 %v9480_v28 }
 0x254   : > { %12724 = vst [vmem:[#allocation63_spill] sm:$0xff] %v9798_v34  ;;  %3375 = vmatmul.f32.gmra.mxu3 %v9295_v33  ;;  %3690 = vadd.xlane.f32.xlu0 %v3689_v49 }
 0x255   : > { %12725 = vst [vmem:[#allocation64_spill] sm:$0xff] %v9800_v18  ;;  %4359 = vmatpush.xpose.msra.mxu3 %v9805_v62  ;;  %3318 = vmatmul.f32.gmra.mxu2 %v9295_v33  ;;  %v9828_v18 = vand.u32 127, %v6659_v43 }
 0x256   : > { %3166 = vmatmul.f32.gmra.mxu0 %v9306_v53  ;;  %12726 = vst [vmem:[#allocation65_spill] sm:$0xff] %v9805_v62  ;;  %v9817_v53 = vand.u32 4294901760, %v4222_v32  ;;  %4258 = vmatpush.xpose.msra.mxu2 %v9711_v61  ;;  %v9839_v33 = vpop.xlane.xlu1 %3648 }
 0x257   : > { %12727 = vst [vmem:[#allocation66_spill] sm:$0xff] %v9811_v23  ;;  %4110 = vmatpush.xpose.msra.mxu0 %v9540_v26  ;;  %v9823_v42 = vpop.f32.mrf.mxu3  ;;  %v9835_v60 = vpop.f32.mrf.mxu1  ;;  %v9845_v28 = vadd.s32 4294967288, %v9828_v18  ;;  %4175 = vmatpush.xpose.msra.mxu1 %v9490_v17  ;;  %v6705_v17 = vperm.slane %v9839_v33, %v9828_v18 }
 0x258   : > { %12728 = vst [vmem:[#allocation67_spill] sm:$0xff] %v9817_v53  ;;  %v3534_v49 = vld [vmem:[#allocation2 + $0xf8] sm:$0xff]  ;;  %v9842_v62 = vpop.f32.mrf.mxu2  ;;  %v9850_v11 = vsub.f32 %v4222_v32, %v9817_v53 }
 0x259   : > { %12729 = vst [vmem:[#allocation68_spill] sm:$0xff] %v9820_v39  ;;  %v3582_v43 = vmul.f32 %v3534_v49, %v3534_v49  ;;  %4365 = vmatpush.xpose.msra.mxu3 %v9831_v2  ;;  %v9860_v49 = vand.u32 4294901760, %v9820_v39 }
 0x25a   : > { %12730 = vst [vmem:[#allocation69_spill] sm:$0xff] %v9826_v24  ;;  %4260 = vmatpush.xpose.msra.mxu2 %v9726_v5  ;;  %3233 = vmatmul.f32.gmra.mxu1 %v9318_v1 }
 0x25b   : > { %12731 = vst [vmem:[#allocation70_spill] sm:$0xff] %v9828_v18  ;;  %v9833_v34 = vpop.f32.mrf.mxu0  ;;  %4114 = vmatpush.xpose.msra.mxu0 %v9565_v6  ;;  %v9852_v26 = vpop.xlane.xlu0 %3645  ;;  %v4288_v6 = vsub.f32 %v9796_v21, %v9826_v24  ;;  %4177 = vmatpush.xpose.msra.mxu1 %v9500_v22 }
 0x25c   : > { %12732 = vst [vmem:[#allocation71_spill] sm:$0xff] %v9831_v2  ;;  %v9855_v23 = vpop.xlane.xlu2 %3651  ;;  %3379 = vmatmul.f32.gmra.mxu3 %v9272_v27 }
 0x25d   : > { %12733 = vst [vmem:[#allocation72_spill] sm:$0xff] %v9845_v28  ;;  %v6706_v32 = vperm.slane %v9855_v23, %v9845_v28  ;;  %3322 = vmatmul.f32.gmra.mxu2 %v9272_v27  ;;  %v9895_v27 = vadd.s32 4294967280, %v9828_v18 }
 0x25e   : > { %12734 = vst [vmem:[#allocation73_spill] sm:$0xff] %v9850_v11  ;;  %3171 = vmatmul.f32.gmra.mxu0 %v9288_v50  ;;  %v3692_v50 = vsel %vm142_vm2, %v3582_v43, 0.0  ;;  %4262 = vmatpush.xpose.msra.mxu2 %v9742_v31 }
 0x25f   : > { %12735 = vst [vmem:[#allocation74_spill] sm:$0xff] %v9852_v26  ;;  %v9868_v26 = vand.u32 4294901760, %v4296_v16  ;;  %4118 = vmatpush.xpose.msra.mxu0 %v9588_v59  ;;  %v6707_v2 = vsel %vm6664_vm3, %v6706_v32, %v6705_v17  ;;  %3693 = vadd.xlane.f32.xlu1 %v3692_v50  ;;  %v9877_v1 = vpop.f32.mrf.mxu3  ;;  %v9880_v16 = vand.u32 4294901760, %v4288_v6  ;;  %v9884_v24 = vpop.f32.mrf.mxu1  ;;  %v4280_v17 = vsub.f32 %v9820_v39, %v9860_v49 }
 0x260   : > { %12736 = vst [vmem:[#allocation75_spill] sm:$0xff] %v9860_v49  ;;  %v9889_v32 = vand.u32 4294901760, %v9850_v11  ;;  %v9892_v50 = vpop.f32.mrf.mxu2  ;;  %4179 = vmatpush.xpose.msra.mxu1 %v9519_v47 }
 0x261   : > { %12737 = vst [vmem:[#allocation76_spill] sm:$0xff] %v9868_v26  ;;  %4371 = vmatpush.xpose.msra.mxu3 %v9868_v26  ;;  %v9906_v22 = vand.u32 4294901760, %v4280_v17 }
 0x262   : > { %12738 = vst [vmem:[#allocation77_spill] sm:$0xff] %v9880_v16  ;;  %4264 = vmatpush.xpose.msra.mxu2 %v9765_v4  ;;  %3239 = vmatmul.f32.gmra.mxu1 %v9301_v25  ;;  %v4272_v49 = vsub.f32 %v9850_v11, %v9889_v32 }
 0x263   : > { %v9882_v43 = vpop.f32.mrf.mxu0  ;;  %12739 = vst [vmem:[#allocation78_spill] sm:$0xff] %v9889_v32  ;;  %4122 = vmatpush.xpose.msra.mxu0 %v9604_v30  ;;  %v9900_v6 = vpop.xlane.xlu0 %3654 }
 0x264   : > { %12740 = vst [vmem:[#allocation79_spill] sm:$0xff] %v9895_v27  ;;  %v6708_v26 = vperm.slane %v9900_v6, %v9895_v27  ;;  %3383 = vmatmul.f32.gmra.mxu3 %v9240_v9  ;;  %4181 = vmatpush.xpose.msra.mxu1 %v9533_v57  ;;  %v9919_v17 = vand.u32 4294901760, %v4272_v49  ;;  %v12746_v49 = vld [vmem:[#allocation46_spill] sm:$0xff] }
 0x265   : > { %4377 = vmatpush.xpose.msra.mxu3 %v9880_v16  ;;  %12741 = vst [vmem:[#allocation80_spill] sm:$0xff] %v9906_v22  ;;  %3326 = vmatmul.f32.gmra.mxu2 %v9240_v9  ;;  %v12745_v9 = vld [vmem:[#allocation40_spill] sm:$0xff] }
 0x266   : > { %3176 = vmatmul.f32.gmra.mxu0 %v9254_v10  ;;  %v6709_v10 = vsel %vm6668_vm4, %v6708_v26, %v6707_v2  ;;  %4266 = vmatpush.xpose.msra.mxu2 %v9793_v63  ;;  %12743 = vst [vmem:[#allocation82_spill] sm:$0xff] %v9919_v17  ;;  %v9929_v26 = vadd.s32 4294967272, %v9828_v18  ;;  %v12758_v63 = vld [vmem:[#allocation34_spill] sm:$0xff] }
 0x267   : > { %4126 = vmatpush.xpose.msra.mxu0 %v9619_v54  ;;  %v9916_v25 = vpop.f32.mrf.mxu3  ;;  %v9923_v47 = vpop.f32.mrf.mxu1 }
 0x268   : > { %12742 = vst [vmem:[#allocation81_spill] sm:$0xff] %v9916_v25  ;;  %v9926_v32 = vpop.f32.mrf.mxu2  ;;  %4183 = vmatpush.xpose.msra.mxu1 %v9556_v37  ;;  %v12759_v25 = vld [vmem:[#allocation39_spill] sm:$0xff] }
 0x269   : > { %4383 = vmatpush.xpose.msra.mxu3 %v9906_v22  ;;  %12744 = vst [vmem:[#allocation83_spill] sm:$0xff] %v9929_v26 }
 0x26a   : > { %v9934_v2 = vpop.xlane.xlu1 %3657  ;;  %4268 = vmatpush.xpose.msra.mxu2 %v9817_v53  ;;  %3245 = vmatmul.f32.gmra.mxu1 %v12746_v49  ;;  %v9953_v49 = vadd.s32 4294967264, %v9828_v18 }
 0x26b   : > { %v9921_v16 = vpop.f32.mrf.mxu0  ;;  %4130 = vmatpush.xpose.msra.mxu0 %v9636_v14  ;;  %v6710_v22 = vperm.slane %v9934_v2, %v9929_v26  ;;  %v12751_v26 = vld [vmem:[#allocation36_spill] sm:$0xff] }
 0x26c   : > { %3387 = vmatmul.f32.gmra.mxu3 %v9205_v45  ;;  %4185 = vmatpush.xpose.msra.mxu1 %v9576_v52  ;;  %12750 = vst [vmem:[#allocation85_spill] sm:$0xff] %v9953_v49 }
 0x26d   : > { %4389 = vmatpush.xpose.msra.mxu3 %v9919_v17  ;;  %v6711_v57 = vsel %vm6672_vm5, %v6710_v22, %v6709_v10  ;;  %3330 = vmatmul.f32.gmra.mxu2 %v9205_v45  ;;  %v12752_v22 = vld [vmem:[#allocation44_spill] sm:$0xff] }
 0x26e   : > { %3181 = vmatmul.f32.gmra.mxu0 %v12745_v9 }
 0x26f   : > { %v9944_v17 = vpop.f32.mrf.mxu3  ;;  %v9948_v11 = vpop.f32.mrf.mxu1 }
 0x270   : > { %12747 = vst [vmem:[#allocation40_spill] sm:$0xff] %v9944_v17  ;;  %v9950_v53 = vpop.f32.mrf.mxu2  ;;  %4187 = vmatpush.xpose.msra.mxu1 %v9596_v44 }
 0x271   : > { %12749 = vst [vmem:[#allocation84_spill] sm:$0xff] %v9950_v53 }
 0x272   : > { %v9957_v27 = vpop.xlane.xlu2 %3660  ;;  %3251 = vmatmul.f32.gmra.mxu1 %v12752_v22  ;;  %v9974_v22 = vadd.s32 4294967256, %v9828_v18 }
 0x273   : > { %v9946_v9 = vpop.f32.mrf.mxu0  ;;  %v6712_v45 = vperm.slane %v9957_v27, %v9953_v49 }
 0x274   : > { %12748 = vst [vmem:[#allocation46_spill] sm:$0xff] %v9946_v9  ;;  %3391 = vmatmul.f32.gmra.mxu3 %v9191_v12 }
 0x275   : > { %v6713_v10 = vsel %vm6676_vm6, %v6712_v45, %v6711_v57  ;;  %3334 = vmatmul.f32.gmra.mxu2 %v9191_v12  ;;  %12757 = vst [vmem:[#allocation88_spill] sm:$0xff] %v9974_v22 }
 0x276   : > { %3186 = vmatmul.f32.gmra.mxu0 %v12751_v26 }
 0x277   : > { %v9965_v17 = vpop.f32.mrf.mxu3  ;;  %v9969_v53 = vpop.f32.mrf.mxu1 }
 0x278   : > { %12753 = vst [vmem:[#allocation36_spill] sm:$0xff] %v9965_v17  ;;  %v9971_v26 = vpop.f32.mrf.mxu2 }
 0x279   : > { %12755 = vst [vmem:[#allocation86_spill] sm:$0xff] %v9969_v53  ;;  %v2619_v53 = vadd.f32 %v9779_v29, %v9731_v8  ;;  %v10009_v8 = vadd.s32 4294967240, %v9828_v18 }
 0x27a   : > { %12756 = vst [vmem:[#allocation87_spill] sm:$0xff] %v9971_v26  ;;  %v3664_v49 = vpop.xlane.xlu0 %3663  ;;  %3257 = vmatmul.f32.gmra.mxu1 %v12759_v25  ;;  %v12765_v25 = vld [vmem:[#allocation6_spill] sm:$0xff] }
 0x27b   : > { %v9967_v9 = vpop.f32.mrf.mxu0  ;;  %v6714_v57 = vperm.slane %v3664_v49, %v9974_v22  ;;  %12767 = vst [vmem:[#allocation6_spill] sm:$0xff] %v10009_v8 }
 0x27c   : > { %12754 = vst [vmem:[#allocation44_spill] sm:$0xff] %v9967_v9  ;;  %3395 = vmatmul.f32.gmra.mxu3 %v9161_v0 }
 0x27d   : > { %v6715_v12 = vsel %vm6680_vm7, %v6714_v57, %v6713_v10  ;;  %3338 = vmatmul.f32.gmra.mxu2 %v9161_v0  ;;  %v12766_v10 = vld [vmem:[#allocation29_spill] sm:$0xff] }
 0x27e   : > { %3191 = vmatmul.f32.gmra.mxu0 %v12758_v63  ;;  %v9991_v63 = vadd.s32 4294967248, %v9828_v18 }
 0x27f   : > { %v9982_v45 = vpop.f32.mrf.mxu3  ;;  %v9986_v9 = vpop.f32.mrf.mxu1 }
 0x280   : > { %12760 = vst [vmem:[#allocation34_spill] sm:$0xff] %v9982_v45  ;;  %v9988_v26 = vpop.f32.mrf.mxu2 }
 0x281   : > { %12762 = vst [vmem:[#allocation89_spill] sm:$0xff] %v9986_v9 }
 0x282   : > { %12763 = vst [vmem:[#allocation90_spill] sm:$0xff] %v9988_v26  ;;  %v3667_v22 = vpop.xlane.xlu1 %3666  ;;  %3263 = vmatmul.f32.gmra.mxu1 %v12766_v10 }
 0x283   : > { %v9984_v17 = vpop.f32.mrf.mxu0  ;;  %12764 = vst [vmem:[#allocation91_spill] sm:$0xff] %v9991_v63  ;;  %v6716_v0 = vperm.slane %v3667_v22, %v9991_v63 }
 0x284   : > { %12761 = vst [vmem:[#allocation39_spill] sm:$0xff] %v9984_v17  ;;  %3399 = vmatmul.f32.gmra.mxu3 %v9127_v36  ;;  %v2685_v17 = vadd.f32 %v9789_v58, %v2619_v53  ;;  %v2623_v58 = vadd.f32 %v9835_v60, %v9777_v19  ;;  %v519_v19 = vld [vmem:[#allocation2 + $0x100] sm:$0xff] }
 0x285   : > { %v6717_v57 = vsel %vm6684_vm8, %v6716_v0, %v6715_v12  ;;  %3342 = vmatmul.f32.gmra.mxu2 %v9127_v36  ;;  %v12768_v12 = vld [vmem:[#allocation30_spill] sm:$0xff] }
 0x286   : > { %3196 = vmatmul.f32.gmra.mxu0 %v12765_v25  ;;  %v2751_v10 = vadd.f32 %v9768_v13, %v2685_v17 }
 0x287   : > { %v10001_v45 = vpop.f32.mrf.mxu3  ;;  %v10004_v25 = vpop.f32.mrf.mxu1 }
 0x288   : > { %v10006_v9 = vpop.f32.mrf.mxu2 }
 0x28a   : > { %v3670_v29 = vpop.xlane.xlu2 %3669  ;;  %3269 = vmatmul.f32.gmra.mxu1 %v12768_v12 }
 0x28b   : > { %v2837_v26 = vpop.f32.mrf.mxu0  ;;  %v6718_v36 = vperm.slane %v3670_v29, %v10009_v8 }
 0x28c   : > { %4045 = vmatmul.f32.vlgmr.msrb.gmra.mxu3 %v9636_v14  ;;  %v2838_v53 = vadd.f32 %v2837_v26, %v2751_v10  ;;  %v2690_v10 = vadd.f32 %v9842_v62, %v2623_v58 }
 0x28d   : > { %v6719_v0 = vsel %vm6688_vm9, %v6718_v36, %v6717_v57  ;;  %4651 = vmatpush.xpose.msrb.mxu3 %v9688_v41  ;;  %3979 = vmatmul.f32.vlgmr.msrb.gmra.mxu2 %v9615_v51 }
 0x28e   : > { %3796 = vmatmul.f32.vlgmr.msrb.gmra.mxu0 %v9665_v15  ;;  %v10021_v15 = vadd.f32 %v6719_v0, %v3670_v29  ;;  %v10027_v17 = vadd.f32 %v6719_v0, %v9839_v33  ;;  %v10030_v12 = vadd.f32 %v6719_v0, %v9855_v23  ;;  %v10033_v14 = vadd.f32 %v6719_v0, %v9900_v6 }
 0x28f   : > { %4433 = vmatpush.xpose.msrb.mxu0 %v9699_v55  ;;  %v10024_v13 = vpop.f32.mrf.mxu3  ;;  %4580 = vmatpush.xpose.msrb.mxu2 %v9718_v7  ;;  %v2894_v26 = vpop.f32.mrf.mxu1  ;;  %v10038_v51 = vadd.f32 %v6719_v0, %v9934_v2  ;;  %v10041_v57 = vadd.f32 %v6719_v0, %v9957_v27  ;;  %v10043_v33 = vadd.f32 %v6719_v0, %v3664_v49  ;;  %v12803_v55 = vld [vmem:[#allocation10_spill] sm:$0xff] }
 0x290   : > { %12769 = vst [vmem:[#allocation29_spill] sm:$0xff] %v10021_v15  ;;  %v2895_v23 = vadd.f32 %v2894_v26, %v2838_v53  ;;  %v10045_v29 = vpop.f32.mrf.mxu2  ;;  %v10047_v6 = vadd.f32 %v6719_v0, %v3667_v22  ;;  %v2627_v27 = vadd.f32 %v9884_v24, %v9833_v34  ;;  %v2757_v62 = vadd.f32 %v9823_v42, %v2690_v10  ;;  %v12778_v22 = vld [vmem:[#allocation56_spill] sm:$0xff] }
 0x291   : > { %12770 = vst [vmem:[#allocation30_spill] sm:$0xff] %v10027_v17  ;;  %4653 = vmatpush.xpose.msrb.mxu3 %v9696_v20  ;;  %v12779_v0 = vld [vmem:[#allocation48_spill] sm:$0xff]  ;;  %v2631_v26 = vadd.f32 %v9923_v47, %v9882_v43  ;;  %v12781_v43 = vld [vmem:[#allocation66_spill] sm:$0xff]  ;;  %v12800_v17 = vld [vmem:[#allocation83_spill] sm:$0xff] }
 0x292   : > { %12771 = vst [vmem:[#allocation92_spill] sm:$0xff] %v10030_v12  ;;  %v3435_v36 = vadd.f32 %v2895_v23, %v519_v19  ;;  %3913 = vmatmul.f32.vlgmr.msrb.gmra.mxu1 %v9596_v44  ;;  %v2695_v34 = vadd.f32 %v9892_v50, %v2627_v27 }
 0x293   : > { %12772 = vst [vmem:[#allocation93_spill] sm:$0xff] %v10033_v14  ;;  %4436 = vmatpush.xpose.msrb.mxu0 %v9714_v56  ;;  %v2841_v60 = vpop.f32.mrf.mxu0  ;;  %4584 = vmatpush.xpose.msrb.mxu2 %v9736_v40  ;;  %v12795_v14 = vld [vmem:[#allocation28_spill] sm:$0xff] }
 0x294   : > { %12773 = vst [vmem:[#allocation94_spill] sm:$0xff] %v10038_v51  ;;  %4051 = vmatmul.f32.gmra.mxu3 %v9619_v54  ;;  %4505 = vmatpush.xpose.msrb.mxu1 %v9688_v41  ;;  %v2842_v49 = vadd.f32 %v2841_v60, %v2757_v62  ;;  %v520_v54 = vld [vmem:[#allocation2 + $0x108] sm:$0xff]  ;;  %v2763_v23 = vadd.f32 %v9877_v1, %v2695_v34  ;;  %v12794_v51 = vld [vmem:[#allocation25_spill] sm:$0xff]  ;;  %v12805_v56 = vld [vmem:[#allocation44_spill] sm:$0xff] }
 0x295   : > { %12774 = vst [vmem:[#allocation95_spill] sm:$0xff] %v10041_v57  ;;  %4655 = vmatpush.xpose.msrb.mxu3 %v9711_v61  ;;  %v2700_v1 = vadd.f32 %v9926_v32, %v2631_v26  ;;  %v12782_v32 = vld [vmem:[#allocation13_spill] sm:$0xff] }
 0x296   : > { %12775 = vst [vmem:[#allocation96_spill] sm:$0xff] %v10043_v33  ;;  %3804 = vmatmul.f32.gmra.mxu0 %v9649_v38  ;;  %v12777_v38 = vld [vmem:[#allocation12_spill] sm:$0xff]  ;;  %v10083_v10 = vpop.xlane.xlu0 %3672  ;;  %v12792_v33 = vld [vmem:[#allocation14_spill] sm:$0xff] }
 0x297   : > { %12776 = vst [vmem:[#allocation97_spill] sm:$0xff] %v10047_v6  ;;  %4439 = vmatpush.xpose.msrb.mxu0 %v9729_v48  ;;  %3984 = vmatmul.f32.gmra.mxu2 %v12777_v38  ;;  %v10063_v2 = vpop.f32.mrf.mxu3  ;;  %v2898_v53 = vpop.f32.mrf.mxu1  ;;  %v12807_v48 = vld [vmem:[#allocation36_spill] sm:$0xff] }
 0x298   : > { %3484 = vst.msk [vmem:[#allocation2 + $0x100] sm:$0xff] %vm142_vm2, %v3435_v36  ;;  %4588 = vmatpush.xpose.msrb.mxu2 %v12778_v22  ;;  %4507 = vmatpush.xpose.msrb.mxu1 %v9696_v20  ;;  %v2899_v42 = vadd.f32 %v2898_v53, %v2842_v49  ;;  %v10070_v24 = vpop.f32.mrf.mxu2  ;;  %v12780_v36 = vld [vmem:[#allocation37_spill] sm:$0xff]  ;;  %v521_v49 = vld [vmem:[#allocation2 + $0x110] sm:$0xff]  ;;  %v6720_v53 = vperm.slane %v10083_v10, %v9828_v18  ;;  %v12804_v22 = vld [vmem:[#allocation43_spill] sm:$0xff] }
 0x299   : > { %4657 = vmatpush.xpose.msrb.mxu3 %v9726_v5 }
 0x29a   : > { %v3436_v19 = vadd.f32 %v2899_v42, %v520_v54  ;;  %3917 = vmatmul.f32.gmra.mxu1 %v9576_v52 }
 0x29b   : > { %v2845_v58 = vpop.f32.mrf.mxu0  ;;  %4442 = vmatpush.xpose.msrb.mxu0 %v9751_v35 }
 0x29c   : > { %4592 = vmatpush.xpose.msrb.mxu2 %v9784_v3  ;;  %4057 = vmatmul.f32.gmra.mxu3 %v9604_v30  ;;  %3485 = vst.msk [vmem:[#allocation2 + $0x108] sm:$0xff] %vm142_vm2, %v3436_v19  ;;  %v2846_v30 = vadd.f32 %v2845_v58, %v2763_v23  ;;  %v12784_v23 = vld [vmem:[#allocation81_spill] sm:$0xff] }
 0x29d   : > { %4509 = vmatpush.xpose.msrb.mxu1 %v9711_v61  ;;  %4659 = vmatpush.xpose.msrb.mxu3 %v9742_v31  ;;  %v12806_v3 = vld [vmem:[#allocation89_spill] sm:$0xff] }
 0x29e   : > { %3812 = vmatmul.f32.gmra.mxu0 %v12779_v0  ;;  %v10092_v38 = vpop.xlane.xlu1 %3675 }
 0x29f   : > { %v3535_v60 = vld [vmem:[#allocation2 + $0x100] sm:$0xff]  ;;  %4445 = vmatpush.xpose.msrb.mxu0 %v9771_v46  ;;  %3989 = vmatmul.f32.gmra.mxu2 %v12780_v36  ;;  %v10086_v27 = vpop.f32.mrf.mxu3  ;;  %v2902_v54 = vpop.f32.mrf.mxu1  ;;  %v6721_v58 = vperm.slane %v10092_v38, %v9845_v28  ;;  %v2769_v36 = vadd.f32 %v12784_v23, %v2700_v1 }
 0x2a0   : > { %v3583_v50 = vmul.f32 %v3535_v60, %v3535_v60  ;;  %4596 = vmatpush.xpose.msrb.mxu2 %v12781_v43  ;;  %v2903_v34 = vadd.f32 %v2902_v54, %v2846_v30  ;;  %v10100_v42 = vpop.f32.mrf.mxu2  ;;  %v12783_v60 = vld [vmem:[#allocation69_spill] sm:$0xff]  ;;  %v7526_v46 = vld [vmem:[#allocation2 + $0xa0] sm:$0xff] }
 0x2a1   : > { %4511 = vmatpush.xpose.msrb.mxu1 %v9726_v5  ;;  %4661 = vmatpush.xpose.msrb.mxu3 %v9765_v4  ;;  %v6722_v0 = vsel %vm6664_vm3, %v6721_v58, %v6720_v53  ;;  %v12787_v58 = vld [vmem:[#allocation75_spill] sm:$0xff] }
 0x2a2   : > { %v3695_v47 = vsel %vm142_vm2, %v3583_v50, 0.0  ;;  %v3437_v19 = vadd.f32 %v2903_v34, %v521_v49  ;;  %3921 = vmatmul.f32.gmra.mxu1 %v9556_v37  ;;  %v2635_v50 = vadd.f32 %v9948_v11, %v9921_v16  ;;  %v12786_v49 = vld [vmem:[#allocation11_spill] sm:$0xff] }
 0x2a3   : > { %v2849_v62 = vpop.f32.mrf.mxu0  ;;  %3696 = vadd.xlane.f32.xlu2 %v3695_v47  ;;  %4448 = vmatpush.xpose.msrb.mxu0 %v9796_v21  ;;  %v3536_v26 = vld [vmem:[#allocation2 + $0x108] sm:$0xff]  ;;  %v12785_v47 = vld [vmem:[#allocation61_spill] sm:$0xff]  ;;  %v12833_v21 = vld [vmem:[#allocation82_spill] sm:$0xff] }
 0x2a4   : > { %4600 = vmatpush.xpose.msrb.mxu2 %v12783_v60  ;;  %4063 = vmatmul.f32.gmra.mxu3 %v9588_v59  ;;  %3486 = vst.msk [vmem:[#allocation2 + $0x110] sm:$0xff] %vm142_vm2, %v3437_v19  ;;  %v3584_v30 = vmul.f32 %v3536_v26, %v3536_v26  ;;  %v2850_v53 = vadd.f32 %v2849_v62, %v2769_v36  ;;  %v12788_v34 = vld [vmem:[#allocation79_spill] sm:$0xff]  ;;  %v522_v19 = vld [vmem:[#allocation2 + $0x118] sm:$0xff]  ;;  %v12790_v26 = vld [vmem:[#allocation84_spill] sm:$0xff] }
 0x2a5   : > { %4513 = vmatpush.xpose.msrb.mxu1 %v9742_v31  ;;  %4663 = vmatpush.xpose.msrb.mxu3 %v12785_v47  ;;  %v12791_v62 = vld [vmem:[#allocation67_spill] sm:$0xff]  ;;  %v526_v60 = vld [vmem:[#allocation2 + $0x138] sm:$0xff] }
 0x2a6   : > { %3820 = vmatmul.f32.gmra.mxu0 %v12782_v32  ;;  %v10117_v59 = vpop.xlane.xlu2 %3678  ;;  %v3698_v1 = vsel %vm142_vm2, %v3584_v30, 0.0  ;;  %v12789_v32 = vld [vmem:[#allocation73_spill] sm:$0xff]  ;;  %v12793_v30 = vld [vmem:[#allocation78_spill] sm:$0xff] }
 0x2a7   : > { %4451 = vmatpush.xpose.msrb.mxu0 %v9820_v39  ;;  %3994 = vmatmul.f32.gmra.mxu2 %v12786_v49  ;;  %v10115_v54 = vpop.f32.mrf.mxu3  ;;  %v6723_v11 = vperm.slane %v10117_v59, %v12788_v34  ;;  %v2906_v23 = vpop.f32.mrf.mxu1  ;;  %v2705_v49 = vadd.f32 %v12790_v26, %v2635_v50  ;;  %v12796_v50 = vld [vmem:[#allocation46_spill] sm:$0xff] }
 0x2a8   : > { %4604 = vmatpush.xpose.msrb.mxu2 %v12787_v58  ;;  %3699 = vadd.xlane.f32.xlu0 %v3698_v1  ;;  %v2907_v36 = vadd.f32 %v2906_v23, %v2850_v53  ;;  %v10128_v6 = vpop.f32.mrf.mxu2  ;;  %v12797_v26 = vld [vmem:[#allocation86_spill] sm:$0xff]  ;;  %v12799_v23 = vld [vmem:[#allocation9_spill] sm:$0xff]  ;;  %v12832_v58 = vld [vmem:[#allocation88_spill] sm:$0xff] }
 0x2a9   : > { %v6724_v15 = vsel %vm6668_vm4, %v6723_v11, %v6722_v0  ;;  %4515 = vmatpush.xpose.msrb.mxu1 %v9765_v4  ;;  %4665 = vmatpush.xpose.msrb.mxu3 %v12791_v62  ;;  %v2639_v0 = vadd.f32 %v12797_v26, %v12796_v50  ;;  %v12798_v11 = vld [vmem:[#allocation40_spill] sm:$0xff]  ;;  %v523_v26 = vld [vmem:[#allocation2 + $0x120] sm:$0xff] }
 0x2aa   : > { %v3438_v57 = vadd.f32 %v2907_v36, %v522_v19  ;;  %3925 = vmatmul.f32.gmra.mxu1 %v12794_v51  ;;  %v2775_v12 = vadd.f32 %v12798_v11, %v2705_v49 }
 0x2ab   : > { %v2853_v16 = vpop.f32.mrf.mxu0  ;;  %4454 = vmatpush.xpose.msrb.mxu0 %v12789_v32  ;;  %v3537_v1 = vld [vmem:[#allocation2 + $0x110] sm:$0xff] }
 0x2ac   : > { %4608 = vmatpush.xpose.msrb.mxu2 %v12793_v30  ;;  %4069 = vmatmul.f32.gmra.mxu3 %v12795_v14  ;;  %3487 = vst.msk [vmem:[#allocation2 + $0x118] sm:$0xff] %vm142_vm2, %v3438_v57  ;;  %v3585_v53 = vmul.f32 %v3537_v1, %v3537_v1  ;;  %v2854_v19 = vadd.f32 %v2853_v16, %v2775_v12  ;;  %v12801_v57 = vld [vmem:[#allocation87_spill] sm:$0xff]  ;;  %v12802_v12 = vld [vmem:[#allocation22_spill] sm:$0xff] }
 0x2ad   : > { %4517 = vmatpush.xpose.msrb.mxu1 %v12785_v47  ;;  %v2710_v11 = vadd.f32 %v12801_v57, %v2639_v0 }
 0x2ae   : > { %3828 = vmatmul.f32.gmra.mxu0 %v12792_v33  ;;  %v10140_v33 = vpop.xlane.xlu0 %3681  ;;  %v3701_v50 = vsel %vm142_vm2, %v3585_v53, 0.0 }
 0x2af   : > { %3999 = vmatmul.f32.gmra.mxu2 %v12799_v23  ;;  %v10142_v36 = vpop.f32.mrf.mxu3  ;;  %v6725_v14 = vperm.slane %v10140_v33, %v12800_v17  ;;  %v2910_v49 = vpop.f32.mrf.mxu1  ;;  %3702 = vadd.xlane.f32.xlu1 %v3701_v50  ;;  %v2643_v50 = vadd.f32 %v12806_v3, %v12805_v56  ;;  %v2781_v0 = vadd.f32 %v12807_v48, %v2710_v11  ;;  %v524_v17 = vld [vmem:[#allocation2 + $0x128] sm:$0xff]  ;;  %v12810_v48 = vld [vmem:[#allocation90_spill] sm:$0xff] }
 0x2b0   : > { %v2911_v23 = vadd.f32 %v2910_v49, %v2854_v19  ;;  %v10150_v40 = vpop.f32.mrf.mxu2 }
 0x2b1   : > { %v6726_v1 = vsel %vm6672_vm5, %v6725_v14, %v6724_v15  ;;  %4519 = vmatpush.xpose.msrb.mxu1 %v12791_v62  ;;  %v12808_v14 = vld [vmem:[#allocation31_spill] sm:$0xff]  ;;  %v2715_v3 = vadd.f32 %v12810_v48, %v2643_v50  ;;  %v12816_v50 = vld [vmem:[#allocation33_spill] sm:$0xff] }
 0x2b2   : > { %v3439_v16 = vadd.f32 %v2911_v23, %v523_v26  ;;  %3929 = vmatmul.f32.gmra.mxu1 %v12803_v55  ;;  %v12809_v26 = vld [vmem:[#allocation85_spill] sm:$0xff] }
 0x2b3   : > { %v2857_v7 = vpop.f32.mrf.mxu0  ;;  %v3538_v53 = vld [vmem:[#allocation2 + $0x118] sm:$0xff] }
 0x2b4   : > { %4075 = vmatmul.f32.gmra.mxu3 %v12804_v22  ;;  %3488 = vst.msk [vmem:[#allocation2 + $0x120] sm:$0xff] %vm142_vm2, %v3439_v16  ;;  %v3586_v15 = vmul.f32 %v3538_v53, %v3538_v53  ;;  %v2858_v49 = vadd.f32 %v2857_v7, %v2781_v0  ;;  %v12811_v7 = vld [vmem:[#allocation41_spill] sm:$0xff] }
 0x2b6   : > { %3836 = vmatmul.f32.gmra.mxu0 %v12802_v12  ;;  %v10160_v19 = vpop.xlane.xlu1 %3684  ;;  %v3704_v12 = vsel %vm142_vm2, %v3586_v15, 0.0  ;;  %v12814_v15 = vld [vmem:[#allocation39_spill] sm:$0xff] }
 0x2b7   : > { %4004 = vmatmul.f32.gmra.mxu2 %v12808_v14  ;;  %v10162_v57 = vpop.f32.mrf.mxu3  ;;  %v6727_v23 = vperm.slane %v10160_v19, %v12809_v26  ;;  %v2914_v56 = vpop.f32.mrf.mxu1  ;;  %3705 = vadd.xlane.f32.xlu2 %v3704_v12  ;;  %v12812_v14 = vld [vmem:[#allocation27_spill] sm:$0xff]  ;;  %v12813_v26 = vld [vmem:[#allocation42_spill] sm:$0xff]  ;;  %v2647_v35 = vadd.f32 %v10004_v25, %v12814_v15 }
 0x2b8   : > { %v2915_v16 = vadd.f32 %v2914_v56, %v2858_v49  ;;  %v10171_v53 = vpop.f32.mrf.mxu2  ;;  %v12815_v12 = vld [vmem:[#allocation34_spill] sm:$0xff]  ;;  %v7523_v56 = vld [vmem:[#allocation2 + $0xb8] sm:$0xff] }
 0x2b9   : > { %v10169_v11 = vsel %vm6676_vm6, %v6727_v23, %v6726_v1  ;;  %v2787_v34 = vadd.f32 %v12815_v12, %v2715_v3  ;;  %v4721_v48 = vsel %vm142_vm2, %v7523_v56, 0  ;;  %v2720_v25 = vadd.f32 %v10006_v9, %v2647_v35  ;;  %v7525_v9 = vld [vmem:[#allocation2 + $0xa8] sm:$0xff] }
 0x2ba   : > { %v3440_v0 = vadd.f32 %v2915_v16, %v524_v17  ;;  %3933 = vmatmul.f32.gmra.mxu1 %v12812_v14  ;;  %v525_v16 = vld [vmem:[#allocation2 + $0x130] sm:$0xff] }
 0x2bb   : > { %v2861_v22 = vpop.f32.mrf.mxu0  ;;  %v3539_v43 = vld [vmem:[#allocation2 + $0x120] sm:$0xff] }
 0x2bc   : > { %4081 = vmatmul.f32.gmra.mxu3 %v12813_v26  ;;  %3489 = vst.msk [vmem:[#allocation2 + $0x128] sm:$0xff] %vm142_vm2, %v3440_v0  ;;  %v3587_v1 = vmul.f32 %v3539_v43, %v3539_v43  ;;  %v2862_v49 = vadd.f32 %v2861_v22, %v2787_v34  ;;  %v12817_v43 = vld [vmem:[#allocation21_spill] sm:$0xff]  ;;  %v7524_v0 = vld [vmem:[#allocation2 + $0xb0] sm:$0xff]  ;;  %v10190_v22 = vand.u32 4294901760, %v4721_v48 }
 0x2bd   : > { %v4718_v34 = vsel %vm142_vm2, %v7524_v0, 0 }
 0x2be   : > { %3844 = vmatmul.f32.gmra.mxu0 %v12811_v7  ;;  %v3707_v17 = vsel %vm142_vm2, %v3587_v1, 0.0  ;;  %12818 = vst [vmem:[#allocation12_spill] sm:$0xff] %v10190_v22  ;;  %v12819_v1 = vld [vmem:[#allocation32_spill] sm:$0xff]  ;;  %v10201_v0 = vsub.f32 %v4721_v48, %v10190_v22 }
 0x2bf   : > { %4009 = vmatmul.f32.gmra.mxu2 %v12816_v50  ;;  %v10181_v23 = vpop.f32.mrf.mxu3  ;;  %v2918_v7 = vpop.f32.mrf.mxu1  ;;  %3708 = vadd.xlane.f32.xlu0 %v3707_v17  ;;  %v12820_v50 = vld [vmem:[#allocation8_spill] sm:$0xff]  ;;  %v2793_v17 = vadd.f32 %v10001_v45, %v2720_v25 }
 0x2c0   : > { %v2919_v3 = vadd.f32 %v2918_v7, %v2862_v49  ;;  %v10186_v15 = vpop.f32.mrf.mxu2  ;;  %v4715_v49 = vsel %vm142_vm2, %v7525_v9, 0  ;;  %v10197_v7 = vand.u32 4294901760, %v4718_v34  ;;  %12823 = vst [vmem:[#allocation37_spill] sm:$0xff] %v10201_v0 }
 0x2c2   : > { %v3441_v12 = vadd.f32 %v2919_v3, %v525_v16  ;;  %3937 = vmatmul.f32.gmra.mxu1 %v12819_v1  ;;  %12821 = vst [vmem:[#allocation48_spill] sm:$0xff] %v10197_v7  ;;  %v10212_v48 = vsub.f32 %v4718_v34, %v10197_v7 }
 0x2c3   : > { %v2865_v26 = vpop.f32.mrf.mxu0  ;;  %v3540_v56 = vld [vmem:[#allocation2 + $0x128] sm:$0xff] }
 0x2c4   : > { %4087 = vmatmul.f32.gmra.mxu3 %v12820_v50  ;;  %3490 = vst.msk [vmem:[#allocation2 + $0x130] sm:$0xff] %vm142_vm2, %v3441_v12  ;;  %v3588_v35 = vmul.f32 %v3540_v56, %v3540_v56  ;;  %v2866_v16 = vadd.f32 %v2865_v26, %v2793_v17  ;;  %v10206_v12 = vand.u32 4294901760, %v4715_v49  ;;  %v10215_v26 = vpop.xlane.xlu2 %3687  ;;  %v10239_v30 = vand.u32 4294901760, %v10212_v48 }
 0x2c5   : > { %12825 = vst [vmem:[#allocation81_spill] sm:$0xff] %v10212_v48 }
 0x2c6   : > { %3852 = vmatmul.f32.gmra.mxu0 %v12817_v43  ;;  %v12822_v43 = vld [vmem:[#allocation7_spill] sm:$0xff]  ;;  %v3710_v50 = vsel %vm142_vm2, %v3588_v35, 0.0  ;;  %12824 = vst [vmem:[#allocation13_spill] sm:$0xff] %v10206_v12  ;;  %v12827_v35 = vld [vmem:[#allocation20_spill] sm:$0xff]  ;;  %v10229_v18 = vsub.f32 %v4715_v49, %v10206_v12 }
 0x2c7   : > { %4014 = vmatmul.f32.gmra.mxu2 %v12822_v43  ;;  %v10203_v3 = vpop.f32.mrf.mxu3  ;;  %v2922_v45 = vpop.f32.mrf.mxu1  ;;  %3711 = vadd.xlane.f32.xlu1 %v3710_v50  ;;  %v4712_v43 = vsel %vm142_vm2, %v7526_v46, 0  ;;  %12826 = vst [vmem:[#allocation61_spill] sm:$0xff] %v10215_v26  ;;  %v10220_v50 = vand.u32 4294901760, %v10201_v0 }
 0x2c8   : > { %v2923_v56 = vadd.f32 %v2922_v45, %v2866_v16  ;;  %v10208_v9 = vpop.f32.mrf.mxu2  ;;  %v7527_v16 = vld [vmem:[#allocation2 + $0x98] sm:$0xff]  ;;  %v10223_v28 = vpop.xlane.xlu0 %3690  ;;  %v10226_v34 = vand.u32 4294901760, %v4712_v43  ;;  %12831 = vst [vmem:[#allocation14_spill] sm:$0xff] %v10229_v18 }
 0x2c9   : > { %12828 = vst [vmem:[#allocation11_spill] sm:$0xff] %v10220_v50  ;;  %v4709_v45 = vsel %vm142_vm2, %v7527_v16, 0  ;;  %v6729_v16 = vperm.slane %v10215_v26, %v12832_v58  ;;  %v6731_v49 = vperm.slane %v10223_v28, %v9991_v63  ;;  %v7528_v58 = vld [vmem:[#allocation2 + $0x90] sm:$0xff]  ;;  %v10258_v63 = vand.u32 4294901760, %v10229_v18 }
 0x2ca   : > { %v3442_v17 = vadd.f32 %v2923_v56, %v526_v60  ;;  %3941 = vmatmul.f32.gmra.mxu1 %v12827_v35  ;;  %12829 = vst [vmem:[#allocation73_spill] sm:$0xff] %v10223_v28  ;;  %v3097_v60 = vadd.f32 %v10024_v13, %v10045_v29 }
 0x2cb   : > { %v3162_v25 = vpop.f32.mrf.mxu0  ;;  %v3541_v46 = vld [vmem:[#allocation2 + $0x130] sm:$0xff]  ;;  %12830 = vst [vmem:[#allocation84_spill] sm:$0xff] %v10226_v34 }
 0x2cc   : > { %4391 = vmatmul.f32.vlgmr.msra.gmra.mxu3 %v12791_v62  ;;  %3491 = vst.msk [vmem:[#allocation2 + $0x138] sm:$0xff] %vm142_vm2, %v3442_v17  ;;  %v3589_v56 = vmul.f32 %v3541_v46, %v3541_v46  ;;  %v3163_v39 = vadd.f32 %v3162_v25, %v3097_v60  ;;  %v4806_v17 = vsub.f32 %v10201_v0, %v10220_v50  ;;  %v10248_v46 = vand.u32 4294901760, %v4709_v45 }
 0x2cd   : > { %4983 = vmatpush.xpose.msra.mxu3 %v10190_v22  ;;  %12834 = vst [vmem:[#allocation25_spill] sm:$0xff] %v10239_v30  ;;  %v10252_v25 = vsub.f32 %v4712_v43, %v10226_v34  ;;  %v7529_v43 = vld [vmem:[#allocation2 + $0x88] sm:$0xff] }
 0x2ce   : > { %4132 = vmatmul.f32.vlgmr.msra.gmra.mxu0 %v9596_v44  ;;  %v3713_v29 = vsel %vm142_vm2, %v3589_v56, 0.0  ;;  %12835 = vst [vmem:[#allocation28_spill] sm:$0xff] %v10248_v46  ;;  %v10271_v62 = vand.u32 4294901760, %v4806_v17 }
 0x2cf   : > { %4732 = vmatpush.xpose.msra.mxu0 %v10190_v22  ;;  %4274 = vmatmul.f32.vlgmr.msra.gmra.mxu2 %v12833_v21  ;;  %v3372_v13 = vpop.f32.mrf.mxu3  ;;  %v3228_v26 = vpop.f32.mrf.mxu1  ;;  %v4706_v22 = vsel %vm142_vm2, %v7528_v58, 0  ;;  %12836 = vst [vmem:[#allocation46_spill] sm:$0xff] %v10252_v25  ;;  %v4798_v58 = vsub.f32 %v10212_v48, %v10239_v30 }
 0x2d0   : > { %4911 = vmatpush.xpose.msra.mxu2 %v10201_v0  ;;  %3714 = vadd.xlane.f32.xlu2 %v3713_v29  ;;  %v3229_v28 = vadd.f32 %v3228_v26, %v3163_v39  ;;  %v3315_v56 = vpop.f32.mrf.mxu2  ;;  %12838 = vst [vmem:[#allocation40_spill] sm:$0xff] %v10258_v63  ;;  %v6730_v0 = vsel %vm6680_vm7, %v6729_v16, %v10169_v11  ;;  %v10273_v11 = vand.u32 4294901760, %v4706_v22 }
 0x2d1   : > { %4985 = vmatpush.xpose.msra.mxu3 %v10197_v7  ;;  %v6732_v39 = vsel %vm6684_vm8, %v6731_v49, %v6730_v0  ;;  %12839 = vst [vmem:[#allocation9_spill] sm:$0xff] %v10271_v62  ;;  %v10276_v16 = vsub.f32 %v4709_v45, %v10248_v46  ;;  %v4790_v45 = vsub.f32 %v10229_v18, %v10258_v63  ;;  %v12844_v49 = vld [vmem:[#allocation80_spill] sm:$0xff]  ;;  %v10293_v17 = vand.u32 4294901760, %v4798_v58 }
 0x2d2   : > { %v10255_v60 = vpop.xlane.xlu1 %3693  ;;  %v3316_v26 = vadd.f32 %v3315_v56, %v3229_v28  ;;  %4189 = vmatmul.f32.vlgmr.msra.gmra.mxu1 %v9596_v44  ;;  %12840 = vst [vmem:[#allocation87_spill] sm:$0xff] %v10273_v11 }
 0x2d3   : > { %4734 = vmatpush.xpose.msra.mxu0 %v10197_v7  ;;  %v3167_v21 = vpop.f32.mrf.mxu0  ;;  %12837 = vst [vmem:[#allocation86_spill] sm:$0xff] %v10255_v60  ;;  %v6733_v29 = vperm.slane %v10255_v60, %v10009_v8  ;;  %v4703_v7 = vsel %vm142_vm2, %v7529_v43, 0  ;;  %v3101_v60 = vadd.f32 %v10063_v2, %v10070_v24  ;;  %v527_v43 = vld [vmem:[#allocation2 + $0x140] sm:$0xff]  ;;  %v3542_v28 = vld [vmem:[#allocation2 + $0x138] sm:$0xff]  ;;  %4825 = vmatpush.xpose.msra.mxu1 %v10271_v62  ;;  %v10290_v2 = vand.u32 4294901760, %v10252_v25 }
 0x2d4   : > { %4914 = vmatpush.xpose.msra.mxu2 %v10212_v48  ;;  %12841 = vst [vmem:[#allocation22_spill] sm:$0xff] %v10276_v16  ;;  %4395 = vmatmul.f32.gmra.mxu3 %v12785_v47  ;;  %v3373_v44 = vadd.f32 %v3372_v13, %v3316_v26  ;;  %v3590_v0 = vmul.f32 %v3542_v28, %v3542_v28  ;;  %v7530_v28 = vld [vmem:[#allocation2 + $0x80] sm:$0xff] }
 0x2d5   : > { %v10281_v8 = vsel %vm6688_vm9, %v6733_v29, %v6732_v39  ;;  %4987 = vmatpush.xpose.msra.mxu3 %v10206_v12  ;;  %12843 = vst [vmem:[#allocation43_spill] sm:$0xff] %v10290_v2  ;;  %v3168_v24 = vadd.f32 %v3167_v21, %v3101_v60 }
 0x2d6   : > { %4136 = vmatmul.f32.gmra.mxu0 %v9576_v52  ;;  %12842 = vst [vmem:[#allocation10_spill] sm:$0xff] %v10281_v8  ;;  %v10297_v56 = vadd.f32 %v10281_v8, %v10083_v10  ;;  %v10301_v13 = vadd.f32 %v10281_v8, %v10092_v38  ;;  %v3443_v29 = vadd.f32 %v3373_v44, %v527_v43  ;;  %v3716_v26 = vsel %vm142_vm2, %v3590_v0, 0.0 }
 0x2d7   : > { %4736 = vmatpush.xpose.msra.mxu0 %v10206_v12  ;;  %4282 = vmatmul.f32.gmra.mxu2 %v12844_v49  ;;  %12845 = vst [vmem:[#allocation44_spill] sm:$0xff] %v10293_v17  ;;  %v3376_v39 = vpop.f32.mrf.mxu3  ;;  %v10307_v21 = vadd.f32 %v10281_v8, %v10117_v59  ;;  %v10311_v60 = vadd.f32 %v10281_v8, %v10140_v33  ;;  %v3234_v58 = vpop.f32.mrf.mxu1  ;;  %v4700_v33 = vsel %vm142_vm2, %v7530_v28, 0  ;;  %v10322_v44 = vand.u32 4294901760, %v4703_v7 }
 0x2d8   : > { %12846 = vst [vmem:[#allocation89_spill] sm:$0xff] %v10297_v56  ;;  %4917 = vmatpush.xpose.msra.mxu2 %v10229_v18  ;;  %3717 = vadd.xlane.f32.xlu0 %v3716_v26  ;;  %v10316_v38 = vadd.f32 %v10281_v8, %v10160_v19  ;;  %v3235_v59 = vadd.f32 %v3234_v58, %v3168_v24  ;;  %v3319_v43 = vpop.f32.mrf.mxu2  ;;  %v10330_v49 = vand.u32 4294901760, %v4790_v45  ;;  %v528_v26 = vld [vmem:[#allocation2 + $0x148] sm:$0xff] }
 0x2d9   : > { %12847 = vst [vmem:[#allocation36_spill] sm:$0xff] %v10301_v13  ;;  %4831 = vmatpush.xpose.msra.mxu1 %v10293_v17  ;;  %4989 = vmatpush.xpose.msra.mxu3 %v10226_v34  ;;  %v10325_v0 = vsub.f32 %v4706_v22, %v10273_v11  ;;  %v4782_v24 = vsub.f32 %v10252_v25, %v10290_v2  ;;  %v12881_v17 = vld [vmem:[#allocation78_spill] sm:$0xff] }
 0x2da   : > { %12848 = vst [vmem:[#allocation31_spill] sm:$0xff] %v10307_v21  ;;  %v3320_v19 = vadd.f32 %v3319_v43, %v3235_v59  ;;  %4193 = vmatmul.f32.gmra.mxu1 %v9576_v52  ;;  %v3105_v22 = vadd.f32 %v10086_v27, %v10100_v42  ;;  %v10343_v52 = vand.u32 4294901760, %v4700_v33  ;;  %v10346_v45 = vsub.f32 %v4703_v7, %v10322_v44  ;;  %v12854_v59 = vld [vmem:[#allocation77_spill] sm:$0xff] }
 0x2db   : > { %12849 = vst [vmem:[#allocation90_spill] sm:$0xff] %v10311_v60  ;;  %4738 = vmatpush.xpose.msra.mxu0 %v10226_v34  ;;  %v3172_v10 = vpop.f32.mrf.mxu0  ;;  %v10350_v43 = vand.u32 4294901760, %v10325_v0  ;;  %v10353_v42 = vand.u32 4294901760, %v4782_v24 }
 0x2dc   : > { %12850 = vst [vmem:[#allocation41_spill] sm:$0xff] %v10316_v38  ;;  %4920 = vmatpush.xpose.msra.mxu2 %v10252_v25  ;;  %4399 = vmatmul.f32.gmra.mxu3 %v9765_v4  ;;  %v3377_v58 = vadd.f32 %v3376_v39, %v3320_v19  ;;  %v3173_v28 = vadd.f32 %v3172_v10, %v3105_v22 }
 0x2dd   : > { %3492 = vst.msk [vmem:[#allocation2 + $0x140] sm:$0xff] %vm142_vm2, %v3443_v29  ;;  %v10335_v29 = vand.u32 4294901760, %v10276_v16  ;;  %4837 = vmatpush.xpose.msra.mxu1 %v10330_v49  ;;  %4991 = vmatpush.xpose.msra.mxu3 %v10248_v46  ;;  %v10362_v24 = vsub.f32 %v4700_v33, %v10343_v52  ;;  %v3109_v33 = vadd.f32 %v10115_v54, %v10128_v6 }
 0x2de   : > { %12851 = vst [vmem:[#allocation27_spill] sm:$0xff] %v10325_v0  ;;  %4140 = vmatmul.f32.gmra.mxu0 %v9556_v37  ;;  %v3444_v8 = vadd.f32 %v3377_v58, %v528_v26  ;;  %v10366_v58 = vand.u32 4294901760, %v10346_v45 }
 0x2df   : > { %12852 = vst [vmem:[#allocation42_spill] sm:$0xff] %v10330_v49  ;;  %4740 = vmatpush.xpose.msra.mxu0 %v10248_v46  ;;  %4290 = vmatmul.f32.gmra.mxu2 %v12854_v59  ;;  %v3380_v27 = vpop.f32.mrf.mxu3  ;;  %v4774_v39 = vsub.f32 %v10276_v16, %v10335_v29  ;;  %v3240_v7 = vpop.f32.mrf.mxu1 }
 0x2e0   : > { %12853 = vst [vmem:[#allocation39_spill] sm:$0xff] %v10335_v29  ;;  %4923 = vmatpush.xpose.msra.mxu2 %v10276_v16  ;;  %v3241_v10 = vadd.f32 %v3240_v7, %v3173_v28  ;;  %v3323_v26 = vpop.f32.mrf.mxu2  ;;  %v529_v28 = vld [vmem:[#allocation2 + $0x150] sm:$0xff]  ;;  %v4758_v6 = vsub.f32 %v10346_v45, %v10366_v58  ;;  %v12892_v16 = vld [vmem:[#allocation75_spill] sm:$0xff] }
 0x2e1   : > { %12855 = vst [vmem:[#allocation34_spill] sm:$0xff] %v10353_v42  ;;  %4843 = vmatpush.xpose.msra.mxu1 %v10353_v42  ;;  %4993 = vmatpush.xpose.msra.mxu3 %v10273_v11  ;;  %v12891_v42 = vld [vmem:[#allocation62_spill] sm:$0xff] }
 0x2e2   : > { %3493 = vst.msk [vmem:[#allocation2 + $0x148] sm:$0xff] %vm142_vm2, %v3444_v8  ;;  %v3324_v59 = vadd.f32 %v3323_v26, %v3241_v10  ;;  %4197 = vmatmul.f32.gmra.mxu1 %v9556_v37  ;;  %v10370_v8 = vand.u32 4294901760, %v4774_v39  ;;  %v12857_v37 = vld [vmem:[#allocation76_spill] sm:$0xff]  ;;  %v10383_v39 = vand.u32 4294901760, %v10362_v24 }
 0x2e3   : > { %4742 = vmatpush.xpose.msra.mxu0 %v10273_v11  ;;  %v3177_v19 = vpop.f32.mrf.mxu0 }
 0x2e4   : > { %v3543_v38 = vld [vmem:[#allocation2 + $0x140] sm:$0xff]  ;;  %4926 = vmatpush.xpose.msra.mxu2 %v10325_v0  ;;  %12856 = vst [vmem:[#allocation33_spill] sm:$0xff] %v10370_v8  ;;  %4403 = vmatmul.f32.gmra.mxu3 %v9742_v31  ;;  %v3381_v7 = vadd.f32 %v3380_v27, %v3324_v59  ;;  %v3178_v10 = vadd.f32 %v3177_v19, %v3109_v33  ;;  %v10397_v33 = vand.u32 4294901760, %v4758_v6 }
 0x2e5   : > { %v3591_v22 = vmul.f32 %v3543_v38, %v3543_v38  ;;  %v4766_v38 = vsub.f32 %v10325_v0, %v10350_v43  ;;  %4849 = vmatpush.xpose.msra.mxu1 %v10370_v8  ;;  %4995 = vmatpush.xpose.msra.mxu3 %v10322_v44 }
 0x2e6   : > { %4144 = vmatmul.f32.gmra.mxu0 %v12794_v51  ;;  %v3445_v26 = vadd.f32 %v3381_v7, %v529_v28 }
 0x2e7   : > { %v3719_v60 = vsel %vm142_vm2, %v3591_v22, 0.0  ;;  %4744 = vmatpush.xpose.msra.mxu0 %v10322_v44  ;;  %4298 = vmatmul.f32.gmra.mxu2 %v12857_v37  ;;  %v3384_v22 = vpop.f32.mrf.mxu3  ;;  %v10386_v21 = vand.u32 4294901760, %v4766_v38  ;;  %v3246_v27 = vpop.f32.mrf.mxu1  ;;  %v4750_v37 = vsub.f32 %v10362_v24, %v10383_v39 }
 0x2e8   : > { %3720 = vadd.xlane.f32.xlu1 %v3719_v60  ;;  %4929 = vmatpush.xpose.msra.mxu2 %v10346_v45  ;;  %3494 = vst.msk [vmem:[#allocation2 + $0x150] sm:$0xff] %vm142_vm2, %v3445_v26  ;;  %v3247_v19 = vadd.f32 %v3246_v27, %v3178_v10  ;;  %v3327_v59 = vpop.f32.mrf.mxu2  ;;  %v530_v26 = vld [vmem:[#allocation2 + $0x158] sm:$0xff]  ;;  %v3113_v10 = vadd.f32 %v10142_v36, %v10150_v40 }
 0x2e9   : > { %v3544_v60 = vld [vmem:[#allocation2 + $0x148] sm:$0xff]  ;;  %4855 = vmatpush.xpose.msra.mxu1 %v10386_v21  ;;  %4997 = vmatpush.xpose.msra.mxu3 %v10343_v52 }
 0x2ea   : > { %v3592_v28 = vmul.f32 %v3544_v60, %v3544_v60  ;;  %v3328_v38 = vadd.f32 %v3327_v59, %v3247_v19  ;;  %4201 = vmatmul.f32.gmra.mxu1 %v12794_v51  ;;  %v12858_v60 = vld [vmem:[#allocation71_spill] sm:$0xff]  ;;  %v10407_v59 = vand.u32 4294901760, %v4750_v37 }
 0x2eb   : > { %4746 = vmatpush.xpose.msra.mxu0 %v10343_v52  ;;  %v3182_v54 = vpop.f32.mrf.mxu0 }
 0x2ec   : > { %4932 = vmatpush.xpose.msra.mxu2 %v10362_v24  ;;  %v3722_v7 = vsel %vm142_vm2, %v3592_v28, 0.0  ;;  %4407 = vmatmul.f32.gmra.mxu3 %v9726_v5  ;;  %v3385_v27 = vadd.f32 %v3384_v22, %v3328_v38  ;;  %v3183_v51 = vadd.f32 %v3182_v54, %v3113_v10  ;;  %v531_v54 = vld [vmem:[#allocation2 + $0x160] sm:$0xff]  ;;  %v3117_v38 = vadd.f32 %v10162_v57, %v10171_v53 }
 0x2ed   : > { %3723 = vadd.xlane.f32.xlu2 %v3722_v7  ;;  %4861 = vmatpush.xpose.msra.mxu1 %v10397_v33 }
 0x2ee   : > { %4148 = vmatmul.f32.gmra.mxu0 %v12803_v55  ;;  %v3446_v6 = vadd.f32 %v3385_v27, %v530_v26  ;;  %v12859_v26 = vld [vmem:[#allocation65_spill] sm:$0xff] }
 0x2ef   : > { %4306 = vmatmul.f32.gmra.mxu2 %v12858_v60  ;;  %v3388_v19 = vpop.f32.mrf.mxu3  ;;  %v3252_v13 = vpop.f32.mrf.mxu1  ;;  %v3545_v56 = vld [vmem:[#allocation2 + $0x150] sm:$0xff]  ;;  %v7531_v27 = vld [vmem:[#allocation2 + $0xf8] sm:$0xff] }
 0x2f0   : > { %3495 = vst.msk [vmem:[#allocation2 + $0x158] sm:$0xff] %vm142_vm2, %v3446_v6  ;;  %v3253_v7 = vadd.f32 %v3252_v13, %v3183_v51  ;;  %v3331_v62 = vpop.f32.mrf.mxu2  ;;  %v3593_v40 = vmul.f32 %v3545_v56, %v3545_v56 }
 0x2f1   : > { %4867 = vmatpush.xpose.msra.mxu1 %v10407_v59 }
 0x2f2   : > { %v3332_v36 = vadd.f32 %v3331_v62, %v3253_v7  ;;  %4205 = vmatmul.f32.gmra.mxu1 %v12803_v55  ;;  %v3725_v22 = vsel %vm142_vm2, %v3593_v40, 0.0  ;;  %v5199_v62 = vsel %vm142_vm2, %v7531_v27, 0 }
 0x2f3   : > { %v3187_v28 = vpop.f32.mrf.mxu0  ;;  %3726 = vadd.xlane.f32.xlu0 %v3725_v22  ;;  %v10421_v57 = vand.u32 4294901760, %v5199_v62  ;;  %v532_v22 = vld [vmem:[#allocation2 + $0x168] sm:$0xff] }
 0x2f4   : > { %4411 = vmatmul.f32.gmra.mxu3 %v9711_v61  ;;  %v3389_v37 = vadd.f32 %v3388_v19, %v3332_v36  ;;  %v3188_v13 = vadd.f32 %v3187_v28, %v3117_v38  ;;  %v7532_v28 = vld [vmem:[#allocation2 + $0xf0] sm:$0xff] }
 0x2f5   : > { %12860 = vst [vmem:[#allocation21_spill] sm:$0xff] %v10421_v57  ;;  %v5196_v36 = vsel %vm142_vm2, %v7532_v28, 0 }
 0x2f6   : > { %4152 = vmatmul.f32.gmra.mxu0 %v12812_v14  ;;  %v3447_v10 = vadd.f32 %v3389_v37, %v531_v54  ;;  %v3121_v54 = vadd.f32 %v10181_v23, %v10186_v15  ;;  %v7533_v37 = vld [vmem:[#allocation2 + $0xe8] sm:$0xff] }
 0x2f7   : > { %4314 = vmatmul.f32.gmra.mxu2 %v12859_v26  ;;  %v3392_v56 = vpop.f32.mrf.mxu3  ;;  %v3258_v55 = vpop.f32.mrf.mxu1  ;;  %v3546_v51 = vld [vmem:[#allocation2 + $0x158] sm:$0xff]  ;;  %v5193_v26 = vsel %vm142_vm2, %v7533_v37, 0  ;;  %v3125_v37 = vadd.f32 %v10203_v3, %v10208_v9 }
 0x2f8   : > { %3496 = vst.msk [vmem:[#allocation2 + $0x160] sm:$0xff] %vm142_vm2, %v3447_v10  ;;  %v3259_v6 = vadd.f32 %v3258_v55, %v3188_v13  ;;  %v3335_v7 = vpop.f32.mrf.mxu2  ;;  %v3594_v40 = vmul.f32 %v3546_v51, %v3546_v51  ;;  %v12861_v13 = vld [vmem:[#allocation58_spill] sm:$0xff]  ;;  %v10431_v10 = vand.u32 4294901760, %v5196_v36  ;;  %v10438_v28 = vand.u32 4294901760, %v5193_v26 }
 0x2fa   : > { %v3336_v53 = vadd.f32 %v3335_v7, %v3259_v6  ;;  %4209 = vmatmul.f32.gmra.mxu1 %v12812_v14  ;;  %v3728_v19 = vsel %vm142_vm2, %v3594_v40, 0.0  ;;  %12862 = vst [vmem:[#allocation32_spill] sm:$0xff] %v10431_v10  ;;  %v10434_v14 = vsub.f32 %v5199_v62, %v10421_v57  ;;  %v10442_v62 = vsub.f32 %v5196_v36, %v10431_v10 }
 0x2fb   : > { %v3192_v60 = vpop.f32.mrf.mxu0  ;;  %3729 = vadd.xlane.f32.xlu1 %v3728_v19 }
 0x2fc   : > { %4415 = vmatmul.f32.gmra.mxu3 %v9696_v20  ;;  %v3393_v38 = vadd.f32 %v3392_v56, %v3336_v53  ;;  %12863 = vst [vmem:[#allocation8_spill] sm:$0xff] %v10434_v14  ;;  %v3193_v27 = vadd.f32 %v3192_v60, %v3121_v54  ;;  %v7534_v53 = vld [vmem:[#allocation2 + $0xe0] sm:$0xff]  ;;  %v10447_v54 = vand.u32 4294901760, %v10434_v14 }
 0x2fd   : > { %v5190_v19 = vsel %vm142_vm2, %v7534_v53, 0  ;;  %12864 = vst [vmem:[#allocation7_spill] sm:$0xff] %v10442_v62  ;;  %v10462_v53 = vand.u32 4294901760, %v10442_v62 }
 0x2fe   : > { %4156 = vmatmul.f32.gmra.mxu0 %v12819_v1  ;;  %v3448_v55 = vadd.f32 %v3393_v38, %v532_v22  ;;  %12865 = vst [vmem:[#allocation20_spill] sm:$0xff] %v10447_v54  ;;  %v533_v38 = vld [vmem:[#allocation2 + $0x170] sm:$0xff] }
 0x2ff   : > { %4322 = vmatmul.f32.gmra.mxu2 %v12861_v13  ;;  %v3396_v51 = vpop.f32.mrf.mxu3  ;;  %v3264_v7 = vpop.f32.mrf.mxu1  ;;  %v3547_v40 = vld [vmem:[#allocation2 + $0x160] sm:$0xff]  ;;  %12868 = vst [vmem:[#allocation80_spill] sm:$0xff] %v10462_v53 }
 0x300   : > { %3497 = vst.msk [vmem:[#allocation2 + $0x168] sm:$0xff] %vm142_vm2, %v3448_v55  ;;  %v3265_v23 = vadd.f32 %v3264_v7, %v3193_v27  ;;  %v3339_v15 = vpop.f32.mrf.mxu2  ;;  %v3595_v56 = vmul.f32 %v3547_v40, %v3547_v40  ;;  %v7535_v27 = vld [vmem:[#allocation2 + $0xd8] sm:$0xff]  ;;  %v10453_v55 = vand.u32 4294901760, %v5190_v19  ;;  %v12867_v7 = vld [vmem:[#allocation55_spill] sm:$0xff] }
 0x301   : > { %v5187_v36 = vsel %vm142_vm2, %v7535_v27, 0  ;;  %v7536_v27 = vld [vmem:[#allocation2 + $0xd0] sm:$0xff] }
 0x302   : > { %v3340_v60 = vadd.f32 %v3339_v15, %v3265_v23  ;;  %4213 = vmatmul.f32.gmra.mxu1 %v12819_v1  ;;  %v3731_v22 = vsel %vm142_vm2, %v3595_v56, 0.0  ;;  %v10456_v1 = vsub.f32 %v5193_v26, %v10438_v28  ;;  %v5284_v56 = vsub.f32 %v10434_v14, %v10447_v54 }
 0x303   : > { %v3197_v6 = vpop.f32.mrf.mxu0  ;;  %3732 = vadd.xlane.f32.xlu2 %v3731_v22 }
 0x304   : > { %4419 = vmatmul.f32.gmra.mxu3 %v9688_v41  ;;  %v3397_v13 = vadd.f32 %v3396_v51, %v3340_v60  ;;  %12866 = vst [vmem:[#allocation82_spill] sm:$0xff] %v10456_v1  ;;  %v3198_v40 = vadd.f32 %v3197_v6, %v3125_v37  ;;  %v5184_v6 = vsel %vm142_vm2, %v7536_v27, 0  ;;  %v10471_v37 = vsub.f32 %v5190_v19, %v10453_v55  ;;  %v12873_v19 = vld [vmem:[#allocation67_spill] sm:$0xff] }
 0x305   : > { %v7537_v27 = vld [vmem:[#allocation2 + $0xc8] sm:$0xff] }
 0x306   : > { %4160 = vmatmul.f32.gmra.mxu0 %v12827_v35  ;;  %v3449_v23 = vadd.f32 %v3397_v13, %v533_v38  ;;  %v10468_v38 = vand.u32 4294901760, %v5187_v36  ;;  %12870 = vst [vmem:[#allocation76_spill] sm:$0xff] %v10471_v37  ;;  %v10475_v13 = vand.u32 4294901760, %v10456_v1 }
 0x307   : > { %4330 = vmatmul.f32.gmra.mxu2 %v12867_v7  ;;  %v3400_v15 = vpop.f32.mrf.mxu3  ;;  %v3270_v3 = vpop.f32.mrf.mxu1  ;;  %v3548_v51 = vld [vmem:[#allocation2 + $0x168] sm:$0xff] }
 0x308   : > { %3498 = vst.msk [vmem:[#allocation2 + $0x170] sm:$0xff] %vm142_vm2, %v3449_v23  ;;  %v3271_v60 = vadd.f32 %v3270_v3, %v3198_v40  ;;  %v3343_v26 = vpop.f32.mrf.mxu2  ;;  %v3596_v22 = vmul.f32 %v3548_v51, %v3548_v51  ;;  %v10479_v40 = vand.u32 4294901760, %v5284_v56  ;;  %v5276_v3 = vsub.f32 %v10442_v62, %v10462_v53  ;;  %v534_v51 = vld [vmem:[#allocation2 + $0x178] sm:$0xff] }
 0x309   : > { %12869 = vst [vmem:[#allocation77_spill] sm:$0xff] %v10468_v38  ;;  %v10490_v56 = vsub.f32 %v5187_v36, %v10468_v38 }
 0x30a   : > { %12871 = vst [vmem:[#allocation71_spill] sm:$0xff] %v10475_v13  ;;  %v3344_v7 = vadd.f32 %v3343_v26, %v3271_v60  ;;  %4217 = vmatmul.f32.gmra.mxu1 %v12827_v35  ;;  %v3734_v23 = vsel %vm142_vm2, %v3596_v22, 0.0  ;;  %v5181_v60 = vsel %vm142_vm2, %v7537_v27, 0  ;;  %v10487_v35 = vand.u32 4294901760, %v5184_v6 }
 0x30b   : > { %v10464_v9 = vpop.f32.mrf.mxu0  ;;  %12872 = vst [vmem:[#allocation65_spill] sm:$0xff] %v10479_v40  ;;  %3735 = vadd.xlane.f32.xlu0 %v3734_v23  ;;  %v10502_v23 = vand.u32 4294901760, %v10471_v37 }
 0x30c   : > { %4667 = vmatmul.f32.vlgmr.msrb.gmra.mxu3 %v12873_v19  ;;  %12874 = vst [vmem:[#allocation58_spill] sm:$0xff] %v10487_v35  ;;  %v10516_v48 = vsub.f32 %v5184_v6, %v10487_v35  ;;  %v12884_v6 = vld [vmem:[#allocation12_spill] sm:$0xff] }
 0x30d   : > { %5303 = vmatpush.xpose.msrb.mxu3 %v10479_v40  ;;  %12875 = vst [vmem:[#allocation55_spill] sm:$0xff] %v10490_v56 }
 0x30e   : > { %4457 = vmatmul.f32.vlgmr.msrb.gmra.mxu0 %v12789_v32  ;;  %v3401_v32 = vadd.f32 %v3400_v15, %v3344_v7  ;;  %v10497_v15 = vand.u32 4294901760, %v5276_v3  ;;  %v5268_v7 = vsub.f32 %v10456_v1, %v10475_v13  ;;  %12877 = vst [vmem:[#allocation98_spill] sm:$0xff] %v10502_v23  ;;  %v7538_v3 = vld [vmem:[#allocation2 + $0xc0] sm:$0xff] }
 0x30f   : > { %5058 = vmatpush.xpose.msrb.mxu0 %v10220_v50  ;;  %4610 = vmatmul.f32.vlgmr.msrb.gmra.mxu2 %v12873_v19  ;;  %v10494_v22 = vpop.f32.mrf.mxu3  ;;  %v10506_v36 = vpop.f32.mrf.mxu1  ;;  %v3549_v19 = vld [vmem:[#allocation2 + $0x170] sm:$0xff]  ;;  %v5178_v40 = vsel %vm142_vm2, %v7538_v3, 0  ;;  %v10513_v50 = vand.u32 4294901760, %v5181_v60  ;;  %12879 = vst [vmem:[#allocation100_spill] sm:$0xff] %v10516_v48  ;;  %v10527_v3 = vand.u32 4294901760, %v10490_v56 }
 0x310   : > { %v3450_v26 = vadd.f32 %v3401_v32, %v534_v51  ;;  %5210 = vmatpush.xpose.msrb.mxu2 %v10421_v57  ;;  %12876 = vst [vmem:[#allocation67_spill] sm:$0xff] %v10497_v15  ;;  %v10510_v51 = vpop.f32.mrf.mxu2  ;;  %v3597_v32 = vmul.f32 %v3549_v19, %v3549_v19  ;;  %v5260_v19 = vsub.f32 %v10471_v37, %v10502_v23 }
 0x311   : > { %5309 = vmatpush.xpose.msrb.mxu3 %v10497_v15  ;;  %12878 = vst [vmem:[#allocation99_spill] sm:$0xff] %v10513_v50  ;;  %v5252_v18 = vsub.f32 %v10490_v56, %v10527_v3 }
 0x312   : > { %3499 = vst.msk [vmem:[#allocation2 + $0x178] sm:$0xff] %vm142_vm2, %v3450_v26  ;;  %4523 = vmatmul.f32.vlgmr.msrb.gmra.mxu1 %v12881_v17  ;;  %v10521_v26 = vand.u32 4294901760, %v5268_v7  ;;  %v3737_v15 = vsel %vm142_vm2, %v3597_v32, 0.0  ;;  %v10537_v17 = vsub.f32 %v5181_v60, %v10513_v50  ;;  %v10542_v32 = vand.u32 4294901760, %v5260_v19 }
 0x313   : > { %5062 = vmatpush.xpose.msrb.mxu0 %v10239_v30  ;;  %v10504_v27 = vpop.f32.mrf.mxu0  ;;  %v12880_v30 = vld [vmem:[#allocation68_spill] sm:$0xff]  ;;  %12883 = vst [vmem:[#allocation78_spill] sm:$0xff] %v10527_v3  ;;  %5129 = vmatpush.xpose.msrb.mxu1 %v12884_v6  ;;  %v10547_v6 = vand.u32 4294901760, %v10516_v48  ;;  %v10568_v8 = vand.u32 4294901760, %v5252_v18 }
 0x314   : > { %5212 = vmatpush.xpose.msrb.mxu2 %v10431_v10  ;;  %12882 = vst [vmem:[#allocation68_spill] sm:$0xff] %v10521_v26  ;;  %4671 = vmatmul.f32.gmra.mxu3 %v12785_v47 }
 0x315   : > { %5315 = vmatpush.xpose.msrb.mxu3 %v10521_v26  ;;  %3738 = vadd.xlane.f32.xlu1 %v3737_v15  ;;  %12886 = vst [vmem:[#allocation102_spill] sm:$0xff] %v10537_v17 }
 0x316   : > { %4462 = vmatmul.f32.gmra.mxu0 %v12880_v30  ;;  %v10533_v30 = vand.u32 4294901760, %v5178_v40  ;;  %12887 = vst [vmem:[#allocation103_spill] sm:$0xff] %v10542_v32  ;;  %v10554_v26 = vpop.xlane.xlu2 %3696 }
 0x317   : > { %5066 = vmatpush.xpose.msrb.mxu0 %v10258_v63  ;;  %4614 = vmatmul.f32.gmra.mxu2 %v12785_v47  ;;  %v10540_v7 = vpop.f32.mrf.mxu3  ;;  %12888 = vst [vmem:[#allocation104_spill] sm:$0xff] %v10547_v6  ;;  %v10552_v47 = vpop.f32.mrf.mxu1  ;;  %v12889_v63 = vld [vmem:[#allocation48_spill] sm:$0xff] }
 0x318   : > { %12885 = vst [vmem:[#allocation101_spill] sm:$0xff] %v10533_v30  ;;  %5214 = vmatpush.xpose.msrb.mxu2 %v10438_v28  ;;  %5131 = vmatpush.xpose.msrb.mxu1 %v12889_v63  ;;  %v10561_v25 = vsub.f32 %v5178_v40, %v10533_v30  ;;  %v12895_v40 = vld [vmem:[#allocation70_spill] sm:$0xff] }
 0x319   : > { %v3550_v60 = vld [vmem:[#allocation2 + $0x178] sm:$0xff]  ;;  %5321 = vmatpush.xpose.msrb.mxu3 %v10542_v32  ;;  %12893 = vst [vmem:[#allocation62_spill] sm:$0xff] %v10568_v8  ;;  %v5244_v32 = vsub.f32 %v10516_v48, %v10547_v6  ;;  %v6735_v3 = vperm.slane %v10554_v26, %v12895_v40 }
 0x31a   : > { %v10558_v19 = vpop.f32.mrf.mxu2  ;;  %v3598_v49 = vmul.f32 %v3550_v60, %v3550_v60  ;;  %12890 = vst [vmem:[#allocation105_spill] sm:$0xff] %v10561_v25  ;;  %4529 = vmatmul.f32.gmra.mxu1 %v12892_v16  ;;  %v10574_v60 = vand.u32 4294901760, %v10537_v17 }
 0x31b   : > { %5070 = vmatpush.xpose.msrb.mxu0 %v10290_v2  ;;  %v10550_v15 = vpop.f32.mrf.mxu0  ;;  %v10565_v2 = vpop.xlane.xlu0 %3699 }
 0x31c   : > { %5216 = vmatpush.xpose.msrb.mxu2 %v10453_v55  ;;  %v3740_v63 = vsel %vm142_vm2, %v3598_v49, 0.0  ;;  %12894 = vst [vmem:[#allocation75_spill] sm:$0xff] %v10574_v60  ;;  %4675 = vmatmul.f32.gmra.mxu3 %v9765_v4  ;;  %v10589_v49 = vand.u32 4294901760, %v5244_v32  ;;  %v5236_v6 = vsub.f32 %v10537_v17, %v10574_v60  ;;  %v12918_v17 = vld [vmem:[#allocation59_spill] sm:$0xff] }
 0x31d   : > { %5133 = vmatpush.xpose.msrb.mxu1 %v10206_v12  ;;  %5327 = vmatpush.xpose.msrb.mxu3 %v10568_v8 }
 0x31e   : > { %4467 = vmatmul.f32.gmra.mxu0 %v12891_v42  ;;  %v12896_v42 = vld [vmem:[#allocation72_spill] sm:$0xff]  ;;  %3741 = vadd.xlane.f32.xlu2 %v3740_v63  ;;  %12898 = vst [vmem:[#allocation107_spill] sm:$0xff] %v10589_v49  ;;  %v12901_v63 = vld [vmem:[#allocation57_spill] sm:$0xff]  ;;  %v10608_v32 = vand.u32 4294901760, %v5236_v6 }
 0x31f   : > { %v6736_v0 = vperm.slane %v10565_v2, %v12896_v42  ;;  %5074 = vmatpush.xpose.msrb.mxu0 %v10335_v29  ;;  %4618 = vmatmul.f32.gmra.mxu2 %v9765_v4  ;;  %v10587_v16 = vpop.f32.mrf.mxu3  ;;  %v10594_v29 = vand.u32 4294901760, %v10561_v25 }
 0x320   : > { %5218 = vmatpush.xpose.msrb.mxu2 %v10468_v38  ;;  %12897 = vst [vmem:[#allocation106_spill] sm:$0xff] %v10587_v16 }
 0x321   : > { %v6737_v18 = vsel %vm6664_vm3, %v6736_v0, %v6735_v3  ;;  %12899 = vst [vmem:[#allocation108_spill] sm:$0xff] %v10594_v29  ;;  %v10599_v0 = vpop.f32.mrf.mxu1  ;;  %5135 = vmatpush.xpose.msrb.mxu1 %v10226_v34  ;;  %5333 = vmatpush.xpose.msrb.mxu3 %v10589_v49  ;;  %v12902_v3 = vld [vmem:[#allocation69_spill] sm:$0xff]  ;;  %v5228_v60 = vsub.f32 %v10561_v25, %v10594_v29  ;;  %v12904_v49 = vld [vmem:[#allocation79_spill] sm:$0xff] }
 0x322   : > { %v10603_v4 = vpop.f32.mrf.mxu2  ;;  %4535 = vmatmul.f32.gmra.mxu1 %v12902_v3  ;;  %12903 = vst [vmem:[#allocation57_spill] sm:$0xff] %v10608_v32  ;;  %v10610_v12 = vpop.xlane.xlu1 %3702 }
 0x323   : > { %5078 = vmatpush.xpose.msrb.mxu0 %v10350_v43  ;;  %v10597_v8 = vpop.f32.mrf.mxu0  ;;  %v6738_v34 = vperm.slane %v10610_v12, %v12904_v49  ;;  %v10625_v3 = vand.u32 4294901760, %v5228_v60  ;;  %v12911_v60 = vld [vmem:[#allocation66_spill] sm:$0xff] }
 0x324   : > { %12900 = vst [vmem:[#allocation109_spill] sm:$0xff] %v10597_v8  ;;  %5220 = vmatpush.xpose.msrb.mxu2 %v10487_v35  ;;  %4679 = vmatmul.f32.gmra.mxu3 %v9742_v31  ;;  %v12926_v35 = vld [vmem:[#allocation88_spill] sm:$0xff] }
 0x325   : > { %5137 = vmatpush.xpose.msrb.mxu1 %v10248_v46  ;;  %5339 = vmatpush.xpose.msrb.mxu3 %v10608_v32  ;;  %12906 = vst [vmem:[#allocation110_spill] sm:$0xff] %v10625_v3 }
 0x326   : > { %4472 = vmatmul.f32.gmra.mxu0 %v12901_v63  ;;  %v6739_v63 = vsel %vm6668_vm4, %v6738_v34, %v6737_v18  ;;  %v12910_v34 = vld [vmem:[#allocation54_spill] sm:$0xff]  ;;  %v12912_v18 = vld [vmem:[#allocation83_spill] sm:$0xff] }
 0x327   : > { %5082 = vmatpush.xpose.msrb.mxu0 %v10366_v58  ;;  %4622 = vmatmul.f32.gmra.mxu2 %v9742_v31  ;;  %v10623_v6 = vpop.f32.mrf.mxu3 }
 0x328   : > { %5222 = vmatpush.xpose.msrb.mxu2 %v10513_v50  ;;  %12905 = vst [vmem:[#allocation69_spill] sm:$0xff] %v10623_v6  ;;  %v12917_v6 = vld [vmem:[#allocation26_spill] sm:$0xff] }
 0x329   : > { %v10630_v25 = vpop.f32.mrf.mxu1  ;;  %5139 = vmatpush.xpose.msrb.mxu1 %v10273_v11  ;;  %5345 = vmatpush.xpose.msrb.mxu3 %v10625_v3  ;;  %v12919_v11 = vld [vmem:[#allocation85_spill] sm:$0xff] }
 0x32a   : > { %12908 = vst [vmem:[#allocation112_spill] sm:$0xff] %v10630_v25  ;;  %v10634_v32 = vpop.f32.mrf.mxu2  ;;  %v10638_v31 = vpop.xlane.xlu2 %3705  ;;  %4541 = vmatmul.f32.gmra.mxu1 %v12911_v60  ;;  %v12940_v25 = vld [vmem:[#allocation23_spill] sm:$0xff] }
 0x32b   : > { %5086 = vmatpush.xpose.msrb.mxu0 %v10383_v39  ;;  %v10628_v29 = vpop.f32.mrf.mxu0  ;;  %12909 = vst [vmem:[#allocation113_spill] sm:$0xff] %v10634_v32  ;;  %v6740_v46 = vperm.slane %v10638_v31, %v12912_v18 }
 0x32c   : > { %12907 = vst [vmem:[#allocation111_spill] sm:$0xff] %v10628_v29  ;;  %5224 = vmatpush.xpose.msrb.mxu2 %v10533_v30  ;;  %4683 = vmatmul.f32.gmra.mxu3 %v9726_v5 }
 0x32d   : > { %5141 = vmatpush.xpose.msrb.mxu1 %v10322_v44  ;;  %v6741_v50 = vsel %vm6672_vm5, %v6740_v46, %v6739_v63 }
 0x32e   : > { %4477 = vmatmul.f32.gmra.mxu0 %v12910_v34 }
 0x32f   : > { %4626 = vmatmul.f32.gmra.mxu2 %v9726_v5  ;;  %v10647_v3 = vpop.f32.mrf.mxu3 }
 0x330   : > { %12913 = vst [vmem:[#allocation54_spill] sm:$0xff] %v10647_v3 }
 0x331   : > { %v10651_v30 = vpop.f32.mrf.mxu1  ;;  %5143 = vmatpush.xpose.msrb.mxu1 %v10343_v52 }
 0x332   : > { %12915 = vst [vmem:[#allocation114_spill] sm:$0xff] %v10651_v30  ;;  %v10654_v60 = vpop.f32.mrf.mxu2  ;;  %v10657_v29 = vpop.xlane.xlu0 %3708  ;;  %4547 = vmatmul.f32.gmra.mxu1 %v12918_v17  ;;  %v12925_v17 = vld [vmem:[#allocation56_spill] sm:$0xff] }
 0x333   : > { %v10649_v34 = vpop.f32.mrf.mxu0  ;;  %12916 = vst [vmem:[#allocation115_spill] sm:$0xff] %v10654_v60  ;;  %v6742_v46 = vperm.slane %v10657_v29, %v12919_v11  ;;  %v12924_v60 = vld [vmem:[#allocation49_spill] sm:$0xff] }
 0x334   : > { %12914 = vst [vmem:[#allocation66_spill] sm:$0xff] %v10649_v34  ;;  %4687 = vmatmul.f32.gmra.mxu3 %v9711_v61 }
 0x335   : > { %v6743_v5 = vsel %vm6676_vm6, %v6742_v46, %v6741_v50 }
 0x336   : > { %4482 = vmatmul.f32.gmra.mxu0 %v12917_v6 }
 0x337   : > { %4630 = vmatmul.f32.gmra.mxu2 %v9711_v61  ;;  %v10665_v63 = vpop.f32.mrf.mxu3 }
 0x338   : > { %12920 = vst [vmem:[#allocation26_spill] sm:$0xff] %v10665_v63 }
 0x339   : > { %v10669_v34 = vpop.f32.mrf.mxu1 }
 0x33a   : > { %12922 = vst [vmem:[#allocation116_spill] sm:$0xff] %v10669_v34  ;;  %v10671_v6 = vpop.f32.mrf.mxu2  ;;  %4553 = vmatmul.f32.gmra.mxu1 %v12925_v17  ;;  %v3712_v30 = vpop.xlane.xlu1 %3711  ;;  %v12933_v34 = vld [vmem:[#allocation17_spill] sm:$0xff] }
 0x33b   : > { %v10667_v3 = vpop.f32.mrf.mxu0  ;;  %12923 = vst [vmem:[#allocation117_spill] sm:$0xff] %v10671_v6  ;;  %v6744_v32 = vperm.slane %v3712_v30, %v12926_v35  ;;  %v12932_v6 = vld [vmem:[#allocation38_spill] sm:$0xff]  ;;  %v6663_v48 = vperm.slane %v12933_v34, %v12896_v42  ;;  %v12938_v42 = vld [vmem:[#allocation51_spill] sm:$0xff] }
 0x33c   : > { %12921 = vst [vmem:[#allocation59_spill] sm:$0xff] %v10667_v3  ;;  %4691 = vmatmul.f32.gmra.mxu3 %v9696_v20 }
 0x33d   : > { %v6745_v50 = vsel %vm6680_vm7, %v6744_v32, %v6743_v5  ;;  %v3915_v32 = vadd.f32 %v10506_v36, %v10464_v9  ;;  %v6675_v9 = vperm.slane %v12938_v42, %v12919_v11  ;;  %v12943_v42 = vld [vmem:[#allocation18_spill] sm:$0xff] }
 0x33e   : > { %4487 = vmatmul.f32.gmra.mxu0 %v12924_v60  ;;  %v12931_v60 = vld [vmem:[#allocation19_spill] sm:$0xff] }
 0x33f   : > { %4634 = vmatmul.f32.gmra.mxu2 %v9696_v20  ;;  %v10679_v61 = vpop.f32.mrf.mxu3  ;;  %v12934_v20 = vld [vmem:[#allocation91_spill] sm:$0xff] }
 0x340   : > { %12927 = vst [vmem:[#allocation49_spill] sm:$0xff] %v10679_v61  ;;  %v12935_v61 = vld [vmem:[#allocation24_spill] sm:$0xff] }
 0x341   : > { %v10683_v63 = vpop.f32.mrf.mxu1 }
 0x342   : > { %12929 = vst [vmem:[#allocation88_spill] sm:$0xff] %v10683_v63  ;;  %v10685_v3 = vpop.f32.mrf.mxu2  ;;  %4559 = vmatmul.f32.gmra.mxu1 %v12932_v6 }
 0x343   : > { %v10681_v46 = vpop.f32.mrf.mxu0  ;;  %12930 = vst [vmem:[#allocation118_spill] sm:$0xff] %v10685_v3  ;;  %v3715_v17 = vpop.xlane.xlu2 %3714  ;;  %v12936_v3 = vld [vmem:[#allocation47_spill] sm:$0xff] }
 0x344   : > { %12928 = vst [vmem:[#allocation56_spill] sm:$0xff] %v10681_v46  ;;  %v6746_v5 = vperm.slane %v3715_v17, %v12934_v20  ;;  %4695 = vmatmul.f32.gmra.mxu3 %v9688_v41  ;;  %v6667_v46 = vperm.slane %v12935_v61, %v12904_v49  ;;  %v6661_v63 = vperm.slane %v12936_v3, %v12895_v40 }
 0x345   : > { %v6679_v49 = vperm.slane %v12940_v25, %v12926_v35  ;;  %v3981_v61 = vadd.f32 %v10510_v51, %v3915_v32  ;;  %v12944_v32 = vld [vmem:[#allocation45_spill] sm:$0xff] }
 0x346   : > { %4492 = vmatmul.f32.gmra.mxu0 %v12931_v60  ;;  %v12937_v60 = vld [vmem:[#allocation15_spill] sm:$0xff]  ;;  %v6747_v6 = vsel %vm6684_vm8, %v6746_v5, %v6745_v50  ;;  %v6665_v16 = vsel %vm6664_vm3, %v6663_v48, %v6661_v63  ;;  %v12941_v50 = vld [vmem:[#allocation16_spill] sm:$0xff] }
 0x347   : > { %v6671_v38 = vperm.slane %v12937_v60, %v12912_v18  ;;  %4638 = vmatmul.f32.gmra.mxu2 %v9688_v41  ;;  %v10705_v36 = vpop.f32.mrf.mxu3  ;;  %v6669_v18 = vsel %vm6668_vm4, %v6667_v46, %v6665_v16  ;;  %v6683_v41 = vperm.slane %v12941_v50, %v12934_v20  ;;  %v4047_v46 = vadd.f32 %v10494_v22, %v3981_v61 }
 0x348   : > { %12939 = vst [vmem:[#allocation19_spill] sm:$0xff] %v10705_v36  ;;  %v12942_v36 = vld [vmem:[#allocation6_spill] sm:$0xff] }
 0x349   : > { %v10711_v40 = vpop.f32.mrf.mxu1  ;;  %v6673_v11 = vsel %vm6672_vm5, %v6671_v38, %v6669_v18  ;;  %v6687_v48 = vperm.slane %v12943_v42, %v12942_v36 }
 0x34a   : > { %v10716_v5 = vpop.f32.mrf.mxu2  ;;  %v6677_v63 = vsel %vm6676_vm6, %v6675_v9, %v6673_v11  ;;  %4565 = vmatmul.f32.gmra.mxu1 %v12944_v32  ;;  %v12954_v32 = vld [vmem:[#allocation109_spill] sm:$0xff] }
 0x34b   : > { %v4133_v8 = vpop.f32.mrf.mxu0  ;;  %v3718_v51 = vpop.xlane.xlu0 %3717  ;;  %v6681_v16 = vsel %vm6680_vm7, %v6679_v49, %v6677_v63 }
 0x34c   : > { %v6748_v20 = vperm.slane %v3718_v51, %v12942_v36  ;;  %5001 = vmatmul.f32.vlgmr.msra.gmra.mxu3 %v10383_v39  ;;  %v6685_v38 = vsel %vm6684_vm8, %v6683_v41, %v6681_v16  ;;  %v4134_v18 = vadd.f32 %v4133_v8, %v4047_v46  ;;  %v12955_v16 = vld [vmem:[#allocation112_spill] sm:$0xff] }
 0x34d   : > { %5607 = vmatpush.xpose.msra.mxu3 %v10421_v57  ;;  %v10734_v11 = vsel %vm6688_vm9, %v6687_v48, %v6685_v38  ;;  %v3927_v46 = vadd.f32 %v12955_v16, %v12954_v32  ;;  %v12966_v16 = vld [vmem:[#allocation33_spill] sm:$0xff] }
 0x34e   : > { %4752 = vmatmul.f32.vlgmr.msra.gmra.mxu0 %v10407_v59  ;;  %v3919_v59 = vadd.f32 %v10552_v47, %v10504_v27  ;;  %v6749_v9 = vsel %vm6688_vm9, %v6748_v20, %v6747_v6 }
 0x34f   : > { %5389 = vmatpush.xpose.msra.mxu0 %v10434_v14  ;;  %4935 = vmatmul.f32.vlgmr.msra.gmra.mxu2 %v10362_v24  ;;  %v10738_v22 = vadd.f32 %v6749_v9, %v3718_v51  ;;  %v10741_v39 = vpop.f32.mrf.mxu3  ;;  %v10745_v27 = vadd.f32 %v6749_v9, %v10554_v26  ;;  %v10748_v47 = vadd.f32 %v6749_v9, %v10565_v2  ;;  %v12985_v14 = vld [vmem:[#allocation28_spill] sm:$0xff] }
 0x350   : > { %5536 = vmatpush.xpose.msra.mxu2 %v10447_v54  ;;  %v10751_v61 = vadd.f32 %v6749_v9, %v10610_v12  ;;  %v10754_v24 = vadd.f32 %v6749_v9, %v10638_v31  ;;  %v10757_v20 = vadd.f32 %v6749_v9, %v10657_v29  ;;  %v10759_v6 = vadd.f32 %v6749_v9, %v3712_v30 }
 0x351   : > { %12945 = vst [vmem:[#allocation38_spill] sm:$0xff] %v10738_v22  ;;  %v4190_v8 = vpop.f32.mrf.mxu1  ;;  %v3986_v41 = vadd.f32 %v10558_v19, %v3919_v59  ;;  %5609 = vmatpush.xpose.msra.mxu3 %v10431_v10  ;;  %v10765_v48 = vadd.f32 %v6749_v9, %v3715_v17  ;;  %v6813_v29 = vadd.f32 %v10734_v11, %v12936_v3  ;;  %v12956_v59 = vld [vmem:[#allocation106_spill] sm:$0xff] }
 0x352   : > { %12946 = vst [vmem:[#allocation17_spill] sm:$0xff] %v10745_v27  ;;  %v4191_v26 = vadd.f32 %v4190_v8, %v4134_v18  ;;  %v10763_v2 = vpop.f32.mrf.mxu2  ;;  %4869 = vmatmul.f32.vlgmr.msra.gmra.mxu1 %v10343_v52  ;;  %v3923_v30 = vadd.f32 %v10599_v0, %v10550_v15  ;;  %v12973_v22 = vld [vmem:[#allocation114_spill] sm:$0xff] }
 0x353   : > { %5392 = vmatpush.xpose.msra.mxu0 %v10442_v62  ;;  %12947 = vst [vmem:[#allocation47_spill] sm:$0xff] %v10748_v47  ;;  %v4137_v49 = vpop.f32.mrf.mxu0  ;;  %v4053_v19 = vadd.f32 %v10540_v7, %v3986_v41  ;;  %5461 = vmatpush.xpose.msra.mxu1 %v10421_v57  ;;  %v12981_v47 = vld [vmem:[#allocation115_spill] sm:$0xff]  ;;  %v12983_v27 = vld [vmem:[#allocation34_spill] sm:$0xff] }
 0x354   : > { %12948 = vst [vmem:[#allocation15_spill] sm:$0xff] %v10751_v61  ;;  %v6861_v12 = vmul.f32 2.0, %v4191_v26  ;;  %5540 = vmatpush.xpose.msra.mxu2 %v10462_v53  ;;  %5007 = vmatmul.f32.gmra.mxu3 %v10366_v58  ;;  %v3991_v7 = vadd.f32 %v10603_v4, %v3923_v30  ;;  %v6814_v4 = vadd.f32 %v10734_v11, %v12933_v34  ;;  %v12959_v34 = vld [vmem:[#allocation78_spill] sm:$0xff]  ;;  %v12962_v30 = vld [vmem:[#allocation72_spill] sm:$0xff]  ;;  %v12979_v61 = vld [vmem:[#allocation79_spill] sm:$0xff] }
 0x355   : > { %12949 = vst [vmem:[#allocation23_spill] sm:$0xff] %v10754_v24  ;;  %5611 = vmatpush.xpose.msra.mxu3 %v10438_v28  ;;  %v4138_v31 = vadd.f32 %v4137_v49, %v4053_v19  ;;  %v12958_v49 = vld [vmem:[#allocation27_spill] sm:$0xff]  ;;  %v12984_v53 = vld [vmem:[#allocation108_spill] sm:$0xff]  ;;  %v12989_v62 = vld [vmem:[#allocation54_spill] sm:$0xff] }
 0x356   : > { %12950 = vst [vmem:[#allocation16_spill] sm:$0xff] %v10757_v20  ;;  %4760 = vmatmul.f32.gmra.mxu0 %v10397_v33  ;;  %v6909_v33 = vsub.f32 %v6813_v29, %v6861_v12  ;;  %v4059_v18 = vadd.f32 %v12956_v59, %v3991_v7  ;;  %v12961_v12 = vld [vmem:[#allocation70_spill] sm:$0xff]  ;;  %v12964_v7 = vld [vmem:[#allocation113_spill] sm:$0xff]  ;;  %v12977_v20 = vld [vmem:[#allocation75_spill] sm:$0xff] }
 0x357   : > { %12951 = vst [vmem:[#allocation6_spill] sm:$0xff] %v10759_v6  ;;  %5395 = vmatpush.xpose.msra.mxu0 %v10456_v1  ;;  %4940 = vmatmul.f32.gmra.mxu2 %v10346_v45  ;;  %v10781_v3 = vpop.f32.mrf.mxu3  ;;  %v12974_v6 = vld [vmem:[#allocation69_spill] sm:$0xff] }
 0x358   : > { %12952 = vst [vmem:[#allocation18_spill] sm:$0xff] %v10765_v48  ;;  %5544 = vmatpush.xpose.msra.mxu2 %v10475_v13  ;;  %v10783_v58 = vmax.f32 %v6909_v33, 0.0  ;;  %5463 = vmatpush.xpose.msra.mxu1 %v10431_v10  ;;  %v12963_v33 = vld [vmem:[#allocation100_spill] sm:$0xff]  ;;  %v13026_v10 = vld [vmem:[#allocation37_spill] sm:$0xff] }
 0x359   : > { %v4194_v15 = vpop.f32.mrf.mxu1  ;;  %5613 = vmatpush.xpose.msra.mxu3 %v10453_v55 }
 0x35a   : > { %12953 = vst [vmem:[#allocation45_spill] sm:$0xff] %v10783_v58  ;;  %v4195_v0 = vadd.f32 %v4194_v15, %v4138_v31  ;;  %v10789_v63 = vpop.f32.mrf.mxu2  ;;  %v7005_v45 = vsel %vm142_vm2, %v10783_v58, -inf  ;;  %4873 = vmatmul.f32.gmra.mxu1 %v10322_v44 }
 0x35b   : > { %5398 = vmatpush.xpose.msra.mxu0 %v10471_v37  ;;  %v4141_v17 = vpop.f32.mrf.mxu0  ;;  %7006 = vmax.xlane.f32.xlu0 %v7005_v45  ;;  %v10802_v38 = vpop.xlane.xlu1 %3720 }
 0x35c   : > { %v6862_v51 = vmul.f32 2.0, %v4195_v0  ;;  %5548 = vmatpush.xpose.msra.mxu2 %v10502_v23  ;;  %5013 = vmatmul.f32.gmra.mxu3 %v10350_v43  ;;  %v4142_v8 = vadd.f32 %v4141_v17, %v4059_v18  ;;  %v6750_v29 = vperm.slane %v10802_v38, %v12961_v12  ;;  %v3996_v17 = vadd.f32 %v12964_v7, %v3927_v46  ;;  %v12965_v0 = vld [vmem:[#allocation58_spill] sm:$0xff]  ;;  %v12967_v18 = vld [vmem:[#allocation104_spill] sm:$0xff]  ;;  %v12970_v7 = vld [vmem:[#allocation39_spill] sm:$0xff] }
 0x35d   : > { %5465 = vmatpush.xpose.msra.mxu1 %v10438_v28  ;;  %v12969_v46 = vld [vmem:[#allocation24_spill] sm:$0xff] }
 0x35e   : > { %4768 = vmatmul.f32.gmra.mxu0 %v10386_v21  ;;  %v12957_v21 = vld [vmem:[#allocation77_spill] sm:$0xff]  ;;  %v6910_v9 = vsub.f32 %v6814_v4, %v6862_v51 }
 0x35f   : > { %5401 = vmatpush.xpose.msra.mxu0 %v10490_v56  ;;  %5615 = vmatpush.xpose.msra.mxu3 %v12957_v21  ;;  %v10809_v43 = vpop.f32.mrf.mxu3  ;;  %v13000_v56 = vld [vmem:[#allocation26_spill] sm:$0xff] }
 0x360   : > { %4945 = vmatmul.f32.gmra.mxu2 %v12958_v49  ;;  %v10811_v41 = vpop.xlane.xlu2 %3723  ;;  %v10813_v26 = vmax.f32 %v6910_v9, 0.0  ;;  %v12968_v9 = vld [vmem:[#allocation87_spill] sm:$0xff]  ;;  %v6815_v49 = vadd.f32 %v10734_v11, %v12969_v46 }
 0x361   : > { %5552 = vmatpush.xpose.msra.mxu2 %v12959_v34  ;;  %v6751_v19 = vperm.slane %v10811_v41, %v12962_v30  ;;  %v4198_v15 = vpop.f32.mrf.mxu1  ;;  %5467 = vmatpush.xpose.msra.mxu1 %v10453_v55 }
 0x362   : > { %12960 = vst [vmem:[#allocation109_spill] sm:$0xff] %v10813_v26  ;;  %v4199_v45 = vadd.f32 %v4198_v15, %v4142_v8  ;;  %v10823_v51 = vpop.f32.mrf.mxu2  ;;  %v7008_v4 = vsel %vm142_vm2, %v10813_v26, -inf  ;;  %4877 = vmatmul.f32.gmra.mxu1 %v12968_v9  ;;  %v12971_v8 = vld [vmem:[#allocation102_spill] sm:$0xff]  ;;  %v12972_v15 = vld [vmem:[#allocation111_spill] sm:$0xff] }
 0x363   : > { %5404 = vmatpush.xpose.msra.mxu0 %v12963_v33  ;;  %v4145_v31 = vpop.f32.mrf.mxu0  ;;  %5617 = vmatpush.xpose.msra.mxu3 %v12965_v0  ;;  %v6752_v32 = vsel %vm6664_vm3, %v6751_v19, %v6750_v29  ;;  %v3931_v48 = vadd.f32 %v12973_v22, %v12972_v15  ;;  %v4065_v29 = vadd.f32 %v12974_v6, %v3996_v17  ;;  %v12975_v19 = vld [vmem:[#allocation99_spill] sm:$0xff]  ;;  %v12980_v6 = vld [vmem:[#allocation105_spill] sm:$0xff]  ;;  %v13004_v26 = vld [vmem:[#allocation118_spill] sm:$0xff] }
 0x364   : > { %7009 = vmax.xlane.f32.xlu1 %v7008_v4  ;;  %v6863_v59 = vmul.f32 2.0, %v4199_v45  ;;  %5019 = vmatmul.f32.gmra.mxu3 %v12970_v7  ;;  %v12976_v4 = vld [vmem:[#allocation22_spill] sm:$0xff] }
 0x365   : > { %5556 = vmatpush.xpose.msra.mxu2 %v12967_v18  ;;  %5469 = vmatpush.xpose.msra.mxu1 %v12957_v21 }
 0x366   : > { %4776 = vmatmul.f32.gmra.mxu0 %v12966_v16  ;;  %v6911_v45 = vsub.f32 %v6815_v49, %v6863_v59  ;;  %v4146_v16 = vadd.f32 %v4145_v31, %v4065_v29  ;;  %v10844_v7 = vpop.xlane.xlu0 %3726  ;;  %v4001_v59 = vadd.f32 %v12981_v47, %v3931_v48  ;;  %v12982_v31 = vld [vmem:[#allocation101_spill] sm:$0xff]  ;;  %v6816_v47 = vadd.f32 %v10734_v11, %v12937_v60  ;;  %v12986_v48 = vld [vmem:[#allocation43_spill] sm:$0xff] }
 0x367   : > { %5407 = vmatpush.xpose.msra.mxu0 %v12971_v8  ;;  %5619 = vmatpush.xpose.msra.mxu3 %v12975_v19  ;;  %v10842_v46 = vpop.f32.mrf.mxu3  ;;  %v6753_v22 = vperm.slane %v10844_v7, %v12979_v61  ;;  %v12992_v60 = vld [vmem:[#allocation83_spill] sm:$0xff] }
 0x368   : > { %4950 = vmatmul.f32.gmra.mxu2 %v12976_v4  ;;  %v10846_v24 = vmax.f32 %v6911_v45, 0.0  ;;  %v4071_v23 = vadd.f32 %v12989_v62, %v4001_v59  ;;  %v12994_v59 = vld [vmem:[#allocation42_spill] sm:$0xff] }
 0x369   : > { %5560 = vmatpush.xpose.msra.mxu2 %v12977_v20  ;;  %v4202_v15 = vpop.f32.mrf.mxu1  ;;  %5471 = vmatpush.xpose.msra.mxu1 %v12965_v0  ;;  %v6754_v4 = vsel %vm6668_vm4, %v6753_v22, %v6752_v32  ;;  %v12990_v22 = vld [vmem:[#allocation46_spill] sm:$0xff] }
 0x36a   : > { %12978 = vst [vmem:[#allocation112_spill] sm:$0xff] %v10846_v24  ;;  %v4203_v49 = vadd.f32 %v4202_v15, %v4146_v16  ;;  %v10854_v29 = vpop.f32.mrf.mxu2  ;;  %v7011_v45 = vsel %vm142_vm2, %v10846_v24, -inf  ;;  %4881 = vmatmul.f32.gmra.mxu1 %v12985_v14  ;;  %v12987_v16 = vld [vmem:[#allocation66_spill] sm:$0xff]  ;;  %v12988_v15 = vld [vmem:[#allocation116_spill] sm:$0xff] }
 0x36b   : > { %5410 = vmatpush.xpose.msra.mxu0 %v12980_v6  ;;  %v4149_v17 = vpop.f32.mrf.mxu0  ;;  %5621 = vmatpush.xpose.msra.mxu3 %v12982_v31  ;;  %v3935_v13 = vadd.f32 %v12988_v15, %v12987_v16  ;;  %v12993_v16 = vld [vmem:[#allocation117_spill] sm:$0xff]  ;;  %v13023_v6 = vld [vmem:[#allocation19_spill] sm:$0xff] }
 0x36c   : > { %7012 = vmax.xlane.f32.xlu2 %v7011_v45  ;;  %v6864_v54 = vmul.f32 2.0, %v4203_v49  ;;  %5025 = vmatmul.f32.gmra.mxu3 %v12986_v48 }
 0x36d   : > { %5564 = vmatpush.xpose.msra.mxu2 %v12984_v53  ;;  %5473 = vmatpush.xpose.msra.mxu1 %v12975_v19  ;;  %v4006_v15 = vadd.f32 %v12993_v16, %v3935_v13  ;;  %v12997_v13 = vld [vmem:[#allocation40_spill] sm:$0xff]  ;;  %v12998_v16 = vld [vmem:[#allocation59_spill] sm:$0xff] }
 0x36e   : > { %4784 = vmatmul.f32.gmra.mxu0 %v12983_v27  ;;  %v6912_v32 = vsub.f32 %v6816_v47, %v6864_v54  ;;  %v4150_v27 = vadd.f32 %v4149_v17, %v4071_v23  ;;  %v10872_v45 = vpop.xlane.xlu1 %3729 }
 0x36f   : > { %v10870_v49 = vpop.f32.mrf.mxu3  ;;  %v6755_v48 = vperm.slane %v10872_v45, %v12992_v60  ;;  %v4077_v24 = vadd.f32 %v13000_v56, %v4006_v15  ;;  %v13007_v15 = vld [vmem:[#allocation25_spill] sm:$0xff] }
 0x370   : > { %4955 = vmatmul.f32.gmra.mxu2 %v12990_v22  ;;  %v10874_v1 = vmax.f32 %v6912_v32, 0.0  ;;  %v12995_v32 = vld [vmem:[#allocation84_spill] sm:$0xff]  ;;  %v12996_v22 = vld [vmem:[#allocation51_spill] sm:$0xff] }
 0x371   : > { %v4206_v37 = vpop.f32.mrf.mxu1  ;;  %5475 = vmatpush.xpose.msra.mxu1 %v12982_v31  ;;  %v6756_v17 = vsel %vm6672_vm5, %v6755_v48, %v6754_v4  ;;  %v6817_v18 = vadd.f32 %v10734_v11, %v12996_v22 }
 0x372   : > { %12991 = vst [vmem:[#allocation106_spill] sm:$0xff] %v10874_v1  ;;  %v4207_v62 = vadd.f32 %v4206_v37, %v4150_v27  ;;  %v10880_v54 = vpop.f32.mrf.mxu2  ;;  %v7014_v23 = vsel %vm142_vm2, %v10874_v1, -inf  ;;  %4885 = vmatmul.f32.gmra.mxu1 %v12995_v32  ;;  %v12999_v37 = vld [vmem:[#allocation88_spill] sm:$0xff]  ;;  %v13001_v1 = vld [vmem:[#allocation14_spill] sm:$0xff] }
 0x373   : > { %v4153_v34 = vpop.f32.mrf.mxu0  ;;  %7015 = vmax.xlane.f32.xlu0 %v7014_v23  ;;  %v3939_v27 = vadd.f32 %v12999_v37, %v12998_v16 }
 0x374   : > { %v6865_v47 = vmul.f32 2.0, %v4207_v62  ;;  %5031 = vmatmul.f32.gmra.mxu3 %v12997_v13  ;;  %v4154_v4 = vadd.f32 %v4153_v34, %v4077_v24  ;;  %v13005_v24 = vld [vmem:[#allocation44_spill] sm:$0xff]  ;;  %v13006_v34 = vld [vmem:[#allocation13_spill] sm:$0xff] }
 0x375   : > { %v4011_v53 = vadd.f32 %v13004_v26, %v3939_v27  ;;  %v13008_v26 = vld [vmem:[#allocation56_spill] sm:$0xff]  ;;  %v13009_v27 = vld [vmem:[#allocation49_spill] sm:$0xff] }
 0x376   : > { %4792 = vmatmul.f32.gmra.mxu0 %v12994_v59  ;;  %v6913_v20 = vsub.f32 %v6817_v18, %v6865_v47  ;;  %v10896_v23 = vpop.xlane.xlu2 %3732  ;;  %v13003_v59 = vld [vmem:[#allocation85_spill] sm:$0xff]  ;;  %v6818_v18 = vadd.f32 %v10734_v11, %v12940_v25  ;;  %v3943_v47 = vadd.f32 %v10711_v40, %v13008_v26 }
 0x377   : > { %v10894_v48 = vpop.f32.mrf.mxu3  ;;  %v6757_v22 = vperm.slane %v10896_v23, %v13003_v59 }
 0x378   : > { %4960 = vmatmul.f32.gmra.mxu2 %v13001_v1  ;;  %v10898_v62 = vmax.f32 %v6913_v20, 0.0  ;;  %v4016_v40 = vadd.f32 %v10716_v5, %v3943_v47 }
 0x379   : > { %v4210_v13 = vpop.f32.mrf.mxu1  ;;  %v10908_v56 = vsel %vm6676_vm6, %v6757_v22, %v6756_v17 }
 0x37a   : > { %13002 = vst [vmem:[#allocation77_spill] sm:$0xff] %v10898_v62  ;;  %v4211_v16 = vadd.f32 %v4210_v13, %v4154_v4  ;;  %v10903_v37 = vpop.f32.mrf.mxu2  ;;  %v7017_v1 = vsel %vm142_vm2, %v10898_v62, -inf  ;;  %4889 = vmatmul.f32.gmra.mxu1 %v13006_v34  ;;  %v4083_v4 = vadd.f32 %v13009_v27, %v4011_v53  ;;  %v13010_v62 = vld [vmem:[#allocation81_spill] sm:$0xff]  ;;  %v6819_v27 = vadd.f32 %v10734_v11, %v12941_v50  ;;  %v13022_v50 = vld [vmem:[#allocation63_spill] sm:$0xff] }
 0x37b   : > { %v4157_v33 = vpop.f32.mrf.mxu0  ;;  %7018 = vmax.xlane.f32.xlu1 %v7017_v1 }
 0x37c   : > { %v6866_v20 = vmul.f32 2.0, %v4211_v16  ;;  %5037 = vmatmul.f32.gmra.mxu3 %v13007_v15  ;;  %v4158_v17 = vadd.f32 %v4157_v33, %v4083_v4  ;;  %v7539_v16 = vld [vmem:[#allocation2 + $0x138] sm:$0xff]  ;;  %v13013_v15 = vld [vmem:[#allocation52_spill] sm:$0xff]  ;;  %v13017_v4 = vld [vmem:[#allocation50_spill] sm:$0xff] }
 0x37d   : > { %v6691_v58 = vperm.slane %v13013_v15, %v12962_v30  ;;  %v6690_v30 = vperm.slane %v13017_v4, %v12961_v12  ;;  %v4089_v12 = vadd.f32 %v13023_v6, %v4016_v40 }
 0x37e   : > { %4800 = vmatmul.f32.gmra.mxu0 %v13005_v24  ;;  %v6914_v13 = vsub.f32 %v6818_v18, %v6866_v20  ;;  %v5677_v24 = vsel %vm142_vm2, %v7539_v16, 0  ;;  %v13016_v18 = vld [vmem:[#allocation9_spill] sm:$0xff]  ;;  %v13019_v16 = vld [vmem:[#allocation48_spill] sm:$0xff] }
 0x37f   : > { %v10919_v22 = vpop.f32.mrf.mxu3  ;;  %v10939_v47 = vand.u32 4294901760, %v5677_v24 }
 0x380   : > { %4965 = vmatmul.f32.gmra.mxu2 %v13010_v62  ;;  %13011 = vst [vmem:[#allocation27_spill] sm:$0xff] %v10919_v22  ;;  %v10921_v1 = vmax.f32 %v6914_v13, 0.0  ;;  %v13015_v62 = vld [vmem:[#allocation35_spill] sm:$0xff]  ;;  %v7540_v13 = vld [vmem:[#allocation2 + $0x130] sm:$0xff] }
 0x381   : > { %v4214_v25 = vpop.f32.mrf.mxu1  ;;  %v6693_v20 = vperm.slane %v13015_v62, %v12979_v61  ;;  %v5674_v5 = vsel %vm142_vm2, %v7540_v13, 0  ;;  %13018 = vst [vmem:[#allocation113_spill] sm:$0xff] %v10939_v47  ;;  %v13024_v22 = vld [vmem:[#allocation60_spill] sm:$0xff] }
 0x382   : > { %13012 = vst [vmem:[#allocation70_spill] sm:$0xff] %v10921_v1  ;;  %v4215_v26 = vadd.f32 %v4214_v25, %v4158_v17  ;;  %v10927_v53 = vpop.f32.mrf.mxu2  ;;  %v7020_v33 = vsel %vm142_vm2, %v10921_v1, -inf  ;;  %4893 = vmatmul.f32.gmra.mxu1 %v13019_v16  ;;  %v13020_v25 = vld [vmem:[#allocation53_spill] sm:$0xff]  ;;  %v6697_v1 = vperm.slane %v13022_v50, %v13003_v59 }
 0x383   : > { %v4161_v8 = vpop.f32.mrf.mxu0  ;;  %13014 = vst [vmem:[#allocation72_spill] sm:$0xff] %v10927_v53  ;;  %7021 = vmax.xlane.f32.xlu2 %v7020_v33  ;;  %v6695_v61 = vperm.slane %v13020_v25, %v12992_v60  ;;  %v13021_v33 = vld [vmem:[#allocation11_spill] sm:$0xff]  ;;  %v10952_v53 = vand.u32 4294901760, %v5674_v5 }
 0x384   : > { %v6867_v17 = vmul.f32 2.0, %v4215_v26  ;;  %5043 = vmatmul.f32.gmra.mxu3 %v13021_v33  ;;  %v6699_v26 = vperm.slane %v13024_v22, %v12926_v35  ;;  %v7541_v60 = vld [vmem:[#allocation2 + $0x128] sm:$0xff] }
 0x385   : > { %13025 = vst [vmem:[#allocation58_spill] sm:$0xff] %v10952_v53  ;;  %v5671_v33 = vsel %vm142_vm2, %v7541_v60, 0 }
 0x386   : > { %4808 = vmatmul.f32.gmra.mxu0 %v13016_v18  ;;  %v6692_v18 = vsel %vm6664_vm3, %v6691_v58, %v6690_v30  ;;  %v6915_v57 = vsub.f32 %v6819_v27, %v6867_v17  ;;  %v10957_v58 = vsub.f32 %v5677_v24, %v10939_v47  ;;  %v4162_v30 = vadd.f32 %v4161_v8, %v4089_v12  ;;  %v13030_v27 = vld [vmem:[#allocation64_spill] sm:$0xff]  ;;  %v13031_v8 = vld [vmem:[#allocation74_spill] sm:$0xff] }
 0x387   : > { %v6694_v13 = vsel %vm6668_vm4, %v6693_v20, %v6692_v18  ;;  %v10959_v59 = vpop.f32.mrf.mxu3  ;;  %v13029_v20 = vld [vmem:[#allocation91_spill] sm:$0xff]  ;;  %v6703_v12 = vperm.slane %v13031_v8, %v12942_v36  ;;  %v7543_v8 = vld [vmem:[#allocation2 + $0x118] sm:$0xff] }
 0x388   : > { %4970 = vmatmul.f32.gmra.mxu2 %v13026_v10  ;;  %13027 = vst [vmem:[#allocation33_spill] sm:$0xff] %v10957_v58  ;;  %v10961_v6 = vmax.f32 %v6915_v57, 0.0  ;;  %v6696_v40 = vsel %vm6672_vm5, %v6695_v61, %v6694_v13  ;;  %v6701_v17 = vperm.slane %v13030_v27, %v13029_v20  ;;  %v7542_v57 = vld [vmem:[#allocation2 + $0x120] sm:$0xff]  ;;  %v10974_v61 = vand.u32 4294901760, %v5671_v33 }
 0x389   : > { %v4218_v18 = vpop.f32.mrf.mxu1  ;;  %v6698_v10 = vsel %vm6676_vm6, %v6697_v1, %v6696_v40  ;;  %v5668_v60 = vsel %vm142_vm2, %v7542_v57, 0  ;;  %v10977_v13 = vsub.f32 %v5674_v5, %v10952_v53  ;;  %v6820_v1 = vadd.f32 %v10734_v11, %v12943_v42  ;;  %v10983_v40 = vpop.xlane.xlu0 %3735 }
 0x38a   : > { %13028 = vst [vmem:[#allocation87_spill] sm:$0xff] %v10961_v6  ;;  %v4219_v16 = vadd.f32 %v4218_v18, %v4162_v30  ;;  %v10967_v50 = vpop.f32.mrf.mxu2  ;;  %v7023_v24 = vsel %vm142_vm2, %v10961_v6, -inf  ;;  %v6700_v30 = vsel %vm6680_vm7, %v6699_v26, %v6698_v10  ;;  %v13035_v6 = vld [vmem:[#allocation12_spill] sm:$0xff]  ;;  %v10988_v57 = vand.u32 4294901760, %v10957_v58 }
 0x38b   : > { %v4458_v22 = vpop.f32.mrf.mxu0  ;;  %13032 = vst [vmem:[#allocation24_spill] sm:$0xff] %v10974_v61  ;;  %7024 = vmax.xlane.f32.xlu0 %v7023_v24  ;;  %4897 = vmatmul.f32.gmra.mxu1 %v13035_v6  ;;  %v6702_v5 = vsel %vm6684_vm8, %v6701_v17, %v6700_v30  ;;  %v10991_v24 = vpop.xlane.xlu1 %3738  ;;  %v5665_v42 = vsel %vm142_vm2, %v7543_v8, 0  ;;  %v10995_v11 = vand.u32 4294901760, %v5668_v60  ;;  %v11004_v17 = vsub.f32 %v5671_v33, %v10974_v61 }
 0x38c   : > { %13033 = vst [vmem:[#allocation39_spill] sm:$0xff] %v10977_v13  ;;  %v6868_v18 = vmul.f32 2.0, %v4219_v16  ;;  %5347 = vmatmul.f32.vlgmr.msrb.gmra.mxu3 %v12982_v31  ;;  %v4393_v16 = vadd.f32 %v10741_v39, %v10763_v2  ;;  %v11001_v10 = vsel %vm6688_vm9, %v6703_v12, %v6702_v5  ;;  %v6759_v30 = vperm.slane %v10983_v40, %v12926_v35  ;;  %v13040_v31 = vld [vmem:[#allocation110_spill] sm:$0xff]  ;;  %v7544_v5 = vld [vmem:[#allocation2 + $0x110] sm:$0xff] }
 0x38d   : > { %13034 = vst [vmem:[#allocation111_spill] sm:$0xff] %v10983_v40  ;;  %5939 = vmatpush.xpose.msrb.mxu3 %v10939_v47  ;;  %v11010_v8 = vand.u32 4294901760, %v10977_v13  ;;  %v6761_v39 = vperm.slane %v10991_v24, %v13029_v20  ;;  %v5762_v33 = vsub.f32 %v10957_v58, %v10988_v57  ;;  %v11020_v35 = vand.u32 4294901760, %v5665_v42 }
 0x38e   : > { %5088 = vmatmul.f32.vlgmr.msrb.gmra.mxu0 %v10343_v52  ;;  %13036 = vst [vmem:[#allocation114_spill] sm:$0xff] %v10988_v57  ;;  %v6916_v26 = vsub.f32 %v6820_v1, %v6868_v18  ;;  %v4459_v2 = vadd.f32 %v4458_v22, %v4393_v16  ;;  %v5662_v40 = vsel %vm142_vm2, %v7544_v5, 0  ;;  %v11024_v20 = vsub.f32 %v5668_v60, %v10995_v11 }
 0x38f   : > { %5688 = vmatpush.xpose.msrb.mxu0 %v10939_v47  ;;  %13037 = vst [vmem:[#allocation69_spill] sm:$0xff] %v10991_v24  ;;  %v4668_v1 = vpop.f32.mrf.mxu3  ;;  %v11037_v60 = vand.u32 4294901760, %v11004_v17  ;;  %v6821_v5 = vadd.f32 %v11001_v10, %v13017_v4 }
 0x390   : > { %13038 = vst [vmem:[#allocation99_spill] sm:$0xff] %v10995_v11  ;;  %5230 = vmatmul.f32.vlgmr.msrb.gmra.mxu2 %v13040_v31  ;;  %v11016_v12 = vmax.f32 %v6916_v26, 0.0 }
 0x391   : > { %13039 = vst [vmem:[#allocation22_spill] sm:$0xff] %v11004_v17  ;;  %5867 = vmatpush.xpose.msrb.mxu2 %v10957_v58  ;;  %v4524_v18 = vpop.f32.mrf.mxu1  ;;  %v11026_v22 = vpop.xlane.xlu2 %3741  ;;  %5941 = vmatpush.xpose.msrb.mxu3 %v10952_v53  ;;  %v6760_v58 = vsel %vm6680_vm7, %v6759_v30, %v10908_v56  ;;  %v11044_v56 = vand.u32 4294901760, %v5762_v33 }
 0x392   : > { %13041 = vst [vmem:[#allocation79_spill] sm:$0xff] %v11010_v8  ;;  %v4525_v16 = vadd.f32 %v4524_v18, %v4459_v2  ;;  %v4611_v26 = vpop.f32.mrf.mxu2  ;;  %v7026_v24 = vsel %vm142_vm2, %v11016_v12, -inf  ;;  %v6763_v47 = vperm.slane %v11026_v22, %v12942_v36  ;;  %v6762_v2 = vsel %vm6684_vm8, %v6761_v39, %v6760_v58 }
 0x393   : > { %5690 = vmatpush.xpose.msrb.mxu0 %v10952_v53  ;;  %13042 = vst [vmem:[#allocation115_spill] sm:$0xff] %v11016_v12  ;;  %v4463_v31 = vpop.f32.mrf.mxu0  ;;  %7027 = vmax.xlane.f32.xlu1 %v7026_v24  ;;  %v5754_v36 = vsub.f32 %v10977_v13, %v11010_v8  ;;  %v7545_v24 = vld [vmem:[#allocation2 + $0x108] sm:$0xff]  ;;  %v11052_v12 = vsub.f32 %v5665_v42, %v11020_v35  ;;  %v11064_v39 = vand.u32 4294901760, %v11024_v20 }
 0x394   : > { %13043 = vst [vmem:[#allocation34_spill] sm:$0xff] %v11020_v35  ;;  %v4612_v18 = vadd.f32 %v4611_v26, %v4525_v16  ;;  %5145 = vmatmul.f32.vlgmr.msrb.gmra.mxu1 %v10343_v52  ;;  %v5659_v30 = vsel %vm142_vm2, %v7545_v24, 0  ;;  %v11055_v4 = vsel %vm6688_vm9, %v6763_v47, %v6762_v2  ;;  %5351 = vmatmul.f32.gmra.mxu3 %v12975_v19  ;;  %v13052_v47 = vld [vmem:[#allocation57_spill] sm:$0xff]  ;;  %v7546_v24 = vld [vmem:[#allocation2 + $0x100] sm:$0xff] }
 0x395   : > { %13044 = vst [vmem:[#allocation28_spill] sm:$0xff] %v11024_v20  ;;  %5870 = vmatpush.xpose.msrb.mxu2 %v10977_v13  ;;  %v4397_v52 = vadd.f32 %v10781_v3, %v10789_v63  ;;  %5781 = vmatpush.xpose.msrb.mxu1 %v11044_v56  ;;  %v11068_v42 = vadd.f32 %v11055_v4, %v10802_v38  ;;  %v11088_v2 = vand.u32 4294901760, %v5754_v36 }
 0x396   : > { %13045 = vst [vmem:[#allocation43_spill] sm:$0xff] %v11026_v22  ;;  %5092 = vmatmul.f32.gmra.mxu0 %v10322_v44  ;;  %v11049_v22 = vand.u32 4294901760, %v5662_v40  ;;  %v4669_v58 = vadd.f32 %v4668_v1, %v4612_v18  ;;  %5943 = vmatpush.xpose.msrb.mxu3 %v10974_v61  ;;  %v11073_v33 = vadd.f32 %v11055_v4, %v10811_v41 }
 0x397   : > { %13046 = vst [vmem:[#allocation66_spill] sm:$0xff] %v11037_v60  ;;  %5692 = vmatpush.xpose.msrb.mxu0 %v10974_v61  ;;  %v11077_v3 = vadd.f32 %v11055_v4, %v10844_v7  ;;  %v11081_v63 = vadd.f32 %v11055_v4, %v10872_v45  ;;  %v11085_v1 = vadd.f32 %v11055_v4, %v10896_v23  ;;  %v4672_v26 = vpop.f32.mrf.mxu3 }
 0x398   : > { %13047 = vst [vmem:[#allocation116_spill] sm:$0xff] %v11044_v56  ;;  %5238 = vmatmul.f32.gmra.mxu2 %v13052_v47  ;;  %v4464_v38 = vadd.f32 %v4463_v31, %v4397_v52  ;;  %v6869_v16 = vmul.f32 2.0, %v4669_v58  ;;  %v5746_v41 = vsub.f32 %v11004_v17, %v11037_v60  ;;  %v5656_v52 = vsel %vm142_vm2, %v7546_v24, 0 }
 0x399   : > { %13048 = vst [vmem:[#allocation54_spill] sm:$0xff] %v11052_v12  ;;  %5873 = vmatpush.xpose.msrb.mxu2 %v11004_v17  ;;  %v4530_v18 = vpop.f32.mrf.mxu1  ;;  %5787 = vmatpush.xpose.msrb.mxu1 %v11088_v2  ;;  %v11096_v58 = vand.u32 4294901760, %v5659_v30  ;;  %v11099_v36 = vsub.f32 %v5662_v40, %v11049_v22  ;;  %v11103_v47 = vand.u32 4294901760, %v11052_v12  ;;  %v4401_v40 = vadd.f32 %v10809_v43, %v10823_v51 }
 0x39a   : > { %13049 = vst [vmem:[#allocation46_spill] sm:$0xff] %v11055_v4  ;;  %5945 = vmatpush.xpose.msrb.mxu3 %v10995_v11  ;;  %v4531_v45 = vadd.f32 %v4530_v18, %v4464_v38  ;;  %v4615_v23 = vpop.f32.mrf.mxu2  ;;  %v6917_v31 = vsub.f32 %v6821_v5, %v6869_v16  ;;  %v11107_v38 = vand.u32 4294901760, %v5746_v41  ;;  %v5738_v16 = vsub.f32 %v11024_v20, %v11064_v39 }
 0x39b   : > { %13050 = vst [vmem:[#allocation83_spill] sm:$0xff] %v11064_v39  ;;  %5694 = vmatpush.xpose.msrb.mxu0 %v10995_v11  ;;  %v4468_v7 = vpop.f32.mrf.mxu0  ;;  %v11121_v41 = vand.u32 4294901760, %v5656_v52  ;;  %v11130_v43 = vand.u32 4294901760, %v11099_v36 }
 0x39c   : > { %13051 = vst [vmem:[#allocation117_spill] sm:$0xff] %v11068_v42  ;;  %v4616_v4 = vadd.f32 %v4615_v23, %v4531_v45  ;;  %5149 = vmatmul.f32.gmra.mxu1 %v10322_v44  ;;  %v11109_v5 = vmax.f32 %v6917_v31, 0.0  ;;  %5355 = vmatmul.f32.gmra.mxu3 %v12965_v0  ;;  %v11124_v45 = vsub.f32 %v5659_v30, %v11096_v58  ;;  %v13060_v23 = vld [vmem:[#allocation107_spill] sm:$0xff]  ;;  %v11133_v24 = vand.u32 4294901760, %v5738_v16 }
 0x39d   : > { %13053 = vst [vmem:[#allocation42_spill] sm:$0xff] %v11073_v33  ;;  %5876 = vmatpush.xpose.msrb.mxu2 %v11024_v20  ;;  %5793 = vmatpush.xpose.msrb.mxu1 %v11107_v38  ;;  %v6822_v31 = vadd.f32 %v11001_v10, %v13013_v15  ;;  %v4469_v51 = vadd.f32 %v4468_v7, %v4401_v40 }
 0x39e   : > { %13054 = vst [vmem:[#allocation84_spill] sm:$0xff] %v11077_v3  ;;  %5096 = vmatmul.f32.gmra.mxu0 %v12968_v9  ;;  %v4673_v18 = vadd.f32 %v4672_v26, %v4616_v4  ;;  %5947 = vmatpush.xpose.msrb.mxu3 %v11020_v35  ;;  %v7029_v44 = vsel %vm142_vm2, %v11109_v5, -inf  ;;  %v5730_v30 = vsub.f32 %v11052_v12, %v11103_v47  ;;  %v11145_v16 = vand.u32 4294901760, %v11124_v45 }
 0x39f   : > { %13055 = vst [vmem:[#allocation51_spill] sm:$0xff] %v11081_v63  ;;  %5696 = vmatpush.xpose.msrb.mxu0 %v11020_v35  ;;  %7030 = vmax.xlane.f32.xlu2 %v7029_v44  ;;  %v4676_v26 = vpop.f32.mrf.mxu3  ;;  %v11141_v40 = vsub.f32 %v5656_v52, %v11121_v41  ;;  %v4405_v52 = vadd.f32 %v10842_v46, %v10854_v29 }
 0x3a0   : > { %13056 = vst [vmem:[#allocation40_spill] sm:$0xff] %v11085_v1  ;;  %5246 = vmatmul.f32.gmra.mxu2 %v13060_v23  ;;  %v6870_v4 = vmul.f32 2.0, %v4673_v18  ;;  %v11149_v63 = vand.u32 4294901760, %v5730_v30 }
 0x3a1   : > { %13057 = vst [vmem:[#allocation59_spill] sm:$0xff] %v11088_v2  ;;  %5879 = vmatpush.xpose.msrb.mxu2 %v11052_v12  ;;  %v4536_v44 = vpop.f32.mrf.mxu1  ;;  %5799 = vmatpush.xpose.msrb.mxu1 %v11133_v24  ;;  %v11167_v30 = vand.u32 4294901760, %v11141_v40 }
 0x3a2   : > { %13058 = vst [vmem:[#allocation88_spill] sm:$0xff] %v11103_v47  ;;  %5949 = vmatpush.xpose.msrb.mxu3 %v11049_v22  ;;  %v4537_v15 = vadd.f32 %v4536_v44, %v4469_v51  ;;  %v4619_v1 = vpop.f32.mrf.mxu2  ;;  %v6918_v7 = vsub.f32 %v6822_v31, %v6870_v4  ;;  %v5722_v31 = vsub.f32 %v11099_v36, %v11130_v43 }
 0x3a3   : > { %13059 = vst [vmem:[#allocation26_spill] sm:$0xff] %v11107_v38  ;;  %5698 = vmatpush.xpose.msrb.mxu0 %v11049_v22  ;;  %v4473_v23 = vpop.f32.mrf.mxu0  ;;  %v6823_v4 = vadd.f32 %v11001_v10, %v13015_v62  ;;  %v7552_v38 = vld [vmem:[#allocation2 + $0x150] sm:$0xff] }
 0x3a4   : > { %13061 = vst [vmem:[#allocation14_spill] sm:$0xff] %v11133_v24  ;;  %v4620_v18 = vadd.f32 %v4619_v1, %v4537_v15  ;;  %5153 = vmatmul.f32.gmra.mxu1 %v12968_v9  ;;  %v11151_v3 = vmax.f32 %v6918_v7, 0.0  ;;  %5359 = vmatmul.f32.gmra.mxu3 %v12957_v21  ;;  %v13063_v1 = vld [vmem:[#allocation62_spill] sm:$0xff]  ;;  %v4474_v44 = vadd.f32 %v4473_v23, %v4405_v52  ;;  %v11170_v29 = vand.u32 4294901760, %v5722_v31 }
 0x3a5   : > { %5882 = vmatpush.xpose.msrb.mxu2 %v11099_v36  ;;  %13062 = vst [vmem:[#allocation85_spill] sm:$0xff] %v11149_v63  ;;  %5805 = vmatpush.xpose.msrb.mxu1 %v11149_v63  ;;  %v13102_v63 = vld [vmem:[#allocation100_spill] sm:$0xff] }
 0x3a6   : > { %5100 = vmatmul.f32.gmra.mxu0 %v12985_v14  ;;  %v4677_v51 = vadd.f32 %v4676_v26, %v4620_v18  ;;  %5951 = vmatpush.xpose.msrb.mxu3 %v11096_v58  ;;  %v7032_v9 = vsel %vm142_vm2, %v11151_v3, -inf  ;;  %v5714_v26 = vsub.f32 %v11124_v45, %v11145_v16 }
 0x3a7   : > { %5700 = vmatpush.xpose.msrb.mxu0 %v11096_v58  ;;  %7033 = vmax.xlane.f32.xlu0 %v7032_v9  ;;  %v4680_v46 = vpop.f32.mrf.mxu3 }
 0x3a8   : > { %5254 = vmatmul.f32.gmra.mxu2 %v13063_v1  ;;  %v6871_v15 = vmul.f32 2.0, %v4677_v51  ;;  %v11180_v31 = vand.u32 4294901760, %v5714_v26  ;;  %v5706_v1 = vsub.f32 %v11141_v40, %v11167_v30 }
 0x3a9   : > { %5885 = vmatpush.xpose.msrb.mxu2 %v11124_v45  ;;  %v4542_v18 = vpop.f32.mrf.mxu1  ;;  %5811 = vmatpush.xpose.msrb.mxu1 %v11170_v29 }
 0x3aa   : > { %5953 = vmatpush.xpose.msrb.mxu3 %v11121_v41  ;;  %v4543_v62 = vadd.f32 %v4542_v18, %v4474_v44  ;;  %v4623_v9 = vpop.f32.mrf.mxu2  ;;  %v6919_v23 = vsub.f32 %v6823_v4, %v6871_v15  ;;  %v4409_v44 = vadd.f32 %v10870_v49, %v10880_v54  ;;  %v13065_v18 = vld [vmem:[#allocation103_spill] sm:$0xff] }
 0x3ab   : > { %5702 = vmatpush.xpose.msrb.mxu0 %v11121_v41  ;;  %v4478_v7 = vpop.f32.mrf.mxu0 }
 0x3ac   : > { %v4624_v52 = vadd.f32 %v4623_v9, %v4543_v62  ;;  %5157 = vmatmul.f32.gmra.mxu1 %v12985_v14  ;;  %v11182_v51 = vmax.f32 %v6919_v23, 0.0  ;;  %5363 = vmatmul.f32.gmra.mxu3 %v10453_v55  ;;  %v4479_v14 = vadd.f32 %v4478_v7, %v4409_v44  ;;  %v11193_v9 = vand.u32 4294901760, %v5706_v1 }
 0x3ad   : > { %5888 = vmatpush.xpose.msrb.mxu2 %v11141_v40  ;;  %5817 = vmatpush.xpose.msrb.mxu1 %v11180_v31  ;;  %v6824_v23 = vadd.f32 %v11001_v10, %v13020_v25  ;;  %v4413_v1 = vadd.f32 %v10894_v48, %v10903_v37 }
 0x3ae   : > { %5104 = vmatmul.f32.gmra.mxu0 %v12995_v32  ;;  %13064 = vst [vmem:[#allocation118_spill] sm:$0xff] %v11182_v51  ;;  %v4681_v4 = vadd.f32 %v4680_v46, %v4624_v52  ;;  %v7035_v15 = vsel %vm142_vm2, %v11182_v51, -inf }
 0x3af   : > { %7036 = vmax.xlane.f32.xlu1 %v7035_v15  ;;  %v4684_v62 = vpop.f32.mrf.mxu3 }
 0x3b0   : > { %5262 = vmatmul.f32.gmra.mxu2 %v13065_v18  ;;  %v6872_v26 = vmul.f32 2.0, %v4681_v4  ;;  %v13067_v4 = vld [vmem:[#allocation68_spill] sm:$0xff] }
 0x3b1   : > { %v4548_v42 = vpop.f32.mrf.mxu1  ;;  %5823 = vmatpush.xpose.msrb.mxu1 %v11193_v9 }
 0x3b2   : > { %v4549_v49 = vadd.f32 %v4548_v42, %v4479_v14  ;;  %v4627_v54 = vpop.f32.mrf.mxu2  ;;  %v6920_v46 = vsub.f32 %v6824_v23, %v6872_v26  ;;  %v13068_v14 = vld [vmem:[#allocation63_spill] sm:$0xff]  ;;  %v7547_v26 = vld [vmem:[#allocation2 + $0x178] sm:$0xff] }
 0x3b3   : > { %v4483_v33 = vpop.f32.mrf.mxu0  ;;  %v6155_v23 = vsel %vm142_vm2, %v7547_v26, 0  ;;  %v13073_v26 = vld [vmem:[#allocation27_spill] sm:$0xff] }
 0x3b4   : > { %v4628_v52 = vadd.f32 %v4627_v54, %v4549_v49  ;;  %5161 = vmatmul.f32.gmra.mxu1 %v12995_v32  ;;  %v11200_v7 = vmax.f32 %v6920_v46, 0.0  ;;  %5367 = vmatmul.f32.gmra.mxu3 %v10438_v28  ;;  %v4484_v42 = vadd.f32 %v4483_v33, %v4413_v1  ;;  %v6825_v32 = vadd.f32 %v11001_v10, %v13068_v14  ;;  %v7548_v1 = vld [vmem:[#allocation2 + $0x170] sm:$0xff] }
 0x3b5   : > { %v13072_v14 = vld [vmem:[#allocation72_spill] sm:$0xff] }
 0x3b6   : > { %5108 = vmatmul.f32.gmra.mxu0 %v13006_v34  ;;  %13066 = vst [vmem:[#allocation44_spill] sm:$0xff] %v11200_v7  ;;  %v4685_v25 = vadd.f32 %v4684_v62, %v4628_v52  ;;  %v7038_v44 = vsel %vm142_vm2, %v11200_v7, -inf  ;;  %v13069_v62 = vld [vmem:[#allocation48_spill] sm:$0xff]  ;;  %v11212_v52 = vand.u32 4294901760, %v6155_v23  ;;  %v4417_v56 = vadd.f32 %v13073_v26, %v13072_v14 }
 0x3b7   : > { %7039 = vmax.xlane.f32.xlu2 %v7038_v44  ;;  %v4688_v18 = vpop.f32.mrf.mxu3  ;;  %v13071_v44 = vld [vmem:[#allocation32_spill] sm:$0xff] }
 0x3b8   : > { %5270 = vmatmul.f32.gmra.mxu2 %v13067_v4  ;;  %v6873_v15 = vmul.f32 2.0, %v4685_v25  ;;  %v6152_v25 = vsel %vm142_vm2, %v7548_v1, 0  ;;  %v11230_v1 = vsub.f32 %v6155_v23, %v11212_v52 }
 0x3b9   : > { %v4554_v54 = vpop.f32.mrf.mxu1 }
 0x3ba   : > { %v4555_v46 = vadd.f32 %v4554_v54, %v4484_v42  ;;  %v4631_v48 = vpop.f32.mrf.mxu2  ;;  %v6921_v37 = vsub.f32 %v6825_v32, %v6873_v15  ;;  %v7549_v32 = vld [vmem:[#allocation2 + $0x168] sm:$0xff]  ;;  %13076 = vst [vmem:[#allocation25_spill] sm:$0xff] %v11230_v1 }
 0x3bb   : > { %v4488_v49 = vpop.f32.mrf.mxu0  ;;  %v6149_v54 = vsel %vm142_vm2, %v7549_v32, 0  ;;  %v7550_v32 = vld [vmem:[#allocation2 + $0x160] sm:$0xff] }
 0x3bc   : > { %v4632_v4 = vadd.f32 %v4631_v48, %v4555_v46  ;;  %5165 = vmatmul.f32.gmra.mxu1 %v13006_v34  ;;  %v11215_v33 = vmax.f32 %v6921_v37, 0.0  ;;  %5371 = vmatmul.f32.gmra.mxu3 %v13071_v44  ;;  %v13074_v46 = vld [vmem:[#allocation67_spill] sm:$0xff]  ;;  %v13075_v34 = vld [vmem:[#allocation60_spill] sm:$0xff]  ;;  %v11227_v37 = vand.u32 4294901760, %v6152_v25  ;;  %v4489_v13 = vadd.f32 %v4488_v49, %v4417_v56 }
 0x3bd   : > { %v6826_v48 = vadd.f32 %v11001_v10, %v13075_v34  ;;  %v11243_v49 = vand.u32 4294901760, %v11230_v1 }
 0x3be   : > { %5112 = vmatmul.f32.gmra.mxu0 %v13069_v62  ;;  %13070 = vst [vmem:[#allocation13_spill] sm:$0xff] %v11215_v33  ;;  %v4689_v42 = vadd.f32 %v4688_v18, %v4632_v4  ;;  %v7041_v15 = vsel %vm142_vm2, %v11215_v33, -inf  ;;  %v11237_v34 = vsub.f32 %v6152_v25, %v11227_v37  ;;  %v7551_v25 = vld [vmem:[#allocation2 + $0x158] sm:$0xff] }
 0x3bf   : > { %7042 = vmax.xlane.f32.xlu0 %v7041_v15  ;;  %v4692_v18 = vpop.f32.mrf.mxu3  ;;  %v11233_v15 = vand.u32 4294901760, %v6149_v54  ;;  %13079 = vst [vmem:[#allocation81_spill] sm:$0xff] %v11243_v49 }
 0x3c0   : > { %5278 = vmatmul.f32.gmra.mxu2 %v13074_v46  ;;  %v6874_v14 = vmul.f32 2.0, %v4689_v42  ;;  %v6146_v46 = vsel %vm142_vm2, %v7550_v32, 0  ;;  %13077 = vst [vmem:[#allocation56_spill] sm:$0xff] %v11237_v34  ;;  %v4421_v42 = vadd.f32 %v10959_v59, %v10967_v50  ;;  %v6240_v32 = vsub.f32 %v11230_v1, %v11243_v49 }
 0x3c1   : > { %v4560_v26 = vpop.f32.mrf.mxu1 }
 0x3c2   : > { %v4561_v2 = vadd.f32 %v4560_v26, %v4489_v13  ;;  %v4635_v17 = vpop.f32.mrf.mxu2  ;;  %v6922_v33 = vsub.f32 %v6826_v48, %v6874_v14  ;;  %v13080_v13 = vld [vmem:[#allocation21_spill] sm:$0xff]  ;;  %v6827_v26 = vadd.f32 %v11001_v10, %v13030_v27  ;;  %v6140_v27 = vsel %vm142_vm2, %v7552_v38, 0 }
 0x3c3   : > { %v4493_v4 = vpop.f32.mrf.mxu0 }
 0x3c4   : > { %v4636_v23 = vadd.f32 %v4635_v17, %v4561_v2  ;;  %5169 = vmatmul.f32.gmra.mxu1 %v13069_v62  ;;  %v11240_v56 = vmax.f32 %v6922_v33, 0.0  ;;  %5375 = vmatmul.f32.gmra.mxu3 %v13080_v13  ;;  %v6143_v17 = vsel %vm142_vm2, %v7551_v25, 0  ;;  %v11251_v2 = vand.u32 4294901760, %v6146_v46  ;;  %v13081_v33 = vld [vmem:[#allocation65_spill] sm:$0xff] }
 0x3c5   : > { %v11254_v62 = vsub.f32 %v6149_v54, %v11233_v15  ;;  %v4494_v50 = vadd.f32 %v4493_v4, %v4421_v42  ;;  %v11268_v4 = vand.u32 4294901760, %v6143_v17 }
 0x3c6   : > { %5116 = vmatmul.f32.gmra.mxu0 %v13035_v6  ;;  %13078 = vst [vmem:[#allocation49_spill] sm:$0xff] %v11240_v56  ;;  %v4693_v48 = vadd.f32 %v4692_v18, %v4636_v23  ;;  %v7044_v14 = vsel %vm142_vm2, %v11240_v56, -inf  ;;  %v11262_v23 = vand.u32 4294901760, %v11237_v34  ;;  %v11271_v42 = vsub.f32 %v6146_v46, %v11251_v2 }
 0x3c7   : > { %7045 = vmax.xlane.f32.xlu1 %v7044_v14  ;;  %v4696_v18 = vpop.f32.mrf.mxu3  ;;  %v11275_v20 = vand.u32 4294901760, %v11254_v62 }
 0x3c8   : > { %5286 = vmatmul.f32.gmra.mxu2 %v13081_v33  ;;  %v6875_v59 = vmul.f32 2.0, %v4693_v48  ;;  %13082 = vst [vmem:[#allocation52_spill] sm:$0xff] %v11262_v23  ;;  %v13083_v48 = vld [vmem:[#allocation105_spill] sm:$0xff]  ;;  %v6232_v46 = vsub.f32 %v11237_v34, %v11262_v23 }
 0x3c9   : > { %v4566_v25 = vpop.f32.mrf.mxu1  ;;  %13084 = vst [vmem:[#allocation35_spill] sm:$0xff] %v11275_v20 }
 0x3ca   : > { %v4567_v54 = vadd.f32 %v4566_v25, %v4494_v50  ;;  %v4639_v33 = vpop.f32.mrf.mxu2  ;;  %v6923_v14 = vsub.f32 %v6827_v26, %v6875_v59  ;;  %v11279_v50 = vand.u32 4294901760, %v6240_v32  ;;  %v13087_v26 = vld [vmem:[#allocation101_spill] sm:$0xff]  ;;  %v13088_v59 = vld [vmem:[#allocation74_spill] sm:$0xff] }
 0x3cb   : > { %v11264_v56 = vpop.f32.mrf.mxu0  ;;  %v6828_v25 = vadd.f32 %v11001_v10, %v13088_v59 }
 0x3cc   : > { %v4640_v7 = vadd.f32 %v4639_v33, %v4567_v54  ;;  %5173 = vmatmul.f32.gmra.mxu1 %v13035_v6  ;;  %13085 = vst [vmem:[#allocation9_spill] sm:$0xff] %v11279_v50  ;;  %v11285_v38 = vmax.f32 %v6923_v14, 0.0  ;;  %5623 = vmatmul.f32.vlgmr.msra.gmra.mxu3 %v13087_v26  ;;  %v7553_v54 = vld [vmem:[#allocation2 + $0x148] sm:$0xff]  ;;  %v11296_v14 = vand.u32 4294901760, %v6140_v27 }
 0x3cd   : > { %v6137_v6 = vsel %vm142_vm2, %v7553_v54, 0  ;;  %6259 = vmatpush.xpose.msra.mxu3 %v11279_v50  ;;  %v13090_v54 = vld [vmem:[#allocation45_spill] sm:$0xff] }
 0x3ce   : > { %5413 = vmatmul.f32.vlgmr.msra.gmra.mxu0 %v13083_v48  ;;  %13086 = vst [vmem:[#allocation50_spill] sm:$0xff] %v11285_v38  ;;  %v4697_v33 = vadd.f32 %v4696_v18, %v4640_v7  ;;  %v7007_v32 = vpop.xlane.xlu0 %7006  ;;  %v7047_v48 = vsel %vm142_vm2, %v11285_v38, -inf  ;;  %v11306_v7 = vand.u32 4294901760, %v6232_v46  ;;  %v6224_v18 = vsub.f32 %v11254_v62, %v11275_v20  ;;  %v7554_v38 = vld [vmem:[#allocation2 + $0x140] sm:$0xff] }
 0x3cf   : > { %6014 = vmatpush.xpose.msra.mxu0 %v10988_v57  ;;  %v11299_v57 = vsub.f32 %v6143_v17, %v11268_v4  ;;  %v7149_v24 = vmul.f32 0.25, %v7007_v32  ;;  %7048 = vmax.xlane.f32.xlu2 %v7047_v48  ;;  %v11303_v59 = vpop.f32.mrf.mxu3  ;;  %v11311_v17 = vand.u32 4294901760, %v11271_v42  ;;  %v12501_v32 = vmov 0  }
 0x3d0   : > { %5566 = vmatmul.f32.vlgmr.msra.gmra.mxu2 %v13087_v26  ;;  %v6876_v10 = vmul.f32 2.0, %v4697_v33  ;;  %13089 = vst [vmem:[#allocation53_spill] sm:$0xff] %v11306_v7  ;;  %v11323_v12 = vand.u32 4294901760, %v6137_v6  ;;  %v11326_v51 = vsub.f32 %v6140_v27, %v11296_v14 }
 0x3d1   : > { %6166 = vmatpush.xpose.msra.mxu2 %v11212_v52  ;;  %vm7197_vm10 = vcmp.lt.f32.partialorder %v13090_v54, %v7149_v24  ;;  %v11316_v33 = vpop.f32.mrf.mxu1  ;;  %6265 = vmatpush.xpose.msra.mxu3 %v11306_v7  ;;  %v13092_v24 = vld [vmem:[#allocation102_spill] sm:$0xff]  ;;  %v13093_v54 = vld [vmem:[#allocation108_spill] sm:$0xff]  ;;  %v11343_v27 = vand.u32 4294901760, %v11299_v57 }
 0x3d2   : > { %v7245_v48 = vsel %vm7197_vm10, 1, %v12501_v32  ;;  %v11320_v50 = vpop.f32.mrf.mxu2  ;;  %v6924_v46 = vsub.f32 %v6828_v25, %v6876_v10  ;;  %13091 = vst [vmem:[#allocation11_spill] sm:$0xff] %v11323_v12  ;;  %v11336_v25 = vand.u32 4294901760, %v6224_v18  ;;  %v11355_v32 = vsub.f32 %v6137_v6, %v11323_v12 }
 0x3d3   : > { %6018 = vmatpush.xpose.msra.mxu0 %v11010_v8  ;;  %v11314_v26 = vpop.f32.mrf.mxu0  ;;  %v6134_v8 = vsel %vm142_vm2, %v7554_v38, 0  ;;  %7293 = vst.msk [vmem:[%s11329_s27] sm:$0xff] %vm142_vm2, %v7245_v48  ;;  %v6216_v38 = vsub.f32 %v11271_v42, %v11311_v17  ;;  %v13096_v48 = vld [vmem:[#allocation113_spill] sm:$0xff] }
 0x3d4   : > { %5479 = vmatmul.f32.vlgmr.msra.gmra.mxu1 %v13093_v54  ;;  %13094 = vst [vmem:[#allocation19_spill] sm:$0xff] %v11336_v25  ;;  %v11338_v10 = vmax.f32 %v6924_v46, 0.0  ;;  %5627 = vmatmul.f32.gmra.mxu3 %v12975_v19  ;;  %v11351_v46 = vand.u32 4294901760, %v6134_v8 }
 0x3d5   : > { %6168 = vmatpush.xpose.msra.mxu2 %v11227_v37  ;;  %6085 = vmatpush.xpose.msra.mxu1 %v13096_v48  ;;  %13098 = vst [vmem:[#allocation64_spill] sm:$0xff] %v11355_v32  ;;  %v11360_v48 = vand.u32 4294901760, %v6216_v38 }
 0x3d6   : > { %5418 = vmatmul.f32.gmra.mxu0 %v13092_v24  ;;  %13095 = vst [vmem:[#allocation37_spill] sm:$0xff] %v11338_v10  ;;  %6271 = vmatpush.xpose.msra.mxu3 %v11336_v25  ;;  %v7050_v18 = vsel %vm142_vm2, %v11338_v10, -inf  ;;  %v6208_v25 = vsub.f32 %v11299_v57, %v11343_v27  ;;  %v11365_v10 = vand.u32 4294901760, %v11326_v51 }
 0x3d7   : > { %6022 = vmatpush.xpose.msra.mxu0 %v11037_v60  ;;  %v7010_v24 = vpop.xlane.xlu1 %7009  ;;  %13097 = vst [vmem:[#allocation91_spill] sm:$0xff] %v11351_v46  ;;  %7051 = vmax.xlane.f32.xlu0 %v7050_v18  ;;  %v11358_v7 = vpop.f32.mrf.mxu3  ;;  %v13100_v60 = vld [vmem:[#allocation109_spill] sm:$0xff] }
 0x3d8   : > { %5570 = vmatmul.f32.gmra.mxu2 %v12975_v19  ;;  %v7150_v54 = vmul.f32 0.25, %v7010_v24  ;;  %13099 = vst [vmem:[#allocation12_spill] sm:$0xff] %v11360_v48  ;;  %v13101_v24 = vmov 0  }
 0x3d9   : > { %6170 = vmatpush.xpose.msra.mxu2 %v11233_v15  ;;  %v11371_v6 = vpop.f32.mrf.mxu1  ;;  %6087 = vmatpush.xpose.msra.mxu1 %v10952_v53  ;;  %v6200_v53 = vsub.f32 %v11326_v51, %v11365_v10 }
 0x3da   : > { %vm7198_vm11 = vcmp.lt.f32.partialorder %v13100_v60, %v7150_v54  ;;  %6277 = vmatpush.xpose.msra.mxu3 %v11360_v48  ;;  %v11376_v38 = vpop.f32.mrf.mxu2  ;;  %v11382_v60 = vsub.f32 %v6134_v8, %v11351_v46  ;;  %v13104_v54 = vld [vmem:[#allocation75_spill] sm:$0xff]  ;;  %v11391_v48 = vand.u32 4294901760, %v11355_v32 }
 0x3db   : > { %6026 = vmatpush.xpose.msra.mxu0 %v11064_v39  ;;  %v11369_v19 = vpop.f32.mrf.mxu0  ;;  %v7246_v18 = vsel %vm7198_vm11, 1, %v13101_v24  ;;  %v11386_v39 = vand.u32 4294901760, %v6208_v25 }
 0x3dc   : > { %7294 = vst.msk [vmem:[%s11329_s27 + $0x8] sm:$0xff] %vm142_vm2, %v7246_v18  ;;  %5485 = vmatmul.f32.gmra.mxu1 %v13104_v54  ;;  %5631 = vmatmul.f32.gmra.mxu3 %v12965_v0  ;;  %v11401_v18 = vand.u32 4294901760, %v6200_v53  ;;  %v6192_v54 = vsub.f32 %v11355_v32, %v11391_v48 }
 0x3dd   : > { %13103 = vst [vmem:[#allocation110_spill] sm:$0xff] %v11382_v60  ;;  %6172 = vmatpush.xpose.msra.mxu2 %v11251_v2  ;;  %6089 = vmatpush.xpose.msra.mxu1 %v10974_v61  ;;  %v13109_v61 = vld [vmem:[#allocation112_spill] sm:$0xff] }
 0x3de   : > { %5423 = vmatmul.f32.gmra.mxu0 %v13102_v63  ;;  %13105 = vst [vmem:[#allocation57_spill] sm:$0xff] %v11386_v39  ;;  %6283 = vmatpush.xpose.msra.mxu3 %v11386_v39 }
 0x3df   : > { %13106 = vst [vmem:[#allocation107_spill] sm:$0xff] %v11391_v48  ;;  %6030 = vmatpush.xpose.msra.mxu0 %v11103_v47  ;;  %v7013_v8 = vpop.xlane.xlu2 %7012  ;;  %v11399_v25 = vpop.f32.mrf.mxu3  ;;  %v11406_v47 = vand.u32 4294901760, %v11382_v60  ;;  %v13110_v48 = vld [vmem:[#allocation55_spill] sm:$0xff] }
 0x3e0   : > { %5574 = vmatmul.f32.gmra.mxu2 %v12965_v0  ;;  %v7151_v63 = vmul.f32 0.25, %v7013_v8  ;;  %13107 = vst [vmem:[#allocation62_spill] sm:$0xff] %v11401_v18 }
 0x3e1   : > { %6174 = vmatpush.xpose.msra.mxu2 %v11268_v4  ;;  %13108 = vst [vmem:[#allocation103_spill] sm:$0xff] %v11406_v47  ;;  %v11412_v0 = vpop.f32.mrf.mxu1  ;;  %6091 = vmatpush.xpose.msra.mxu1 %v10995_v11  ;;  %v6184_v32 = vsub.f32 %v11382_v60, %v11406_v47  ;;  %v13118_v47 = vld [vmem:[#allocation77_spill] sm:$0xff] }
 0x3e2   : > { %vm7199_vm12 = vcmp.lt.f32.partialorder %v13109_v61, %v7151_v63  ;;  %6289 = vmatpush.xpose.msra.mxu3 %v11401_v18  ;;  %v13111_v61 = vld [vmem:[#allocation104_spill] sm:$0xff]  ;;  %v11424_v63 = vand.u32 4294901760, %v6192_v54  ;;  %v13114_v18 = vld [vmem:[#allocation106_spill] sm:$0xff] }
 0x3e3   : > { %6034 = vmatpush.xpose.msra.mxu0 %v11130_v43  ;;  %v11410_v39 = vpop.f32.mrf.mxu0  ;;  %v7247_v8 = vsel %vm7199_vm12, 1, %v13101_v24  ;;  %v11417_v53 = vpop.f32.mrf.mxu2 }
 0x3e4   : > { %7295 = vst.msk [vmem:[%s11329_s27 + $0x10] sm:$0xff] %vm142_vm2, %v7247_v8  ;;  %5491 = vmatmul.f32.gmra.mxu1 %v13111_v61  ;;  %5635 = vmatmul.f32.gmra.mxu3 %v12957_v21  ;;  %v11436_v61 = vand.u32 4294901760, %v6184_v32  ;;  %v13115_v32 = vld [vmem:[#allocation76_spill] sm:$0xff] }
 0x3e5   : > { %6176 = vmatpush.xpose.msra.mxu2 %v11296_v14  ;;  %13112 = vst [vmem:[#allocation68_spill] sm:$0xff] %v11424_v63  ;;  %6093 = vmatpush.xpose.msra.mxu1 %v11020_v35 }
 0x3e6   : > { %5428 = vmatmul.f32.gmra.mxu0 %v13110_v48  ;;  %6295 = vmatpush.xpose.msra.mxu3 %v11424_v63  ;;  %v7016_v8 = vpop.xlane.xlu0 %7015  ;;  %13113 = vst [vmem:[#allocation63_spill] sm:$0xff] %v11436_v61 }
 0x3e7   : > { %6038 = vmatpush.xpose.msra.mxu0 %v11145_v16  ;;  %v7152_v48 = vmul.f32 0.25, %v7016_v8  ;;  %v11434_v54 = vpop.f32.mrf.mxu3 }
 0x3e8   : > { %5578 = vmatmul.f32.gmra.mxu2 %v12957_v21 }
 0x3e9   : > { %6178 = vmatpush.xpose.msra.mxu2 %v11323_v12  ;;  %vm7200_vm13 = vcmp.lt.f32.partialorder %v13114_v18, %v7152_v48  ;;  %v11442_v35 = vpop.f32.mrf.mxu1  ;;  %6095 = vmatpush.xpose.msra.mxu1 %v11049_v22  ;;  %v13116_v18 = vld [vmem:[#allocation78_spill] sm:$0xff] }
 0x3ea   : > { %v7248_v63 = vsel %vm7200_vm13, 1, %v13101_v24  ;;  %6301 = vmatpush.xpose.msra.mxu3 %v11436_v61 }
 0x3eb   : > { %6042 = vmatpush.xpose.msra.mxu0 %v11167_v30  ;;  %v11440_v11 = vpop.f32.mrf.mxu0  ;;  %v11447_v21 = vpop.f32.mrf.mxu2  ;;  %7296 = vst.msk [vmem:[%s11329_s27 + $0x18] sm:$0xff] %vm142_vm2, %v7248_v63 }
 0x3ec   : > { %5497 = vmatmul.f32.gmra.mxu1 %v13116_v18  ;;  %5639 = vmatmul.f32.gmra.mxu3 %v10453_v55 }
 0x3ed   : > { %6180 = vmatpush.xpose.msra.mxu2 %v11351_v46  ;;  %6097 = vmatpush.xpose.msra.mxu1 %v11096_v58  ;;  %v13121_v46 = vld [vmem:[#allocation82_spill] sm:$0xff] }
 0x3ee   : > { %5433 = vmatmul.f32.gmra.mxu0 %v13115_v32  ;;  %v7019_v8 = vpop.xlane.xlu1 %7018 }
 0x3ef   : > { %v7153_v48 = vmul.f32 0.25, %v7019_v8  ;;  %v11457_v61 = vpop.f32.mrf.mxu3 }
 0x3f0   : > { %5582 = vmatmul.f32.gmra.mxu2 %v10453_v55  ;;  %13117 = vst [vmem:[#allocation48_spill] sm:$0xff] %v11457_v61  ;;  %v13122_v55 = vld [vmem:[#allocation98_spill] sm:$0xff] }
 0x3f1   : > { %vm7201_vm14 = vcmp.lt.f32.partialorder %v13118_v47, %v7153_v48  ;;  %v11462_v60 = vpop.f32.mrf.mxu1  ;;  %6099 = vmatpush.xpose.msra.mxu1 %v11121_v41  ;;  %v13124_v61 = vld [vmem:[#allocation70_spill] sm:$0xff] }
 0x3f2   : > { %v7249_v32 = vsel %vm7201_vm14, 1, %v13101_v24 }
 0x3f3   : > { %v11460_v63 = vpop.f32.mrf.mxu0  ;;  %v11466_v18 = vpop.f32.mrf.mxu2  ;;  %7297 = vst.msk [vmem:[%s11329_s27 + $0x20] sm:$0xff] %vm142_vm2, %v7249_v32 }
 0x3f4   : > { %13119 = vst [vmem:[#allocation32_spill] sm:$0xff] %v11460_v63  ;;  %5503 = vmatmul.f32.gmra.mxu1 %v13122_v55  ;;  %5643 = vmatmul.f32.gmra.mxu3 %v10438_v28  ;;  %v13127_v55 = vld [vmem:[#allocation7_spill] sm:$0xff] }
 0x3f5   : > { %13120 = vst [vmem:[#allocation72_spill] sm:$0xff] %v11466_v18  ;;  %v13128_v18 = vld [vmem:[#allocation71_spill] sm:$0xff] }
 0x3f6   : > { %5438 = vmatmul.f32.gmra.mxu0 %v13121_v46  ;;  %v7022_v47 = vpop.xlane.xlu2 %7021 }
 0x3f7   : > { %v7154_v8 = vmul.f32 0.25, %v7022_v47  ;;  %v11474_v48 = vpop.f32.mrf.mxu3 }
 0x3f8   : > { %5586 = vmatmul.f32.gmra.mxu2 %v10438_v28  ;;  %13123 = vst [vmem:[#allocation27_spill] sm:$0xff] %v11474_v48 }
 0x3f9   : > { %vm7202_vm15 = vcmp.lt.f32.partialorder %v13124_v61, %v7154_v8  ;;  %v11479_v12 = vpop.f32.mrf.mxu1  ;;  %v13130_v8 = vld [vmem:[#allocation87_spill] sm:$0xff] }
 0x3fa   : > { %v7250_v32 = vsel %vm7202_vm15, 1, %v13101_v24 }
 0x3fb   : > { %v11477_v63 = vpop.f32.mrf.mxu0  ;;  %v11482_v46 = vpop.f32.mrf.mxu2  ;;  %7298 = vst.msk [vmem:[%s11329_s27 + $0x28] sm:$0xff] %vm142_vm2, %v7250_v32 }
 0x3fc   : > { %13125 = vst [vmem:[#allocation67_spill] sm:$0xff] %v11477_v63  ;;  %5509 = vmatmul.f32.gmra.mxu1 %v13128_v18  ;;  %5647 = vmatmul.f32.gmra.mxu3 %v13071_v44  ;;  %v13133_v18 = vld [vmem:[#allocation8_spill] sm:$0xff] }
 0x3fd   : > { %13126 = vst [vmem:[#allocation60_spill] sm:$0xff] %v11482_v46 }
 0x3fe   : > { %5443 = vmatmul.f32.gmra.mxu0 %v13127_v55  ;;  %v7025_v28 = vpop.xlane.xlu0 %7024  ;;  %v13134_v55 = vld [vmem:[#allocation80_spill] sm:$0xff] }
 0x3ff   : > { %v7155_v61 = vmul.f32 0.25, %v7025_v28  ;;  %v11490_v47 = vpop.f32.mrf.mxu3 }
 0x400   : > { %5590 = vmatmul.f32.gmra.mxu2 %v13071_v44  ;;  %13129 = vst [vmem:[#allocation21_spill] sm:$0xff] %v11490_v47  ;;  %v4871_v44 = vadd.f32 %v11316_v33, %v11264_v56  ;;  %v13135_v47 = vld [vmem:[#allocation115_spill] sm:$0xff]  ;;  %v13136_v56 = vld [vmem:[#allocation20_spill] sm:$0xff] }
 0x401   : > { %vm7203_vm0 = vcmp.lt.f32.partialorder %v13130_v8, %v7155_v61  ;;  %v11495_v63 = vpop.f32.mrf.mxu1 }
 0x402   : > { %v7251_v32 = vsel %vm7203_vm0, 1, %v13101_v24 }
 0x403   : > { %v11493_v48 = vpop.f32.mrf.mxu0  ;;  %v11498_v46 = vpop.f32.mrf.mxu2  ;;  %7299 = vst.msk [vmem:[%s11329_s27 + $0x30] sm:$0xff] %vm142_vm2, %v7251_v32 }
 0x404   : > { %13131 = vst [vmem:[#allocation65_spill] sm:$0xff] %v11493_v48  ;;  %5515 = vmatmul.f32.gmra.mxu1 %v13134_v55  ;;  %5651 = vmatmul.f32.gmra.mxu3 %v13080_v13 }
 0x405   : > { %13132 = vst [vmem:[#allocation105_spill] sm:$0xff] %v11498_v46 }
 0x406   : > { %5448 = vmatmul.f32.gmra.mxu0 %v13133_v18  ;;  %v7028_v28 = vpop.xlane.xlu1 %7027  ;;  %v4937_v18 = vadd.f32 %v11320_v50, %v4871_v44 }
 0x407   : > { %v7156_v61 = vmul.f32 0.25, %v7028_v28  ;;  %v11508_v8 = vpop.f32.mrf.mxu3 }
 0x408   : > { %5594 = vmatmul.f32.gmra.mxu2 %v13080_v13  ;;  %v4875_v13 = vadd.f32 %v11371_v6, %v11314_v26  ;;  %v5003_v33 = vadd.f32 %v11303_v59, %v4937_v18 }
 0x409   : > { %vm7204_vm1 = vcmp.lt.f32.partialorder %v13135_v47, %v7156_v61  ;;  %v11511_v48 = vpop.f32.mrf.mxu1 }
 0x40a   : > { %v7252_v55 = vsel %vm7204_vm1, 1, %v13101_v24 }
 0x40b   : > { %v5089_v32 = vpop.f32.mrf.mxu0  ;;  %v11515_v46 = vpop.f32.mrf.mxu2  ;;  %7300 = vst.msk [vmem:[%s11329_s27 + $0x38] sm:$0xff] %vm142_vm2, %v7252_v55 }
 0x40c   : > { %5521 = vmatmul.f32.gmra.mxu1 %v13136_v56  ;;  %5957 = vmatmul.f32.vlgmr.msrb.gmra.mxu3 %v11167_v30  ;;  %v5090_v50 = vadd.f32 %v5089_v32, %v5003_v33  ;;  %v4942_v30 = vadd.f32 %v11376_v38, %v4875_v13  ;;  %v4879_v38 = vadd.f32 %v11412_v0, %v11369_v19 }
 0x40d   : > { %6563 = vmatpush.xpose.msrb.mxu3 %v11212_v52 }
 0x40e   : > { %5708 = vmatmul.f32.vlgmr.msrb.gmra.mxu0 %v11193_v9  ;;  %v5009_v61 = vadd.f32 %v11358_v7, %v4942_v30  ;;  %v4947_v55 = vadd.f32 %v11417_v53, %v4879_v38  ;;  %v4883_v53 = vadd.f32 %v11442_v35, %v11410_v39 }
 0x40f   : > { %6345 = vmatpush.xpose.msrb.mxu0 %v11230_v1  ;;  %v11529_v47 = vpop.f32.mrf.mxu3  ;;  %v13175_v1 = vld [vmem:[#allocation96_spill] sm:$0xff] }
 0x410   : > { %5891 = vmatmul.f32.vlgmr.msrb.gmra.mxu2 %v11141_v40 }
 0x411   : > { %6492 = vmatpush.xpose.msrb.mxu2 %v11243_v49  ;;  %v5146_v44 = vpop.f32.mrf.mxu1  ;;  %6565 = vmatpush.xpose.msrb.mxu3 %v11227_v37 }
 0x412   : > { %v5147_v26 = vadd.f32 %v5146_v44, %v5090_v50  ;;  %v7031_v59 = vpop.xlane.xlu2 %7030  ;;  %v5015_v44 = vadd.f32 %v11399_v25, %v4947_v55 }
 0x413   : > { %6348 = vmatpush.xpose.msrb.mxu0 %v11237_v34  ;;  %v5093_v9 = vpop.f32.mrf.mxu0  ;;  %v11534_v6 = vpop.f32.mrf.mxu2  ;;  %v7157_v28 = vmul.f32 0.25, %v7031_v59  ;;  %v4952_v59 = vadd.f32 %v11447_v21, %v4883_v53  ;;  %v13140_v21 = vld [vmem:[#allocation118_spill] sm:$0xff]  ;;  %v13146_v53 = vld [vmem:[#allocation107_spill] sm:$0xff] }
 0x414   : > { %v6877_v40 = vmul.f32 2.0, %v5147_v26  ;;  %5825 = vmatmul.f32.vlgmr.msrb.gmra.mxu1 %v11121_v41  ;;  %5963 = vmatmul.f32.gmra.mxu3 %v11145_v16 }
 0x415   : > { %6496 = vmatpush.xpose.msrb.mxu2 %v11262_v23  ;;  %vm7205_vm3 = vcmp.lt.f32.partialorder %v11109_v5, %v7157_v28  ;;  %6417 = vmatpush.xpose.msrb.mxu1 %v11212_v52  ;;  %v5094_v5 = vadd.f32 %v5093_v9, %v5009_v61 }
 0x416   : > { %5716 = vmatmul.f32.gmra.mxu0 %v11180_v31  ;;  %v7253_v32 = vsel %vm7205_vm3, 1, %v13101_v24  ;;  %6567 = vmatpush.xpose.msrb.mxu3 %v11233_v15  ;;  %v13137_v31 = vld [vmem:[#allocation30_spill] sm:$0xff] }
 0x417   : > { %6351 = vmatpush.xpose.msrb.mxu0 %v11254_v62  ;;  %v6925_v18 = vsub.f32 %v13137_v31, %v6877_v40  ;;  %7301 = vst.msk [vmem:[%s11329_s27 + $0x40] sm:$0xff] %vm142_vm2, %v7253_v32  ;;  %v11553_v16 = vpop.f32.mrf.mxu3  ;;  %v13139_v32 = vld [vmem:[#allocation85_spill] sm:$0xff] }
 0x418   : > { %5896 = vmatmul.f32.gmra.mxu2 %v11124_v45 }
 0x419   : > { %6500 = vmatpush.xpose.msrb.mxu2 %v11275_v20  ;;  %v11555_v19 = vmax.f32 %v6925_v18, 0.0  ;;  %v5150_v0 = vpop.f32.mrf.mxu1  ;;  %6419 = vmatpush.xpose.msrb.mxu1 %v11227_v37  ;;  %v13141_v18 = vld [vmem:[#allocation88_spill] sm:$0xff] }
 0x41a   : > { %6569 = vmatpush.xpose.msrb.mxu3 %v11251_v2  ;;  %v5151_v56 = vadd.f32 %v5150_v0, %v5094_v5  ;;  %v7034_v45 = vpop.xlane.xlu0 %7033  ;;  %v13142_v5 = vld [vmem:[#allocation64_spill] sm:$0xff]  ;;  %v5021_v0 = vadd.f32 %v11434_v54, %v4952_v59 }
 0x41b   : > { %6354 = vmatpush.xpose.msrb.mxu0 %v11271_v42  ;;  %v5097_v7 = vpop.f32.mrf.mxu0  ;;  %v11561_v13 = vpop.f32.mrf.mxu2  ;;  %v7053_v33 = vsel %vm142_vm2, %v11555_v19, -inf  ;;  %v7158_v50 = vmul.f32 0.25, %v7034_v45  ;;  %v13144_v45 = vld [vmem:[#allocation93_spill] sm:$0xff] }
 0x41c   : > { %7054 = vmax.xlane.f32.xlu1 %v7053_v33  ;;  %v6878_v9 = vmul.f32 2.0, %v5151_v56  ;;  %5829 = vmatmul.f32.gmra.mxu1 %v11096_v58  ;;  %v13143_v56 = vld [vmem:[#allocation11_spill] sm:$0xff] }
 0x41d   : > { %6504 = vmatpush.xpose.msrb.mxu2 %v11311_v17  ;;  %vm7206_vm4 = vcmp.lt.f32.partialorder %v11151_v3, %v7158_v50  ;;  %5969 = vmatmul.f32.gmra.mxu3 %v11130_v43  ;;  %v5098_v3 = vadd.f32 %v5097_v7, %v5015_v44  ;;  %v4887_v7 = vadd.f32 %v11462_v60, %v11440_v11  ;;  %v13145_v50 = vld [vmem:[#allocation54_spill] sm:$0xff] }
 0x41e   : > { %5724 = vmatmul.f32.gmra.mxu0 %v11170_v29  ;;  %v7254_v30 = vsel %vm7206_vm4, 1, %v13101_v24  ;;  %6421 = vmatpush.xpose.msrb.mxu1 %v11233_v15  ;;  %v13138_v29 = vld [vmem:[#allocation92_spill] sm:$0xff]  ;;  %v13147_v60 = vld [vmem:[#allocation110_spill] sm:$0xff] }
 0x41f   : > { %6357 = vmatpush.xpose.msrb.mxu0 %v11299_v57  ;;  %6571 = vmatpush.xpose.msrb.mxu3 %v11268_v4  ;;  %v6926_v26 = vsub.f32 %v13138_v29, %v6878_v9  ;;  %7302 = vst.msk [vmem:[%s11329_s27 + $0x48] sm:$0xff] %vm142_vm2, %v7254_v30  ;;  %v11582_v43 = vpop.f32.mrf.mxu3  ;;  %v13148_v29 = vld [vmem:[#allocation72_spill] sm:$0xff] }
 0x420   : > { %5901 = vmatmul.f32.gmra.mxu2 %v11099_v36 }
 0x421   : > { %6508 = vmatpush.xpose.msrb.mxu2 %v11343_v27  ;;  %v11584_v35 = vmax.f32 %v6926_v26, 0.0  ;;  %v5154_v25 = vpop.f32.mrf.mxu1  ;;  %v4957_v26 = vadd.f32 %v13148_v29, %v4887_v7  ;;  %v13155_v7 = vld [vmem:[#allocation32_spill] sm:$0xff] }
 0x422   : > { %6423 = vmatpush.xpose.msrb.mxu1 %v11251_v2  ;;  %v5155_v28 = vadd.f32 %v5154_v25, %v5098_v3  ;;  %v7037_v36 = vpop.xlane.xlu1 %7036  ;;  %v13149_v3 = vld [vmem:[#allocation91_spill] sm:$0xff] }
 0x423   : > { %6360 = vmatpush.xpose.msrb.mxu0 %v11326_v51  ;;  %v5101_v39 = vpop.f32.mrf.mxu0  ;;  %6573 = vmatpush.xpose.msrb.mxu3 %v11296_v14  ;;  %v11590_v40 = vpop.f32.mrf.mxu2  ;;  %v7056_v38 = vsel %vm142_vm2, %v11584_v35, -inf  ;;  %v7159_v61 = vmul.f32 0.25, %v7037_v36 }
 0x424   : > { %7057 = vmax.xlane.f32.xlu2 %v7056_v38  ;;  %v6879_v31 = vmul.f32 2.0, %v5155_v28  ;;  %5833 = vmatmul.f32.gmra.mxu1 %v11049_v22  ;;  %v5102_v9 = vadd.f32 %v5101_v39, %v5021_v0  ;;  %v13150_v38 = vld [vmem:[#allocation14_spill] sm:$0xff]  ;;  %v4891_v0 = vadd.f32 %v11479_v12, %v13155_v7  ;;  %v13159_v12 = vld [vmem:[#allocation60_spill] sm:$0xff] }
 0x425   : > { %6512 = vmatpush.xpose.msrb.mxu2 %v11365_v10  ;;  %vm7207_vm5 = vcmp.lt.f32.partialorder %v13140_v21, %v7159_v61  ;;  %5975 = vmatmul.f32.gmra.mxu3 %v13141_v18  ;;  %v13153_v21 = vld [vmem:[#allocation44_spill] sm:$0xff]  ;;  %v13154_v18 = vld [vmem:[#allocation83_spill] sm:$0xff] }
 0x426   : > { %5732 = vmatmul.f32.gmra.mxu0 %v13139_v32  ;;  %v7255_v55 = vsel %vm7207_vm5, 1, %v13101_v24  ;;  %6425 = vmatpush.xpose.msrb.mxu1 %v11268_v4  ;;  %v6927_v33 = vsub.f32 %v13144_v45, %v6879_v31  ;;  %v13151_v32 = vld [vmem:[#allocation103_spill] sm:$0xff]  ;;  %v13152_v31 = vld [vmem:[#allocation34_spill] sm:$0xff] }
 0x427   : > { %6363 = vmatpush.xpose.msrb.mxu0 %v13142_v5  ;;  %6575 = vmatpush.xpose.msrb.mxu3 %v13143_v56  ;;  %7303 = vst.msk [vmem:[%s11329_s27 + $0x50] sm:$0xff] %vm142_vm2, %v7255_v55  ;;  %v11611_v44 = vpop.f32.mrf.mxu3  ;;  %v13156_v55 = vld [vmem:[#allocation48_spill] sm:$0xff] }
 0x428   : > { %5906 = vmatmul.f32.gmra.mxu2 %v13145_v50  ;;  %v11613_v11 = vmax.f32 %v6927_v33, 0.0  ;;  %v5027_v45 = vadd.f32 %v13156_v55, %v4957_v26  ;;  %v13157_v50 = vld [vmem:[#allocation94_spill] sm:$0xff] }
 0x429   : > { %6516 = vmatpush.xpose.msrb.mxu2 %v13146_v53  ;;  %v5158_v30 = vpop.f32.mrf.mxu1 }
 0x42a   : > { %6427 = vmatpush.xpose.msrb.mxu1 %v11296_v14  ;;  %v5159_v25 = vadd.f32 %v5158_v30, %v5102_v9  ;;  %v7040_v39 = vpop.xlane.xlu2 %7039  ;;  %v7059_v28 = vsel %vm142_vm2, %v11613_v11, -inf  ;;  %v13158_v30 = vld [vmem:[#allocation28_spill] sm:$0xff] }
 0x42b   : > { %6366 = vmatpush.xpose.msrb.mxu0 %v13147_v60  ;;  %v5105_v54 = vpop.f32.mrf.mxu0  ;;  %6577 = vmatpush.xpose.msrb.mxu3 %v13149_v3  ;;  %v11619_v59 = vpop.f32.mrf.mxu2  ;;  %v7160_v36 = vmul.f32 0.25, %v7040_v39 }
 0x42c   : > { %7060 = vmax.xlane.f32.xlu0 %v7059_v28  ;;  %v6880_v61 = vmul.f32 2.0, %v5159_v25  ;;  %5837 = vmatmul.f32.gmra.mxu1 %v13152_v31  ;;  %v5106_v29 = vadd.f32 %v5105_v54, %v5027_v45  ;;  %v13160_v54 = vld [vmem:[#allocation26_spill] sm:$0xff]  ;;  %v13161_v45 = vld [vmem:[#allocation99_spill] sm:$0xff] }
 0x42d   : > { %6520 = vmatpush.xpose.msrb.mxu2 %v13151_v32  ;;  %vm7208_vm6 = vcmp.lt.f32.partialorder %v13153_v21, %v7160_v36  ;;  %5981 = vmatmul.f32.gmra.mxu3 %v13154_v18 }
 0x42e   : > { %5740 = vmatmul.f32.gmra.mxu0 %v13150_v38  ;;  %v7256_v33 = vsel %vm7208_vm6, 1, %v13101_v24  ;;  %6429 = vmatpush.xpose.msrb.mxu1 %v13143_v56  ;;  %v6928_v9 = vsub.f32 %v13157_v50, %v6880_v61  ;;  %v4962_v38 = vadd.f32 %v13159_v12, %v4891_v0  ;;  %v13163_v0 = vld [vmem:[#allocation66_spill] sm:$0xff]  ;;  %v13164_v50 = vld [vmem:[#allocation67_spill] sm:$0xff] }
 0x42f   : > { %7304 = vst.msk [vmem:[%s11329_s27 + $0x58] sm:$0xff] %vm142_vm2, %v7256_v33  ;;  %v11637_v25 = vpop.f32.mrf.mxu3  ;;  %v13162_v33 = vld [vmem:[#allocation13_spill] sm:$0xff]  ;;  %v13166_v12 = vld [vmem:[#allocation95_spill] sm:$0xff] }
 0x430   : > { %5911 = vmatmul.f32.gmra.mxu2 %v13158_v30  ;;  %v11639_v39 = vmax.f32 %v6928_v9, 0.0  ;;  %v4895_v9 = vadd.f32 %v11495_v63, %v13164_v50  ;;  %v13165_v30 = vld [vmem:[#allocation27_spill] sm:$0xff] }
 0x431   : > { %v5162_v36 = vpop.f32.mrf.mxu1 }
 0x432   : > { %6431 = vmatpush.xpose.msrb.mxu1 %v13149_v3  ;;  %v5163_v26 = vadd.f32 %v5162_v36, %v5106_v29  ;;  %v7043_v61 = vpop.xlane.xlu0 %7042  ;;  %v7062_v18 = vsel %vm142_vm2, %v11639_v39, -inf  ;;  %v5033_v29 = vadd.f32 %v13165_v30, %v4962_v38 }
 0x433   : > { %v5109_v28 = vpop.f32.mrf.mxu0  ;;  %v11643_v21 = vpop.f32.mrf.mxu2  ;;  %v7161_v7 = vmul.f32 0.25, %v7043_v61  ;;  %7063 = vmax.xlane.f32.xlu1 %v7062_v18  ;;  %v13167_v61 = vld [vmem:[#allocation22_spill] sm:$0xff] }
 0x434   : > { %v6881_v55 = vmul.f32 2.0, %v5163_v26  ;;  %5841 = vmatmul.f32.gmra.mxu1 %v13161_v45  ;;  %v5110_v26 = vadd.f32 %v5109_v28, %v5033_v29  ;;  %v13170_v29 = vld [vmem:[#allocation24_spill] sm:$0xff] }
 0x435   : > { %vm7209_vm7 = vcmp.lt.f32.partialorder %v13162_v33, %v7161_v7  ;;  %5987 = vmatmul.f32.gmra.mxu3 %v13163_v0  ;;  %v13168_v0 = vld [vmem:[#allocation105_spill] sm:$0xff] }
 0x436   : > { %5748 = vmatmul.f32.gmra.mxu0 %v13160_v54  ;;  %v7257_v36 = vsel %vm7209_vm7, 1, %v13101_v24  ;;  %v6929_v49 = vsub.f32 %v13166_v12, %v6881_v55  ;;  %v4967_v23 = vadd.f32 %v13168_v0, %v4895_v9  ;;  %v13172_v12 = vld [vmem:[#allocation79_spill] sm:$0xff]  ;;  %v13173_v9 = vld [vmem:[#allocation65_spill] sm:$0xff] }
 0x437   : > { %7305 = vst.msk [vmem:[%s11329_s27 + $0x60] sm:$0xff] %vm142_vm2, %v7257_v36  ;;  %v11659_v18 = vpop.f32.mrf.mxu3  ;;  %v13169_v36 = vld [vmem:[#allocation59_spill] sm:$0xff] }
 0x438   : > { %5916 = vmatmul.f32.gmra.mxu2 %v13167_v61  ;;  %v11661_v54 = vmax.f32 %v6929_v49, 0.0  ;;  %v13171_v49 = vld [vmem:[#allocation49_spill] sm:$0xff]  ;;  %v4899_v61 = vadd.f32 %v11511_v48, %v13173_v9 }
 0x439   : > { %v5166_v33 = vpop.f32.mrf.mxu1 }
 0x43a   : > { %v5167_v63 = vadd.f32 %v5166_v33, %v5110_v26  ;;  %v7046_v50 = vpop.xlane.xlu1 %7045  ;;  %v7065_v55 = vsel %vm142_vm2, %v11661_v54, -inf  ;;  %v13174_v26 = vld [vmem:[#allocation21_spill] sm:$0xff]  ;;  %v4972_v48 = vadd.f32 %v11515_v46, %v4899_v61 }
 0x43b   : > { %v5113_v7 = vpop.f32.mrf.mxu0  ;;  %v11664_v38 = vpop.f32.mrf.mxu2  ;;  %v7162_v30 = vmul.f32 0.25, %v7046_v50  ;;  %7066 = vmax.xlane.f32.xlu2 %v7065_v55  ;;  %v5039_v33 = vadd.f32 %v13174_v26, %v4967_v23  ;;  %v13176_v50 = vld [vmem:[#allocation39_spill] sm:$0xff]  ;;  %v13178_v26 = vld [vmem:[#allocation116_spill] sm:$0xff] }
 0x43c   : > { %v6882_v28 = vmul.f32 2.0, %v5167_v63  ;;  %5845 = vmatmul.f32.gmra.mxu1 %v13170_v29  ;;  %v5045_v46 = vadd.f32 %v11508_v8, %v4972_v48 }
 0x43d   : > { %vm7210_vm8 = vcmp.lt.f32.partialorder %v13171_v49, %v7162_v30  ;;  %5993 = vmatmul.f32.gmra.mxu3 %v13172_v12  ;;  %v5114_v63 = vadd.f32 %v5113_v7, %v5039_v33  ;;  %v13179_v33 = vld [vmem:[#allocation58_spill] sm:$0xff] }
 0x43e   : > { %5756 = vmatmul.f32.gmra.mxu0 %v13169_v36  ;;  %v7258_v0 = vsel %vm7210_vm8, 1, %v13101_v24  ;;  %v6930_v20 = vsub.f32 %v13175_v1, %v6882_v28 }
 0x43f   : > { %7306 = vst.msk [vmem:[%s11329_s27 + $0x68] sm:$0xff] %vm142_vm2, %v7258_v0  ;;  %v11680_v55 = vpop.f32.mrf.mxu3  ;;  %v13181_v0 = vld [vmem:[#allocation114_spill] sm:$0xff] }
 0x440   : > { %5921 = vmatmul.f32.gmra.mxu2 %v13176_v50  ;;  %v11682_v36 = vmax.f32 %v6930_v20, 0.0  ;;  %v13180_v20 = vld [vmem:[#allocation50_spill] sm:$0xff]  ;;  %v13182_v50 = vld [vmem:[#allocation97_spill] sm:$0xff] }
 0x441   : > { %v5170_v49 = vpop.f32.mrf.mxu1 }
 0x442   : > { %13177 = vst [vmem:[#allocation101_spill] sm:$0xff] %v11682_v36  ;;  %v5171_v12 = vadd.f32 %v5170_v49, %v5114_v63  ;;  %v7049_v9 = vpop.xlane.xlu2 %7048  ;;  %v7068_v1 = vsel %vm142_vm2, %v11682_v36, -inf  ;;  %v13183_v49 = vld [vmem:[#allocation33_spill] sm:$0xff] }
 0x443   : > { %v5117_v30 = vpop.f32.mrf.mxu0  ;;  %v11685_v23 = vpop.f32.mrf.mxu2  ;;  %v7163_v28 = vmul.f32 0.25, %v7049_v9  ;;  %7069 = vmax.xlane.f32.xlu0 %v7068_v1 }
 0x444   : > { %v6883_v7 = vmul.f32 2.0, %v5171_v12  ;;  %5849 = vmatmul.f32.gmra.mxu1 %v13179_v33  ;;  %v5118_v9 = vadd.f32 %v5117_v30, %v5045_v46  ;;  %v13185_v30 = vld [vmem:[#allocation113_spill] sm:$0xff] }
 0x445   : > { %vm7211_vm9 = vcmp.lt.f32.partialorder %v13180_v20, %v7163_v28  ;;  %5999 = vmatmul.f32.gmra.mxu3 %v13181_v0  ;;  %v13186_v46 = vld [vmem:[#allocation37_spill] sm:$0xff] }
 0x446   : > { %5764 = vmatmul.f32.gmra.mxu0 %v13178_v26  ;;  %v7259_v61 = vsel %vm7211_vm9, 1, %v13101_v24  ;;  %v6931_v63 = vsub.f32 %v13182_v50, %v6883_v7  ;;  %v5349_v50 = vadd.f32 %v11529_v47, %v11534_v6  ;;  %v5353_v6 = vadd.f32 %v11553_v16, %v11561_v13 }
 0x447   : > { %7307 = vst.msk [vmem:[%s11329_s27 + $0x70] sm:$0xff] %vm142_vm2, %v7259_v61  ;;  %v11699_v1 = vpop.f32.mrf.mxu3  ;;  %v5357_v16 = vadd.f32 %v11582_v43, %v11590_v40  ;;  %v5361_v40 = vadd.f32 %v11611_v44, %v11619_v59  ;;  %v5365_v59 = vadd.f32 %v11637_v25, %v11643_v21  ;;  %v5369_v21 = vadd.f32 %v11659_v18, %v11664_v38 }
 0x448   : > { %5926 = vmatmul.f32.gmra.mxu2 %v13183_v49  ;;  %v11701_v12 = vmax.f32 %v6931_v63, 0.0  ;;  %v13187_v49 = vld [vmem:[#allocation29_spill] sm:$0xff]  ;;  %v5373_v38 = vadd.f32 %v11680_v55, %v11685_v23 }
 0x449   : > { %v5174_v26 = vpop.f32.mrf.mxu1 }
 0x44a   : > { %13184 = vst [vmem:[#allocation74_spill] sm:$0xff] %v11701_v12  ;;  %v5175_v20 = vadd.f32 %v5174_v26, %v5118_v9  ;;  %v7052_v8 = vpop.xlane.xlu0 %7051  ;;  %v7071_v48 = vsel %vm142_vm2, %v11701_v12, -inf  ;;  %v13188_v26 = vld [vmem:[#allocation63_spill] sm:$0xff] }
 0x44b   : > { %v5414_v28 = vpop.f32.mrf.mxu0  ;;  %v11703_v0 = vpop.f32.mrf.mxu2  ;;  %v7164_v7 = vmul.f32 0.25, %v7052_v8  ;;  %7072 = vmax.xlane.f32.xlu1 %v7071_v48 }
 0x44c   : > { %v6884_v61 = vmul.f32 2.0, %v5175_v20  ;;  %5853 = vmatmul.f32.gmra.mxu1 %v13185_v30  ;;  %v5415_v8 = vadd.f32 %v5414_v28, %v5349_v50 }
 0x44d   : > { %vm7212_vm10 = vcmp.lt.f32.partialorder %v13186_v46, %v7164_v7  ;;  %6303 = vmatmul.f32.vlgmr.msra.gmra.mxu3 %v13149_v3 }
 0x44e   : > { %6044 = vmatmul.f32.vlgmr.msra.gmra.mxu0 %v11121_v41  ;;  %v7260_v63 = vsel %vm7212_vm10, 1, %v13101_v24  ;;  %v6932_v9 = vsub.f32 %v13187_v49, %v6884_v61  ;;  %v13190_v61 = vld [vmem:[#allocation68_spill] sm:$0xff] }
 0x44f   : > { %7308 = vst.msk [vmem:[%s11329_s27 + $0x78] sm:$0xff] %vm142_vm2, %v7260_v63  ;;  %v5624_v48 = vpop.f32.mrf.mxu3 }
 0x450   : > { %6186 = vmatmul.f32.vlgmr.msra.gmra.mxu2 %v13188_v26  ;;  %v11718_v20 = vmax.f32 %v6932_v9, 0.0 }
 0x451   : > { %v5480_v34 = vpop.f32.mrf.mxu1 }
 0x452   : > { %13189 = vst [vmem:[#allocation45_spill] sm:$0xff] %v11718_v20  ;;  %v5481_v7 = vadd.f32 %v5480_v34, %v5415_v8  ;;  %v7074_v36 = vsel %vm142_vm2, %v11718_v20, -inf  ;;  %v13191_v8 = vld [vmem:[#allocation89_spill] sm:$0xff] }
 0x453   : > { %v5419_v12 = vpop.f32.mrf.mxu0  ;;  %v5567_v46 = vpop.f32.mrf.mxu2  ;;  %7075 = vmax.xlane.f32.xlu2 %v7074_v36 }
 0x454   : > { %v5568_v47 = vadd.f32 %v5567_v46, %v5481_v7  ;;  %6101 = vmatmul.f32.vlgmr.msra.gmra.mxu1 %v11121_v41  ;;  %v5420_v50 = vadd.f32 %v5419_v12, %v5353_v6 }
 0x455   : > { %6307 = vmatmul.f32.gmra.mxu3 %v13143_v56 }
 0x456   : > { %6048 = vmatmul.f32.gmra.mxu0 %v11096_v58  ;;  %v5625_v28 = vadd.f32 %v5624_v48, %v5568_v47  ;;  %v13192_v48 = vld [vmem:[#allocation62_spill] sm:$0xff] }
 0x457   : > { %v5628_v63 = vpop.f32.mrf.mxu3 }
 0x458   : > { %6194 = vmatmul.f32.gmra.mxu2 %v13190_v61  ;;  %v6885_v34 = vmul.f32 2.0, %v5625_v28 }
 0x459   : > { %v5486_v9 = vpop.f32.mrf.mxu1 }
 0x45a   : > { %v5487_v26 = vadd.f32 %v5486_v9, %v5420_v50  ;;  %v6933_v20 = vsub.f32 %v13191_v8, %v6885_v34  ;;  %v13193_v50 = vld [vmem:[#allocation36_spill] sm:$0xff] }
 0x45b   : > { %v5424_v49 = vpop.f32.mrf.mxu0  ;;  %v5571_v36 = vpop.f32.mrf.mxu2 }
 0x45c   : > { %v5572_v41 = vadd.f32 %v5571_v36, %v5487_v26  ;;  %6105 = vmatmul.f32.gmra.mxu1 %v11096_v58  ;;  %v11731_v7 = vmax.f32 %v6933_v20, 0.0  ;;  %v5425_v46 = vadd.f32 %v5424_v49, %v5357_v16  ;;  %v13194_v26 = vld [vmem:[#allocation57_spill] sm:$0xff] }
 0x45d   : > { %6311 = vmatmul.f32.gmra.mxu3 %v11296_v14 }
 0x45e   : > { %6052 = vmatmul.f32.gmra.mxu0 %v11049_v22  ;;  %v5629_v13 = vadd.f32 %v5628_v63, %v5572_v41  ;;  %v7077_v12 = vsel %vm142_vm2, %v11731_v7, -inf }
 0x45f   : > { %7078 = vmax.xlane.f32.xlu0 %v7077_v12  ;;  %v5632_v6 = vpop.f32.mrf.mxu3 }
 0x460   : > { %6202 = vmatmul.f32.gmra.mxu2 %v13192_v48  ;;  %v6886_v47 = vmul.f32 2.0, %v5629_v13  ;;  %v13195_v48 = vld [vmem:[#allocation31_spill] sm:$0xff] }
 0x461   : > { %v5492_v61 = vpop.f32.mrf.mxu1 }
 0x462   : > { %v5493_v58 = vadd.f32 %v5492_v61, %v5425_v46  ;;  %v6934_v34 = vsub.f32 %v13193_v50, %v6886_v47  ;;  %v13196_v61 = vld [vmem:[#allocation12_spill] sm:$0xff] }
 0x463   : > { %v5429_v28 = vpop.f32.mrf.mxu0  ;;  %v5575_v20 = vpop.f32.mrf.mxu2 }
 0x464   : > { %v5576_v9 = vadd.f32 %v5575_v20, %v5493_v58  ;;  %6109 = vmatmul.f32.gmra.mxu1 %v11049_v22  ;;  %v11742_v43 = vmax.f32 %v6934_v34, 0.0  ;;  %v5430_v36 = vadd.f32 %v5429_v28, %v5361_v40 }
 0x465   : > { %6315 = vmatmul.f32.gmra.mxu3 %v11268_v4 }
 0x466   : > { %6056 = vmatmul.f32.gmra.mxu0 %v13152_v31  ;;  %v5633_v63 = vadd.f32 %v5632_v6, %v5576_v9  ;;  %v7080_v49 = vsel %vm142_vm2, %v11742_v43, -inf }
 0x467   : > { %7081 = vmax.xlane.f32.xlu1 %v7080_v49  ;;  %v5636_v41 = vpop.f32.mrf.mxu3 }
 0x468   : > { %6210 = vmatmul.f32.gmra.mxu2 %v13194_v26  ;;  %v6887_v8 = vmul.f32 2.0, %v5633_v63  ;;  %v13197_v63 = vld [vmem:[#allocation90_spill] sm:$0xff] }
 0x469   : > { %v5498_v13 = vpop.f32.mrf.mxu1 }
 0x46a   : > { %v5499_v22 = vadd.f32 %v5498_v13, %v5430_v36  ;;  %v6935_v46 = vsub.f32 %v13195_v48, %v6887_v8 }
 0x46b   : > { %v5434_v16 = vpop.f32.mrf.mxu0  ;;  %v5579_v12 = vpop.f32.mrf.mxu2 }
 0x46c   : > { %v5580_v47 = vadd.f32 %v5579_v12, %v5499_v22  ;;  %6113 = vmatmul.f32.gmra.mxu1 %v13152_v31  ;;  %v11753_v44 = vmax.f32 %v6935_v46, 0.0  ;;  %v5435_v58 = vadd.f32 %v5434_v16, %v5365_v59 }
 0x46d   : > { %6319 = vmatmul.f32.gmra.mxu3 %v11251_v2 }
 0x46e   : > { %6060 = vmatmul.f32.gmra.mxu0 %v13161_v45  ;;  %v5637_v6 = vadd.f32 %v5636_v41, %v5580_v47  ;;  %v7083_v28 = vsel %vm142_vm2, %v11753_v44, -inf  ;;  %v13198_v41 = vld [vmem:[#allocation19_spill] sm:$0xff]  ;;  %v13199_v47 = vld [vmem:[#allocation41_spill] sm:$0xff] }
 0x46f   : > { %7084 = vmax.xlane.f32.xlu2 %v7083_v28  ;;  %v5640_v50 = vpop.f32.mrf.mxu3 }
 0x470   : > { %6218 = vmatmul.f32.gmra.mxu2 %v13196_v61  ;;  %v6888_v20 = vmul.f32 2.0, %v5637_v6 }
 0x471   : > { %v5504_v9 = vpop.f32.mrf.mxu1 }
 0x472   : > { %v5505_v31 = vadd.f32 %v5504_v9, %v5435_v58  ;;  %v6936_v49 = vsub.f32 %v13197_v63, %v6888_v20  ;;  %v13200_v58 = vld [vmem:[#allocation53_spill] sm:$0xff] }
 0x473   : > { %v5439_v34 = vpop.f32.mrf.mxu0  ;;  %v5583_v40 = vpop.f32.mrf.mxu2  ;;  %v13201_v9 = vld [vmem:[#allocation61_spill] sm:$0xff] }
 0x474   : > { %v5584_v26 = vadd.f32 %v5583_v40, %v5505_v31  ;;  %6117 = vmatmul.f32.gmra.mxu1 %v13161_v45  ;;  %v11764_v25 = vmax.f32 %v6936_v49, 0.0  ;;  %v5440_v16 = vadd.f32 %v5439_v34, %v5369_v21  ;;  %v13202_v31 = vld [vmem:[#allocation10_spill] sm:$0xff] }
 0x475   : > { %6323 = vmatmul.f32.gmra.mxu3 %v11233_v15 }
 0x476   : > { %6064 = vmatmul.f32.gmra.mxu0 %v13170_v29  ;;  %v5641_v36 = vadd.f32 %v5640_v50, %v5584_v26  ;;  %v7086_v8 = vsel %vm142_vm2, %v11764_v25, -inf }
 0x477   : > { %7087 = vmax.xlane.f32.xlu0 %v7086_v8  ;;  %v5644_v22 = vpop.f32.mrf.mxu3 }
 0x478   : > { %6226 = vmatmul.f32.gmra.mxu2 %v13198_v41  ;;  %v6889_v13 = vmul.f32 2.0, %v5641_v36  ;;  %v5377_v36 = vadd.f32 %v11699_v1, %v11703_v0 }
 0x479   : > { %v5510_v48 = vpop.f32.mrf.mxu1 }
 0x47a   : > { %v5511_v45 = vadd.f32 %v5510_v48, %v5440_v16  ;;  %v6937_v59 = vsub.f32 %v13199_v47, %v6889_v13  ;;  %v13203_v16 = vld [vmem:[#allocation9_spill] sm:$0xff] }
 0x47b   : > { %v5444_v12 = vpop.f32.mrf.mxu0  ;;  %v5587_v46 = vpop.f32.mrf.mxu2  ;;  %v13204_v48 = vld [vmem:[#allocation73_spill] sm:$0xff] }
 0x47c   : > { %v5588_v6 = vadd.f32 %v5587_v46, %v5511_v45  ;;  %6121 = vmatmul.f32.gmra.mxu1 %v13170_v29  ;;  %v11775_v18 = vmax.f32 %v6937_v59, 0.0  ;;  %v5445_v20 = vadd.f32 %v5444_v12, %v5373_v38  ;;  %v6842_v29 = vadd.f32 %v13202_v31, %v13201_v9 }
 0x47d   : > { %6327 = vmatmul.f32.gmra.mxu3 %v11227_v37 }
 0x47e   : > { %6068 = vmatmul.f32.gmra.mxu0 %v13179_v33  ;;  %v5645_v28 = vadd.f32 %v5644_v22, %v5588_v6  ;;  %v7089_v61 = vsel %vm142_vm2, %v11775_v18, -inf }
 0x47f   : > { %7090 = vmax.xlane.f32.xlu1 %v7089_v61  ;;  %v5648_v34 = vpop.f32.mrf.mxu3 }
 0x480   : > { %6234 = vmatmul.f32.gmra.mxu2 %v13200_v58  ;;  %v6890_v50 = vmul.f32 2.0, %v5645_v28 }
 0x481   : > { %v5516_v63 = vpop.f32.mrf.mxu1 }
 0x482   : > { %v5517_v49 = vadd.f32 %v5516_v63, %v5445_v20  ;;  %v6938_v21 = vsub.f32 %v6842_v29, %v6890_v50  ;;  %v13205_v20 = vld [vmem:[#allocation86_spill] sm:$0xff] }
 0x483   : > { %v5449_v40 = vpop.f32.mrf.mxu0  ;;  %v5591_v26 = vpop.f32.mrf.mxu2 }
 0x484   : > { %v5592_v55 = vadd.f32 %v5591_v26, %v5517_v49  ;;  %6125 = vmatmul.f32.gmra.mxu1 %v13179_v33  ;;  %v11787_v23 = vmax.f32 %v6938_v21, 0.0  ;;  %v5450_v13 = vadd.f32 %v5449_v40, %v5377_v36  ;;  %v6843_v33 = vadd.f32 %v13202_v31, %v13204_v48 }
 0x485   : > { %6331 = vmatmul.f32.gmra.mxu3 %v11212_v52 }
 0x486   : > { %6072 = vmatmul.f32.gmra.mxu0 %v13185_v30  ;;  %v5649_v8 = vadd.f32 %v5648_v34, %v5592_v55  ;;  %v7092_v41 = vsel %vm142_vm2, %v11787_v23, -inf }
 0x487   : > { %7093 = vmax.xlane.f32.xlu2 %v7092_v41  ;;  %v5652_v12 = vpop.f32.mrf.mxu3 }
 0x488   : > { %6242 = vmatmul.f32.gmra.mxu2 %v13203_v16  ;;  %v6891_v22 = vmul.f32 2.0, %v5649_v8 }
 0x489   : > { %v5522_v45 = vpop.f32.mrf.mxu1 }
 0x48a   : > { %v5523_v47 = vadd.f32 %v5522_v45, %v5450_v13  ;;  %v6939_v6 = vsub.f32 %v6843_v33, %v6891_v22 }
 0x48b   : > { %v11797_v46 = vpop.f32.mrf.mxu0  ;;  %v5595_v59 = vpop.f32.mrf.mxu2 }
 0x48c   : > { %v5596_v1 = vadd.f32 %v5595_v59, %v5523_v47  ;;  %6129 = vmatmul.f32.gmra.mxu1 %v13185_v30  ;;  %v11801_v0 = vmax.f32 %v6939_v6, 0.0  ;;  %v13206_v47 = vld [vmem:[#allocation101_spill] sm:$0xff] }
 0x48d   : > { %6579 = vmatmul.f32.vlgmr.msrb.gmra.mxu3 %v13149_v3 }
 0x48e   : > { %6369 = vmatmul.f32.vlgmr.msrb.gmra.mxu0 %v13147_v60  ;;  %v5653_v38 = vadd.f32 %v5652_v12, %v5596_v1  ;;  %v7095_v61 = vsel %vm142_vm2, %v11801_v0, -inf  ;;  %v6844_v60 = vadd.f32 %v13202_v31, %v13205_v20 }
 0x48f   : > { %v7055_v28 = vpop.xlane.xlu1 %7054  ;;  %7096 = vmax.xlane.f32.xlu0 %v7095_v61  ;;  %v11809_v34 = vpop.f32.mrf.mxu3 }
 0x490   : > { %6522 = vmatmul.f32.vlgmr.msrb.gmra.mxu2 %v13149_v3  ;;  %v7165_v58 = vmul.f32 0.25, %v7055_v28  ;;  %v6892_v50 = vmul.f32 2.0, %v5653_v38  ;;  %v13208_v38 = vld [vmem:[#allocation35_spill] sm:$0xff] }
 0x491   : > { %v11814_v9 = vpop.f32.mrf.mxu1 }
 0x492   : > { %vm7213_vm11 = vcmp.lt.f32.partialorder %v11555_v19, %v7165_v58  ;;  %v6940_v63 = vsub.f32 %v6844_v60, %v6892_v50  ;;  %v13209_v58 = vld [vmem:[#allocation74_spill] sm:$0xff] }
 0x493   : > { %v11812_v30 = vpop.f32.mrf.mxu0  ;;  %v7261_v29 = vsel %vm7213_vm11, 1, %v13101_v24  ;;  %v11817_v40 = vpop.f32.mrf.mxu2 }
 0x494   : > { %7309 = vst.msk [vmem:[%s11329_s27 + $0x80] sm:$0xff] %vm142_vm2, %v7261_v29  ;;  %6435 = vmatmul.f32.vlgmr.msrb.gmra.mxu1 %v13151_v32  ;;  %v11823_v3 = vmax.f32 %v6940_v63, 0.0  ;;  %v13210_v63 = vld [vmem:[#allocation25_spill] sm:$0xff] }
 0x495   : > { %6583 = vmatmul.f32.gmra.mxu3 %v13143_v56 }
 0x496   : > { %6374 = vmatmul.f32.gmra.mxu0 %v13142_v5  ;;  %v7098_v31 = vsel %vm142_vm2, %v11823_v3, -inf }
 0x497   : > { %v7058_v19 = vpop.xlane.xlu2 %7057  ;;  %7099 = vmax.xlane.f32.xlu1 %v7098_v31  ;;  %v11829_v26 = vpop.f32.mrf.mxu3 }
 0x498   : > { %6526 = vmatmul.f32.gmra.mxu2 %v13143_v56  ;;  %v7166_v49 = vmul.f32 0.25, %v7058_v19  ;;  %v13211_v19 = vld [vmem:[#allocation52_spill] sm:$0xff] }
 0x499   : > { %v11834_v5 = vpop.f32.mrf.mxu1 }
 0x49a   : > { %vm7214_vm12 = vcmp.lt.f32.partialorder %v11584_v35, %v7166_v49 }
 0x49b   : > { %v11832_v21 = vpop.f32.mrf.mxu0  ;;  %v7262_v32 = vsel %vm7214_vm12, 1, %v13101_v24  ;;  %v11837_v55 = vpop.f32.mrf.mxu2 }
 0x49c   : > { %7310 = vst.msk [vmem:[%s11329_s27 + $0x88] sm:$0xff] %vm142_vm2, %v7262_v32  ;;  %6441 = vmatmul.f32.gmra.mxu1 %v13146_v53 }
 0x49d   : > { %6587 = vmatmul.f32.gmra.mxu3 %v11296_v14 }
 0x49e   : > { %6379 = vmatmul.f32.gmra.mxu0 %v11326_v51 }
 0x49f   : > { %v7061_v56 = vpop.xlane.xlu0 %7060 }
 0x4a0   : > { %6530 = vmatmul.f32.gmra.mxu2 %v11296_v14  ;;  %v7167_v35 = vmul.f32 0.25, %v7061_v56  ;;  %v11845_v36 = vpop.f32.mrf.mxu3  ;;  %v13212_v56 = vld [vmem:[#allocation45_spill] sm:$0xff] }
 0x4a1   : > { %v11850_v41 = vpop.f32.mrf.mxu1 }
 0x4a2   : > { %vm7215_vm13 = vcmp.lt.f32.partialorder %v11613_v11, %v7167_v35 }
 0x4a3   : > { %v11848_v8 = vpop.f32.mrf.mxu0  ;;  %v7263_v16 = vsel %vm7215_vm13, 1, %v13101_v24  ;;  %v11853_v51 = vpop.f32.mrf.mxu2 }
 0x4a4   : > { %7311 = vst.msk [vmem:[%s11329_s27 + $0x90] sm:$0xff] %vm142_vm2, %v7263_v16  ;;  %6447 = vmatmul.f32.gmra.mxu1 %v11365_v10 }
 0x4a5   : > { %6591 = vmatmul.f32.gmra.mxu3 %v11268_v4 }
 0x4a6   : > { %6384 = vmatmul.f32.gmra.mxu0 %v11299_v57  ;;  %v7064_v14 = vpop.xlane.xlu1 %7063 }
 0x4a7   : > { %v7168_v53 = vmul.f32 0.25, %v7064_v14 }
 0x4a8   : > { %6534 = vmatmul.f32.gmra.mxu2 %v11268_v4  ;;  %v11861_v11 = vpop.f32.mrf.mxu3 }
 0x4a9   : > { %vm7216_vm14 = vcmp.lt.f32.partialorder %v11639_v39, %v7168_v53  ;;  %v11866_v22 = vpop.f32.mrf.mxu1 }
 0x4aa   : > { %v7264_v12 = vsel %vm7216_vm14, 1, %v13101_v24 }
 0x4ab   : > { %v11864_v13 = vpop.f32.mrf.mxu0  ;;  %v11869_v57 = vpop.f32.mrf.mxu2  ;;  %7312 = vst.msk [vmem:[%s11329_s27 + $0x98] sm:$0xff] %vm142_vm2, %v7264_v12 }
 0x4ac   : > { %6453 = vmatmul.f32.gmra.mxu1 %v11343_v27 }
 0x4ad   : > { %6595 = vmatmul.f32.gmra.mxu3 %v11251_v2 }
 0x4ae   : > { %6389 = vmatmul.f32.gmra.mxu0 %v11271_v42  ;;  %v7067_v4 = vpop.xlane.xlu2 %7066 }
 0x4af   : > { %v7169_v10 = vmul.f32 0.25, %v7067_v4 }
 0x4b0   : > { %6538 = vmatmul.f32.gmra.mxu2 %v11251_v2  ;;  %v11877_v39 = vpop.f32.mrf.mxu3 }
 0x4b1   : > { %vm7217_vm15 = vcmp.lt.f32.partialorder %v11661_v54, %v7169_v10  ;;  %v11882_v33 = vpop.f32.mrf.mxu1 }
 0x4b2   : > { %v7265_v45 = vsel %vm7217_vm15, 1, %v13101_v24 }
 0x4b3   : > { %v11880_v48 = vpop.f32.mrf.mxu0  ;;  %v11885_v42 = vpop.f32.mrf.mxu2  ;;  %7313 = vst.msk [vmem:[%s11329_s27 + $0xa0] sm:$0xff] %vm142_vm2, %v7265_v45 }
 0x4b4   : > { %6459 = vmatmul.f32.gmra.mxu1 %v11311_v17  ;;  %v13207_v17 = vld [vmem:[#allocation56_spill] sm:$0xff] }
 0x4b5   : > { %6599 = vmatmul.f32.gmra.mxu3 %v11233_v15 }
 0x4b6   : > { %6394 = vmatmul.f32.gmra.mxu0 %v11254_v62  ;;  %v7070_v2 = vpop.xlane.xlu0 %7069 }
 0x4b7   : > { %v7170_v27 = vmul.f32 0.25, %v7070_v2 }
 0x4b8   : > { %6542 = vmatmul.f32.gmra.mxu2 %v11233_v15  ;;  %v11893_v54 = vpop.f32.mrf.mxu3 }
 0x4b9   : > { %vm7218_vm0 = vcmp.lt.f32.partialorder %v13206_v47, %v7170_v27  ;;  %v11898_v6 = vpop.f32.mrf.mxu1 }
 0x4ba   : > { %v7266_v1 = vsel %vm7218_vm0, 1, %v13101_v24 }
 0x4bb   : > { %v11896_v59 = vpop.f32.mrf.mxu0  ;;  %v11901_v62 = vpop.f32.mrf.mxu2  ;;  %7314 = vst.msk [vmem:[%s11329_s27 + $0xa8] sm:$0xff] %vm142_vm2, %v7266_v1 }
 0x4bc   : > { %6465 = vmatmul.f32.gmra.mxu1 %v13208_v38 }
 0x4bd   : > { %6603 = vmatmul.f32.gmra.mxu3 %v11227_v37 }
 0x4be   : > { %6399 = vmatmul.f32.gmra.mxu0 %v13207_v17  ;;  %v7073_v15 = vpop.xlane.xlu1 %7072 }
 0x4bf   : > { %v7171_v28 = vmul.f32 0.25, %v7073_v15  ;;  %v13214_v15 = vld [vmem:[#allocation17_spill] sm:$0xff] }
 0x4c0   : > { %6546 = vmatmul.f32.gmra.mxu2 %v11227_v37  ;;  %v11909_v61 = vpop.f32.mrf.mxu3  ;;  %v5827_v37 = vadd.f32 %v11814_v9, %v11797_v46  ;;  %v13213_v46 = vld [vmem:[#allocation81_spill] sm:$0xff] }
 0x4c1   : > { %vm7219_vm1 = vcmp.lt.f32.partialorder %v13209_v58, %v7171_v28  ;;  %v11914_v60 = vpop.f32.mrf.mxu1 }
 0x4c2   : > { %v7267_v50 = vsel %vm7219_vm1, 1, %v13101_v24  ;;  %v5893_v14 = vadd.f32 %v11817_v40, %v5827_v37 }
 0x4c3   : > { %v11912_v20 = vpop.f32.mrf.mxu0  ;;  %v11917_v29 = vpop.f32.mrf.mxu2  ;;  %7315 = vst.msk [vmem:[%s11329_s27 + $0xb0] sm:$0xff] %vm142_vm2, %v7267_v50 }
 0x4c4   : > { %6471 = vmatmul.f32.gmra.mxu1 %v13211_v19  ;;  %v5959_v9 = vadd.f32 %v11809_v34, %v5893_v14 }
 0x4c5   : > { %6607 = vmatmul.f32.gmra.mxu3 %v11212_v52 }
 0x4c6   : > { %6404 = vmatmul.f32.gmra.mxu0 %v13210_v63  ;;  %v7076_v31 = vpop.xlane.xlu2 %7075 }
 0x4c7   : > { %v7172_v49 = vmul.f32 0.25, %v7076_v31 }
 0x4c8   : > { %6550 = vmatmul.f32.gmra.mxu2 %v11212_v52  ;;  %v11927_v32 = vpop.f32.mrf.mxu3  ;;  %v5831_v52 = vadd.f32 %v11834_v5, %v11812_v30  ;;  %v5835_v30 = vadd.f32 %v11850_v41, %v11832_v21 }
 0x4c9   : > { %vm7220_vm3 = vcmp.lt.f32.partialorder %v13212_v56, %v7172_v49  ;;  %v11930_v35 = vpop.f32.mrf.mxu1  ;;  %v5839_v56 = vadd.f32 %v11866_v22, %v11848_v8 }
 0x4ca   : > { %v7268_v53 = vsel %vm7220_vm3, 1, %v13101_v24  ;;  %v5898_v40 = vadd.f32 %v11837_v55, %v5831_v52 }
 0x4cb   : > { %v6045_v16 = vpop.f32.mrf.mxu0  ;;  %v11934_v12 = vpop.f32.mrf.mxu2  ;;  %7316 = vst.msk [vmem:[%s11329_s27 + $0xb8] sm:$0xff] %vm142_vm2, %v7268_v53 }
 0x4cc   : > { %6477 = vmatmul.f32.gmra.mxu1 %v13213_v46  ;;  %v6046_v4 = vadd.f32 %v6045_v16, %v5959_v9  ;;  %v5965_v34 = vadd.f32 %v11829_v26, %v5898_v40 }
 0x4d0   : > { %v11942_v10 = vpop.f32.mrf.mxu3 }
 0x4d1   : > { %v6102_v2 = vpop.f32.mrf.mxu1 }
 0x4d2   : > { %v6103_v27 = vadd.f32 %v6102_v2, %v6046_v4  ;;  %v7079_v1 = vpop.xlane.xlu0 %7078 }
 0x4d3   : > { %v6049_v45 = vpop.f32.mrf.mxu0  ;;  %v11945_v47 = vpop.f32.mrf.mxu2  ;;  %v7173_v17 = vmul.f32 0.25, %v7079_v1  ;;  %v5843_v1 = vadd.f32 %v11882_v33, %v11864_v13 }
 0x4d4   : > { %v6893_v38 = vmul.f32 2.0, %v6103_v27  ;;  %v6050_v55 = vadd.f32 %v6049_v45, %v5965_v34 }
 0x4d5   : > { %vm7221_vm4 = vcmp.lt.f32.partialorder %v11731_v7, %v7173_v17  ;;  %v5903_v7 = vadd.f32 %v11853_v51, %v5835_v30  ;;  %v13215_v51 = vld [vmem:[#allocation47_spill] sm:$0xff] }
 0x4d6   : > { %v7269_v5 = vsel %vm7221_vm4, 1, %v13101_v24  ;;  %v6941_v28 = vsub.f32 %v13214_v15, %v6893_v38 }
 0x4d7   : > { %7317 = vst.msk [vmem:[%s11329_s27 + $0xc0] sm:$0xff] %vm142_vm2, %v7269_v5  ;;  %v5971_v16 = vadd.f32 %v11845_v36, %v5903_v7 }
 0x4d8   : > { %v11955_v58 = vpop.f32.mrf.mxu3  ;;  %v11957_v50 = vmax.f32 %v6941_v28, 0.0 }
 0x4d9   : > { %v6106_v19 = vpop.f32.mrf.mxu1 }
 0x4da   : > { %v6107_v37 = vadd.f32 %v6106_v19, %v6050_v55  ;;  %v7082_v26 = vpop.xlane.xlu1 %7081  ;;  %v7101_v41 = vsel %vm142_vm2, %v11957_v50, -inf }
 0x4db   : > { %v6053_v63 = vpop.f32.mrf.mxu0  ;;  %v11960_v21 = vpop.f32.mrf.mxu2  ;;  %v7174_v31 = vmul.f32 0.25, %v7082_v26  ;;  %7102 = vmax.xlane.f32.xlu2 %v7101_v41 }
 0x4dc   : > { %v6894_v49 = vmul.f32 2.0, %v6107_v37  ;;  %v6054_v46 = vadd.f32 %v6053_v63, %v5971_v16  ;;  %v5847_v37 = vadd.f32 %v11898_v6, %v11880_v48 }
 0x4dd   : > { %vm7222_vm5 = vcmp.lt.f32.partialorder %v11742_v43, %v7174_v31  ;;  %v5908_v43 = vadd.f32 %v11869_v57, %v5839_v56  ;;  %v13216_v57 = vld [vmem:[#allocation15_spill] sm:$0xff] }
 0x4de   : > { %v7270_v14 = vsel %vm7222_vm5, 1, %v13101_v24  ;;  %v6942_v53 = vsub.f32 %v13215_v51, %v6894_v49 }
 0x4df   : > { %7318 = vst.msk [vmem:[%s11329_s27 + $0xc8] sm:$0xff] %vm142_vm2, %v7270_v14  ;;  %v5977_v17 = vadd.f32 %v11861_v11, %v5908_v43 }
 0x4e0   : > { %v11972_v52 = vpop.f32.mrf.mxu3  ;;  %v11974_v9 = vmax.f32 %v6942_v53, 0.0 }
 0x4e1   : > { %v6110_v45 = vpop.f32.mrf.mxu1 }
 0x4e2   : > { %v6111_v2 = vadd.f32 %v6110_v45, %v6054_v46  ;;  %v7085_v36 = vpop.xlane.xlu2 %7084  ;;  %v7104_v22 = vsel %vm142_vm2, %v11974_v9, -inf  ;;  %v5851_v45 = vadd.f32 %v11914_v60, %v11896_v59 }
 0x4e3   : > { %v6057_v4 = vpop.f32.mrf.mxu0  ;;  %v11977_v8 = vpop.f32.mrf.mxu2  ;;  %v7175_v40 = vmul.f32 0.25, %v7085_v36  ;;  %7105 = vmax.xlane.f32.xlu0 %v7104_v22 }
 0x4e4   : > { %v6895_v27 = vmul.f32 2.0, %v6111_v2  ;;  %v6058_v34 = vadd.f32 %v6057_v4, %v5977_v17 }
 0x4e5   : > { %vm7223_vm6 = vcmp.lt.f32.partialorder %v11753_v44, %v7175_v40  ;;  %v5913_v44 = vadd.f32 %v11885_v42, %v5843_v1  ;;  %v13217_v42 = vld [vmem:[#allocation23_spill] sm:$0xff] }
 0x4e6   : > { %v7271_v38 = vsel %vm7223_vm6, 1, %v13101_v24  ;;  %v6943_v30 = vsub.f32 %v13216_v57, %v6895_v27 }
 0x4e7   : > { %7319 = vst.msk [vmem:[%s11329_s27 + $0xd0] sm:$0xff] %vm142_vm2, %v7271_v38  ;;  %v5983_v26 = vadd.f32 %v11877_v39, %v5913_v44 }
 0x4e8   : > { %v11989_v5 = vpop.f32.mrf.mxu3  ;;  %v11991_v15 = vmax.f32 %v6943_v30, 0.0 }
 0x4e9   : > { %v6114_v55 = vpop.f32.mrf.mxu1 }
 0x4ea   : > { %v6115_v63 = vadd.f32 %v6114_v55, %v6058_v34  ;;  %v7088_v11 = vpop.xlane.xlu0 %7087  ;;  %v7107_v33 = vsel %vm142_vm2, %v11991_v15, -inf  ;;  %v5855_v34 = vadd.f32 %v11930_v35, %v11912_v20 }
 0x4eb   : > { %v6061_v28 = vpop.f32.mrf.mxu0  ;;  %v11994_v13 = vpop.f32.mrf.mxu2  ;;  %v7176_v19 = vmul.f32 0.25, %v7088_v11  ;;  %7108 = vmax.xlane.f32.xlu1 %v7107_v33 }
 0x4ec   : > { %v6896_v7 = vmul.f32 2.0, %v6115_v63  ;;  %v6062_v49 = vadd.f32 %v6061_v28, %v5983_v26 }
 0x4ed   : > { %vm7224_vm7 = vcmp.lt.f32.partialorder %v11764_v25, %v7176_v19  ;;  %v5918_v25 = vadd.f32 %v11901_v62, %v5847_v37  ;;  %v13218_v62 = vld [vmem:[#allocation16_spill] sm:$0xff] }
 0x4ee   : > { %v7272_v41 = vsel %vm7224_vm7, 1, %v13101_v24  ;;  %v6944_v31 = vsub.f32 %v13217_v42, %v6896_v7 }
 0x4ef   : > { %7320 = vst.msk [vmem:[%s11329_s27 + $0xd8] sm:$0xff] %vm142_vm2, %v7272_v41  ;;  %v5989_v43 = vadd.f32 %v11893_v54, %v5918_v25 }
 0x4f0   : > { %v12006_v56 = vpop.f32.mrf.mxu3  ;;  %v12008_v16 = vmax.f32 %v6944_v31, 0.0 }
 0x4f1   : > { %v6118_v51 = vpop.f32.mrf.mxu1 }
 0x4f2   : > { %v6119_v53 = vadd.f32 %v6118_v51, %v6062_v49  ;;  %v7091_v39 = vpop.xlane.xlu1 %7090  ;;  %v7110_v6 = vsel %vm142_vm2, %v12008_v16, -inf  ;;  %v13220_v49 = vld [vmem:[#allocation18_spill] sm:$0xff] }
 0x4f3   : > { %v6065_v14 = vpop.f32.mrf.mxu0  ;;  %v12011_v48 = vpop.f32.mrf.mxu2  ;;  %v7177_v46 = vmul.f32 0.25, %v7091_v39  ;;  %7111 = vmax.xlane.f32.xlu2 %v7110_v6 }
 0x4f4   : > { %v6897_v4 = vmul.f32 2.0, %v6119_v53  ;;  %v6066_v22 = vadd.f32 %v6065_v14, %v5989_v43  ;;  %v6305_v43 = vadd.f32 %v11942_v10, %v11945_v47  ;;  %v6309_v10 = vadd.f32 %v11955_v58, %v11960_v21 }
 0x4f5   : > { %vm7225_vm8 = vcmp.lt.f32.partialorder %v11775_v18, %v7177_v46  ;;  %v5923_v18 = vadd.f32 %v11917_v29, %v5851_v45  ;;  %v13219_v29 = vld [vmem:[#allocation6_spill] sm:$0xff] }
 0x4f6   : > { %v7273_v2 = vsel %vm7225_vm8, 1, %v13101_v24  ;;  %v6945_v36 = vsub.f32 %v13218_v62, %v6897_v4  ;;  %v13221_v62 = vld [vmem:[#allocation38_spill] sm:$0xff] }
 0x4f7   : > { %7321 = vst.msk [vmem:[%s11329_s27 + $0xe0] sm:$0xff] %vm142_vm2, %v7273_v2  ;;  %v5995_v28 = vadd.f32 %v11909_v61, %v5923_v18 }
 0x4f8   : > { %v12023_v40 = vpop.f32.mrf.mxu3  ;;  %v12025_v27 = vmax.f32 %v6945_v36, 0.0 }
 0x4f9   : > { %v6122_v17 = vpop.f32.mrf.mxu1 }
 0x4fa   : > { %v6123_v38 = vadd.f32 %v6122_v17, %v6066_v22  ;;  %v7094_v54 = vpop.xlane.xlu2 %7093  ;;  %v7113_v60 = vsel %vm142_vm2, %v12025_v27, -inf }
 0x4fb   : > { %v6069_v1 = vpop.f32.mrf.mxu0  ;;  %v12028_v59 = vpop.f32.mrf.mxu2  ;;  %v7178_v57 = vmul.f32 0.25, %v7094_v54  ;;  %7114 = vmax.xlane.f32.xlu0 %v7113_v60 }
 0x4fc   : > { %v6898_v30 = vmul.f32 2.0, %v6123_v38  ;;  %v6070_v63 = vadd.f32 %v6069_v1, %v5995_v28 }
 0x4fd   : > { %vm7226_vm9 = vcmp.lt.f32.partialorder %v11787_v23, %v7178_v57  ;;  %v5928_v23 = vadd.f32 %v11934_v12, %v5855_v34 }
 0x4fe   : > { %v7274_v55 = vsel %vm7226_vm9, 1, %v13101_v24  ;;  %v6946_v44 = vsub.f32 %v13219_v29, %v6898_v30 }
 0x4ff   : > { %7322 = vst.msk [vmem:[%s11329_s27 + $0xe8] sm:$0xff] %vm142_vm2, %v7274_v55  ;;  %v6001_v42 = vadd.f32 %v11927_v32, %v5928_v23 }
 0x500   : > { %v12040_v11 = vpop.f32.mrf.mxu3  ;;  %v12042_v33 = vmax.f32 %v6946_v44, 0.0 }
 0x501   : > { %v6126_v7 = vpop.f32.mrf.mxu1 }
 0x502   : > { %v6127_v37 = vadd.f32 %v6126_v7, %v6070_v63  ;;  %v7097_v61 = vpop.xlane.xlu0 %7096  ;;  %v7116_v35 = vsel %vm142_vm2, %v12042_v33, -inf }
 0x503   : > { %v6073_v19 = vpop.f32.mrf.mxu0  ;;  %v12045_v20 = vpop.f32.mrf.mxu2  ;;  %v7179_v26 = vmul.f32 0.25, %v7097_v61  ;;  %7117 = vmax.xlane.f32.xlu1 %v7116_v35  ;;  %v6313_v61 = vadd.f32 %v11972_v52, %v11977_v8  ;;  %v6317_v52 = vadd.f32 %v11989_v5, %v11994_v13  ;;  %v6321_v5 = vadd.f32 %v12006_v56, %v12011_v48 }
 0x504   : > { %v6899_v41 = vmul.f32 2.0, %v6127_v37  ;;  %v6074_v12 = vadd.f32 %v6073_v19, %v6001_v42  ;;  %v13222_v19 = vld [vmem:[#allocation117_spill] sm:$0xff]  ;;  %v6325_v56 = vadd.f32 %v12023_v40, %v12028_v59  ;;  %v6329_v40 = vadd.f32 %v12040_v11, %v12045_v20 }
 0x505   : > { %vm7227_vm10 = vcmp.lt.f32.partialorder %v11801_v0, %v7179_v26 }
 0x506   : > { %v7275_v31 = vsel %vm7227_vm10, 1, %v13101_v24  ;;  %v6947_v14 = vsub.f32 %v13220_v49, %v6899_v41 }
 0x507   : > { %7323 = vst.msk [vmem:[%s11329_s27 + $0xf0] sm:$0xff] %vm142_vm2, %v7275_v31 }
 0x508   : > { %v12055_v51 = vpop.f32.mrf.mxu3  ;;  %v12057_v25 = vmax.f32 %v6947_v14, 0.0 }
 0x509   : > { %v6130_v53 = vpop.f32.mrf.mxu1 }
 0x50a   : > { %v6131_v6 = vadd.f32 %v6130_v53, %v6074_v12  ;;  %v7100_v0 = vpop.xlane.xlu1 %7099  ;;  %v7119_v32 = vsel %vm142_vm2, %v12057_v25, -inf  ;;  %v13223_v12 = vld [vmem:[#allocation42_spill] sm:$0xff] }
 0x50b   : > { %v6370_v39 = vpop.f32.mrf.mxu0  ;;  %v12059_v46 = vpop.f32.mrf.mxu2  ;;  %v7180_v4 = vmul.f32 0.25, %v7100_v0  ;;  %7120 = vmax.xlane.f32.xlu2 %v7119_v32 }
 0x50c   : > { %v6900_v45 = vmul.f32 2.0, %v6131_v6  ;;  %v6371_v22 = vadd.f32 %v6370_v39, %v6305_v43  ;;  %v6333_v11 = vadd.f32 %v12055_v51, %v12059_v46 }
 0x50d   : > { %vm7228_vm11 = vcmp.lt.f32.partialorder %v11823_v3, %v7180_v4 }
 0x50e   : > { %v7276_v2 = vsel %vm7228_vm11, 1, %v13101_v24  ;;  %v6948_v36 = vsub.f32 %v13221_v62, %v6900_v45 }
 0x50f   : > { %7324 = vst.msk [vmem:[%s11329_s27 + $0xf8] sm:$0xff] %vm142_vm2, %v7276_v2 }
 0x510   : > { %v6580_v1 = vpop.f32.mrf.mxu3  ;;  %v12070_v17 = vmax.f32 %v6948_v36, 0.0 }
 0x511   : > { %v6436_v38 = vpop.f32.mrf.mxu1 }
 0x512   : > { %v6437_v54 = vadd.f32 %v6436_v38, %v6371_v22  ;;  %v7122_v3 = vsel %vm142_vm2, %v12070_v17, -inf  ;;  %v13224_v22 = vld [vmem:[#allocation84_spill] sm:$0xff] }
 0x513   : > { %v6375_v18 = vpop.f32.mrf.mxu0  ;;  %v6523_v60 = vpop.f32.mrf.mxu2  ;;  %7123 = vmax.xlane.f32.xlu0 %v7122_v3 }
 0x514   : > { %v6524_v57 = vadd.f32 %v6523_v60, %v6437_v54  ;;  %v6376_v30 = vadd.f32 %v6375_v18, %v6309_v10 }
 0x516   : > { %v6581_v47 = vadd.f32 %v6580_v1, %v6524_v57 }
 0x518   : > { %v6901_v34 = vmul.f32 2.0, %v6581_v47  ;;  %v6584_v28 = vpop.f32.mrf.mxu3 }
 0x519   : > { %v6442_v29 = vpop.f32.mrf.mxu1 }
 0x51a   : > { %v6443_v44 = vadd.f32 %v6442_v29, %v6376_v30  ;;  %v6949_v7 = vsub.f32 %v13222_v19, %v6901_v34 }
 0x51b   : > { %v6380_v55 = vpop.f32.mrf.mxu0  ;;  %v6527_v63 = vpop.f32.mrf.mxu2 }
 0x51c   : > { %v6528_v23 = vadd.f32 %v6527_v63, %v6443_v44  ;;  %v12077_v37 = vmax.f32 %v6949_v7, 0.0  ;;  %v6381_v21 = vadd.f32 %v6380_v55, %v6313_v61 }
 0x51e   : > { %v6585_v35 = vadd.f32 %v6584_v28, %v6528_v23  ;;  %v7125_v58 = vsel %vm142_vm2, %v12077_v37, -inf  ;;  %v13225_v28 = vld [vmem:[#allocation51_spill] sm:$0xff] }
 0x51f   : > { %7126 = vmax.xlane.f32.xlu1 %v7125_v58 }
 0x520   : > { %v6902_v26 = vmul.f32 2.0, %v6585_v35  ;;  %v6588_v41 = vpop.f32.mrf.mxu3 }
 0x521   : > { %v6448_v31 = vpop.f32.mrf.mxu1 }
 0x522   : > { %v6449_v49 = vadd.f32 %v6448_v31, %v6381_v21  ;;  %v6950_v53 = vsub.f32 %v13223_v12, %v6902_v26  ;;  %v13226_v21 = vld [vmem:[#allocation40_spill] sm:$0xff] }
 0x523   : > { %v6385_v42 = vpop.f32.mrf.mxu0  ;;  %v6531_v14 = vpop.f32.mrf.mxu2 }
 0x524   : > { %v6532_v39 = vadd.f32 %v6531_v14, %v6449_v49  ;;  %v12084_v6 = vmax.f32 %v6950_v53, 0.0  ;;  %v6386_v32 = vadd.f32 %v6385_v42, %v6317_v52  ;;  %v13227_v53 = vld [vmem:[#allocation111_spill] sm:$0xff] }
 0x526   : > { %v6589_v8 = vadd.f32 %v6588_v41, %v6532_v39  ;;  %v7128_v0 = vsel %vm142_vm2, %v12084_v6, -inf  ;;  %v13228_v39 = vld [vmem:[#allocation46_spill] sm:$0xff] }
 0x527   : > { %7129 = vmax.xlane.f32.xlu2 %v7128_v0  ;;  %v6858_v52 = vadd.f32 %v13228_v39, %v13227_v53 }
 0x528   : > { %v6903_v4 = vmul.f32 2.0, %v6589_v8  ;;  %v6592_v45 = vpop.f32.mrf.mxu3 }
 0x529   : > { %v6454_v2 = vpop.f32.mrf.mxu1 }
 0x52a   : > { %v6455_v62 = vadd.f32 %v6454_v2, %v6386_v32  ;;  %v6951_v1 = vsub.f32 %v13224_v22, %v6903_v4 }
 0x52b   : > { %v6390_v43 = vpop.f32.mrf.mxu0  ;;  %v6535_v36 = vpop.f32.mrf.mxu2 }
 0x52c   : > { %v6536_v18 = vadd.f32 %v6535_v36, %v6455_v62  ;;  %v12091_v38 = vmax.f32 %v6951_v1, 0.0  ;;  %v6391_v60 = vadd.f32 %v6390_v43, %v6321_v5 }
 0x52e   : > { %v6593_v13 = vadd.f32 %v6592_v45, %v6536_v18  ;;  %v7131_v54 = vsel %vm142_vm2, %v12091_v38, -inf  ;;  %v13229_v18 = vld [vmem:[#allocation69_spill] sm:$0xff] }
 0x52f   : > { %7132 = vmax.xlane.f32.xlu0 %v7131_v54  ;;  %v6859_v5 = vadd.f32 %v13228_v39, %v13229_v18 }
 0x530   : > { %v6904_v3 = vmul.f32 2.0, %v6593_v13  ;;  %v6596_v57 = vpop.f32.mrf.mxu3 }
 0x531   : > { %v6460_v47 = vpop.f32.mrf.mxu1 }
 0x532   : > { %v6461_v30 = vadd.f32 %v6460_v47, %v6391_v60  ;;  %v6952_v55 = vsub.f32 %v13225_v28, %v6904_v3  ;;  %v13230_v28 = vld [vmem:[#allocation43_spill] sm:$0xff] }
 0x533   : > { %v6395_v10 = vpop.f32.mrf.mxu0  ;;  %v6539_v34 = vpop.f32.mrf.mxu2 }
 0x534   : > { %v6540_v29 = vadd.f32 %v6539_v34, %v6461_v30  ;;  %v12098_v44 = vmax.f32 %v6952_v55, 0.0  ;;  %v6396_v19 = vadd.f32 %v6395_v10, %v6325_v56  ;;  %v6860_v55 = vadd.f32 %v13228_v39, %v13230_v28 }
 0x536   : > { %v6597_v48 = vadd.f32 %v6596_v57, %v6540_v29  ;;  %v7134_v63 = vsel %vm142_vm2, %v12098_v44, -inf }
 0x537   : > { %7135 = vmax.xlane.f32.xlu1 %v7134_v63 }
 0x538   : > { %v6905_v7 = vmul.f32 2.0, %v6597_v48  ;;  %v6600_v23 = vpop.f32.mrf.mxu3 }
 0x539   : > { %v6466_v61 = vpop.f32.mrf.mxu1 }
 0x53a   : > { %v6467_v35 = vadd.f32 %v6466_v61, %v6396_v19  ;;  %v6953_v26 = vsub.f32 %v13226_v21, %v6905_v7 }
 0x53b   : > { %v6543_v58 = vpop.f32.mrf.mxu2  ;;  %v6400_v41 = vpop.f32.mrf.mxu0 }
 0x53c   : > { %v6544_v42 = vadd.f32 %v6543_v58, %v6467_v35  ;;  %v12105_v31 = vmax.f32 %v6953_v26, 0.0  ;;  %v6401_v14 = vadd.f32 %v6400_v41, %v6329_v40 }
 0x53e   : > { %v6601_v59 = vadd.f32 %v6600_v23, %v6544_v42  ;;  %v7137_v49 = vsel %vm142_vm2, %v12105_v31, -inf }
 0x53f   : > { %7138 = vmax.xlane.f32.xlu2 %v7137_v49 }
 0x540   : > { %v6906_v12 = vmul.f32 2.0, %v6601_v59  ;;  %v6604_v45 = vpop.f32.mrf.mxu3 }
 0x541   : > { %v6472_v8 = vpop.f32.mrf.mxu1 }
 0x542   : > { %v6473_v0 = vadd.f32 %v6472_v8, %v6401_v14  ;;  %v6954_v4 = vsub.f32 %v6858_v52, %v6906_v12 }
 0x543   : > { %v6547_v32 = vpop.f32.mrf.mxu2  ;;  %v6405_v62 = vpop.f32.mrf.mxu0 }
 0x544   : > { %v6548_v43 = vadd.f32 %v6547_v32, %v6473_v0  ;;  %v12113_v2 = vmax.f32 %v6954_v4, 0.0  ;;  %v6406_v22 = vadd.f32 %v6405_v62, %v6333_v11 }
 0x546   : > { %v6605_v20 = vadd.f32 %v6604_v45, %v6548_v43  ;;  %v7140_v36 = vsel %vm142_vm2, %v12113_v2, -inf }
 0x547   : > { %7141 = vmax.xlane.f32.xlu0 %v7140_v36 }
 0x548   : > { %v6907_v1 = vmul.f32 2.0, %v6605_v20  ;;  %v6608_v47 = vpop.f32.mrf.mxu3 }
 0x549   : > { %v6478_v13 = vpop.f32.mrf.mxu1 }
 0x54a   : > { %v6479_v54 = vadd.f32 %v6478_v13, %v6406_v22  ;;  %v6955_v60 = vsub.f32 %v6859_v5, %v6907_v1 }
 0x54b   : > { %v6551_v3 = vpop.f32.mrf.mxu2 }
 0x54c   : > { %v6552_v57 = vadd.f32 %v6551_v3, %v6479_v54  ;;  %v12121_v10 = vmax.f32 %v6955_v60, 0.0 }
 0x54e   : > { %v6609_v51 = vadd.f32 %v6608_v47, %v6552_v57  ;;  %v7103_v46 = vpop.xlane.xlu2 %7102  ;;  %v7143_v30 = vsel %vm142_vm2, %v12121_v10, -inf }
 0x54f   : > { %v7181_v34 = vmul.f32 0.25, %v7103_v46  ;;  %7144 = vmax.xlane.f32.xlu1 %v7143_v30 }
 0x550   : > { %v6908_v29 = vmul.f32 2.0, %v6609_v51 }
 0x551   : > { %vm7229_vm12 = vcmp.lt.f32.partialorder %v11957_v50, %v7181_v34 }
 0x552   : > { %v7277_v56 = vsel %vm7229_vm12, 1, %v13101_v24  ;;  %v6956_v48 = vsub.f32 %v6860_v55, %v6908_v29 }
 0x553   : > { %7325 = vst.msk [vmem:[%s11329_s27 + $0x100] sm:$0xff] %vm142_vm2, %v7277_v56 }
 0x554   : > { %v12131_v63 = vmax.f32 %v6956_v48, 0.0 }
 0x556   : > { %v7106_v19 = vpop.xlane.xlu0 %7105  ;;  %v7146_v7 = vsel %vm142_vm2, %v12131_v63, -inf }
 0x557   : > { %v7182_v23 = vmul.f32 0.25, %v7106_v19  ;;  %7147 = vmax.xlane.f32.xlu2 %v7146_v7 }
 0x559   : > { %vm7230_vm13 = vcmp.lt.f32.partialorder %v11974_v9, %v7182_v23 }
 0x55a   : > { %v7278_v61 = vsel %vm7230_vm13, 1, %v13101_v24 }
 0x55b   : > { %7326 = vst.msk [vmem:[%s11329_s27 + $0x108] sm:$0xff] %vm142_vm2, %v7278_v61 }
 0x55e   : > { %v7109_v50 = vpop.xlane.xlu1 %7108 }
 0x55f   : > { %v7183_v35 = vmul.f32 0.25, %v7109_v50 }
 0x561   : > { %vm7231_vm14 = vcmp.lt.f32.partialorder %v11991_v15, %v7183_v35 }
 0x562   : > { %v7279_v58 = vsel %vm7231_vm14, 1, %v13101_v24 }
 0x563   : > { %7327 = vst.msk [vmem:[%s11329_s27 + $0x110] sm:$0xff] %vm142_vm2, %v7279_v58 }
 0x566   : > { %v7112_v21 = vpop.xlane.xlu2 %7111 }
 0x567   : > { %v7184_v26 = vmul.f32 0.25, %v7112_v21 }
 0x569   : > { %vm7232_vm15 = vcmp.lt.f32.partialorder %v12008_v16, %v7184_v26 }
 0x56a   : > { %v7280_v9 = vsel %vm7232_vm15, 1, %v13101_v24 }
 0x56b   : > { %7328 = vst.msk [vmem:[%s11329_s27 + $0x118] sm:$0xff] %vm142_vm2, %v7280_v9 }
 0x56e   : > { %v7115_v41 = vpop.xlane.xlu0 %7114 }
 0x56f   : > { %v7185_v42 = vmul.f32 0.25, %v7115_v41 }
 0x571   : > { %vm7233_vm0 = vcmp.lt.f32.partialorder %v12025_v27, %v7185_v42 }
 0x572   : > { %v7281_v15 = vsel %vm7233_vm0, 1, %v13101_v24 }
 0x573   : > { %7329 = vst.msk [vmem:[%s11329_s27 + $0x120] sm:$0xff] %vm142_vm2, %v7281_v15 }
 0x576   : > { %v7118_v40 = vpop.xlane.xlu1 %7117 }
 0x577   : > { %v7186_v59 = vmul.f32 0.25, %v7118_v40 }
 0x579   : > { %vm7234_vm1 = vcmp.lt.f32.partialorder %v12042_v33, %v7186_v59 }
 0x57a   : > { %v7282_v16 = vsel %vm7234_vm1, 1, %v13101_v24 }
 0x57b   : > { %7330 = vst.msk [vmem:[%s11329_s27 + $0x128] sm:$0xff] %vm142_vm2, %v7282_v16 }
 0x57e   : > { %v7121_v49 = vpop.xlane.xlu2 %7120 }
 0x57f   : > { %v7187_v14 = vmul.f32 0.25, %v7121_v49 }
 0x581   : > { %vm7235_vm3 = vcmp.lt.f32.partialorder %v12057_v25, %v7187_v14 }
 0x582   : > { %v7283_v27 = vsel %vm7235_vm3, 1, %v13101_v24 }
 0x583   : > { %7331 = vst.msk [vmem:[%s11329_s27 + $0x130] sm:$0xff] %vm142_vm2, %v7283_v27 }
 0x586   : > { %v7124_v12 = vpop.xlane.xlu0 %7123 }
 0x587   : > { %v7188_v53 = vmul.f32 0.25, %v7124_v12 }
 0x589   : > { %vm7236_vm4 = vcmp.lt.f32.partialorder %v12070_v17, %v7188_v53 }
 0x58a   : > { %v7284_v33 = vsel %vm7236_vm4, 1, %v13101_v24 }
 0x58b   : > { %7332 = vst.msk [vmem:[%s11329_s27 + $0x138] sm:$0xff] %vm142_vm2, %v7284_v33 }
 0x592   : > { %v7127_v39 = vpop.xlane.xlu1 %7126 }
 0x593   : > { %v7189_v52 = vmul.f32 0.25, %v7127_v39 }
 0x595   : > { %vm7237_vm5 = vcmp.lt.f32.partialorder %v12077_v37, %v7189_v52 }
 0x596   : > { %v7285_v25 = vsel %vm7237_vm5, 1, %v13101_v24 }
 0x597   : > { %7333 = vst.msk [vmem:[%s11329_s27 + $0x140] sm:$0xff] %vm142_vm2, %v7285_v25 }
 0x59a   : > { %v7130_v8 = vpop.xlane.xlu2 %7129 }
 0x59b   : > { %v7190_v0 = vmul.f32 0.25, %v7130_v8 }
 0x59d   : > { %vm7238_vm6 = vcmp.lt.f32.partialorder %v12084_v6, %v7190_v0 }
 0x59e   : > { %v7286_v17 = vsel %vm7238_vm6, 1, %v13101_v24 }
 0x59f   : > { %7334 = vst.msk [vmem:[%s11329_s27 + $0x148] sm:$0xff] %vm142_vm2, %v7286_v17 }
 0x5a2   : > { %v7133_v32 = vpop.xlane.xlu0 %7132 }
 0x5a3   : > { %v7191_v4 = vmul.f32 0.25, %v7133_v32 }
 0x5a5   : > { %vm7239_vm7 = vcmp.lt.f32.partialorder %v12091_v38, %v7191_v4 }
 0x5a6   : > { %v7287_v37 = vsel %vm7239_vm7, 1, %v13101_v24 }
 0x5a7   : > { %7335 = vst.msk [vmem:[%s11329_s27 + $0x150] sm:$0xff] %vm142_vm2, %v7287_v37 }
 0x5aa   : > { %v7136_v45 = vpop.xlane.xlu1 %7135 }
 0x5ab   : > { %v7192_v43 = vmul.f32 0.25, %v7136_v45 }
 0x5ad   : > { %vm7240_vm8 = vcmp.lt.f32.partialorder %v12098_v44, %v7192_v43 }
 0x5ae   : > { %v7288_v6 = vsel %vm7240_vm8, 1, %v13101_v24 }
 0x5af   : > { %7336 = vst.msk [vmem:[%s11329_s27 + $0x158] sm:$0xff] %vm142_vm2, %v7288_v6 }
 0x5b2   : > { %v7139_v62 = vpop.xlane.xlu2 %7138 }
 0x5b3   : > { %v7193_v11 = vmul.f32 0.25, %v7139_v62 }
 0x5b5   : > { %vm7241_vm9 = vcmp.lt.f32.partialorder %v12105_v31, %v7193_v11 }
 0x5b6   : > { %v7289_v38 = vsel %vm7241_vm9, 1, %v13101_v24 }
 0x5b7   : > { %7337 = vst.msk [vmem:[%s11329_s27 + $0x160] sm:$0xff] %vm142_vm2, %v7289_v38 }
 0x5ba   : > { %v7142_v20 = vpop.xlane.xlu0 %7141 }
 0x5bb   : > { %v7194_v36 = vmul.f32 0.25, %v7142_v20 }
 0x5bd   : > { %vm7242_vm10 = vcmp.lt.f32.partialorder %v12113_v2, %v7194_v36 }
 0x5be   : > { %v7290_v44 = vsel %vm7242_vm10, 1, %v13101_v24 }
 0x5bf   : > { %7338 = vst.msk [vmem:[%s11329_s27 + $0x168] sm:$0xff] %vm142_vm2, %v7290_v44 }
 0x5c2   : > { %v7145_v22 = vpop.xlane.xlu1 %7144 }
 0x5c3   : > { %v7195_v1 = vmul.f32 0.25, %v7145_v22 }
 0x5c5   : > { %vm7243_vm11 = vcmp.lt.f32.partialorder %v12121_v10, %v7195_v1 }
 0x5c6   : > { %v7291_v31 = vsel %vm7243_vm11, 1, %v13101_v24 }
 0x5c7   : > { %7339 = vst.msk [vmem:[%s11329_s27 + $0x170] sm:$0xff] %vm142_vm2, %v7291_v31 }
 0x5ca   : > { %v7148_v2 = vpop.xlane.xlu2 %7147 }
 0x5cb   : > { %v7196_v18 = vmul.f32 0.25, %v7148_v2 }
 0x5cd   : > { %vm7244_vm12 = vcmp.lt.f32.partialorder %v12131_v63, %v7196_v18 }
 0x5ce   : > { %v7292_v5 = vsel %vm7244_vm12, 1, %v13101_v24 }
 0x5cf   : > { %7340 = vst.msk [vmem:[%s11329_s27 + $0x178] sm:$0xff] %vm142_vm2, %v7292_v5 }
 0x5d0   : > { %7582 = shalt.err (!%p7579_p5)
}
 0x5d1   : > { %s7638_s22 = smov 128   ;;  %s7639_s23 = smov 8  }
 0x5d2   : > { %7445 = dma.vmem_to_hbm [thread:$0]  (%p7690_p4), %s7355_s3, 6144, %s7357_s4, %s7342_s5, %s7638_s22, %s7638_s22, %s7639_s23  }
 0x5d3 PF: > { %p7451_p6 = scmp.ge.s32.totalorder %s7633_s11, 2  ;;  %s7371_s24 = sand.u32 1, %s7613_s6  }
 0x5d4   : > { %s7372_s25 = scalar_lea.sflag [#allocation4], %s7371_s24 }
 0x5d5   : > { %p7448_p7 = pnand %p7451_p6, %p7697_p8 }
 0x5d7   : > { %p7449_p9 = pneg %p7448_p7 }
 0x5d9   : > { %7608 = dma.done.wait (%p7449_p9), %s7372_s25, 6144  }
 0x5da   : > { %7610 = vsyncadd (%p7449_p9), %s7372_s25, 4294961152  ;;  %s14_s11 = sadd.s32 1, %s7633_s11   ;;  %s13231_s6 = smov %s7617_s7 }
 0x5db   : > { %p11_p10 = scmp.ge.s32.totalorder %s14_s11, 4   ;;  %s13232_s7 = smov %s7621_s8 }
 0x5dc   : > { %s13233_s8 = smov %s7703_s19  ;;  %s13234_s9 = smov %s7629_s10 }
 0x5dd   : > { %s13235_s10 = smov %s13237_s14  ;;  %13 = sbr.rel (!%p11_p10) target bundleno = 4 (0x4), region = 67 }
 0x5e2   :  { %7378 = vsyncpa [#allocation4], 1 }
 0x5e3   :  { %7380 = vsyncpa [#allocation4 + $0x1], 1 }

</bundles_post_ra>
